<compile_context>
chip_gen: v6e
topology: v6e:2x2x1
jax: 0.10.0
libtpu: 0.0.40
codegen_flags: <defaults>
</compile_context>

<pallas_src>
import functools
import math

import jax
import jax.numpy as jnp
from jax import lax
from jax.experimental import pallas as pl
from jax.experimental.pallas import tpu as pltpu

LN_EPS = 1e-6
NEG_INF = -1e9
# Scoped-VMEM cap: raises v5e's 16 MiB default (keeps tiles double-buffered)
# while staying well inside v7x's 64 MiB physical VMEM per TensorCore.
VMEM_LIMIT_BYTES = 48 * 1024 * 1024


def _pick_tile(dim, preferred):
    """Largest preferred tile that evenly divides `dim`; else full extent."""
    for t in preferred:
        if t <= dim and dim % t == 0:
            return t
    return dim  # full extent is always a legal block size (small demo shapes)


# ---------------------------------------------------------------------------
# Kernel 1: [LayerNorm +] matmul [+ ReLU] [+ residual]   (tiled & pipelined)
#           LN is computed once per M tile (j == 0) and cached in VMEM scratch.
# ---------------------------------------------------------------------------
def _linear_kernel(*refs, apply_ln, activation, has_residual, eps):
    it = iter(refs)
    x_ref = next(it)
    g_ref = next(it) if apply_ln else None
    be_ref = next(it) if apply_ln else None
    w_ref = next(it)
    b_ref = next(it)
    r_ref = next(it) if has_residual else None
    o_ref = next(it)
    xn_sc = next(it)

    # LayerNorm (or just the bf16 cast) once per M tile; all N tiles reuse it.
    # The j axis must therefore run sequentially -> marked "arbitrary".
    @pl.when(pl.program_id(1) == 0)
    def _():
        if apply_ln:
            x = x_ref[...].astype(jnp.float32)
            mean = jnp.mean(x, axis=-1, keepdims=True)
            cen = x - mean
            var = jnp.mean(cen * cen, axis=-1, keepdims=True)
            xn = cen * lax.rsqrt(var + eps) * g_ref[...] + be_ref[...]
            xn_sc[...] = xn.astype(jnp.bfloat16)
        else:
            xn_sc[...] = x_ref[...].astype(jnp.bfloat16)

    y = jnp.dot(xn_sc[...], w_ref[...], preferred_element_type=jnp.float32)
    y = y + b_ref[...]
    if activation == "relu":
        y = jnp.maximum(y, 0.0)
    if has_residual:
        y = y + r_ref[...].astype(jnp.float32)
    o_ref[...] = y.astype(o_ref.dtype)


def linear(x, w, b, *, gamma=None, beta=None, residual=None, activation=None,
           out_dtype=jnp.float32, eps=LN_EPS):
    """y = [LN](x) @ w + b [+relu] [+residual].  x:(M,K), w:(K,N) bf16."""
    M, K = x.shape
    N = w.shape[1]
    # Large M tiles cut weight re-streaming (the whole (K,N) weight is re-read
    # once per M tile); N tiles prefer 256-multiples for the 256-wide MXU on
    # v6e/v7x, then 384, then 128 (sufficient for v5e's 128-wide MXU).
    tm = _pick_tile(M, (512, 256, 128))
    tn = _pick_tile(N, (512, 256, 384, 128))
    apply_ln = gamma is not None

    inputs = [x]
    in_specs = [pl.BlockSpec((tm, K), lambda i, j: (i, 0))]
    if apply_ln:
        inputs += [gamma, beta]
        in_specs += [pl.BlockSpec((1, K), lambda i, j: (0, 0)),
                     pl.BlockSpec((1, K), lambda i, j: (0, 0))]
    inputs += [w, b]
    in_specs += [pl.BlockSpec((K, tn), lambda i, j: (0, j)),
                 pl.BlockSpec((1, tn), lambda i, j: (0, j))]
    if residual is not None:
        inputs.append(residual)
        in_specs.append(pl.BlockSpec((tm, tn), lambda i, j: (i, j)))

    kernel = functools.partial(
        _linear_kernel, apply_ln=apply_ln, activation=activation,
        has_residual=residual is not None, eps=eps)
    return pl.pallas_call(
        kernel,
        out_shape=jax.ShapeDtypeStruct((M, N), out_dtype),
        grid=(M // tm, N // tn),
        in_specs=in_specs,
        out_specs=pl.BlockSpec((tm, tn), lambda i, j: (i, j)),
        scratch_shapes=[pltpu.VMEM((tm, K), jnp.bfloat16)],   # cached LN(x)
        compiler_params=pltpu.CompilerParams(
            dimension_semantics=("parallel", "arbitrary"),
            vmem_limit_bytes=VMEM_LIMIT_BYTES),
    )(*inputs)


# ---------------------------------------------------------------------------
# Kernel 2: fused FFN sublayer: LN -> W1 -> ReLU -> W2 -> +residual
#           (Dff axis tiled as an in-kernel reduction; no (M, Dff) HBM tensor)
# ---------------------------------------------------------------------------
def _ffn_kernel(x_ref, g_ref, be_ref, w1_ref, b1_ref, w2_ref, b2_ref, r_ref,
                o_ref, xn_sc, acc_sc, *, eps):
    f = pl.program_id(1)

    @pl.when(f == 0)
    def _():
        x = x_ref[...].astype(jnp.float32)
        mean = jnp.mean(x, axis=-1, keepdims=True)
        cen = x - mean
        var = jnp.mean(cen * cen, axis=-1, keepdims=True)
        xn = cen * lax.rsqrt(var + eps) * g_ref[...] + be_ref[...]
        xn_sc[...] = xn.astype(jnp.bfloat16)
        acc_sc[...] = jnp.zeros_like(acc_sc)

    h1 = jnp.dot(xn_sc[...], w1_ref[...], preferred_element_type=jnp.float32)
    h1 = jnp.maximum(h1 + b1_ref[...], 0.0)
    acc_sc[...] += jnp.dot(h1.astype(jnp.bfloat16), w2_ref[...],
                           preferred_element_type=jnp.float32)

    @pl.when(f == pl.num_programs(1) - 1)
    def _():
        o_ref[...] = (acc_sc[...] + b2_ref[...]
                      + r_ref[...].astype(jnp.float32)).astype(o_ref.dtype)


def ffn(x, gamma, beta, w1, b1, w2, b2, residual, *, eps=LN_EPS):
    M, D = x.shape
    Dff = w1.shape[1]
    tm = _pick_tile(M, (512, 256, 128))
    tf = _pick_tile(Dff, (512, 256, 128))   # 256-multiples fill v6e/v7x MXU
    return pl.pallas_call(
        functools.partial(_ffn_kernel, eps=eps),
        out_shape=jax.ShapeDtypeStruct((M, D), jnp.float32),
        grid=(M // tm, Dff // tf),
        in_specs=[
            pl.BlockSpec((tm, D), lambda i, f: (i, 0)),    # x
            pl.BlockSpec((1, D), lambda i, f: (0, 0)),     # gamma
            pl.BlockSpec((1, D), lambda i, f: (0, 0)),     # beta
            pl.BlockSpec((D, tf), lambda i, f: (0, f)),    # w1 tile
            pl.BlockSpec((1, tf), lambda i, f: (0, f)),    # b1 tile
            pl.BlockSpec((tf, D), lambda i, f: (f, 0)),    # w2 tile
            pl.BlockSpec((1, D), lambda i, f: (0, 0)),     # b2
            pl.BlockSpec((tm, D), lambda i, f: (i, 0)),    # residual
        ],
        out_specs=pl.BlockSpec((tm, D), lambda i, f: (i, 0)),
        scratch_shapes=[pltpu.VMEM((tm, D), jnp.bfloat16),   # normalized x
                        pltpu.VMEM((tm, D), jnp.float32)],   # f32 accumulator
        compiler_params=pltpu.CompilerParams(
            dimension_semantics=("parallel", "arbitrary"),
            vmem_limit_bytes=VMEM_LIMIT_BYTES),
    )(x, gamma, beta, w1, b1, w2, b2, residual)


# ---------------------------------------------------------------------------
# Kernel 3: multi-head attention, flash-style over (Q-tile, KV-block) grid,
#           all heads of one (batch, Q-tile) handled in-kernel.
#           Scale folded into W_q; mask streamed as additive bf16 bias.
# ---------------------------------------------------------------------------
def _mha_kernel(q_ref, k_ref, v_ref, bias_ref, o_ref,
                qhm_sc, m_sc, l_sc, acc_sc, *, h, dk):
    kb = pl.program_id(2)

    @pl.when(kb == 0)
    def _():
        # Pre-split Q into head-major VMEM scratch once per (batch, Q-tile):
        # the dk-wide lane slices happen h times per Q tile instead of
        # h * num_kv_blocks times.
        q = q_ref[0]                                     # (tq, D) bf16
        for hd in range(h):
            qhm_sc[hd] = q[:, hd * dk:(hd + 1) * dk]
        m_sc[...] = jnp.full(m_sc.shape, -jnp.inf, m_sc.dtype)
        l_sc[...] = jnp.zeros(l_sc.shape, l_sc.dtype)
        acc_sc[...] = jnp.zeros(acc_sc.shape, acc_sc.dtype)

    k = k_ref[0]                                         # (tk, D) bf16
    v = v_ref[0]                                         # (tk, D) bf16
    # Additive mask bias (0 / -1e9), loaded once per KV step, shared by all
    # heads: one VPU add per head instead of compare+select per head.
    bias = bias_ref[0].astype(jnp.float32)               # (1 | tq, tk)

    for hd in range(h):                                  # static, unrolled
        lo, hi = hd * dk, (hd + 1) * dk
        # 1/sqrt(d_k) already folded into W_q / b_q at parameter-prep time.
        s = lax.dot_general(qhm_sc[hd], k[:, lo:hi],
                            (((1,), (1,)), ((), ())),
                            preferred_element_type=jnp.float32) + bias
        m_prev = m_sc[hd]                                # (tq, 1)
        m_new = jnp.maximum(m_prev, jnp.max(s, axis=-1, keepdims=True))
        alpha = jnp.exp(m_prev - m_new)
        p = jnp.exp(s - m_new)
        l_sc[hd] = alpha * l_sc[hd] + jnp.sum(p, axis=-1, keepdims=True)
        acc_sc[hd] = alpha * acc_sc[hd] + jnp.dot(
            p.astype(jnp.bfloat16), v[:, lo:hi],
            preferred_element_type=jnp.float32)
        m_sc[hd] = m_new

    @pl.when(kb == pl.num_programs(2) - 1)
    def _():
        # With the additive-bias formulation l >= 1 always (the row maximum
        # contributes exp(0)=1), so the approximate reciprocal never sees 0
        # and fully-masked rows stay finite.  Single lane-dense (tq, D) store.
        ctx = jnp.concatenate(
            [acc_sc[hd] * pl.reciprocal(l_sc[hd], approx=True)
             for hd in range(h)], axis=-1)
        o_ref[0] = ctx.astype(o_ref.dtype)


def mha(q_src, k_src, v_src, bias, *, h, d_model, q_col, k_col, v_col):
    """q_src:(B,Sq,nq*D), k_src/v_src:(B,Sk,nk*D) packed projections (bf16);
    the *_col block-column indices select which D-wide slab is Q / K / V.
    `bias` is an additive mask bias (0 / -1e9) of shape (1|B, 1|Sq, Sk)."""
    B, Sq, _ = q_src.shape
    Sk = k_src.shape[1]
    dk = d_model // h
    tq = _pick_tile(Sq, (256, 128))        # Q-tile grid axis (parallel)
    tk = _pick_tile(Sk, (256, 128))        # KV tile capped at 256 (VMEM budget)
    mB, mq, _ = bias.shape
    mq_blk = tq if mq == Sq else 1

    def q_idx(b, qi, ki, col=q_col):
        return (b, qi, col)

    def k_idx(b, qi, ki, col=k_col):
        return (b, ki, col)

    def v_idx(b, qi, ki, col=v_col):
        return (b, ki, col)

    def bias_idx(b, qi, ki):
        return (b if mB > 1 else 0, qi if mq > 1 else 0, ki)

    kernel = functools.partial(_mha_kernel, h=h, dk=dk)
    return pl.pallas_call(
        kernel,
        out_shape=jax.ShapeDtypeStruct((B, Sq, d_model), jnp.bfloat16),
        grid=(B, Sq // tq, Sk // tk),
        in_specs=[
            pl.BlockSpec((1, tq, d_model), q_idx),
            pl.BlockSpec((1, tk, d_model), k_idx),
            pl.BlockSpec((1, tk, d_model), v_idx),
            pl.BlockSpec((1, mq_blk, tk), bias_idx),
        ],
        out_specs=pl.BlockSpec((1, tq, d_model), lambda b, qi, ki: (b, qi, 0)),
        scratch_shapes=[
            pltpu.VMEM((h, tq, dk), jnp.bfloat16),  # head-major Q (per Q tile)
            pltpu.VMEM((h, tq, 1), jnp.float32),    # running max
            pltpu.VMEM((h, tq, 1), jnp.float32),    # running denom
            pltpu.VMEM((h, tq, dk), jnp.float32),   # unnormalized context
        ],
        compiler_params=pltpu.CompilerParams(
            dimension_semantics=("parallel", "parallel", "arbitrary"),
            vmem_limit_bytes=VMEM_LIMIT_BYTES),
    )(q_src, k_src, v_src, bias)


def mask_to_bias(mask, sk):
    """masked_fill(mask == 0, -1e9) expressed as an additive bf16 bias."""
    if mask is None:
        return jnp.zeros((1, 1, sk), jnp.bfloat16)
    return jnp.where(mask == 0, NEG_INF, 0.0).astype(jnp.bfloat16)


# ---------------------------------------------------------------------------
# Decoder layer / stack
# ---------------------------------------------------------------------------
def decoder_layer(x, enc, src_bias, tgt_bias, p, h):
    B, St, D = x.shape
    Se = enc.shape[1]
    x2 = x.reshape(B * St, D)
    enc2 = enc.reshape(B * Se, D)

    # 1) masked self-attention sublayer:  x + SelfAttn(LN(x))
    #    LN fused into one (D, 3D) QKV matmul; heads split inside attention.
    qkv = linear(x2, p["w_qkv"], p["b_qkv"], gamma=p["ln1_g"], beta=p["ln1_b"],
                 out_dtype=jnp.bfloat16)                       # (B*St, 3D)
    qkv3 = qkv.reshape(B, St, 3 * D)
    att = mha(qkv3, qkv3, qkv3, tgt_bias, h=h, d_model=D,
              q_col=0, k_col=1, v_col=2)                        # (B, St, D)
    x2 = linear(att.reshape(B * St, D), p["wo1"], p["bo1"], residual=x2)

    # 2) cross-attention sublayer:  x + Attn(LN(x), enc, enc)
    #    (LN applies only to the query input; encoder output is used raw.)
    q = linear(x2, p["wq2"], p["bq2"], gamma=p["ln2_g"], beta=p["ln2_b"],
               out_dtype=jnp.bfloat16)                          # (B*St, D)
    kv = linear(enc2, p["w_kv2"], p["b_kv2"], out_dtype=jnp.bfloat16)  # (B*Se, 2D)
    q3 = q.reshape(B, St, D)
    kv3 = kv.reshape(B, Se, 2 * D)
    att = mha(q3, kv3, kv3, src_bias, h=h, d_model=D,
              q_col=0, k_col=0, v_col=1)
    x2 = linear(att.reshape(B * St, D), p["wo2"], p["bo2"], residual=x2)

    # 3) feed-forward sublayer:  x + FFN(LN(x))   (fully fused, Dff tiled)
    x2 = ffn(x2, p["ln3_g"], p["ln3_b"], p["ff_w1"], p["ff_b1"],
             p["ff_w2"], p["ff_b2"], x2)
    return x2.reshape(B, St, D)


def transformer_decoder(x, encoder_output, src_mask, tgt_mask, layer_params, h):
    St, Se = x.shape[1], encoder_output.shape[1]
    # Masks converted to additive biases once and reused by every layer.
    tgt_bias = mask_to_bias(tgt_mask, St)
    src_bias = mask_to_bias(src_mask, Se)
    for p in layer_params:
        x = decoder_layer(x, encoder_output, src_bias, tgt_bias, p, h)
    return x


# ---------------------------------------------------------------------------
# Deterministic parameter init (weights bf16 for the MXU, biases/LN in f32)
# ---------------------------------------------------------------------------
def _linear_init(key, din, dout):
    w = (jax.random.normal(key, (din, dout), jnp.float32) * 0.02).astype(jnp.bfloat16)
    return w, jnp.zeros((1, dout), jnp.float32)


def init_layer_params(key, D, Dff):
    ks = jax.random.split(key, 10)
    wq1, bq1 = _linear_init(ks[0], D, D)
    wk1, bk1 = _linear_init(ks[1], D, D)
    wv1, bv1 = _linear_init(ks[2], D, D)
    wo1, bo1 = _linear_init(ks[3], D, D)
    wq2, bq2 = _linear_init(ks[4], D, D)
    wk2, bk2 = _linear_init(ks[5], D, D)
    wv2, bv2 = _linear_init(ks[6], D, D)
    wo2, bo2 = _linear_init(ks[7], D, D)
    ff_w1, ff_b1 = _linear_init(ks[8], D, Dff)
    ff_w2, ff_b2 = _linear_init(ks[9], Dff, D)
    ones = jnp.ones((1, D), jnp.float32)
    zeros = jnp.zeros((1, D), jnp.float32)
    return dict(
        w_qkv=jnp.concatenate([wq1, wk1, wv1], axis=1),
        b_qkv=jnp.concatenate([bq1, bk1, bv1], axis=1),
        wo1=wo1, bo1=bo1,
        wq2=wq2, bq2=bq2,
        w_kv2=jnp.concatenate([wk2, wv2], axis=1),
        b_kv2=jnp.concatenate([bk2, bv2], axis=1),
        wo2=wo2, bo2=bo2,
        ff_w1=ff_w1, ff_b1=ff_b1, ff_w2=ff_w2, ff_b2=ff_b2,
        ln1_g=ones, ln1_b=zeros, ln2_g=ones, ln2_b=zeros,
        ln3_g=ones, ln3_b=zeros,
    )


def prep_layer_params(p, h):
    """Kernel-ready params: fold the 1/sqrt(d_k) softmax scale into the Q
    projection weights/biases (parameter-prep time, zero runtime cost)."""
    D = p["wo1"].shape[0]
    scale = 1.0 / math.sqrt(D // h)
    w_qkv, b_qkv = p["w_qkv"], p["b_qkv"]
    wq_scaled = (w_qkv[:, :D].astype(jnp.float32) * scale).astype(w_qkv.dtype)
    bq_scaled = b_qkv[:, :D] * scale
    q = dict(p)
    q["w_qkv"] = jnp.concatenate([wq_scaled, w_qkv[:, D:]], axis=1)
    q["b_qkv"] = jnp.concatenate([bq_scaled, b_qkv[:, D:]], axis=1)
    q["wq2"] = (p["wq2"].astype(jnp.float32) * scale).astype(p["wq2"].dtype)
    q["bq2"] = p["bq2"] * scale
    return q


# ---------------------------------------------------------------------------
# Pure-JAX reference (f32 math, same bf16-rounded raw weights) for sanity check
# ---------------------------------------------------------------------------
def _ref_layernorm(x, g, b, eps=LN_EPS):
    m = jnp.mean(x, axis=-1, keepdims=True)
    v = jnp.mean((x - m) ** 2, axis=-1, keepdims=True)
    return (x - m) * lax.rsqrt(v + eps) * g + b


def _ref_attention(q_in, kv_in, wq, bq, wk, bk, wv, bv, wo, bo, mask, h):
    B, Sq, D = q_in.shape
    Sk = kv_in.shape[1]
    dk = D // h
    f32 = jnp.float32
    q = q_in @ wq.astype(f32) + bq
    k = kv_in @ wk.astype(f32) + bk
    v = kv_in @ wv.astype(f32) + bv

    def split(t, S):
        return t.reshape(B, S, h, dk).transpose(0, 2, 1, 3)

    q, k, v = split(q, Sq), split(k, Sk), split(v, Sk)
    s = jnp.einsum("bhqd,bhkd->bhqk", q, k) / math.sqrt(dk)
    if mask is not None:
        s = jnp.where(mask[:, None] == 0, -1e9, s)
    p = jax.nn.softmax(s, axis=-1)
    c = jnp.einsum("bhqk,bhkd->bhqd", p, v)
    c = c.transpose(0, 2, 1, 3).reshape(B, Sq, D)
    return c @ wo.astype(f32) + bo


def reference_decoder(x, enc, src_mask, tgt_mask, layer_params, h):
    f32 = jnp.float32
    for p in layer_params:
        D = x.shape[-1]
        wq1, wk1, wv1 = (p["w_qkv"][:, :D], p["w_qkv"][:, D:2 * D],
                         p["w_qkv"][:, 2 * D:])
        bq1, bk1, bv1 = (p["b_qkv"][:, :D], p["b_qkv"][:, D:2 * D],
                         p["b_qkv"][:, 2 * D:])
        wk2, wv2 = p["w_kv2"][:, :D], p["w_kv2"][:, D:]
        bk2, bv2 = p["b_kv2"][:, :D], p["b_kv2"][:, D:]

        y = _ref_layernorm(x, p["ln1_g"], p["ln1_b"])
        x = x + _ref_attention(y, y, wq1, bq1, wk1, bk1, wv1, bv1,
                               p["wo1"], p["bo1"], tgt_mask, h)
        y = _ref_layernorm(x, p["ln2_g"], p["ln2_b"])
        x = x + _ref_attention(y, enc, p["wq2"], p["bq2"], wk2, bk2, wv2, bv2,
                               p["wo2"], p["bo2"], src_mask, h)
        y = _ref_layernorm(x, p["ln3_g"], p["ln3_b"])
        h1 = jnp.maximum(y @ p["ff_w1"].astype(f32) + p["ff_b1"], 0.0)
        x = x + h1 @ p["ff_w2"].astype(f32) + p["ff_b2"]
    return x


# ---------------------------------------------------------------------------
# Demo
# ---------------------------------------------------------------------------
if __name__ == "__main__":
    B, St, Se = 2, 16, 32        # batch, target seq, source seq
    D, H, NL = 128, 4, 2         # d_model, heads, decoder layers (small demo)
    Dff = 4 * D

    key = jax.random.PRNGKey(0)
    k_x, k_enc, k_par = jax.random.split(key, 3)

    x = jax.random.normal(k_x, (B, St, D), jnp.float32)
    encoder_output = jax.random.normal(k_enc, (B, Se, D), jnp.float32)
    tgt_mask = jnp.tril(jnp.ones((1, St, St), jnp.float32))   # causal mask
    src_mask = jnp.ones((B, 1, Se), jnp.float32)              # no source padding

    # clones() deep-copies one initialized layer -> identical initial weights.
    shared_layer = init_layer_params(k_par, D, Dff)
    ref_params = [shared_layer] * NL
    kernel_params = [prep_layer_params(shared_layer, H)] * NL  # scale folded in

    fwd = jax.jit(lambda x_, e_, sm_, tm_, lp_:
                  transformer_decoder(x_, e_, sm_, tm_, lp_, H))
    out = fwd(x, encoder_output, src_mask, tgt_mask, kernel_params)
    jax.block_until_ready(out)
    assert out.shape == (B, St, D)

    ref = reference_decoder(x, encoder_output, src_mask, tgt_mask,
                            ref_params, H)
    err = float(jnp.max(jnp.abs(out - ref)))
    assert err < 5e-2, f"max abs error vs reference: {err}"
    print("KERNEL_OK")
</pallas_src>

<mosaic_0001>
module attributes {stable_mosaic.version = 11 : i64} {
  func.func @_linear_kernel(%arg0: i32, %arg1: i32, %arg2: memref<32x128xbf16, #tpu.memory_space<vmem>>, %arg3: memref<128x128xbf16, #tpu.memory_space<vmem>>, %arg4: memref<1x128xf32, #tpu.memory_space<vmem>>, %arg5: memref<32x128xf32, #tpu.memory_space<vmem>>, %arg6: memref<32x128xf32, #tpu.memory_space<vmem>>, %arg7: memref<32x128xbf16, #tpu.memory_space<vmem>>) attributes {dimension_semantics = [#tpu.dimension_semantics<parallel>, #tpu.dimension_semantics<arbitrary>], iteration_bounds = array<i64: 1, 1>, scalar_prefetch = 0 : i64, scratch_operands = 1 : i64, tpu.core_type = #tpu.core_type<tc>, window_params = [{transform_indices = @transform_0, window_bounds = array<i64: 32, 128>}, {transform_indices = @transform_1, window_bounds = array<i64: 128, 128>}, {transform_indices = @transform_2, window_bounds = array<i64: 1, 128>}, {transform_indices = @transform_3, window_bounds = array<i64: 32, 128>}, {transform_indices = @transform_4, window_bounds = array<i64: 32, 128>}]} {
    %c0_i32 = arith.constant 0 : i32
    %0 = arith.cmpi eq, %arg1, %c0_i32 : i32
    %1 = arith.extui %0 : i1 to i32
    %c0_i32_0 = arith.constant 0 : i32
    %2 = arith.cmpi ne, %1, %c0_i32_0 : i32
    scf.if %2 {
      %c0_10 = arith.constant 0 : index
      %c0_11 = arith.constant 0 : index
      %12 = vector.load %arg2[%c0_10, %c0_11] : memref<32x128xbf16, #tpu.memory_space<vmem>>, vector<32x128xbf16>
      %c0_12 = arith.constant 0 : index
      %c0_13 = arith.constant 0 : index
      %13 = vector.load %arg7[%c0_12, %c0_13] : memref<32x128xbf16, #tpu.memory_space<vmem>>, vector<32x128xbf16>
      tpu.vector_store %arg7[%c0_12, %c0_13], %12 {strides = array<i32>} : memref<32x128xbf16, #tpu.memory_space<vmem>>, vector<32x128xbf16>,
    } else {
    }
    %c0 = arith.constant 0 : index
    %c0_1 = arith.constant 0 : index
    %3 = vector.load %arg7[%c0, %c0_1] : memref<32x128xbf16, #tpu.memory_space<vmem>>, vector<32x128xbf16>
    %c0_2 = arith.constant 0 : index
    %c0_3 = arith.constant 0 : index
    %4 = vector.load %arg3[%c0_2, %c0_3] : memref<128x128xbf16, #tpu.memory_space<vmem>>, vector<128x128xbf16>
    %cst = arith.constant dense<0.000000e+00> : vector<32x128xf32>
    %5 = tpu.matmul %3, %4, %cst {dimension_numbers = #tpu.dot_dimension_numbers<[1], [0], [0], [1], [0, 0, 1, 1], [], []>} : vector<32x128xbf16>, vector<128x128xbf16>, vector<32x128xf32> -> vector<32x128xf32>
    %c0_4 = arith.constant 0 : index
    %c0_5 = arith.constant 0 : index
    %6 = vector.load %arg4[%c0_4, %c0_5] : memref<1x128xf32, #tpu.memory_space<vmem>>, vector<1x128xf32>
    %7 = vector.broadcast %6 : vector<1x128xf32> to vector<32x128xf32>
    %8 = arith.addf %5, %7 : vector<32x128xf32>
    %c0_6 = arith.constant 0 : index
    %c0_7 = arith.constant 0 : index
    %9 = vector.load %arg5[%c0_6, %c0_7] : memref<32x128xf32, #tpu.memory_space<vmem>>, vector<32x128xf32>
    %10 = arith.addf %8, %9 : vector<32x128xf32>
    %c0_8 = arith.constant 0 : index
    %c0_9 = arith.constant 0 : index
    %11 = vector.load %arg6[%c0_8, %c0_9] : memref<32x128xf32, #tpu.memory_space<vmem>>, vector<32x128xf32>
    tpu.vector_store %arg6[%c0_8, %c0_9], %10 {strides = array<i32>} : memref<32x128xf32, #tpu.memory_space<vmem>>, vector<32x128xf32>,
    return
  }
  func.func @transform_0(%arg0: i32, %arg1: i32) -> (i32, i32) {
    %c0_i32 = arith.constant 0 : i32
    %c0_i32_0 = arith.constant 0 : i32
    return %arg0, %c0_i32 : i32, i32
  }
  func.func @transform_1(%arg0: i32, %arg1: i32) -> (i32, i32) {
    %c0_i32 = arith.constant 0 : i32
    %c0_i32_0 = arith.constant 0 : i32
    return %c0_i32, %arg1 : i32, i32
  }
  func.func @transform_2(%arg0: i32, %arg1: i32) -> (i32, i32) {
    %c0_i32 = arith.constant 0 : i32
    %c0_i32_0 = arith.constant 0 : i32
    return %c0_i32, %arg1 : i32, i32
  }
  func.func @transform_3(%arg0: i32, %arg1: i32) -> (i32, i32) {
    %c0_i32 = arith.constant 0 : i32
    return %arg0, %arg1 : i32, i32
  }
  func.func @transform_4(%arg0: i32, %arg1: i32) -> (i32, i32) {
    %c0_i32 = arith.constant 0 : i32
    return %arg0, %arg1 : i32, i32
  }
}

module attributes {stable_mosaic.version = 11 : i64} {
  func.func @_linear_kernel(%arg0: i32, %arg1: i32, %arg2: memref<32x128xf32, #tpu.memory_space<vmem>>, %arg3: memref<1x128xf32, #tpu.memory_space<vmem>>, %arg4: memref<1x128xf32, #tpu.memory_space<vmem>>, %arg5: memref<128x384xbf16, #tpu.memory_space<vmem>>, %arg6: memref<1x384xf32, #tpu.memory_space<vmem>>, %arg7: memref<32x384xbf16, #tpu.memory_space<vmem>>, %arg8: memref<32x128xbf16, #tpu.memory_space<vmem>>) attributes {dimension_semantics = [#tpu.dimension_semantics<parallel>, #tpu.dimension_semantics<arbitrary>], iteration_bounds = array<i64: 1, 1>, scalar_prefetch = 0 : i64, scratch_operands = 1 : i64, tpu.core_type = #tpu.core_type<tc>, window_params = [{transform_indices = @transform_0, window_bounds = array<i64: 32, 128>}, {pipeline_mode = #tpu.pipeline_mode<synchronous>, transform_indices = @transform_1, window_bounds = array<i64: 1, 128>}, {pipeline_mode = #tpu.pipeline_mode<synchronous>, transform_indices = @transform_2, window_bounds = array<i64: 1, 128>}, {transform_indices = @transform_3, window_bounds = array<i64: 128, 384>}, {transform_indices = @transform_4, window_bounds = array<i64: 1, 384>}, {transform_indices = @transform_5, window_bounds = array<i64: 32, 384>}]} {
    %c0_i32 = arith.constant 0 : i32
    %0 = arith.cmpi eq, %arg1, %c0_i32 : i32
    %1 = arith.extui %0 : i1 to i32
    %c0_i32_0 = arith.constant 0 : i32
    %2 = arith.cmpi ne, %1, %c0_i32_0 : i32
    scf.if %2 {
      %c0_8 = arith.constant 0 : index
      %c0_9 = arith.constant 0 : index
      %11 = vector.load %arg2[%c0_8, %c0_9] : memref<32x128xf32, #tpu.memory_space<vmem>>, vector<32x128xf32>
      %cst_10 = arith.constant dense<0.000000e+00> : vector<32xf32>
      %12 = vector.multi_reduction <add>, %11, %cst_10 [1] : vector<32x128xf32> to vector<32xf32>
      %13 = vector.shape_cast %12 : vector<32xf32> to vector<32x1xf32>
      %cst_11 = arith.constant 1.280000e+02 : f32
      %14 = vector.broadcast %cst_11 : f32 to vector<32x1xf32>
      %15 = arith.divf %13, %14 : vector<32x1xf32>
      %16 = vector.broadcast %15 : vector<32x1xf32> to vector<32x128xf32>
      %17 = arith.subf %11, %16 : vector<32x128xf32>
      %18 = arith.mulf %17, %17 : vector<32x128xf32>
      %cst_12 = arith.constant dense<0.000000e+00> : vector<32xf32>
      %19 = vector.multi_reduction <add>, %18, %cst_12 [1] : vector<32x128xf32> to vector<32xf32>
      %20 = vector.shape_cast %19 : vector<32xf32> to vector<32x1xf32>
      %cst_13 = arith.constant 1.280000e+02 : f32
      %21 = vector.broadcast %cst_13 : f32 to vector<32x1xf32>
      %22 = arith.divf %20, %21 : vector<32x1xf32>
      %cst_14 = arith.constant 9.99999997E-7 : f32
      %23 = vector.broadcast %cst_14 : f32 to vector<32x1xf32>
      %24 = arith.addf %22, %23 : vector<32x1xf32>
      %25 = math.rsqrt %24 : vector<32x1xf32>
      %26 = vector.broadcast %25 : vector<32x1xf32> to vector<32x128xf32>
      %27 = arith.mulf %17, %26 : vector<32x128xf32>
      %c0_15 = arith.constant 0 : index
      %c0_16 = arith.constant 0 : index
      %28 = vector.load %arg3[%c0_15, %c0_16] : memref<1x128xf32, #tpu.memory_space<vmem>>, vector<1x128xf32>
      %29 = vector.broadcast %28 : vector<1x128xf32> to vector<32x128xf32>
      %30 = arith.mulf %27, %29 : vector<32x128xf32>
      %c0_17 = arith.constant 0 : index
      %c0_18 = arith.constant 0 : index
      %31 = vector.load %arg4[%c0_17, %c0_18] : memref<1x128xf32, #tpu.memory_space<vmem>>, vector<1x128xf32>
      %32 = vector.broadcast %31 : vector<1x128xf32> to vector<32x128xf32>
      %33 = arith.addf %30, %32 : vector<32x128xf32>
      %34 = arith.truncf %33 : vector<32x128xf32> to vector<32x128xbf16>
      %c0_19 = arith.constant 0 : index
      %c0_20 = arith.constant 0 : index
      %35 = vector.load %arg8[%c0_19, %c0_20] : memref<32x128xbf16, #tpu.memory_space<vmem>>, vector<32x128xbf16>
      tpu.vector_store %arg8[%c0_19, %c0_20], %34 {strides = array<i32>} : memref<32x128xbf16, #tpu.memory_space<vmem>>, vector<32x128xbf16>,
    } else {
    }
    %c0 = arith.constant 0 : index
    %c0_1 = arith.constant 0 : index
    %3 = vector.load %arg8[%c0, %c0_1] : memref<32x128xbf16, #tpu.memory_space<vmem>>, vector<32x128xbf16>
    %c0_2 = arith.constant 0 : index
    %c0_3 = arith.constant 0 : index
    %4 = vector.load %arg5[%c0_2, %c0_3] : memref<128x384xbf16, #tpu.memory_space<vmem>>, vector<128x384xbf16>
    %cst = arith.constant dense<0.000000e+00> : vector<32x384xf32>
    %5 = tpu.matmul %3, %4, %cst {dimension_numbers = #tpu.dot_dimension_numbers<[1], [0], [0], [1], [0, 0, 1, 1], [], []>} : vector<32x128xbf16>, vector<128x384xbf16>, vector<32x384xf32> -> vector<32x384xf32>
    %c0_4 = arith.constant 0 : index
    %c0_5 = arith.constant 0 : index
    %6 = vector.load %arg6[%c0_4, %c0_5] : memref<1x384xf32, #tpu.memory_space<vmem>>, vector<1x384xf32>
    %7 = vector.broadcast %6 : vector<1x384xf32> to vector<32x384xf32>
    %8 = arith.addf %5, %7 : vector<32x384xf32>
    %9 = arith.truncf %8 : vector<32x384xf32> to vector<32x384xbf16>
    %c0_6 = arith.constant 0 : index
    %c0_7 = arith.constant 0 : index
    %10 = vector.load %arg7[%c0_6, %c0_7] : memref<32x384xbf16, #tpu.memory_space<vmem>>, vector<32x384xbf16>
    tpu.vector_store %arg7[%c0_6, %c0_7], %9 {strides = array<i32>} : memref<32x384xbf16, #tpu.memory_space<vmem>>, vector<32x384xbf16>,
    return
  }
  func.func @transform_0(%arg0: i32, %arg1: i32) -> (i32, i32) {
    %c0_i32 = arith.constant 0 : i32
    %c0_i32_0 = arith.constant 0 : i32
    return %arg0, %c0_i32 : i32, i32
  }
  func.func @transform_1(%arg0: i32, %arg1: i32) -> (i32, i32) {
    %c0_i32 = arith.constant 0 : i32
    %c0_i32_0 = arith.constant 0 : i32
    %c0_i32_1 = arith.constant 0 : i32
    return %c0_i32, %c0_i32_0 : i32, i32
  }
  func.func @transform_2(%arg0: i32, %arg1: i32) -> (i32, i32) {
    %c0_i32 = arith.constant 0 : i32
    %c0_i32_0 = arith.constant 0 : i32
    %c0_i32_1 = arith.constant 0 : i32
    return %c0_i32, %c0_i32_0 : i32, i32
  }
  func.func @transform_3(%arg0: i32, %arg1: i32) -> (i32, i32) {
    %c0_i32 = arith.constant 0 : i32
    %c0_i32_0 = arith.constant 0 : i32
    return %c0_i32, %arg1 : i32, i32
  }
  func.func @transform_4(%arg0: i32, %arg1: i32) -> (i32, i32) {
    %c0_i32 = arith.constant 0 : i32
    %c0_i32_0 = arith.constant 0 : i32
    return %c0_i32, %arg1 : i32, i32
  }
  func.func @transform_5(%arg0: i32, %arg1: i32) -> (i32, i32) {
    %c0_i32 = arith.constant 0 : i32
    return %arg0, %arg1 : i32, i32
  }
}

module attributes {stable_mosaic.version = 11 : i64} {
  func.func @_mha_kernel(%arg0: i32, %arg1: i32, %arg2: i32, %arg3: memref<1x16x128xbf16, #tpu.memory_space<vmem>>, %arg4: memref<1x16x128xbf16, #tpu.memory_space<vmem>>, %arg5: memref<1x16x128xbf16, #tpu.memory_space<vmem>>, %arg6: memref<1x16x16xbf16, #tpu.memory_space<vmem>>, %arg7: memref<1x16x128xbf16, #tpu.memory_space<vmem>>, %arg8: memref<4x16x32xbf16, #tpu.memory_space<vmem>>, %arg9: memref<4x16x1xf32, #tpu.memory_space<vmem>>, %arg10: memref<4x16x1xf32, #tpu.memory_space<vmem>>, %arg11: memref<4x16x32xf32, #tpu.memory_space<vmem>>) attributes {dimension_semantics = [#tpu.dimension_semantics<parallel>, #tpu.dimension_semantics<parallel>, #tpu.dimension_semantics<arbitrary>], iteration_bounds = array<i64: 2, 1, 1>, scalar_prefetch = 0 : i64, scratch_operands = 4 : i64, tpu.core_type = #tpu.core_type<tc>, window_params = [{transform_indices = @transform_0, window_bounds = array<i64: 1, 16, 128>}, {transform_indices = @transform_1, window_bounds = array<i64: 1, 16, 128>}, {transform_indices = @transform_2, window_bounds = array<i64: 1, 16, 128>}, {transform_indices = @transform_3, window_bounds = array<i64: 1, 16, 16>}, {transform_indices = @transform_4, window_bounds = array<i64: 1, 16, 128>}]} {
    %c0_i32 = arith.constant 0 : i32
    %0 = arith.cmpi eq, %arg2, %c0_i32 : i32
    %1 = arith.extui %0 : i1 to i32
    %c0_i32_0 = arith.constant 0 : i32
    %2 = arith.cmpi ne, %1, %c0_i32_0 : i32
    scf.if %2 {
      %c0_107 = arith.constant 0 : index
      %c0_108 = arith.constant 0 : index
      %c0_109 = arith.constant 0 : index
      %165 = vector.load %arg3[%c0_107, %c0_108, %c0_109] : memref<1x16x128xbf16, #tpu.memory_space<vmem>>, vector<1x16x128xbf16>
      %166 = vector.shape_cast %165 : vector<1x16x128xbf16> to vector<16x128xbf16>
      %167 = vector.extract_strided_slice %166 {offsets = [0, 0], sizes = [16, 32], strides = [1, 1]} : vector<16x128xbf16> to vector<16x32xbf16>
      %c0_110 = arith.constant 0 : index
      %c0_111 = arith.constant 0 : index
      %c0_112 = arith.constant 0 : index
      %168 = vector.load %arg8[%c0_110, %c0_111, %c0_112] : memref<4x16x32xbf16, #tpu.memory_space<vmem>>, vector<1x16x32xbf16>
      %169 = vector.shape_cast %168 : vector<1x16x32xbf16> to vector<16x32xbf16>
      %170 = vector.shape_cast %167 : vector<16x32xbf16> to vector<1x16x32xbf16>
      tpu.vector_store %arg8[%c0_110, %c0_111, %c0_112], %170 {strides = array<i32>} : memref<4x16x32xbf16, #tpu.memory_space<vmem>>, vector<1x16x32xbf16>,
      %171 = vector.extract_strided_slice %166 {offsets = [0, 32], sizes = [16, 32], strides = [1, 1]} : vector<16x128xbf16> to vector<16x32xbf16>
      %c1_113 = arith.constant 1 : index
      %c0_114 = arith.constant 0 : index
      %c0_115 = arith.constant 0 : index
      %172 = vector.load %arg8[%c1_113, %c0_114, %c0_115] : memref<4x16x32xbf16, #tpu.memory_space<vmem>>, vector<1x16x32xbf16>
      %173 = vector.shape_cast %172 : vector<1x16x32xbf16> to vector<16x32xbf16>
      %174 = vector.shape_cast %171 : vector<16x32xbf16> to vector<1x16x32xbf16>
      tpu.vector_store %arg8[%c1_113, %c0_114, %c0_115], %174 {strides = array<i32>} : memref<4x16x32xbf16, #tpu.memory_space<vmem>>, vector<1x16x32xbf16>,
      %175 = vector.extract_strided_slice %166 {offsets = [0, 64], sizes = [16, 32], strides = [1, 1]} : vector<16x128xbf16> to vector<16x32xbf16>
      %c2_116 = arith.constant 2 : index
      %c0_117 = arith.constant 0 : index
      %c0_118 = arith.constant 0 : index
      %176 = vector.load %arg8[%c2_116, %c0_117, %c0_118] : memref<4x16x32xbf16, #tpu.memory_space<vmem>>, vector<1x16x32xbf16>
      %177 = vector.shape_cast %176 : vector<1x16x32xbf16> to vector<16x32xbf16>
      %178 = vector.shape_cast %175 : vector<16x32xbf16> to vector<1x16x32xbf16>
      tpu.vector_store %arg8[%c2_116, %c0_117, %c0_118], %178 {strides = array<i32>} : memref<4x16x32xbf16, #tpu.memory_space<vmem>>, vector<1x16x32xbf16>,
      %179 = vector.extract_strided_slice %166 {offsets = [0, 96], sizes = [16, 32], strides = [1, 1]} : vector<16x128xbf16> to vector<16x32xbf16>
      %c3_119 = arith.constant 3 : index
      %c0_120 = arith.constant 0 : index
      %c0_121 = arith.constant 0 : index
      %180 = vector.load %arg8[%c3_119, %c0_120, %c0_121] : memref<4x16x32xbf16, #tpu.memory_space<vmem>>, vector<1x16x32xbf16>
      %181 = vector.shape_cast %180 : vector<1x16x32xbf16> to vector<16x32xbf16>
      %182 = vector.shape_cast %179 : vector<16x32xbf16> to vector<1x16x32xbf16>
      tpu.vector_store %arg8[%c3_119, %c0_120, %c0_121], %182 {strides = array<i32>} : memref<4x16x32xbf16, #tpu.memory_space<vmem>>, vector<1x16x32xbf16>,
      %cst_122 = arith.constant 0xFF800000 : f32
      %183 = vector.broadcast %cst_122 : f32 to vector<4x16x1xf32>
      %c0_123 = arith.constant 0 : index
      %c0_124 = arith.constant 0 : index
      %c0_125 = arith.constant 0 : index
      %184 = vector.load %arg9[%c0_123, %c0_124, %c0_125] : memref<4x16x1xf32, #tpu.memory_space<vmem>>, vector<4x16x1xf32>
      tpu.vector_store %arg9[%c0_123, %c0_124, %c0_125], %183 {strides = array<i32>} : memref<4x16x1xf32, #tpu.memory_space<vmem>>, vector<4x16x1xf32>,
      %cst_126 = arith.constant 0.000000e+00 : f32
      %185 = vector.broadcast %cst_126 : f32 to vector<4x16x1xf32>
      %c0_127 = arith.constant 0 : index
      %c0_128 = arith.constant 0 : index
      %c0_129 = arith.constant 0 : index
      %186 = vector.load %arg10[%c0_127, %c0_128, %c0_129] : memref<4x16x1xf32, #tpu.memory_space<vmem>>, vector<4x16x1xf32>
      tpu.vector_store %arg10[%c0_127, %c0_128, %c0_129], %185 {strides = array<i32>} : memref<4x16x1xf32, #tpu.memory_space<vmem>>, vector<4x16x1xf32>,
      %cst_130 = arith.constant 0.000000e+00 : f32
      %187 = vector.broadcast %cst_130 : f32 to vector<4x16x32xf32>
      %c0_131 = arith.constant 0 : index
      %c0_132 = arith.constant 0 : index
      %c0_133 = arith.constant 0 : index
      %188 = vector.load %arg11[%c0_131, %c0_132, %c0_133] : memref<4x16x32xf32, #tpu.memory_space<vmem>>, vector<4x16x32xf32>
      tpu.vector_store %arg11[%c0_131, %c0_132, %c0_133], %187 {strides = array<i32>} : memref<4x16x32xf32, #tpu.memory_space<vmem>>, vector<4x16x32xf32>,
    } else {
    }
    %c0 = arith.constant 0 : index
    %c0_1 = arith.constant 0 : index
    %c0_2 = arith.constant 0 : index
    %3 = vector.load %arg4[%c0, %c0_1, %c0_2] : memref<1x16x128xbf16, #tpu.memory_space<vmem>>, vector<1x16x128xbf16>
    %4 = vector.shape_cast %3 : vector<1x16x128xbf16> to vector<16x128xbf16>
    %c0_3 = arith.constant 0 : index
    %c0_4 = arith.constant 0 : index
    %c0_5 = arith.constant 0 : index
    %5 = vector.load %arg5[%c0_3, %c0_4, %c0_5] : memref<1x16x128xbf16, #tpu.memory_space<vmem>>, vector<1x16x128xbf16>
    %6 = vector.shape_cast %5 : vector<1x16x128xbf16> to vector<16x128xbf16>
    %c0_6 = arith.constant 0 : index
    %c0_7 = arith.constant 0 : index
    %c0_8 = arith.constant 0 : index
    %7 = vector.load %arg6[%c0_6, %c0_7, %c0_8] : memref<1x16x16xbf16, #tpu.memory_space<vmem>>, vector<1x16x16xbf16>
    %8 = vector.shape_cast %7 : vector<1x16x16xbf16> to vector<16x16xbf16>
    %9 = arith.extf %8 : vector<16x16xbf16> to vector<16x16xf32>
    %c0_9 = arith.constant 0 : index
    %c0_10 = arith.constant 0 : index
    %c0_11 = arith.constant 0 : index
    %10 = vector.load %arg8[%c0_9, %c0_10, %c0_11] : memref<4x16x32xbf16, #tpu.memory_space<vmem>>, vector<1x16x32xbf16>
    %11 = vector.shape_cast %10 : vector<1x16x32xbf16> to vector<16x32xbf16>
    %12 = vector.extract_strided_slice %4 {offsets = [0, 0], sizes = [16, 32], strides = [1, 1]} : vector<16x128xbf16> to vector<16x32xbf16>
    %cst = arith.constant dense<0.000000e+00> : vector<16x16xf32>
    %13 = tpu.matmul %11, %12, %cst {dimension_numbers = #tpu.dot_dimension_numbers<[1], [1], [0], [0], [0, 0, 1, 0], [], []>} : vector<16x32xbf16>, vector<16x32xbf16>, vector<16x16xf32> -> vector<16x16xf32>
    %14 = arith.addf %13, %9 : vector<16x16xf32>
    %c0_12 = arith.constant 0 : index
    %c0_13 = arith.constant 0 : index
    %c0_14 = arith.constant 0 : index
    %15 = vector.load %arg9[%c0_12, %c0_13, %c0_14] : memref<4x16x1xf32, #tpu.memory_space<vmem>>, vector<1x16x1xf32>
    %16 = vector.shape_cast %15 : vector<1x16x1xf32> to vector<16x1xf32>
    %cst_15 = arith.constant dense<0xFF800000> : vector<16xf32>
    %17 = vector.multi_reduction <maximumf>, %14, %cst_15 [1] : vector<16x16xf32> to vector<16xf32>
    %18 = vector.shape_cast %17 : vector<16xf32> to vector<16x1xf32>
    %19 = arith.maximumf %16, %18 : vector<16x1xf32>
    %20 = arith.subf %16, %19 : vector<16x1xf32>
    %21 = math.exp %20 : vector<16x1xf32>
    %22 = vector.broadcast %19 : vector<16x1xf32> to vector<16x16xf32>
    %23 = arith.subf %14, %22 : vector<16x16xf32>
    %24 = math.exp %23 : vector<16x16xf32>
    %c0_16 = arith.constant 0 : index
    %c0_17 = arith.constant 0 : index
    %c0_18 = arith.constant 0 : index
    %25 = vector.load %arg10[%c0_16, %c0_17, %c0_18] : memref<4x16x1xf32, #tpu.memory_space<vmem>>, vector<1x16x1xf32>
    %26 = vector.shape_cast %25 : vector<1x16x1xf32> to vector<16x1xf32>
    %27 = arith.mulf %21, %26 : vector<16x1xf32>
    %cst_19 = arith.constant dense<0.000000e+00> : vector<16xf32>
    %28 = vector.multi_reduction <add>, %24, %cst_19 [1] : vector<16x16xf32> to vector<16xf32>
    %29 = vector.shape_cast %28 : vector<16xf32> to vector<16x1xf32>
    %30 = arith.addf %27, %29 : vector<16x1xf32>
    %c0_20 = arith.constant 0 : index
    %c0_21 = arith.constant 0 : index
    %c0_22 = arith.constant 0 : index
    %31 = vector.load %arg10[%c0_20, %c0_21, %c0_22] : memref<4x16x1xf32, #tpu.memory_space<vmem>>, vector<1x16x1xf32>
    %32 = vector.shape_cast %31 : vector<1x16x1xf32> to vector<16x1xf32>
    %33 = vector.shape_cast %30 : vector<16x1xf32> to vector<1x16x1xf32>
    tpu.vector_store %arg10[%c0_20, %c0_21, %c0_22], %33 {strides = array<i32>} : memref<4x16x1xf32, #tpu.memory_space<vmem>>, vector<1x16x1xf32>,
    %c0_23 = arith.constant 0 : index
    %c0_24 = arith.constant 0 : index
    %c0_25 = arith.constant 0 : index
    %34 = vector.load %arg11[%c0_23, %c0_24, %c0_25] : memref<4x16x32xf32, #tpu.memory_space<vmem>>, vector<1x16x32xf32>
    %35 = vector.shape_cast %34 : vector<1x16x32xf32> to vector<16x32xf32>
    %36 = vector.broadcast %21 : vector<16x1xf32> to vector<16x32xf32>
    %37 = arith.mulf %36, %35 : vector<16x32xf32>
    %38 = arith.truncf %24 : vector<16x16xf32> to vector<16x16xbf16>
    %39 = vector.extract_strided_slice %6 {offsets = [0, 0], sizes = [16, 32], strides = [1, 1]} : vector<16x128xbf16> to vector<16x32xbf16>
    %cst_26 = arith.constant dense<0.000000e+00> : vector<16x32xf32>
    %40 = tpu.matmul %38, %39, %cst_26 {dimension_numbers = #tpu.dot_dimension_numbers<[1], [0], [0], [1], [0, 0, 1, 1], [], []>} : vector<16x16xbf16>, vector<16x32xbf16>, vector<16x32xf32> -> vector<16x32xf32>
    %41 = arith.addf %37, %40 : vector<16x32xf32>
    %c0_27 = arith.constant 0 : index
    %c0_28 = arith.constant 0 : index
    %c0_29 = arith.constant 0 : index
    %42 = vector.load %arg11[%c0_27, %c0_28, %c0_29] : memref<4x16x32xf32, #tpu.memory_space<vmem>>, vector<1x16x32xf32>
    %43 = vector.shape_cast %42 : vector<1x16x32xf32> to vector<16x32xf32>
    %44 = vector.shape_cast %41 : vector<16x32xf32> to vector<1x16x32xf32>
    tpu.vector_store %arg11[%c0_27, %c0_28, %c0_29], %44 {strides = array<i32>} : memref<4x16x32xf32, #tpu.memory_space<vmem>>, vector<1x16x32xf32>,
    %c0_30 = arith.constant 0 : index
    %c0_31 = arith.constant 0 : index
    %c0_32 = arith.constant 0 : index
    %45 = vector.load %arg9[%c0_30, %c0_31, %c0_32] : memref<4x16x1xf32, #tpu.memory_space<vmem>>, vector<1x16x1xf32>
    %46 = vector.shape_cast %45 : vector<1x16x1xf32> to vector<16x1xf32>
    %47 = vector.shape_cast %19 : vector<16x1xf32> to vector<1x16x1xf32>
    tpu.vector_store %arg9[%c0_30, %c0_31, %c0_32], %47 {strides = array<i32>} : memref<4x16x1xf32, #tpu.memory_space<vmem>>, vector<1x16x1xf32>,
    %c1 = arith.constant 1 : index
    %c0_33 = arith.constant 0 : index
    %c0_34 = arith.constant 0 : index
    %48 = vector.load %arg8[%c1, %c0_33, %c0_34] : memref<4x16x32xbf16, #tpu.memory_space<vmem>>, vector<1x16x32xbf16>
    %49 = vector.shape_cast %48 : vector<1x16x32xbf16> to vector<16x32xbf16>
    %50 = vector.extract_strided_slice %4 {offsets = [0, 32], sizes = [16, 32], strides = [1, 1]} : vector<16x128xbf16> to vector<16x32xbf16>
    %cst_35 = arith.constant dense<0.000000e+00> : vector<16x16xf32>
    %51 = tpu.matmul %49, %50, %cst_35 {dimension_numbers = #tpu.dot_dimension_numbers<[1], [1], [0], [0], [0, 0, 1, 0], [], []>} : vector<16x32xbf16>, vector<16x32xbf16>, vector<16x16xf32> -> vector<16x16xf32>
    %52 = arith.addf %51, %9 : vector<16x16xf32>
    %c1_36 = arith.constant 1 : index
    %c0_37 = arith.constant 0 : index
    %c0_38 = arith.constant 0 : index
    %53 = vector.load %arg9[%c1_36, %c0_37, %c0_38] : memref<4x16x1xf32, #tpu.memory_space<vmem>>, vector<1x16x1xf32>
    %54 = vector.shape_cast %53 : vector<1x16x1xf32> to vector<16x1xf32>
    %cst_39 = arith.constant dense<0xFF800000> : vector<16xf32>
    %55 = vector.multi_reduction <maximumf>, %52, %cst_39 [1] : vector<16x16xf32> to vector<16xf32>
    %56 = vector.shape_cast %55 : vector<16xf32> to vector<16x1xf32>
    %57 = arith.maximumf %54, %56 : vector<16x1xf32>
    %58 = arith.subf %54, %57 : vector<16x1xf32>
    %59 = math.exp %58 : vector<16x1xf32>
    %60 = vector.broadcast %57 : vector<16x1xf32> to vector<16x16xf32>
    %61 = arith.subf %52, %60 : vector<16x16xf32>
    %62 = math.exp %61 : vector<16x16xf32>
    %c1_40 = arith.constant 1 : index
    %c0_41 = arith.constant 0 : index
    %c0_42 = arith.constant 0 : index
    %63 = vector.load %arg10[%c1_40, %c0_41, %c0_42] : memref<4x16x1xf32, #tpu.memory_space<vmem>>, vector<1x16x1xf32>
    %64 = vector.shape_cast %63 : vector<1x16x1xf32> to vector<16x1xf32>
    %65 = arith.mulf %59, %64 : vector<16x1xf32>
    %cst_43 = arith.constant dense<0.000000e+00> : vector<16xf32>
    %66 = vector.multi_reduction <add>, %62, %cst_43 [1] : vector<16x16xf32> to vector<16xf32>
    %67 = vector.shape_cast %66 : vector<16xf32> to vector<16x1xf32>
    %68 = arith.addf %65, %67 : vector<16x1xf32>
    %c1_44 = arith.constant 1 : index
    %c0_45 = arith.constant 0 : index
    %c0_46 = arith.constant 0 : index
    %69 = vector.load %arg10[%c1_44, %c0_45, %c0_46] : memref<4x16x1xf32, #tpu.memory_space<vmem>>, vector<1x16x1xf32>
    %70 = vector.shape_cast %69 : vector<1x16x1xf32> to vector<16x1xf32>
    %71 = vector.shape_cast %68 : vector<16x1xf32> to vector<1x16x1xf32>
    tpu.vector_store %arg10[%c1_44, %c0_45, %c0_46], %71 {strides = array<i32>} : memref<4x16x1xf32, #tpu.memory_space<vmem>>, vector<1x16x1xf32>,
    %c1_47 = arith.constant 1 : index
    %c0_48 = arith.constant 0 : index
    %c0_49 = arith.constant 0 : index
    %72 = vector.load %arg11[%c1_47, %c0_48, %c0_49] : memref<4x16x32xf32, #tpu.memory_space<vmem>>, vector<1x16x32xf32>
    %73 = vector.shape_cast %72 : vector<1x16x32xf32> to vector<16x32xf32>
    %74 = vector.broadcast %59 : vector<16x1xf32> to vector<16x32xf32>
    %75 = arith.mulf %74, %73 : vector<16x32xf32>
    %76 = arith.truncf %62 : vector<16x16xf32> to vector<16x16xbf16>
    %77 = vector.extract_strided_slice %6 {offsets = [0, 32], sizes = [16, 32], strides = [1, 1]} : vector<16x128xbf16> to vector<16x32xbf16>
    %cst_50 = arith.constant dense<0.000000e+00> : vector<16x32xf32>
    %78 = tpu.matmul %76, %77, %cst_50 {dimension_numbers = #tpu.dot_dimension_numbers<[1], [0], [0], [1], [0, 0, 1, 1], [], []>} : vector<16x16xbf16>, vector<16x32xbf16>, vector<16x32xf32> -> vector<16x32xf32>
    %79 = arith.addf %75, %78 : vector<16x32xf32>
    %c1_51 = arith.constant 1 : index
    %c0_52 = arith.constant 0 : index
    %c0_53 = arith.constant 0 : index
    %80 = vector.load %arg11[%c1_51, %c0_52, %c0_53] : memref<4x16x32xf32, #tpu.memory_space<vmem>>, vector<1x16x32xf32>
    %81 = vector.shape_cast %80 : vector<1x16x32xf32> to vector<16x32xf32>
    %82 = vector.shape_cast %79 : vector<16x32xf32> to vector<1x16x32xf32>
    tpu.vector_store %arg11[%c1_51, %c0_52, %c0_53], %82 {strides = array<i32>} : memref<4x16x32xf32, #tpu.memory_space<vmem>>, vector<1x16x32xf32>,
    %c1_54 = arith.constant 1 : index
    %c0_55 = arith.constant 0 : index
    %c0_56 = arith.constant 0 : index
    %83 = vector.load %arg9[%c1_54, %c0_55, %c0_56] : memref<4x16x1xf32, #tpu.memory_space<vmem>>, vector<1x16x1xf32>
    %84 = vector.shape_cast %83 : vector<1x16x1xf32> to vector<16x1xf32>
    %85 = vector.shape_cast %57 : vector<16x1xf32> to vector<1x16x1xf32>
    tpu.vector_store %arg9[%c1_54, %c0_55, %c0_56], %85 {strides = array<i32>} : memref<4x16x1xf32, #tpu.memory_space<vmem>>, vector<1x16x1xf32>,
    %c2 = arith.constant 2 : index
    %c0_57 = arith.constant 0 : index
    %c0_58 = arith.constant 0 : index
    %86 = vector.load %arg8[%c2, %c0_57, %c0_58] : memref<4x16x32xbf16, #tpu.memory_space<vmem>>, vector<1x16x32xbf16>
    %87 = vector.shape_cast %86 : vector<1x16x32xbf16> to vector<16x32xbf16>
    %88 = vector.extract_strided_slice %4 {offsets = [0, 64], sizes = [16, 32], strides = [1, 1]} : vector<16x128xbf16> to vector<16x32xbf16>
    %cst_59 = arith.constant dense<0.000000e+00> : vector<16x16xf32>
    %89 = tpu.matmul %87, %88, %cst_59 {dimension_numbers = #tpu.dot_dimension_numbers<[1], [1], [0], [0], [0, 0, 1, 0], [], []>} : vector<16x32xbf16>, vector<16x32xbf16>, vector<16x16xf32> -> vector<16x16xf32>
    %90 = arith.addf %89, %9 : vector<16x16xf32>
    %c2_60 = arith.constant 2 : index
    %c0_61 = arith.constant 0 : index
    %c0_62 = arith.constant 0 : index
    %91 = vector.load %arg9[%c2_60, %c0_61, %c0_62] : memref<4x16x1xf32, #tpu.memory_space<vmem>>, vector<1x16x1xf32>
    %92 = vector.shape_cast %91 : vector<1x16x1xf32> to vector<16x1xf32>
    %cst_63 = arith.constant dense<0xFF800000> : vector<16xf32>
    %93 = vector.multi_reduction <maximumf>, %90, %cst_63 [1] : vector<16x16xf32> to vector<16xf32>
    %94 = vector.shape_cast %93 : vector<16xf32> to vector<16x1xf32>
    %95 = arith.maximumf %92, %94 : vector<16x1xf32>
    %96 = arith.subf %92, %95 : vector<16x1xf32>
    %97 = math.exp %96 : vector<16x1xf32>
    %98 = vector.broadcast %95 : vector<16x1xf32> to vector<16x16xf32>
    %99 = arith.subf %90, %98 : vector<16x16xf32>
    %100 = math.exp %99 : vector<16x16xf32>
    %c2_64 = arith.constant 2 : index
    %c0_65 = arith.constant 0 : index
    %c0_66 = arith.constant 0 : index
    %101 = vector.load %arg10[%c2_64, %c0_65, %c0_66] : memref<4x16x1xf32, #tpu.memory_space<vmem>>, vector<1x16x1xf32>
    %102 = vector.shape_cast %101 : vector<1x16x1xf32> to vector<16x1xf32>
    %103 = arith.mulf %97, %102 : vector<16x1xf32>
    %cst_67 = arith.constant dense<0.000000e+00> : vector<16xf32>
    %104 = vector.multi_reduction <add>, %100, %cst_67 [1] : vector<16x16xf32> to vector<16xf32>
    %105 = vector.shape_cast %104 : vector<16xf32> to vector<16x1xf32>
    %106 = arith.addf %103, %105 : vector<16x1xf32>
    %c2_68 = arith.constant 2 : index
    %c0_69 = arith.constant 0 : index
    %c0_70 = arith.constant 0 : index
    %107 = vector.load %arg10[%c2_68, %c0_69, %c0_70] : memref<4x16x1xf32, #tpu.memory_space<vmem>>, vector<1x16x1xf32>
    %108 = vector.shape_cast %107 : vector<1x16x1xf32> to vector<16x1xf32>
    %109 = vector.shape_cast %106 : vector<16x1xf32> to vector<1x16x1xf32>
    tpu.vector_store %arg10[%c2_68, %c0_69, %c0_70], %109 {strides = array<i32>} : memref<4x16x1xf32, #tpu.memory_space<vmem>>, vector<1x16x1xf32>,
    %c2_71 = arith.constant 2 : index
    %c0_72 = arith.constant 0 : index
    %c0_73 = arith.constant 0 : index
    %110 = vector.load %arg11[%c2_71, %c0_72, %c0_73] : memref<4x16x32xf32, #tpu.memory_space<vmem>>, vector<1x16x32xf32>
    %111 = vector.shape_cast %110 : vector<1x16x32xf32> to vector<16x32xf32>
    %112 = vector.broadcast %97 : vector<16x1xf32> to vector<16x32xf32>
    %113 = arith.mulf %112, %111 : vector<16x32xf32>
    %114 = arith.truncf %100 : vector<16x16xf32> to vector<16x16xbf16>
    %115 = vector.extract_strided_slice %6 {offsets = [0, 64], sizes = [16, 32], strides = [1, 1]} : vector<16x128xbf16> to vector<16x32xbf16>
    %cst_74 = arith.constant dense<0.000000e+00> : vector<16x32xf32>
    %116 = tpu.matmul %114, %115, %cst_74 {dimension_numbers = #tpu.dot_dimension_numbers<[1], [0], [0], [1], [0, 0, 1, 1], [], []>} : vector<16x16xbf16>, vector<16x32xbf16>, vector<16x32xf32> -> vector<16x32xf32>
    %117 = arith.addf %113, %116 : vector<16x32xf32>
    %c2_75 = arith.constant 2 : index
    %c0_76 = arith.constant 0 : index
    %c0_77 = arith.constant 0 : index
    %118 = vector.load %arg11[%c2_75, %c0_76, %c0_77] : memref<4x16x32xf32, #tpu.memory_space<vmem>>, vector<1x16x32xf32>
    %119 = vector.shape_cast %118 : vector<1x16x32xf32> to vector<16x32xf32>
    %120 = vector.shape_cast %117 : vector<16x32xf32> to vector<1x16x32xf32>
    tpu.vector_store %arg11[%c2_75, %c0_76, %c0_77], %120 {strides = array<i32>} : memref<4x16x32xf32, #tpu.memory_space<vmem>>, vector<1x16x32xf32>,
    %c2_78 = arith.constant 2 : index
    %c0_79 = arith.constant 0 : index
    %c0_80 = arith.constant 0 : index
    %121 = vector.load %arg9[%c2_78, %c0_79, %c0_80] : memref<4x16x1xf32, #tpu.memory_space<vmem>>, vector<1x16x1xf32>
    %122 = vector.shape_cast %121 : vector<1x16x1xf32> to vector<16x1xf32>
    %123 = vector.shape_cast %95 : vector<16x1xf32> to vector<1x16x1xf32>
    tpu.vector_store %arg9[%c2_78, %c0_79, %c0_80], %123 {strides = array<i32>} : memref<4x16x1xf32, #tpu.memory_space<vmem>>, vector<1x16x1xf32>,
    %c3 = arith.constant 3 : index
    %c0_81 = arith.constant 0 : index
    %c0_82 = arith.constant 0 : index
    %124 = vector.load %arg8[%c3, %c0_81, %c0_82] : memref<4x16x32xbf16, #tpu.memory_space<vmem>>, vector<1x16x32xbf16>
    %125 = vector.shape_cast %124 : vector<1x16x32xbf16> to vector<16x32xbf16>
    %126 = vector.extract_strided_slice %4 {offsets = [0, 96], sizes = [16, 32], strides = [1, 1]} : vector<16x128xbf16> to vector<16x32xbf16>
    %cst_83 = arith.constant dense<0.000000e+00> : vector<16x16xf32>
    %127 = tpu.matmul %125, %126, %cst_83 {dimension_numbers = #tpu.dot_dimension_numbers<[1], [1], [0], [0], [0, 0, 1, 0], [], []>} : vector<16x32xbf16>, vector<16x32xbf16>, vector<16x16xf32> -> vector<16x16xf32>
    %128 = arith.addf %127, %9 : vector<16x16xf32>
    %c3_84 = arith.constant 3 : index
    %c0_85 = arith.constant 0 : index
    %c0_86 = arith.constant 0 : index
    %129 = vector.load %arg9[%c3_84, %c0_85, %c0_86] : memref<4x16x1xf32, #tpu.memory_space<vmem>>, vector<1x16x1xf32>
    %130 = vector.shape_cast %129 : vector<1x16x1xf32> to vector<16x1xf32>
    %cst_87 = arith.constant dense<0xFF800000> : vector<16xf32>
    %131 = vector.multi_reduction <maximumf>, %128, %cst_87 [1] : vector<16x16xf32> to vector<16xf32>
    %132 = vector.shape_cast %131 : vector<16xf32> to vector<16x1xf32>
    %133 = arith.maximumf %130, %132 : vector<16x1xf32>
    %134 = arith.subf %130, %133 : vector<16x1xf32>
    %135 = math.exp %134 : vector<16x1xf32>
    %136 = vector.broadcast %133 : vector<16x1xf32> to vector<16x16xf32>
    %137 = arith.subf %128, %136 : vector<16x16xf32>
    %138 = math.exp %137 : vector<16x16xf32>
    %c3_88 = arith.constant 3 : index
    %c0_89 = arith.constant 0 : index
    %c0_90 = arith.constant 0 : index
    %139 = vector.load %arg10[%c3_88, %c0_89, %c0_90] : memref<4x16x1xf32, #tpu.memory_space<vmem>>, vector<1x16x1xf32>
    %140 = vector.shape_cast %139 : vector<1x16x1xf32> to vector<16x1xf32>
    %141 = arith.mulf %135, %140 : vector<16x1xf32>
    %cst_91 = arith.constant dense<0.000000e+00> : vector<16xf32>
    %142 = vector.multi_reduction <add>, %138, %cst_91 [1] : vector<16x16xf32> to vector<16xf32>
    %143 = vector.shape_cast %142 : vector<16xf32> to vector<16x1xf32>
    %144 = arith.addf %141, %143 : vector<16x1xf32>
    %c3_92 = arith.constant 3 : index
    %c0_93 = arith.constant 0 : index
    %c0_94 = arith.constant 0 : index
    %145 = vector.load %arg10[%c3_92, %c0_93, %c0_94] : memref<4x16x1xf32, #tpu.memory_space<vmem>>, vector<1x16x1xf32>
    %146 = vector.shape_cast %145 : vector<1x16x1xf32> to vector<16x1xf32>
    %147 = vector.shape_cast %144 : vector<16x1xf32> to vector<1x16x1xf32>
    tpu.vector_store %arg10[%c3_92, %c0_93, %c0_94], %147 {strides = array<i32>} : memref<4x16x1xf32, #tpu.memory_space<vmem>>, vector<1x16x1xf32>,
    %c3_95 = arith.constant 3 : index
    %c0_96 = arith.constant 0 : index
    %c0_97 = arith.constant 0 : index
    %148 = vector.load %arg11[%c3_95, %c0_96, %c0_97] : memref<4x16x32xf32, #tpu.memory_space<vmem>>, vector<1x16x32xf32>
    %149 = vector.shape_cast %148 : vector<1x16x32xf32> to vector<16x32xf32>
    %150 = vector.broadcast %135 : vector<16x1xf32> to vector<16x32xf32>
    %151 = arith.mulf %150, %149 : vector<16x32xf32>
    %152 = arith.truncf %138 : vector<16x16xf32> to vector<16x16xbf16>
    %153 = vector.extract_strided_slice %6 {offsets = [0, 96], sizes = [16, 32], strides = [1, 1]} : vector<16x128xbf16> to vector<16x32xbf16>
    %cst_98 = arith.constant dense<0.000000e+00> : vector<16x32xf32>
    %154 = tpu.matmul %152, %153, %cst_98 {dimension_numbers = #tpu.dot_dimension_numbers<[1], [0], [0], [1], [0, 0, 1, 1], [], []>} : vector<16x16xbf16>, vector<16x32xbf16>, vector<16x32xf32> -> vector<16x32xf32>
    %155 = arith.addf %151, %154 : vector<16x32xf32>
    %c3_99 = arith.constant 3 : index
    %c0_100 = arith.constant 0 : index
    %c0_101 = arith.constant 0 : index
    %156 = vector.load %arg11[%c3_99, %c0_100, %c0_101] : memref<4x16x32xf32, #tpu.memory_space<vmem>>, vector<1x16x32xf32>
    %157 = vector.shape_cast %156 : vector<1x16x32xf32> to vector<16x32xf32>
    %158 = vector.shape_cast %155 : vector<16x32xf32> to vector<1x16x32xf32>
    tpu.vector_store %arg11[%c3_99, %c0_100, %c0_101], %158 {strides = array<i32>} : memref<4x16x32xf32, #tpu.memory_space<vmem>>, vector<1x16x32xf32>,
    %c3_102 = arith.constant 3 : index
    %c0_103 = arith.constant 0 : index
    %c0_104 = arith.constant 0 : index
    %159 = vector.load %arg9[%c3_102, %c0_103, %c0_104] : memref<4x16x1xf32, #tpu.memory_space<vmem>>, vector<1x16x1xf32>
    %160 = vector.shape_cast %159 : vector<1x16x1xf32> to vector<16x1xf32>
    %161 = vector.shape_cast %133 : vector<16x1xf32> to vector<1x16x1xf32>
    tpu.vector_store %arg9[%c3_102, %c0_103, %c0_104], %161 {strides = array<i32>} : memref<4x16x1xf32, #tpu.memory_space<vmem>>, vector<1x16x1xf32>,
    %c0_i32_105 = arith.constant 0 : i32
    %162 = arith.cmpi eq, %arg2, %c0_i32_105 : i32
    %163 = arith.extui %162 : i1 to i32
    %c0_i32_106 = arith.constant 0 : i32
    %164 = arith.cmpi ne, %163, %c0_i32_106 : i32
    scf.if %164 {
      %c0_107 = arith.constant 0 : index
      %c0_108 = arith.constant 0 : index
      %c0_109 = arith.constant 0 : index
      %165 = vector.load %arg11[%c0_107, %c0_108, %c0_109] : memref<4x16x32xf32, #tpu.memory_space<vmem>>, vector<1x16x32xf32>
      %166 = vector.shape_cast %165 : vector<1x16x32xf32> to vector<16x32xf32>
      %c0_110 = arith.constant 0 : index
      %c0_111 = arith.constant 0 : index
      %c0_112 = arith.constant 0 : index
      %167 = vector.load %arg10[%c0_110, %c0_111, %c0_112] : memref<4x16x1xf32, #tpu.memory_space<vmem>>, vector<1x16x1xf32>
      %168 = vector.shape_cast %167 : vector<1x16x1xf32> to vector<16x1xf32>
      %169 = tpu.reciprocal %168 {approx = true} : vector<16x1xf32> -> vector<16x1xf32>
      %170 = vector.broadcast %169 : vector<16x1xf32> to vector<16x32xf32>
      %171 = arith.mulf %166, %170 : vector<16x32xf32>
      %c1_113 = arith.constant 1 : index
      %c0_114 = arith.constant 0 : index
      %c0_115 = arith.constant 0 : index
      %172 = vector.load %arg11[%c1_113, %c0_114, %c0_115] : memref<4x16x32xf32, #tpu.memory_space<vmem>>, vector<1x16x32xf32>
      %173 = vector.shape_cast %172 : vector<1x16x32xf32> to vector<16x32xf32>
      %c1_116 = arith.constant 1 : index
      %c0_117 = arith.constant 0 : index
      %c0_118 = arith.constant 0 : index
      %174 = vector.load %arg10[%c1_116, %c0_117, %c0_118] : memref<4x16x1xf32, #tpu.memory_space<vmem>>, vector<1x16x1xf32>
      %175 = vector.shape_cast %174 : vector<1x16x1xf32> to vector<16x1xf32>
      %176 = tpu.reciprocal %175 {approx = true} : vector<16x1xf32> -> vector<16x1xf32>
      %177 = vector.broadcast %176 : vector<16x1xf32> to vector<16x32xf32>
      %178 = arith.mulf %173, %177 : vector<16x32xf32>
      %c2_119 = arith.constant 2 : index
      %c0_120 = arith.constant 0 : index
      %c0_121 = arith.constant 0 : index
      %179 = vector.load %arg11[%c2_119, %c0_120, %c0_121] : memref<4x16x32xf32, #tpu.memory_space<vmem>>, vector<1x16x32xf32>
      %180 = vector.shape_cast %179 : vector<1x16x32xf32> to vector<16x32xf32>
      %c2_122 = arith.constant 2 : index
      %c0_123 = arith.constant 0 : index
      %c0_124 = arith.constant 0 : index
      %181 = vector.load %arg10[%c2_122, %c0_123, %c0_124] : memref<4x16x1xf32, #tpu.memory_space<vmem>>, vector<1x16x1xf32>
      %182 = vector.shape_cast %181 : vector<1x16x1xf32> to vector<16x1xf32>
      %183 = tpu.reciprocal %182 {approx = true} : vector<16x1xf32> -> vector<16x1xf32>
      %184 = vector.broadcast %183 : vector<16x1xf32> to vector<16x32xf32>
      %185 = arith.mulf %180, %184 : vector<16x32xf32>
      %c3_125 = arith.constant 3 : index
      %c0_126 = arith.constant 0 : index
      %c0_127 = arith.constant 0 : index
      %186 = vector.load %arg11[%c3_125, %c0_126, %c0_127] : memref<4x16x32xf32, #tpu.memory_space<vmem>>, vector<1x16x32xf32>
      %187 = vector.shape_cast %186 : vector<1x16x32xf32> to vector<16x32xf32>
      %c3_128 = arith.constant 3 : index
      %c0_129 = arith.constant 0 : index
      %c0_130 = arith.constant 0 : index
      %188 = vector.load %arg10[%c3_128, %c0_129, %c0_130] : memref<4x16x1xf32, #tpu.memory_space<vmem>>, vector<1x16x1xf32>
      %189 = vector.shape_cast %188 : vector<1x16x1xf32> to vector<16x1xf32>
      %190 = tpu.reciprocal %189 {approx = true} : vector<16x1xf32> -> vector<16x1xf32>
      %191 = vector.broadcast %190 : vector<16x1xf32> to vector<16x32xf32>
      %192 = arith.mulf %187, %191 : vector<16x32xf32>
      %193 = tpu.concatenate %171, %178, %185, %192 in 1 : vector<16x32xf32>, vector<16x32xf32>, vector<16x32xf32>, vector<16x32xf32> -> vector<16x128xf32>
      %194 = arith.truncf %193 : vector<16x128xf32> to vector<16x128xbf16>
      %c0_131 = arith.constant 0 : index
      %c0_132 = arith.constant 0 : index
      %c0_133 = arith.constant 0 : index
      %195 = vector.load %arg7[%c0_131, %c0_132, %c0_133] : memref<1x16x128xbf16, #tpu.memory_space<vmem>>, vector<1x16x128xbf16>
      %196 = vector.shape_cast %195 : vector<1x16x128xbf16> to vector<16x128xbf16>
      %197 = vector.shape_cast %194 : vector<16x128xbf16> to vector<1x16x128xbf16>
      tpu.vector_store %arg7[%c0_131, %c0_132, %c0_133], %197 {strides = array<i32>} : memref<1x16x128xbf16, #tpu.memory_space<vmem>>, vector<1x16x128xbf16>,
    } else {
    }
    return
  }
  func.func @transform_0(%arg0: i32, %arg1: i32, %arg2: i32) -> (i32, i32, i32) {
    %c0_i32 = arith.constant 0 : i32
    %c0_i32_0 = arith.constant 0 : i32
    return %arg0, %arg1, %c0_i32 : i32, i32, i32
  }
  func.func @transform_1(%arg0: i32, %arg1: i32, %arg2: i32) -> (i32, i32, i32) {
    %c1_i32 = arith.constant 1 : i32
    %c0_i32 = arith.constant 0 : i32
    return %arg0, %arg2, %c1_i32 : i32, i32, i32
  }
  func.func @transform_2(%arg0: i32, %arg1: i32, %arg2: i32) -> (i32, i32, i32) {
    %c2_i32 = arith.constant 2 : i32
    %c0_i32 = arith.constant 0 : i32
    return %arg0, %arg2, %c2_i32 : i32, i32, i32
  }
  func.func @transform_3(%arg0: i32, %arg1: i32, %arg2: i32) -> (i32, i32, i32) {
    %c0_i32 = arith.constant 0 : i32
    %c0_i32_0 = arith.constant 0 : i32
    return %c0_i32, %arg1, %arg2 : i32, i32, i32
  }
  func.func @transform_4(%arg0: i32, %arg1: i32, %arg2: i32) -> (i32, i32, i32) {
    %c0_i32 = arith.constant 0 : i32
    %c0_i32_0 = arith.constant 0 : i32
    return %arg0, %arg1, %c0_i32 : i32, i32, i32
  }
}

module attributes {stable_mosaic.version = 11 : i64} {
  func.func @_linear_kernel(%arg0: i32, %arg1: i32, %arg2: memref<32x128xf32, #tpu.memory_space<vmem>>, %arg3: memref<1x128xf32, #tpu.memory_space<vmem>>, %arg4: memref<1x128xf32, #tpu.memory_space<vmem>>, %arg5: memref<128x128xbf16, #tpu.memory_space<vmem>>, %arg6: memref<1x128xf32, #tpu.memory_space<vmem>>, %arg7: memref<32x128xbf16, #tpu.memory_space<vmem>>, %arg8: memref<32x128xbf16, #tpu.memory_space<vmem>>) attributes {dimension_semantics = [#tpu.dimension_semantics<parallel>, #tpu.dimension_semantics<arbitrary>], iteration_bounds = array<i64: 1, 1>, scalar_prefetch = 0 : i64, scratch_operands = 1 : i64, tpu.core_type = #tpu.core_type<tc>, window_params = [{transform_indices = @transform_0, window_bounds = array<i64: 32, 128>}, {pipeline_mode = #tpu.pipeline_mode<synchronous>, transform_indices = @transform_1, window_bounds = array<i64: 1, 128>}, {pipeline_mode = #tpu.pipeline_mode<synchronous>, transform_indices = @transform_2, window_bounds = array<i64: 1, 128>}, {transform_indices = @transform_3, window_bounds = array<i64: 128, 128>}, {transform_indices = @transform_4, window_bounds = array<i64: 1, 128>}, {transform_indices = @transform_5, window_bounds = array<i64: 32, 128>}]} {
    %c0_i32 = arith.constant 0 : i32
    %0 = arith.cmpi eq, %arg1, %c0_i32 : i32
    %1 = arith.extui %0 : i1 to i32
    %c0_i32_0 = arith.constant 0 : i32
    %2 = arith.cmpi ne, %1, %c0_i32_0 : i32
    scf.if %2 {
      %c0_8 = arith.constant 0 : index
      %c0_9 = arith.constant 0 : index
      %11 = vector.load %arg2[%c0_8, %c0_9] : memref<32x128xf32, #tpu.memory_space<vmem>>, vector<32x128xf32>
      %cst_10 = arith.constant dense<0.000000e+00> : vector<32xf32>
      %12 = vector.multi_reduction <add>, %11, %cst_10 [1] : vector<32x128xf32> to vector<32xf32>
      %13 = vector.shape_cast %12 : vector<32xf32> to vector<32x1xf32>
      %cst_11 = arith.constant 1.280000e+02 : f32
      %14 = vector.broadcast %cst_11 : f32 to vector<32x1xf32>
      %15 = arith.divf %13, %14 : vector<32x1xf32>
      %16 = vector.broadcast %15 : vector<32x1xf32> to vector<32x128xf32>
      %17 = arith.subf %11, %16 : vector<32x128xf32>
      %18 = arith.mulf %17, %17 : vector<32x128xf32>
      %cst_12 = arith.constant dense<0.000000e+00> : vector<32xf32>
      %19 = vector.multi_reduction <add>, %18, %cst_12 [1] : vector<32x128xf32> to vector<32xf32>
      %20 = vector.shape_cast %19 : vector<32xf32> to vector<32x1xf32>
      %cst_13 = arith.constant 1.280000e+02 : f32
      %21 = vector.broadcast %cst_13 : f32 to vector<32x1xf32>
      %22 = arith.divf %20, %21 : vector<32x1xf32>
      %cst_14 = arith.constant 9.99999997E-7 : f32
      %23 = vector.broadcast %cst_14 : f32 to vector<32x1xf32>
      %24 = arith.addf %22, %23 : vector<32x1xf32>
      %25 = math.rsqrt %24 : vector<32x1xf32>
      %26 = vector.broadcast %25 : vector<32x1xf32> to vector<32x128xf32>
      %27 = arith.mulf %17, %26 : vector<32x128xf32>
      %c0_15 = arith.constant 0 : index
      %c0_16 = arith.constant 0 : index
      %28 = vector.load %arg3[%c0_15, %c0_16] : memref<1x128xf32, #tpu.memory_space<vmem>>, vector<1x128xf32>
      %29 = vector.broadcast %28 : vector<1x128xf32> to vector<32x128xf32>
      %30 = arith.mulf %27, %29 : vector<32x128xf32>
      %c0_17 = arith.constant 0 : index
      %c0_18 = arith.constant 0 : index
      %31 = vector.load %arg4[%c0_17, %c0_18] : memref<1x128xf32, #tpu.memory_space<vmem>>, vector<1x128xf32>
      %32 = vector.broadcast %31 : vector<1x128xf32> to vector<32x128xf32>
      %33 = arith.addf %30, %32 : vector<32x128xf32>
      %34 = arith.truncf %33 : vector<32x128xf32> to vector<32x128xbf16>
      %c0_19 = arith.constant 0 : index
      %c0_20 = arith.constant 0 : index
      %35 = vector.load %arg8[%c0_19, %c0_20] : memref<32x128xbf16, #tpu.memory_space<vmem>>, vector<32x128xbf16>
      tpu.vector_store %arg8[%c0_19, %c0_20], %34 {strides = array<i32>} : memref<32x128xbf16, #tpu.memory_space<vmem>>, vector<32x128xbf16>,
    } else {
    }
    %c0 = arith.constant 0 : index
    %c0_1 = arith.constant 0 : index
    %3 = vector.load %arg8[%c0, %c0_1] : memref<32x128xbf16, #tpu.memory_space<vmem>>, vector<32x128xbf16>
    %c0_2 = arith.constant 0 : index
    %c0_3 = arith.constant 0 : index
    %4 = vector.load %arg5[%c0_2, %c0_3] : memref<128x128xbf16, #tpu.memory_space<vmem>>, vector<128x128xbf16>
    %cst = arith.constant dense<0.000000e+00> : vector<32x128xf32>
    %5 = tpu.matmul %3, %4, %cst {dimension_numbers = #tpu.dot_dimension_numbers<[1], [0], [0], [1], [0, 0, 1, 1], [], []>} : vector<32x128xbf16>, vector<128x128xbf16>, vector<32x128xf32> -> vector<32x128xf32>
    %c0_4 = arith.constant 0 : index
    %c0_5 = arith.constant 0 : index
    %6 = vector.load %arg6[%c0_4, %c0_5] : memref<1x128xf32, #tpu.memory_space<vmem>>, vector<1x128xf32>
    %7 = vector.broadcast %6 : vector<1x128xf32> to vector<32x128xf32>
    %8 = arith.addf %5, %7 : vector<32x128xf32>
    %9 = arith.truncf %8 : vector<32x128xf32> to vector<32x128xbf16>
    %c0_6 = arith.constant 0 : index
    %c0_7 = arith.constant 0 : index
    %10 = vector.load %arg7[%c0_6, %c0_7] : memref<32x128xbf16, #tpu.memory_space<vmem>>, vector<32x128xbf16>
    tpu.vector_store %arg7[%c0_6, %c0_7], %9 {strides = array<i32>} : memref<32x128xbf16, #tpu.memory_space<vmem>>, vector<32x128xbf16>,
    return
  }
  func.func @transform_0(%arg0: i32, %arg1: i32) -> (i32, i32) {
    %c0_i32 = arith.constant 0 : i32
    %c0_i32_0 = arith.constant 0 : i32
    return %arg0, %c0_i32 : i32, i32
  }
  func.func @transform_1(%arg0: i32, %arg1: i32) -> (i32, i32) {
    %c0_i32 = arith.constant 0 : i32
    %c0_i32_0 = arith.constant 0 : i32
    %c0_i32_1 = arith.constant 0 : i32
    return %c0_i32, %c0_i32_0 : i32, i32
  }
  func.func @transform_2(%arg0: i32, %arg1: i32) -> (i32, i32) {
    %c0_i32 = arith.constant 0 : i32
    %c0_i32_0 = arith.constant 0 : i32
    %c0_i32_1 = arith.constant 0 : i32
    return %c0_i32, %c0_i32_0 : i32, i32
  }
  func.func @transform_3(%arg0: i32, %arg1: i32) -> (i32, i32) {
    %c0_i32 = arith.constant 0 : i32
    %c0_i32_0 = arith.constant 0 : i32
    return %c0_i32, %arg1 : i32, i32
  }
  func.func @transform_4(%arg0: i32, %arg1: i32) -> (i32, i32) {
    %c0_i32 = arith.constant 0 : i32
    %c0_i32_0 = arith.constant 0 : i32
    return %c0_i32, %arg1 : i32, i32
  }
  func.func @transform_5(%arg0: i32, %arg1: i32) -> (i32, i32) {
    %c0_i32 = arith.constant 0 : i32
    return %arg0, %arg1 : i32, i32
  }
}

module attributes {stable_mosaic.version = 11 : i64} {
  func.func @_linear_kernel(%arg0: i32, %arg1: i32, %arg2: memref<64x128xf32, #tpu.memory_space<vmem>>, %arg3: memref<128x256xbf16, #tpu.memory_space<vmem>>, %arg4: memref<1x256xf32, #tpu.memory_space<vmem>>, %arg5: memref<64x256xbf16, #tpu.memory_space<vmem>>, %arg6: memref<64x128xbf16, #tpu.memory_space<vmem>>) attributes {dimension_semantics = [#tpu.dimension_semantics<parallel>, #tpu.dimension_semantics<arbitrary>], iteration_bounds = array<i64: 1, 1>, scalar_prefetch = 0 : i64, scratch_operands = 1 : i64, tpu.core_type = #tpu.core_type<tc>, window_params = [{transform_indices = @transform_0, window_bounds = array<i64: 64, 128>}, {transform_indices = @transform_1, window_bounds = array<i64: 128, 256>}, {transform_indices = @transform_2, window_bounds = array<i64: 1, 256>}, {transform_indices = @transform_3, window_bounds = array<i64: 64, 256>}]} {
    %c0_i32 = arith.constant 0 : i32
    %0 = arith.cmpi eq, %arg1, %c0_i32 : i32
    %1 = arith.extui %0 : i1 to i32
    %c0_i32_0 = arith.constant 0 : i32
    %2 = arith.cmpi ne, %1, %c0_i32_0 : i32
    scf.if %2 {
      %c0_8 = arith.constant 0 : index
      %c0_9 = arith.constant 0 : index
      %11 = vector.load %arg2[%c0_8, %c0_9] : memref<64x128xf32, #tpu.memory_space<vmem>>, vector<64x128xf32>
      %12 = arith.truncf %11 : vector<64x128xf32> to vector<64x128xbf16>
      %c0_10 = arith.constant 0 : index
      %c0_11 = arith.constant 0 : index
      %13 = vector.load %arg6[%c0_10, %c0_11] : memref<64x128xbf16, #tpu.memory_space<vmem>>, vector<64x128xbf16>
      tpu.vector_store %arg6[%c0_10, %c0_11], %12 {strides = array<i32>} : memref<64x128xbf16, #tpu.memory_space<vmem>>, vector<64x128xbf16>,
    } else {
    }
    %c0 = arith.constant 0 : index
    %c0_1 = arith.constant 0 : index
    %3 = vector.load %arg6[%c0, %c0_1] : memref<64x128xbf16, #tpu.memory_space<vmem>>, vector<64x128xbf16>
    %c0_2 = arith.constant 0 : index
    %c0_3 = arith.constant 0 : index
    %4 = vector.load %arg3[%c0_2, %c0_3] : memref<128x256xbf16, #tpu.memory_space<vmem>>, vector<128x256xbf16>
    %cst = arith.constant dense<0.000000e+00> : vector<64x256xf32>
    %5 = tpu.matmul %3, %4, %cst {dimension_numbers = #tpu.dot_dimension_numbers<[1], [0], [0], [1], [0, 0, 1, 1], [], []>} : vector<64x128xbf16>, vector<128x256xbf16>, vector<64x256xf32> -> vector<64x256xf32>
    %c0_4 = arith.constant 0 : index
    %c0_5 = arith.constant 0 : index
    %6 = vector.load %arg4[%c0_4, %c0_5] : memref<1x256xf32, #tpu.memory_space<vmem>>, vector<1x256xf32>
    %7 = vector.broadcast %6 : vector<1x256xf32> to vector<64x256xf32>
    %8 = arith.addf %5, %7 : vector<64x256xf32>
    %9 = arith.truncf %8 : vector<64x256xf32> to vector<64x256xbf16>
    %c0_6 = arith.constant 0 : index
    %c0_7 = arith.constant 0 : index
    %10 = vector.load %arg5[%c0_6, %c0_7] : memref<64x256xbf16, #tpu.memory_space<vmem>>, vector<64x256xbf16>
    tpu.vector_store %arg5[%c0_6, %c0_7], %9 {strides = array<i32>} : memref<64x256xbf16, #tpu.memory_space<vmem>>, vector<64x256xbf16>,
    return
  }
  func.func @transform_0(%arg0: i32, %arg1: i32) -> (i32, i32) {
    %c0_i32 = arith.constant 0 : i32
    %c0_i32_0 = arith.constant 0 : i32
    return %arg0, %c0_i32 : i32, i32
  }
  func.func @transform_1(%arg0: i32, %arg1: i32) -> (i32, i32) {
    %c0_i32 = arith.constant 0 : i32
    %c0_i32_0 = arith.constant 0 : i32
    return %c0_i32, %arg1 : i32, i32
  }
  func.func @transform_2(%arg0: i32, %arg1: i32) -> (i32, i32) {
    %c0_i32 = arith.constant 0 : i32
    %c0_i32_0 = arith.constant 0 : i32
    return %c0_i32, %arg1 : i32, i32
  }
  func.func @transform_3(%arg0: i32, %arg1: i32) -> (i32, i32) {
    %c0_i32 = arith.constant 0 : i32
    return %arg0, %arg1 : i32, i32
  }
}

module attributes {stable_mosaic.version = 11 : i64} {
  func.func @_ffn_kernel(%arg0: i32, %arg1: i32, %arg2: memref<32x128xf32, #tpu.memory_space<vmem>>, %arg3: memref<1x128xf32, #tpu.memory_space<vmem>>, %arg4: memref<1x128xf32, #tpu.memory_space<vmem>>, %arg5: memref<128x512xbf16, #tpu.memory_space<vmem>>, %arg6: memref<1x512xf32, #tpu.memory_space<vmem>>, %arg7: memref<512x128xbf16, #tpu.memory_space<vmem>>, %arg8: memref<1x128xf32, #tpu.memory_space<vmem>>, %arg9: memref<32x128xf32, #tpu.memory_space<vmem>>, %arg10: memref<32x128xf32, #tpu.memory_space<vmem>>, %arg11: memref<32x128xbf16, #tpu.memory_space<vmem>>, %arg12: memref<32x128xf32, #tpu.memory_space<vmem>>) attributes {dimension_semantics = [#tpu.dimension_semantics<parallel>, #tpu.dimension_semantics<arbitrary>], iteration_bounds = array<i64: 1, 1>, scalar_prefetch = 0 : i64, scratch_operands = 2 : i64, tpu.core_type = #tpu.core_type<tc>, window_params = [{transform_indices = @transform_0, window_bounds = array<i64: 32, 128>}, {pipeline_mode = #tpu.pipeline_mode<synchronous>, transform_indices = @transform_1, window_bounds = array<i64: 1, 128>}, {pipeline_mode = #tpu.pipeline_mode<synchronous>, transform_indices = @transform_2, window_bounds = array<i64: 1, 128>}, {transform_indices = @transform_3, window_bounds = array<i64: 128, 512>}, {transform_indices = @transform_4, window_bounds = array<i64: 1, 512>}, {transform_indices = @transform_5, window_bounds = array<i64: 512, 128>}, {pipeline_mode = #tpu.pipeline_mode<synchronous>, transform_indices = @transform_6, window_bounds = array<i64: 1, 128>}, {transform_indices = @transform_7, window_bounds = array<i64: 32, 128>}, {transform_indices = @transform_8, window_bounds = array<i64: 32, 128>}]} {
    %c0_i32 = arith.constant 0 : i32
    %0 = arith.cmpi eq, %arg1, %c0_i32 : i32
    %1 = arith.extui %0 : i1 to i32
    %c0_i32_0 = arith.constant 0 : i32
    %2 = arith.cmpi ne, %1, %c0_i32_0 : i32
    scf.if %2 {
      %c0_16 = arith.constant 0 : index
      %c0_17 = arith.constant 0 : index
      %20 = vector.load %arg2[%c0_16, %c0_17] : memref<32x128xf32, #tpu.memory_space<vmem>>, vector<32x128xf32>
      %cst_18 = arith.constant dense<0.000000e+00> : vector<32xf32>
      %21 = vector.multi_reduction <add>, %20, %cst_18 [1] : vector<32x128xf32> to vector<32xf32>
      %22 = vector.shape_cast %21 : vector<32xf32> to vector<32x1xf32>
      %cst_19 = arith.constant 1.280000e+02 : f32
      %23 = vector.broadcast %cst_19 : f32 to vector<32x1xf32>
      %24 = arith.divf %22, %23 : vector<32x1xf32>
      %25 = vector.broadcast %24 : vector<32x1xf32> to vector<32x128xf32>
      %26 = arith.subf %20, %25 : vector<32x128xf32>
      %27 = arith.mulf %26, %26 : vector<32x128xf32>
      %cst_20 = arith.constant dense<0.000000e+00> : vector<32xf32>
      %28 = vector.multi_reduction <add>, %27, %cst_20 [1] : vector<32x128xf32> to vector<32xf32>
      %29 = vector.shape_cast %28 : vector<32xf32> to vector<32x1xf32>
      %cst_21 = arith.constant 1.280000e+02 : f32
      %30 = vector.broadcast %cst_21 : f32 to vector<32x1xf32>
      %31 = arith.divf %29, %30 : vector<32x1xf32>
      %cst_22 = arith.constant 9.99999997E-7 : f32
      %32 = vector.broadcast %cst_22 : f32 to vector<32x1xf32>
      %33 = arith.addf %31, %32 : vector<32x1xf32>
      %34 = math.rsqrt %33 : vector<32x1xf32>
      %35 = vector.broadcast %34 : vector<32x1xf32> to vector<32x128xf32>
      %36 = arith.mulf %26, %35 : vector<32x128xf32>
      %c0_23 = arith.constant 0 : index
      %c0_24 = arith.constant 0 : index
      %37 = vector.load %arg3[%c0_23, %c0_24] : memref<1x128xf32, #tpu.memory_space<vmem>>, vector<1x128xf32>
      %38 = vector.broadcast %37 : vector<1x128xf32> to vector<32x128xf32>
      %39 = arith.mulf %36, %38 : vector<32x128xf32>
      %c0_25 = arith.constant 0 : index
      %c0_26 = arith.constant 0 : index
      %40 = vector.load %arg4[%c0_25, %c0_26] : memref<1x128xf32, #tpu.memory_space<vmem>>, vector<1x128xf32>
      %41 = vector.broadcast %40 : vector<1x128xf32> to vector<32x128xf32>
      %42 = arith.addf %39, %41 : vector<32x128xf32>
      %43 = arith.truncf %42 : vector<32x128xf32> to vector<32x128xbf16>
      %c0_27 = arith.constant 0 : index
      %c0_28 = arith.constant 0 : index
      %44 = vector.load %arg11[%c0_27, %c0_28] : memref<32x128xbf16, #tpu.memory_space<vmem>>, vector<32x128xbf16>
      tpu.vector_store %arg11[%c0_27, %c0_28], %43 {strides = array<i32>} : memref<32x128xbf16, #tpu.memory_space<vmem>>, vector<32x128xbf16>,
      %cst_29 = arith.constant 0.000000e+00 : f32
      %45 = vector.broadcast %cst_29 : f32 to vector<32x128xf32>
      %c0_30 = arith.constant 0 : index
      %c0_31 = arith.constant 0 : index
      %46 = vector.load %arg12[%c0_30, %c0_31] : memref<32x128xf32, #tpu.memory_space<vmem>>, vector<32x128xf32>
      tpu.vector_store %arg12[%c0_30, %c0_31], %45 {strides = array<i32>} : memref<32x128xf32, #tpu.memory_space<vmem>>, vector<32x128xf32>,
    } else {
    }
    %c0 = arith.constant 0 : index
    %c0_1 = arith.constant 0 : index
    %3 = vector.load %arg11[%c0, %c0_1] : memref<32x128xbf16, #tpu.memory_space<vmem>>, vector<32x128xbf16>
    %c0_2 = arith.constant 0 : index
    %c0_3 = arith.constant 0 : index
    %4 = vector.load %arg5[%c0_2, %c0_3] : memref<128x512xbf16, #tpu.memory_space<vmem>>, vector<128x512xbf16>
    %cst = arith.constant dense<0.000000e+00> : vector<32x512xf32>
    %5 = tpu.matmul %3, %4, %cst {dimension_numbers = #tpu.dot_dimension_numbers<[1], [0], [0], [1], [0, 0, 1, 1], [], []>} : vector<32x128xbf16>, vector<128x512xbf16>, vector<32x512xf32> -> vector<32x512xf32>
    %c0_4 = arith.constant 0 : index
    %c0_5 = arith.constant 0 : index
    %6 = vector.load %arg6[%c0_4, %c0_5] : memref<1x512xf32, #tpu.memory_space<vmem>>, vector<1x512xf32>
    %7 = vector.broadcast %6 : vector<1x512xf32> to vector<32x512xf32>
    %8 = arith.addf %5, %7 : vector<32x512xf32>
    %cst_6 = arith.constant 0.000000e+00 : f32
    %9 = vector.broadcast %cst_6 : f32 to vector<32x512xf32>
    %10 = arith.maximumf %8, %9 : vector<32x512xf32>
    %c0_7 = arith.constant 0 : index
    %c0_8 = arith.constant 0 : index
    %11 = vector.load %arg12[%c0_7, %c0_8] : memref<32x128xf32, #tpu.memory_space<vmem>>, vector<32x128xf32>
    %12 = arith.truncf %10 : vector<32x512xf32> to vector<32x512xbf16>
    %c0_9 = arith.constant 0 : index
    %c0_10 = arith.constant 0 : index
    %13 = vector.load %arg7[%c0_9, %c0_10] : memref<512x128xbf16, #tpu.memory_space<vmem>>, vector<512x128xbf16>
    %cst_11 = arith.constant dense<0.000000e+00> : vector<32x128xf32>
    %14 = tpu.matmul %12, %13, %cst_11 {dimension_numbers = #tpu.dot_dimension_numbers<[1], [0], [0], [1], [0, 0, 1, 1], [], []>} : vector<32x512xbf16>, vector<512x128xbf16>, vector<32x128xf32> -> vector<32x128xf32>
    %15 = arith.addf %11, %14 : vector<32x128xf32>
    %c0_12 = arith.constant 0 : index
    %c0_13 = arith.constant 0 : index
    %16 = vector.load %arg12[%c0_12, %c0_13] : memref<32x128xf32, #tpu.memory_space<vmem>>, vector<32x128xf32>
    tpu.vector_store %arg12[%c0_12, %c0_13], %15 {strides = array<i32>} : memref<32x128xf32, #tpu.memory_space<vmem>>, vector<32x128xf32>,
    %c0_i32_14 = arith.constant 0 : i32
    %17 = arith.cmpi eq, %arg1, %c0_i32_14 : i32
    %18 = arith.extui %17 : i1 to i32
    %c0_i32_15 = arith.constant 0 : i32
    %19 = arith.cmpi ne, %18, %c0_i32_15 : i32
    scf.if %19 {
      %c0_16 = arith.constant 0 : index
      %c0_17 = arith.constant 0 : index
      %20 = vector.load %arg12[%c0_16, %c0_17] : memref<32x128xf32, #tpu.memory_space<vmem>>, vector<32x128xf32>
      %c0_18 = arith.constant 0 : index
      %c0_19 = arith.constant 0 : index
      %21 = vector.load %arg8[%c0_18, %c0_19] : memref<1x128xf32, #tpu.memory_space<vmem>>, vector<1x128xf32>
      %22 = vector.broadcast %21 : vector<1x128xf32> to vector<32x128xf32>
      %23 = arith.addf %20, %22 : vector<32x128xf32>
      %c0_20 = arith.constant 0 : index
      %c0_21 = arith.constant 0 : index
      %24 = vector.load %arg9[%c0_20, %c0_21] : memref<32x128xf32, #tpu.memory_space<vmem>>, vector<32x128xf32>
      %25 = arith.addf %23, %24 : vector<32x128xf32>
      %c0_22 = arith.constant 0 : index
      %c0_23 = arith.constant 0 : index
      %26 = vector.load %arg10[%c0_22, %c0_23] : memref<32x128xf32, #tpu.memory_space<vmem>>, vector<32x128xf32>
      tpu.vector_store %arg10[%c0_22, %c0_23], %25 {strides = array<i32>} : memref<32x128xf32, #tpu.memory_space<vmem>>, vector<32x128xf32>,
    } else {
    }
    return
  }
  func.func @transform_0(%arg0: i32, %arg1: i32) -> (i32, i32) {
    %c0_i32 = arith.constant 0 : i32
    %c0_i32_0 = arith.constant 0 : i32
    return %arg0, %c0_i32 : i32, i32
  }
  func.func @transform_1(%arg0: i32, %arg1: i32) -> (i32, i32) {
    %c0_i32 = arith.constant 0 : i32
    %c0_i32_0 = arith.constant 0 : i32
    %c0_i32_1 = arith.constant 0 : i32
    return %c0_i32, %c0_i32_0 : i32, i32
  }
  func.func @transform_2(%arg0: i32, %arg1: i32) -> (i32, i32) {
    %c0_i32 = arith.constant 0 : i32
    %c0_i32_0 = arith.constant 0 : i32
    %c0_i32_1 = arith.constant 0 : i32
    return %c0_i32, %c0_i32_0 : i32, i32
  }
  func.func @transform_3(%arg0: i32, %arg1: i32) -> (i32, i32) {
    %c0_i32 = arith.constant 0 : i32
    %c0_i32_0 = arith.constant 0 : i32
    return %c0_i32, %arg1 : i32, i32
  }
  func.func @transform_4(%arg0: i32, %arg1: i32) -> (i32, i32) {
    %c0_i32 = arith.constant 0 : i32
    %c0_i32_0 = arith.constant 0 : i32
    return %c0_i32, %arg1 : i32, i32
  }
  func.func @transform_5(%arg0: i32, %arg1: i32) -> (i32, i32) {
    %c0_i32 = arith.constant 0 : i32
    %c0_i32_0 = arith.constant 0 : i32
    return %arg1, %c0_i32 : i32, i32
  }
  func.func @transform_6(%arg0: i32, %arg1: i32) -> (i32, i32) {
    %c0_i32 = arith.constant 0 : i32
    %c0_i32_0 = arith.constant 0 : i32
    %c0_i32_1 = arith.constant 0 : i32
    return %c0_i32, %c0_i32_0 : i32, i32
  }
  func.func @transform_7(%arg0: i32, %arg1: i32) -> (i32, i32) {
    %c0_i32 = arith.constant 0 : i32
    %c0_i32_0 = arith.constant 0 : i32
    return %arg0, %c0_i32 : i32, i32
  }
  func.func @transform_8(%arg0: i32, %arg1: i32) -> (i32, i32) {
    %c0_i32 = arith.constant 0 : i32
    %c0_i32_0 = arith.constant 0 : i32
    return %arg0, %c0_i32 : i32, i32
  }
}

module attributes {stable_mosaic.version = 11 : i64} {
  func.func @_mha_kernel(%arg0: i32, %arg1: i32, %arg2: i32, %arg3: memref<1x16x128xbf16, #tpu.memory_space<vmem>>, %arg4: memref<1x32x128xbf16, #tpu.memory_space<vmem>>, %arg5: memref<1x32x128xbf16, #tpu.memory_space<vmem>>, %arg6: memref<1x1x32xbf16, #tpu.memory_space<vmem>>, %arg7: memref<1x16x128xbf16, #tpu.memory_space<vmem>>, %arg8: memref<4x16x32xbf16, #tpu.memory_space<vmem>>, %arg9: memref<4x16x1xf32, #tpu.memory_space<vmem>>, %arg10: memref<4x16x1xf32, #tpu.memory_space<vmem>>, %arg11: memref<4x16x32xf32, #tpu.memory_space<vmem>>) attributes {dimension_semantics = [#tpu.dimension_semantics<parallel>, #tpu.dimension_semantics<parallel>, #tpu.dimension_semantics<arbitrary>], iteration_bounds = array<i64: 2, 1, 1>, scalar_prefetch = 0 : i64, scratch_operands = 4 : i64, tpu.core_type = #tpu.core_type<tc>, window_params = [{transform_indices = @transform_0, window_bounds = array<i64: 1, 16, 128>}, {transform_indices = @transform_1, window_bounds = array<i64: 1, 32, 128>}, {transform_indices = @transform_2, window_bounds = array<i64: 1, 32, 128>}, {transform_indices = @transform_3, window_bounds = array<i64: 1, 1, 32>}, {transform_indices = @transform_4, window_bounds = array<i64: 1, 16, 128>}]} {
    %c0_i32 = arith.constant 0 : i32
    %0 = arith.cmpi eq, %arg2, %c0_i32 : i32
    %1 = arith.extui %0 : i1 to i32
    %c0_i32_0 = arith.constant 0 : i32
    %2 = arith.cmpi ne, %1, %c0_i32_0 : i32
    scf.if %2 {
      %c0_107 = arith.constant 0 : index
      %c0_108 = arith.constant 0 : index
      %c0_109 = arith.constant 0 : index
      %169 = vector.load %arg3[%c0_107, %c0_108, %c0_109] : memref<1x16x128xbf16, #tpu.memory_space<vmem>>, vector<1x16x128xbf16>
      %170 = vector.shape_cast %169 : vector<1x16x128xbf16> to vector<16x128xbf16>
      %171 = vector.extract_strided_slice %170 {offsets = [0, 0], sizes = [16, 32], strides = [1, 1]} : vector<16x128xbf16> to vector<16x32xbf16>
      %c0_110 = arith.constant 0 : index
      %c0_111 = arith.constant 0 : index
      %c0_112 = arith.constant 0 : index
      %172 = vector.load %arg8[%c0_110, %c0_111, %c0_112] : memref<4x16x32xbf16, #tpu.memory_space<vmem>>, vector<1x16x32xbf16>
      %173 = vector.shape_cast %172 : vector<1x16x32xbf16> to vector<16x32xbf16>
      %174 = vector.shape_cast %171 : vector<16x32xbf16> to vector<1x16x32xbf16>
      tpu.vector_store %arg8[%c0_110, %c0_111, %c0_112], %174 {strides = array<i32>} : memref<4x16x32xbf16, #tpu.memory_space<vmem>>, vector<1x16x32xbf16>,
      %175 = vector.extract_strided_slice %170 {offsets = [0, 32], sizes = [16, 32], strides = [1, 1]} : vector<16x128xbf16> to vector<16x32xbf16>
      %c1_113 = arith.constant 1 : index
      %c0_114 = arith.constant 0 : index
      %c0_115 = arith.constant 0 : index
      %176 = vector.load %arg8[%c1_113, %c0_114, %c0_115] : memref<4x16x32xbf16, #tpu.memory_space<vmem>>, vector<1x16x32xbf16>
      %177 = vector.shape_cast %176 : vector<1x16x32xbf16> to vector<16x32xbf16>
      %178 = vector.shape_cast %175 : vector<16x32xbf16> to vector<1x16x32xbf16>
      tpu.vector_store %arg8[%c1_113, %c0_114, %c0_115], %178 {strides = array<i32>} : memref<4x16x32xbf16, #tpu.memory_space<vmem>>, vector<1x16x32xbf16>,
      %179 = vector.extract_strided_slice %170 {offsets = [0, 64], sizes = [16, 32], strides = [1, 1]} : vector<16x128xbf16> to vector<16x32xbf16>
      %c2_116 = arith.constant 2 : index
      %c0_117 = arith.constant 0 : index
      %c0_118 = arith.constant 0 : index
      %180 = vector.load %arg8[%c2_116, %c0_117, %c0_118] : memref<4x16x32xbf16, #tpu.memory_space<vmem>>, vector<1x16x32xbf16>
      %181 = vector.shape_cast %180 : vector<1x16x32xbf16> to vector<16x32xbf16>
      %182 = vector.shape_cast %179 : vector<16x32xbf16> to vector<1x16x32xbf16>
      tpu.vector_store %arg8[%c2_116, %c0_117, %c0_118], %182 {strides = array<i32>} : memref<4x16x32xbf16, #tpu.memory_space<vmem>>, vector<1x16x32xbf16>,
      %183 = vector.extract_strided_slice %170 {offsets = [0, 96], sizes = [16, 32], strides = [1, 1]} : vector<16x128xbf16> to vector<16x32xbf16>
      %c3_119 = arith.constant 3 : index
      %c0_120 = arith.constant 0 : index
      %c0_121 = arith.constant 0 : index
      %184 = vector.load %arg8[%c3_119, %c0_120, %c0_121] : memref<4x16x32xbf16, #tpu.memory_space<vmem>>, vector<1x16x32xbf16>
      %185 = vector.shape_cast %184 : vector<1x16x32xbf16> to vector<16x32xbf16>
      %186 = vector.shape_cast %183 : vector<16x32xbf16> to vector<1x16x32xbf16>
      tpu.vector_store %arg8[%c3_119, %c0_120, %c0_121], %186 {strides = array<i32>} : memref<4x16x32xbf16, #tpu.memory_space<vmem>>, vector<1x16x32xbf16>,
      %cst_122 = arith.constant 0xFF800000 : f32
      %187 = vector.broadcast %cst_122 : f32 to vector<4x16x1xf32>
      %c0_123 = arith.constant 0 : index
      %c0_124 = arith.constant 0 : index
      %c0_125 = arith.constant 0 : index
      %188 = vector.load %arg9[%c0_123, %c0_124, %c0_125] : memref<4x16x1xf32, #tpu.memory_space<vmem>>, vector<4x16x1xf32>
      tpu.vector_store %arg9[%c0_123, %c0_124, %c0_125], %187 {strides = array<i32>} : memref<4x16x1xf32, #tpu.memory_space<vmem>>, vector<4x16x1xf32>,
      %cst_126 = arith.constant 0.000000e+00 : f32
      %189 = vector.broadcast %cst_126 : f32 to vector<4x16x1xf32>
      %c0_127 = arith.constant 0 : index
      %c0_128 = arith.constant 0 : index
      %c0_129 = arith.constant 0 : index
      %190 = vector.load %arg10[%c0_127, %c0_128, %c0_129] : memref<4x16x1xf32, #tpu.memory_space<vmem>>, vector<4x16x1xf32>
      tpu.vector_store %arg10[%c0_127, %c0_128, %c0_129], %189 {strides = array<i32>} : memref<4x16x1xf32, #tpu.memory_space<vmem>>, vector<4x16x1xf32>,
      %cst_130 = arith.constant 0.000000e+00 : f32
      %191 = vector.broadcast %cst_130 : f32 to vector<4x16x32xf32>
      %c0_131 = arith.constant 0 : index
      %c0_132 = arith.constant 0 : index
      %c0_133 = arith.constant 0 : index
      %192 = vector.load %arg11[%c0_131, %c0_132, %c0_133] : memref<4x16x32xf32, #tpu.memory_space<vmem>>, vector<4x16x32xf32>
      tpu.vector_store %arg11[%c0_131, %c0_132, %c0_133], %191 {strides = array<i32>} : memref<4x16x32xf32, #tpu.memory_space<vmem>>, vector<4x16x32xf32>,
    } else {
    }
    %c0 = arith.constant 0 : index
    %c0_1 = arith.constant 0 : index
    %c0_2 = arith.constant 0 : index
    %3 = vector.load %arg4[%c0, %c0_1, %c0_2] : memref<1x32x128xbf16, #tpu.memory_space<vmem>>, vector<1x32x128xbf16>
    %4 = vector.shape_cast %3 : vector<1x32x128xbf16> to vector<32x128xbf16>
    %c0_3 = arith.constant 0 : index
    %c0_4 = arith.constant 0 : index
    %c0_5 = arith.constant 0 : index
    %5 = vector.load %arg5[%c0_3, %c0_4, %c0_5] : memref<1x32x128xbf16, #tpu.memory_space<vmem>>, vector<1x32x128xbf16>
    %6 = vector.shape_cast %5 : vector<1x32x128xbf16> to vector<32x128xbf16>
    %c0_6 = arith.constant 0 : index
    %c0_7 = arith.constant 0 : index
    %c0_8 = arith.constant 0 : index
    %7 = vector.load %arg6[%c0_6, %c0_7, %c0_8] : memref<1x1x32xbf16, #tpu.memory_space<vmem>>, vector<1x1x32xbf16>
    %8 = vector.shape_cast %7 : vector<1x1x32xbf16> to vector<1x32xbf16>
    %9 = arith.extf %8 : vector<1x32xbf16> to vector<1x32xf32>
    %c0_9 = arith.constant 0 : index
    %c0_10 = arith.constant 0 : index
    %c0_11 = arith.constant 0 : index
    %10 = vector.load %arg8[%c0_9, %c0_10, %c0_11] : memref<4x16x32xbf16, #tpu.memory_space<vmem>>, vector<1x16x32xbf16>
    %11 = vector.shape_cast %10 : vector<1x16x32xbf16> to vector<16x32xbf16>
    %12 = vector.extract_strided_slice %4 {offsets = [0, 0], sizes = [32, 32], strides = [1, 1]} : vector<32x128xbf16> to vector<32x32xbf16>
    %cst = arith.constant dense<0.000000e+00> : vector<16x32xf32>
    %13 = tpu.matmul %11, %12, %cst {dimension_numbers = #tpu.dot_dimension_numbers<[1], [1], [0], [0], [0, 0, 1, 0], [], []>} : vector<16x32xbf16>, vector<32x32xbf16>, vector<16x32xf32> -> vector<16x32xf32>
    %14 = vector.broadcast %9 : vector<1x32xf32> to vector<16x32xf32>
    %15 = arith.addf %13, %14 : vector<16x32xf32>
    %c0_12 = arith.constant 0 : index
    %c0_13 = arith.constant 0 : index
    %c0_14 = arith.constant 0 : index
    %16 = vector.load %arg9[%c0_12, %c0_13, %c0_14] : memref<4x16x1xf32, #tpu.memory_space<vmem>>, vector<1x16x1xf32>
    %17 = vector.shape_cast %16 : vector<1x16x1xf32> to vector<16x1xf32>
    %cst_15 = arith.constant dense<0xFF800000> : vector<16xf32>
    %18 = vector.multi_reduction <maximumf>, %15, %cst_15 [1] : vector<16x32xf32> to vector<16xf32>
    %19 = vector.shape_cast %18 : vector<16xf32> to vector<16x1xf32>
    %20 = arith.maximumf %17, %19 : vector<16x1xf32>
    %21 = arith.subf %17, %20 : vector<16x1xf32>
    %22 = math.exp %21 : vector<16x1xf32>
    %23 = vector.broadcast %20 : vector<16x1xf32> to vector<16x32xf32>
    %24 = arith.subf %15, %23 : vector<16x32xf32>
    %25 = math.exp %24 : vector<16x32xf32>
    %c0_16 = arith.constant 0 : index
    %c0_17 = arith.constant 0 : index
    %c0_18 = arith.constant 0 : index
    %26 = vector.load %arg10[%c0_16, %c0_17, %c0_18] : memref<4x16x1xf32, #tpu.memory_space<vmem>>, vector<1x16x1xf32>
    %27 = vector.shape_cast %26 : vector<1x16x1xf32> to vector<16x1xf32>
    %28 = arith.mulf %22, %27 : vector<16x1xf32>
    %cst_19 = arith.constant dense<0.000000e+00> : vector<16xf32>
    %29 = vector.multi_reduction <add>, %25, %cst_19 [1] : vector<16x32xf32> to vector<16xf32>
    %30 = vector.shape_cast %29 : vector<16xf32> to vector<16x1xf32>
    %31 = arith.addf %28, %30 : vector<16x1xf32>
    %c0_20 = arith.constant 0 : index
    %c0_21 = arith.constant 0 : index
    %c0_22 = arith.constant 0 : index
    %32 = vector.load %arg10[%c0_20, %c0_21, %c0_22] : memref<4x16x1xf32, #tpu.memory_space<vmem>>, vector<1x16x1xf32>
    %33 = vector.shape_cast %32 : vector<1x16x1xf32> to vector<16x1xf32>
    %34 = vector.shape_cast %31 : vector<16x1xf32> to vector<1x16x1xf32>
    tpu.vector_store %arg10[%c0_20, %c0_21, %c0_22], %34 {strides = array<i32>} : memref<4x16x1xf32, #tpu.memory_space<vmem>>, vector<1x16x1xf32>,
    %c0_23 = arith.constant 0 : index
    %c0_24 = arith.constant 0 : index
    %c0_25 = arith.constant 0 : index
    %35 = vector.load %arg11[%c0_23, %c0_24, %c0_25] : memref<4x16x32xf32, #tpu.memory_space<vmem>>, vector<1x16x32xf32>
    %36 = vector.shape_cast %35 : vector<1x16x32xf32> to vector<16x32xf32>
    %37 = vector.broadcast %22 : vector<16x1xf32> to vector<16x32xf32>
    %38 = arith.mulf %37, %36 : vector<16x32xf32>
    %39 = arith.truncf %25 : vector<16x32xf32> to vector<16x32xbf16>
    %40 = vector.extract_strided_slice %6 {offsets = [0, 0], sizes = [32, 32], strides = [1, 1]} : vector<32x128xbf16> to vector<32x32xbf16>
    %cst_26 = arith.constant dense<0.000000e+00> : vector<16x32xf32>
    %41 = tpu.matmul %39, %40, %cst_26 {dimension_numbers = #tpu.dot_dimension_numbers<[1], [0], [0], [1], [0, 0, 1, 1], [], []>} : vector<16x32xbf16>, vector<32x32xbf16>, vector<16x32xf32> -> vector<16x32xf32>
    %42 = arith.addf %38, %41 : vector<16x32xf32>
    %c0_27 = arith.constant 0 : index
    %c0_28 = arith.constant 0 : index
    %c0_29 = arith.constant 0 : index
    %43 = vector.load %arg11[%c0_27, %c0_28, %c0_29] : memref<4x16x32xf32, #tpu.memory_space<vmem>>, vector<1x16x32xf32>
    %44 = vector.shape_cast %43 : vector<1x16x32xf32> to vector<16x32xf32>
    %45 = vector.shape_cast %42 : vector<16x32xf32> to vector<1x16x32xf32>
    tpu.vector_store %arg11[%c0_27, %c0_28, %c0_29], %45 {strides = array<i32>} : memref<4x16x32xf32, #tpu.memory_space<vmem>>, vector<1x16x32xf32>,
    %c0_30 = arith.constant 0 : index
    %c0_31 = arith.constant 0 : index
    %c0_32 = arith.constant 0 : index
    %46 = vector.load %arg9[%c0_30, %c0_31, %c0_32] : memref<4x16x1xf32, #tpu.memory_space<vmem>>, vector<1x16x1xf32>
    %47 = vector.shape_cast %46 : vector<1x16x1xf32> to vector<16x1xf32>
    %48 = vector.shape_cast %20 : vector<16x1xf32> to vector<1x16x1xf32>
    tpu.vector_store %arg9[%c0_30, %c0_31, %c0_32], %48 {strides = array<i32>} : memref<4x16x1xf32, #tpu.memory_space<vmem>>, vector<1x16x1xf32>,
    %c1 = arith.constant 1 : index
    %c0_33 = arith.constant 0 : index
    %c0_34 = arith.constant 0 : index
    %49 = vector.load %arg8[%c1, %c0_33, %c0_34] : memref<4x16x32xbf16, #tpu.memory_space<vmem>>, vector<1x16x32xbf16>
    %50 = vector.shape_cast %49 : vector<1x16x32xbf16> to vector<16x32xbf16>
    %51 = vector.extract_strided_slice %4 {offsets = [0, 32], sizes = [32, 32], strides = [1, 1]} : vector<32x128xbf16> to vector<32x32xbf16>
    %cst_35 = arith.constant dense<0.000000e+00> : vector<16x32xf32>
    %52 = tpu.matmul %50, %51, %cst_35 {dimension_numbers = #tpu.dot_dimension_numbers<[1], [1], [0], [0], [0, 0, 1, 0], [], []>} : vector<16x32xbf16>, vector<32x32xbf16>, vector<16x32xf32> -> vector<16x32xf32>
    %53 = vector.broadcast %9 : vector<1x32xf32> to vector<16x32xf32>
    %54 = arith.addf %52, %53 : vector<16x32xf32>
    %c1_36 = arith.constant 1 : index
    %c0_37 = arith.constant 0 : index
    %c0_38 = arith.constant 0 : index
    %55 = vector.load %arg9[%c1_36, %c0_37, %c0_38] : memref<4x16x1xf32, #tpu.memory_space<vmem>>, vector<1x16x1xf32>
    %56 = vector.shape_cast %55 : vector<1x16x1xf32> to vector<16x1xf32>
    %cst_39 = arith.constant dense<0xFF800000> : vector<16xf32>
    %57 = vector.multi_reduction <maximumf>, %54, %cst_39 [1] : vector<16x32xf32> to vector<16xf32>
    %58 = vector.shape_cast %57 : vector<16xf32> to vector<16x1xf32>
    %59 = arith.maximumf %56, %58 : vector<16x1xf32>
    %60 = arith.subf %56, %59 : vector<16x1xf32>
    %61 = math.exp %60 : vector<16x1xf32>
    %62 = vector.broadcast %59 : vector<16x1xf32> to vector<16x32xf32>
    %63 = arith.subf %54, %62 : vector<16x32xf32>
    %64 = math.exp %63 : vector<16x32xf32>
    %c1_40 = arith.constant 1 : index
    %c0_41 = arith.constant 0 : index
    %c0_42 = arith.constant 0 : index
    %65 = vector.load %arg10[%c1_40, %c0_41, %c0_42] : memref<4x16x1xf32, #tpu.memory_space<vmem>>, vector<1x16x1xf32>
    %66 = vector.shape_cast %65 : vector<1x16x1xf32> to vector<16x1xf32>
    %67 = arith.mulf %61, %66 : vector<16x1xf32>
    %cst_43 = arith.constant dense<0.000000e+00> : vector<16xf32>
    %68 = vector.multi_reduction <add>, %64, %cst_43 [1] : vector<16x32xf32> to vector<16xf32>
    %69 = vector.shape_cast %68 : vector<16xf32> to vector<16x1xf32>
    %70 = arith.addf %67, %69 : vector<16x1xf32>
    %c1_44 = arith.constant 1 : index
    %c0_45 = arith.constant 0 : index
    %c0_46 = arith.constant 0 : index
    %71 = vector.load %arg10[%c1_44, %c0_45, %c0_46] : memref<4x16x1xf32, #tpu.memory_space<vmem>>, vector<1x16x1xf32>
    %72 = vector.shape_cast %71 : vector<1x16x1xf32> to vector<16x1xf32>
    %73 = vector.shape_cast %70 : vector<16x1xf32> to vector<1x16x1xf32>
    tpu.vector_store %arg10[%c1_44, %c0_45, %c0_46], %73 {strides = array<i32>} : memref<4x16x1xf32, #tpu.memory_space<vmem>>, vector<1x16x1xf32>,
    %c1_47 = arith.constant 1 : index
    %c0_48 = arith.constant 0 : index
    %c0_49 = arith.constant 0 : index
    %74 = vector.load %arg11[%c1_47, %c0_48, %c0_49] : memref<4x16x32xf32, #tpu.memory_space<vmem>>, vector<1x16x32xf32>
    %75 = vector.shape_cast %74 : vector<1x16x32xf32> to vector<16x32xf32>
    %76 = vector.broadcast %61 : vector<16x1xf32> to vector<16x32xf32>
    %77 = arith.mulf %76, %75 : vector<16x32xf32>
    %78 = arith.truncf %64 : vector<16x32xf32> to vector<16x32xbf16>
    %79 = vector.extract_strided_slice %6 {offsets = [0, 32], sizes = [32, 32], strides = [1, 1]} : vector<32x128xbf16> to vector<32x32xbf16>
    %cst_50 = arith.constant dense<0.000000e+00> : vector<16x32xf32>
    %80 = tpu.matmul %78, %79, %cst_50 {dimension_numbers = #tpu.dot_dimension_numbers<[1], [0], [0], [1], [0, 0, 1, 1], [], []>} : vector<16x32xbf16>, vector<32x32xbf16>, vector<16x32xf32> -> vector<16x32xf32>
    %81 = arith.addf %77, %80 : vector<16x32xf32>
    %c1_51 = arith.constant 1 : index
    %c0_52 = arith.constant 0 : index
    %c0_53 = arith.constant 0 : index
    %82 = vector.load %arg11[%c1_51, %c0_52, %c0_53] : memref<4x16x32xf32, #tpu.memory_space<vmem>>, vector<1x16x32xf32>
    %83 = vector.shape_cast %82 : vector<1x16x32xf32> to vector<16x32xf32>
    %84 = vector.shape_cast %81 : vector<16x32xf32> to vector<1x16x32xf32>
    tpu.vector_store %arg11[%c1_51, %c0_52, %c0_53], %84 {strides = array<i32>} : memref<4x16x32xf32, #tpu.memory_space<vmem>>, vector<1x16x32xf32>,
    %c1_54 = arith.constant 1 : index
    %c0_55 = arith.constant 0 : index
    %c0_56 = arith.constant 0 : index
    %85 = vector.load %arg9[%c1_54, %c0_55, %c0_56] : memref<4x16x1xf32, #tpu.memory_space<vmem>>, vector<1x16x1xf32>
    %86 = vector.shape_cast %85 : vector<1x16x1xf32> to vector<16x1xf32>
    %87 = vector.shape_cast %59 : vector<16x1xf32> to vector<1x16x1xf32>
    tpu.vector_store %arg9[%c1_54, %c0_55, %c0_56], %87 {strides = array<i32>} : memref<4x16x1xf32, #tpu.memory_space<vmem>>, vector<1x16x1xf32>,
    %c2 = arith.constant 2 : index
    %c0_57 = arith.constant 0 : index
    %c0_58 = arith.constant 0 : index
    %88 = vector.load %arg8[%c2, %c0_57, %c0_58] : memref<4x16x32xbf16, #tpu.memory_space<vmem>>, vector<1x16x32xbf16>
    %89 = vector.shape_cast %88 : vector<1x16x32xbf16> to vector<16x32xbf16>
    %90 = vector.extract_strided_slice %4 {offsets = [0, 64], sizes = [32, 32], strides = [1, 1]} : vector<32x128xbf16> to vector<32x32xbf16>
    %cst_59 = arith.constant dense<0.000000e+00> : vector<16x32xf32>
    %91 = tpu.matmul %89, %90, %cst_59 {dimension_numbers = #tpu.dot_dimension_numbers<[1], [1], [0], [0], [0, 0, 1, 0], [], []>} : vector<16x32xbf16>, vector<32x32xbf16>, vector<16x32xf32> -> vector<16x32xf32>
    %92 = vector.broadcast %9 : vector<1x32xf32> to vector<16x32xf32>
    %93 = arith.addf %91, %92 : vector<16x32xf32>
    %c2_60 = arith.constant 2 : index
    %c0_61 = arith.constant 0 : index
    %c0_62 = arith.constant 0 : index
    %94 = vector.load %arg9[%c2_60, %c0_61, %c0_62] : memref<4x16x1xf32, #tpu.memory_space<vmem>>, vector<1x16x1xf32>
    %95 = vector.shape_cast %94 : vector<1x16x1xf32> to vector<16x1xf32>
    %cst_63 = arith.constant dense<0xFF800000> : vector<16xf32>
    %96 = vector.multi_reduction <maximumf>, %93, %cst_63 [1] : vector<16x32xf32> to vector<16xf32>
    %97 = vector.shape_cast %96 : vector<16xf32> to vector<16x1xf32>
    %98 = arith.maximumf %95, %97 : vector<16x1xf32>
    %99 = arith.subf %95, %98 : vector<16x1xf32>
    %100 = math.exp %99 : vector<16x1xf32>
    %101 = vector.broadcast %98 : vector<16x1xf32> to vector<16x32xf32>
    %102 = arith.subf %93, %101 : vector<16x32xf32>
    %103 = math.exp %102 : vector<16x32xf32>
    %c2_64 = arith.constant 2 : index
    %c0_65 = arith.constant 0 : index
    %c0_66 = arith.constant 0 : index
    %104 = vector.load %arg10[%c2_64, %c0_65, %c0_66] : memref<4x16x1xf32, #tpu.memory_space<vmem>>, vector<1x16x1xf32>
    %105 = vector.shape_cast %104 : vector<1x16x1xf32> to vector<16x1xf32>
    %106 = arith.mulf %100, %105 : vector<16x1xf32>
    %cst_67 = arith.constant dense<0.000000e+00> : vector<16xf32>
    %107 = vector.multi_reduction <add>, %103, %cst_67 [1] : vector<16x32xf32> to vector<16xf32>
    %108 = vector.shape_cast %107 : vector<16xf32> to vector<16x1xf32>
    %109 = arith.addf %106, %108 : vector<16x1xf32>
    %c2_68 = arith.constant 2 : index
    %c0_69 = arith.constant 0 : index
    %c0_70 = arith.constant 0 : index
    %110 = vector.load %arg10[%c2_68, %c0_69, %c0_70] : memref<4x16x1xf32, #tpu.memory_space<vmem>>, vector<1x16x1xf32>
    %111 = vector.shape_cast %110 : vector<1x16x1xf32> to vector<16x1xf32>
    %112 = vector.shape_cast %109 : vector<16x1xf32> to vector<1x16x1xf32>
    tpu.vector_store %arg10[%c2_68, %c0_69, %c0_70], %112 {strides = array<i32>} : memref<4x16x1xf32, #tpu.memory_space<vmem>>, vector<1x16x1xf32>,
    %c2_71 = arith.constant 2 : index
    %c0_72 = arith.constant 0 : index
    %c0_73 = arith.constant 0 : index
    %113 = vector.load %arg11[%c2_71, %c0_72, %c0_73] : memref<4x16x32xf32, #tpu.memory_space<vmem>>, vector<1x16x32xf32>
    %114 = vector.shape_cast %113 : vector<1x16x32xf32> to vector<16x32xf32>
    %115 = vector.broadcast %100 : vector<16x1xf32> to vector<16x32xf32>
    %116 = arith.mulf %115, %114 : vector<16x32xf32>
    %117 = arith.truncf %103 : vector<16x32xf32> to vector<16x32xbf16>
    %118 = vector.extract_strided_slice %6 {offsets = [0, 64], sizes = [32, 32], strides = [1, 1]} : vector<32x128xbf16> to vector<32x32xbf16>
    %cst_74 = arith.constant dense<0.000000e+00> : vector<16x32xf32>
    %119 = tpu.matmul %117, %118, %cst_74 {dimension_numbers = #tpu.dot_dimension_numbers<[1], [0], [0], [1], [0, 0, 1, 1], [], []>} : vector<16x32xbf16>, vector<32x32xbf16>, vector<16x32xf32> -> vector<16x32xf32>
    %120 = arith.addf %116, %119 : vector<16x32xf32>
    %c2_75 = arith.constant 2 : index
    %c0_76 = arith.constant 0 : index
    %c0_77 = arith.constant 0 : index
    %121 = vector.load %arg11[%c2_75, %c0_76, %c0_77] : memref<4x16x32xf32, #tpu.memory_space<vmem>>, vector<1x16x32xf32>
    %122 = vector.shape_cast %121 : vector<1x16x32xf32> to vector<16x32xf32>
    %123 = vector.shape_cast %120 : vector<16x32xf32> to vector<1x16x32xf32>
    tpu.vector_store %arg11[%c2_75, %c0_76, %c0_77], %123 {strides = array<i32>} : memref<4x16x32xf32, #tpu.memory_space<vmem>>, vector<1x16x32xf32>,
    %c2_78 = arith.constant 2 : index
    %c0_79 = arith.constant 0 : index
    %c0_80 = arith.constant 0 : index
    %124 = vector.load %arg9[%c2_78, %c0_79, %c0_80] : memref<4x16x1xf32, #tpu.memory_space<vmem>>, vector<1x16x1xf32>
    %125 = vector.shape_cast %124 : vector<1x16x1xf32> to vector<16x1xf32>
    %126 = vector.shape_cast %98 : vector<16x1xf32> to vector<1x16x1xf32>
    tpu.vector_store %arg9[%c2_78, %c0_79, %c0_80], %126 {strides = array<i32>} : memref<4x16x1xf32, #tpu.memory_space<vmem>>, vector<1x16x1xf32>,
    %c3 = arith.constant 3 : index
    %c0_81 = arith.constant 0 : index
    %c0_82 = arith.constant 0 : index
    %127 = vector.load %arg8[%c3, %c0_81, %c0_82] : memref<4x16x32xbf16, #tpu.memory_space<vmem>>, vector<1x16x32xbf16>
    %128 = vector.shape_cast %127 : vector<1x16x32xbf16> to vector<16x32xbf16>
    %129 = vector.extract_strided_slice %4 {offsets = [0, 96], sizes = [32, 32], strides = [1, 1]} : vector<32x128xbf16> to vector<32x32xbf16>
    %cst_83 = arith.constant dense<0.000000e+00> : vector<16x32xf32>
    %130 = tpu.matmul %128, %129, %cst_83 {dimension_numbers = #tpu.dot_dimension_numbers<[1], [1], [0], [0], [0, 0, 1, 0], [], []>} : vector<16x32xbf16>, vector<32x32xbf16>, vector<16x32xf32> -> vector<16x32xf32>
    %131 = vector.broadcast %9 : vector<1x32xf32> to vector<16x32xf32>
    %132 = arith.addf %130, %131 : vector<16x32xf32>
    %c3_84 = arith.constant 3 : index
    %c0_85 = arith.constant 0 : index
    %c0_86 = arith.constant 0 : index
    %133 = vector.load %arg9[%c3_84, %c0_85, %c0_86] : memref<4x16x1xf32, #tpu.memory_space<vmem>>, vector<1x16x1xf32>
    %134 = vector.shape_cast %133 : vector<1x16x1xf32> to vector<16x1xf32>
    %cst_87 = arith.constant dense<0xFF800000> : vector<16xf32>
    %135 = vector.multi_reduction <maximumf>, %132, %cst_87 [1] : vector<16x32xf32> to vector<16xf32>
    %136 = vector.shape_cast %135 : vector<16xf32> to vector<16x1xf32>
    %137 = arith.maximumf %134, %136 : vector<16x1xf32>
    %138 = arith.subf %134, %137 : vector<16x1xf32>
    %139 = math.exp %138 : vector<16x1xf32>
    %140 = vector.broadcast %137 : vector<16x1xf32> to vector<16x32xf32>
    %141 = arith.subf %132, %140 : vector<16x32xf32>
    %142 = math.exp %141 : vector<16x32xf32>
    %c3_88 = arith.constant 3 : index
    %c0_89 = arith.constant 0 : index
    %c0_90 = arith.constant 0 : index
    %143 = vector.load %arg10[%c3_88, %c0_89, %c0_90] : memref<4x16x1xf32, #tpu.memory_space<vmem>>, vector<1x16x1xf32>
    %144 = vector.shape_cast %143 : vector<1x16x1xf32> to vector<16x1xf32>
    %145 = arith.mulf %139, %144 : vector<16x1xf32>
    %cst_91 = arith.constant dense<0.000000e+00> : vector<16xf32>
    %146 = vector.multi_reduction <add>, %142, %cst_91 [1] : vector<16x32xf32> to vector<16xf32>
    %147 = vector.shape_cast %146 : vector<16xf32> to vector<16x1xf32>
    %148 = arith.addf %145, %147 : vector<16x1xf32>
    %c3_92 = arith.constant 3 : index
    %c0_93 = arith.constant 0 : index
    %c0_94 = arith.constant 0 : index
    %149 = vector.load %arg10[%c3_92, %c0_93, %c0_94] : memref<4x16x1xf32, #tpu.memory_space<vmem>>, vector<1x16x1xf32>
    %150 = vector.shape_cast %149 : vector<1x16x1xf32> to vector<16x1xf32>
    %151 = vector.shape_cast %148 : vector<16x1xf32> to vector<1x16x1xf32>
    tpu.vector_store %arg10[%c3_92, %c0_93, %c0_94], %151 {strides = array<i32>} : memref<4x16x1xf32, #tpu.memory_space<vmem>>, vector<1x16x1xf32>,
    %c3_95 = arith.constant 3 : index
    %c0_96 = arith.constant 0 : index
    %c0_97 = arith.constant 0 : index
    %152 = vector.load %arg11[%c3_95, %c0_96, %c0_97] : memref<4x16x32xf32, #tpu.memory_space<vmem>>, vector<1x16x32xf32>
    %153 = vector.shape_cast %152 : vector<1x16x32xf32> to vector<16x32xf32>
    %154 = vector.broadcast %139 : vector<16x1xf32> to vector<16x32xf32>
    %155 = arith.mulf %154, %153 : vector<16x32xf32>
    %156 = arith.truncf %142 : vector<16x32xf32> to vector<16x32xbf16>
    %157 = vector.extract_strided_slice %6 {offsets = [0, 96], sizes = [32, 32], strides = [1, 1]} : vector<32x128xbf16> to vector<32x32xbf16>
    %cst_98 = arith.constant dense<0.000000e+00> : vector<16x32xf32>
    %158 = tpu.matmul %156, %157, %cst_98 {dimension_numbers = #tpu.dot_dimension_numbers<[1], [0], [0], [1], [0, 0, 1, 1], [], []>} : vector<16x32xbf16>, vector<32x32xbf16>, vector<16x32xf32> -> vector<16x32xf32>
    %159 = arith.addf %155, %158 : vector<16x32xf32>
    %c3_99 = arith.constant 3 : index
    %c0_100 = arith.constant 0 : index
    %c0_101 = arith.constant 0 : index
    %160 = vector.load %arg11[%c3_99, %c0_100, %c0_101] : memref<4x16x32xf32, #tpu.memory_space<vmem>>, vector<1x16x32xf32>
    %161 = vector.shape_cast %160 : vector<1x16x32xf32> to vector<16x32xf32>
    %162 = vector.shape_cast %159 : vector<16x32xf32> to vector<1x16x32xf32>
    tpu.vector_store %arg11[%c3_99, %c0_100, %c0_101], %162 {strides = array<i32>} : memref<4x16x32xf32, #tpu.memory_space<vmem>>, vector<1x16x32xf32>,
    %c3_102 = arith.constant 3 : index
    %c0_103 = arith.constant 0 : index
    %c0_104 = arith.constant 0 : index
    %163 = vector.load %arg9[%c3_102, %c0_103, %c0_104] : memref<4x16x1xf32, #tpu.memory_space<vmem>>, vector<1x16x1xf32>
    %164 = vector.shape_cast %163 : vector<1x16x1xf32> to vector<16x1xf32>
    %165 = vector.shape_cast %137 : vector<16x1xf32> to vector<1x16x1xf32>
    tpu.vector_store %arg9[%c3_102, %c0_103, %c0_104], %165 {strides = array<i32>} : memref<4x16x1xf32, #tpu.memory_space<vmem>>, vector<1x16x1xf32>,
    %c0_i32_105 = arith.constant 0 : i32
    %166 = arith.cmpi eq, %arg2, %c0_i32_105 : i32
    %167 = arith.extui %166 : i1 to i32
    %c0_i32_106 = arith.constant 0 : i32
    %168 = arith.cmpi ne, %167, %c0_i32_106 : i32
    scf.if %168 {
      %c0_107 = arith.constant 0 : index
      %c0_108 = arith.constant 0 : index
      %c0_109 = arith.constant 0 : index
      %169 = vector.load %arg11[%c0_107, %c0_108, %c0_109] : memref<4x16x32xf32, #tpu.memory_space<vmem>>, vector<1x16x32xf32>
      %170 = vector.shape_cast %169 : vector<1x16x32xf32> to vector<16x32xf32>
      %c0_110 = arith.constant 0 : index
      %c0_111 = arith.constant 0 : index
      %c0_112 = arith.constant 0 : index
      %171 = vector.load %arg10[%c0_110, %c0_111, %c0_112] : memref<4x16x1xf32, #tpu.memory_space<vmem>>, vector<1x16x1xf32>
      %172 = vector.shape_cast %171 : vector<1x16x1xf32> to vector<16x1xf32>
      %173 = tpu.reciprocal %172 {approx = true} : vector<16x1xf32> -> vector<16x1xf32>
      %174 = vector.broadcast %173 : vector<16x1xf32> to vector<16x32xf32>
      %175 = arith.mulf %170, %174 : vector<16x32xf32>
      %c1_113 = arith.constant 1 : index
      %c0_114 = arith.constant 0 : index
      %c0_115 = arith.constant 0 : index
      %176 = vector.load %arg11[%c1_113, %c0_114, %c0_115] : memref<4x16x32xf32, #tpu.memory_space<vmem>>, vector<1x16x32xf32>
      %177 = vector.shape_cast %176 : vector<1x16x32xf32> to vector<16x32xf32>
      %c1_116 = arith.constant 1 : index
      %c0_117 = arith.constant 0 : index
      %c0_118 = arith.constant 0 : index
      %178 = vector.load %arg10[%c1_116, %c0_117, %c0_118] : memref<4x16x1xf32, #tpu.memory_space<vmem>>, vector<1x16x1xf32>
      %179 = vector.shape_cast %178 : vector<1x16x1xf32> to vector<16x1xf32>
      %180 = tpu.reciprocal %179 {approx = true} : vector<16x1xf32> -> vector<16x1xf32>
      %181 = vector.broadcast %180 : vector<16x1xf32> to vector<16x32xf32>
      %182 = arith.mulf %177, %181 : vector<16x32xf32>
      %c2_119 = arith.constant 2 : index
      %c0_120 = arith.constant 0 : index
      %c0_121 = arith.constant 0 : index
      %183 = vector.load %arg11[%c2_119, %c0_120, %c0_121] : memref<4x16x32xf32, #tpu.memory_space<vmem>>, vector<1x16x32xf32>
      %184 = vector.shape_cast %183 : vector<1x16x32xf32> to vector<16x32xf32>
      %c2_122 = arith.constant 2 : index
      %c0_123 = arith.constant 0 : index
      %c0_124 = arith.constant 0 : index
      %185 = vector.load %arg10[%c2_122, %c0_123, %c0_124] : memref<4x16x1xf32, #tpu.memory_space<vmem>>, vector<1x16x1xf32>
      %186 = vector.shape_cast %185 : vector<1x16x1xf32> to vector<16x1xf32>
      %187 = tpu.reciprocal %186 {approx = true} : vector<16x1xf32> -> vector<16x1xf32>
      %188 = vector.broadcast %187 : vector<16x1xf32> to vector<16x32xf32>
      %189 = arith.mulf %184, %188 : vector<16x32xf32>
      %c3_125 = arith.constant 3 : index
      %c0_126 = arith.constant 0 : index
      %c0_127 = arith.constant 0 : index
      %190 = vector.load %arg11[%c3_125, %c0_126, %c0_127] : memref<4x16x32xf32, #tpu.memory_space<vmem>>, vector<1x16x32xf32>
      %191 = vector.shape_cast %190 : vector<1x16x32xf32> to vector<16x32xf32>
      %c3_128 = arith.constant 3 : index
      %c0_129 = arith.constant 0 : index
      %c0_130 = arith.constant 0 : index
      %192 = vector.load %arg10[%c3_128, %c0_129, %c0_130] : memref<4x16x1xf32, #tpu.memory_space<vmem>>, vector<1x16x1xf32>
      %193 = vector.shape_cast %192 : vector<1x16x1xf32> to vector<16x1xf32>
      %194 = tpu.reciprocal %193 {approx = true} : vector<16x1xf32> -> vector<16x1xf32>
      %195 = vector.broadcast %194 : vector<16x1xf32> to vector<16x32xf32>
      %196 = arith.mulf %191, %195 : vector<16x32xf32>
      %197 = tpu.concatenate %175, %182, %189, %196 in 1 : vector<16x32xf32>, vector<16x32xf32>, vector<16x32xf32>, vector<16x32xf32> -> vector<16x128xf32>
      %198 = arith.truncf %197 : vector<16x128xf32> to vector<16x128xbf16>
      %c0_131 = arith.constant 0 : index
      %c0_132 = arith.constant 0 : index
      %c0_133 = arith.constant 0 : index
      %199 = vector.load %arg7[%c0_131, %c0_132, %c0_133] : memref<1x16x128xbf16, #tpu.memory_space<vmem>>, vector<1x16x128xbf16>
      %200 = vector.shape_cast %199 : vector<1x16x128xbf16> to vector<16x128xbf16>
      %201 = vector.shape_cast %198 : vector<16x128xbf16> to vector<1x16x128xbf16>
      tpu.vector_store %arg7[%c0_131, %c0_132, %c0_133], %201 {strides = array<i32>} : memref<1x16x128xbf16, #tpu.memory_space<vmem>>, vector<1x16x128xbf16>,
    } else {
    }
    return
  }
  func.func @transform_0(%arg0: i32, %arg1: i32, %arg2: i32) -> (i32, i32, i32) {
    %c0_i32 = arith.constant 0 : i32
    %c0_i32_0 = arith.constant 0 : i32
    return %arg0, %arg1, %c0_i32 : i32, i32, i32
  }
  func.func @transform_1(%arg0: i32, %arg1: i32, %arg2: i32) -> (i32, i32, i32) {
    %c0_i32 = arith.constant 0 : i32
    %c0_i32_0 = arith.constant 0 : i32
    return %arg0, %arg2, %c0_i32 : i32, i32, i32
  }
  func.func @transform_2(%arg0: i32, %arg1: i32, %arg2: i32) -> (i32, i32, i32) {
    %c1_i32 = arith.constant 1 : i32
    %c0_i32 = arith.constant 0 : i32
    return %arg0, %arg2, %c1_i32 : i32, i32, i32
  }
  func.func @transform_3(%arg0: i32, %arg1: i32, %arg2: i32) -> (i32, i32, i32) {
    %c0_i32 = arith.constant 0 : i32
    %c0_i32_0 = arith.constant 0 : i32
    return %arg0, %c0_i32, %arg2 : i32, i32, i32
  }
  func.func @transform_4(%arg0: i32, %arg1: i32, %arg2: i32) -> (i32, i32, i32) {
    %c0_i32 = arith.constant 0 : i32
    %c0_i32_0 = arith.constant 0 : i32
    return %arg0, %arg1, %c0_i32 : i32, i32, i32
  }
}

module attributes {stable_mosaic.version = 11 : i64} {
  func.func @_linear_kernel(%arg0: i32, %arg1: i32, %arg2: memref<32x128xf32, #tpu.memory_space<vmem>>, %arg3: memref<1x128xf32, #tpu.memory_space<vmem>>, %arg4: memref<1x128xf32, #tpu.memory_space<vmem>>, %arg5: memref<128x384xbf16, #tpu.memory_space<vmem>>, %arg6: memref<1x384xf32, #tpu.memory_space<vmem>>, %arg7: memref<32x384xbf16, #tpu.memory_space<vmem>>, %arg8: memref<32x128xbf16, #tpu.memory_space<vmem>>) attributes {dimension_semantics = [#tpu.dimension_semantics<parallel>, #tpu.dimension_semantics<arbitrary>], iteration_bounds = array<i64: 1, 1>, scalar_prefetch = 0 : i64, scratch_operands = 1 : i64, tpu.core_type = #tpu.core_type<tc>, window_params = [{transform_indices = @transform_0, window_bounds = array<i64: 32, 128>}, {pipeline_mode = #tpu.pipeline_mode<synchronous>, transform_indices = @transform_1, window_bounds = array<i64: 1, 128>}, {pipeline_mode = #tpu.pipeline_mode<synchronous>, transform_indices = @transform_2, window_bounds = array<i64: 1, 128>}, {transform_indices = @transform_3, window_bounds = array<i64: 128, 384>}, {transform_indices = @transform_4, window_bounds = array<i64: 1, 384>}, {transform_indices = @transform_5, window_bounds = array<i64: 32, 384>}]} {
    %c0_i32 = arith.constant 0 : i32
    %0 = arith.cmpi eq, %arg1, %c0_i32 : i32
    %1 = arith.extui %0 : i1 to i32
    %c0_i32_0 = arith.constant 0 : i32
    %2 = arith.cmpi ne, %1, %c0_i32_0 : i32
    scf.if %2 {
      %c0_8 = arith.constant 0 : index
      %c0_9 = arith.constant 0 : index
      %11 = vector.load %arg2[%c0_8, %c0_9] : memref<32x128xf32, #tpu.memory_space<vmem>>, vector<32x128xf32>
      %cst_10 = arith.constant dense<0.000000e+00> : vector<32xf32>
      %12 = vector.multi_reduction <add>, %11, %cst_10 [1] : vector<32x128xf32> to vector<32xf32>
      %13 = vector.shape_cast %12 : vector<32xf32> to vector<32x1xf32>
      %cst_11 = arith.constant 1.280000e+02 : f32
      %14 = vector.broadcast %cst_11 : f32 to vector<32x1xf32>
      %15 = arith.divf %13, %14 : vector<32x1xf32>
      %16 = vector.broadcast %15 : vector<32x1xf32> to vector<32x128xf32>
      %17 = arith.subf %11, %16 : vector<32x128xf32>
      %18 = arith.mulf %17, %17 : vector<32x128xf32>
      %cst_12 = arith.constant dense<0.000000e+00> : vector<32xf32>
      %19 = vector.multi_reduction <add>, %18, %cst_12 [1] : vector<32x128xf32> to vector<32xf32>
      %20 = vector.shape_cast %19 : vector<32xf32> to vector<32x1xf32>
      %cst_13 = arith.constant 1.280000e+02 : f32
      %21 = vector.broadcast %cst_13 : f32 to vector<32x1xf32>
      %22 = arith.divf %20, %21 : vector<32x1xf32>
      %cst_14 = arith.constant 9.99999997E-7 : f32
      %23 = vector.broadcast %cst_14 : f32 to vector<32x1xf32>
      %24 = arith.addf %22, %23 : vector<32x1xf32>
      %25 = math.rsqrt %24 : vector<32x1xf32>
      %26 = vector.broadcast %25 : vector<32x1xf32> to vector<32x128xf32>
      %27 = arith.mulf %17, %26 : vector<32x128xf32>
      %c0_15 = arith.constant 0 : index
      %c0_16 = arith.constant 0 : index
      %28 = vector.load %arg3[%c0_15, %c0_16] : memref<1x128xf32, #tpu.memory_space<vmem>>, vector<1x128xf32>
      %29 = vector.broadcast %28 : vector<1x128xf32> to vector<32x128xf32>
      %30 = arith.mulf %27, %29 : vector<32x128xf32>
      %c0_17 = arith.constant 0 : index
      %c0_18 = arith.constant 0 : index
      %31 = vector.load %arg4[%c0_17, %c0_18] : memref<1x128xf32, #tpu.memory_space<vmem>>, vector<1x128xf32>
      %32 = vector.broadcast %31 : vector<1x128xf32> to vector<32x128xf32>
      %33 = arith.addf %30, %32 : vector<32x128xf32>
      %34 = arith.truncf %33 : vector<32x128xf32> to vector<32x128xbf16>
      %c0_19 = arith.constant 0 : index
      %c0_20 = arith.constant 0 : index
      %35 = vector.load %arg8[%c0_19, %c0_20] : memref<32x128xbf16, #tpu.memory_space<vmem>>, vector<32x128xbf16>
      tpu.vector_store %arg8[%c0_19, %c0_20], %34 {strides = array<i32>} : memref<32x128xbf16, #tpu.memory_space<vmem>>, vector<32x128xbf16>,
    } else {
    }
    %c0 = arith.constant 0 : index
    %c0_1 = arith.constant 0 : index
    %3 = vector.load %arg8[%c0, %c0_1] : memref<32x128xbf16, #tpu.memory_space<vmem>>, vector<32x128xbf16>
    %c0_2 = arith.constant 0 : index
    %c0_3 = arith.constant 0 : index
    %4 = vector.load %arg5[%c0_2, %c0_3] : memref<128x384xbf16, #tpu.memory_space<vmem>>, vector<128x384xbf16>
    %cst = arith.constant dense<0.000000e+00> : vector<32x384xf32>
    %5 = tpu.matmul %3, %4, %cst {dimension_numbers = #tpu.dot_dimension_numbers<[1], [0], [0], [1], [0, 0, 1, 1], [], []>} : vector<32x128xbf16>, vector<128x384xbf16>, vector<32x384xf32> -> vector<32x384xf32>
    %c0_4 = arith.constant 0 : index
    %c0_5 = arith.constant 0 : index
    %6 = vector.load %arg6[%c0_4, %c0_5] : memref<1x384xf32, #tpu.memory_space<vmem>>, vector<1x384xf32>
    %7 = vector.broadcast %6 : vector<1x384xf32> to vector<32x384xf32>
    %8 = arith.addf %5, %7 : vector<32x384xf32>
    %9 = arith.truncf %8 : vector<32x384xf32> to vector<32x384xbf16>
    %c0_6 = arith.constant 0 : index
    %c0_7 = arith.constant 0 : index
    %10 = vector.load %arg7[%c0_6, %c0_7] : memref<32x384xbf16, #tpu.memory_space<vmem>>, vector<32x384xbf16>
    tpu.vector_store %arg7[%c0_6, %c0_7], %9 {strides = array<i32>} : memref<32x384xbf16, #tpu.memory_space<vmem>>, vector<32x384xbf16>,
    return
  }
  func.func @transform_0(%arg0: i32, %arg1: i32) -> (i32, i32) {
    %c0_i32 = arith.constant 0 : i32
    %c0_i32_0 = arith.constant 0 : i32
    return %arg0, %c0_i32 : i32, i32
  }
  func.func @transform_1(%arg0: i32, %arg1: i32) -> (i32, i32) {
    %c0_i32 = arith.constant 0 : i32
    %c0_i32_0 = arith.constant 0 : i32
    %c0_i32_1 = arith.constant 0 : i32
    return %c0_i32, %c0_i32_0 : i32, i32
  }
  func.func @transform_2(%arg0: i32, %arg1: i32) -> (i32, i32) {
    %c0_i32 = arith.constant 0 : i32
    %c0_i32_0 = arith.constant 0 : i32
    %c0_i32_1 = arith.constant 0 : i32
    return %c0_i32, %c0_i32_0 : i32, i32
  }
  func.func @transform_3(%arg0: i32, %arg1: i32) -> (i32, i32) {
    %c0_i32 = arith.constant 0 : i32
    %c0_i32_0 = arith.constant 0 : i32
    return %c0_i32, %arg1 : i32, i32
  }
  func.func @transform_4(%arg0: i32, %arg1: i32) -> (i32, i32) {
    %c0_i32 = arith.constant 0 : i32
    %c0_i32_0 = arith.constant 0 : i32
    return %c0_i32, %arg1 : i32, i32
  }
  func.func @transform_5(%arg0: i32, %arg1: i32) -> (i32, i32) {
    %c0_i32 = arith.constant 0 : i32
    return %arg0, %arg1 : i32, i32
  }
}

module attributes {stable_mosaic.version = 11 : i64} {
  func.func @_ffn_kernel(%arg0: i32, %arg1: i32, %arg2: memref<32x128xf32, #tpu.memory_space<vmem>>, %arg3: memref<1x128xf32, #tpu.memory_space<vmem>>, %arg4: memref<1x128xf32, #tpu.memory_space<vmem>>, %arg5: memref<128x512xbf16, #tpu.memory_space<vmem>>, %arg6: memref<1x512xf32, #tpu.memory_space<vmem>>, %arg7: memref<512x128xbf16, #tpu.memory_space<vmem>>, %arg8: memref<1x128xf32, #tpu.memory_space<vmem>>, %arg9: memref<32x128xf32, #tpu.memory_space<vmem>>, %arg10: memref<32x128xf32, #tpu.memory_space<vmem>>, %arg11: memref<32x128xbf16, #tpu.memory_space<vmem>>, %arg12: memref<32x128xf32, #tpu.memory_space<vmem>>) attributes {dimension_semantics = [#tpu.dimension_semantics<parallel>, #tpu.dimension_semantics<arbitrary>], iteration_bounds = array<i64: 1, 1>, scalar_prefetch = 0 : i64, scratch_operands = 2 : i64, tpu.core_type = #tpu.core_type<tc>, window_params = [{transform_indices = @transform_0, window_bounds = array<i64: 32, 128>}, {pipeline_mode = #tpu.pipeline_mode<synchronous>, transform_indices = @transform_1, window_bounds = array<i64: 1, 128>}, {pipeline_mode = #tpu.pipeline_mode<synchronous>, transform_indices = @transform_2, window_bounds = array<i64: 1, 128>}, {transform_indices = @transform_3, window_bounds = array<i64: 128, 512>}, {transform_indices = @transform_4, window_bounds = array<i64: 1, 512>}, {transform_indices = @transform_5, window_bounds = array<i64: 512, 128>}, {pipeline_mode = #tpu.pipeline_mode<synchronous>, transform_indices = @transform_6, window_bounds = array<i64: 1, 128>}, {transform_indices = @transform_7, window_bounds = array<i64: 32, 128>}, {transform_indices = @transform_8, window_bounds = array<i64: 32, 128>}]} {
    %c0_i32 = arith.constant 0 : i32
    %0 = arith.cmpi eq, %arg1, %c0_i32 : i32
    %1 = arith.extui %0 : i1 to i32
    %c0_i32_0 = arith.constant 0 : i32
    %2 = arith.cmpi ne, %1, %c0_i32_0 : i32
    scf.if %2 {
      %c0_16 = arith.constant 0 : index
      %c0_17 = arith.constant 0 : index
      %20 = vector.load %arg2[%c0_16, %c0_17] : memref<32x128xf32, #tpu.memory_space<vmem>>, vector<32x128xf32>
      %cst_18 = arith.constant dense<0.000000e+00> : vector<32xf32>
      %21 = vector.multi_reduction <add>, %20, %cst_18 [1] : vector<32x128xf32> to vector<32xf32>
      %22 = vector.shape_cast %21 : vector<32xf32> to vector<32x1xf32>
      %cst_19 = arith.constant 1.280000e+02 : f32
      %23 = vector.broadcast %cst_19 : f32 to vector<32x1xf32>
      %24 = arith.divf %22, %23 : vector<32x1xf32>
      %25 = vector.broadcast %24 : vector<32x1xf32> to vector<32x128xf32>
      %26 = arith.subf %20, %25 : vector<32x128xf32>
      %27 = arith.mulf %26, %26 : vector<32x128xf32>
      %cst_20 = arith.constant dense<0.000000e+00> : vector<32xf32>
      %28 = vector.multi_reduction <add>, %27, %cst_20 [1] : vector<32x128xf32> to vector<32xf32>
      %29 = vector.shape_cast %28 : vector<32xf32> to vector<32x1xf32>
      %cst_21 = arith.constant 1.280000e+02 : f32
      %30 = vector.broadcast %cst_21 : f32 to vector<32x1xf32>
      %31 = arith.divf %29, %30 : vector<32x1xf32>
      %cst_22 = arith.constant 9.99999997E-7 : f32
      %32 = vector.broadcast %cst_22 : f32 to vector<32x1xf32>
      %33 = arith.addf %31, %32 : vector<32x1xf32>
      %34 = math.rsqrt %33 : vector<32x1xf32>
      %35 = vector.broadcast %34 : vector<32x1xf32> to vector<32x128xf32>
      %36 = arith.mulf %26, %35 : vector<32x128xf32>
      %c0_23 = arith.constant 0 : index
      %c0_24 = arith.constant 0 : index
      %37 = vector.load %arg3[%c0_23, %c0_24] : memref<1x128xf32, #tpu.memory_space<vmem>>, vector<1x128xf32>
      %38 = vector.broadcast %37 : vector<1x128xf32> to vector<32x128xf32>
      %39 = arith.mulf %36, %38 : vector<32x128xf32>
      %c0_25 = arith.constant 0 : index
      %c0_26 = arith.constant 0 : index
      %40 = vector.load %arg4[%c0_25, %c0_26] : memref<1x128xf32, #tpu.memory_space<vmem>>, vector<1x128xf32>
      %41 = vector.broadcast %40 : vector<1x128xf32> to vector<32x128xf32>
      %42 = arith.addf %39, %41 : vector<32x128xf32>
      %43 = arith.truncf %42 : vector<32x128xf32> to vector<32x128xbf16>
      %c0_27 = arith.constant 0 : index
      %c0_28 = arith.constant 0 : index
      %44 = vector.load %arg11[%c0_27, %c0_28] : memref<32x128xbf16, #tpu.memory_space<vmem>>, vector<32x128xbf16>
      tpu.vector_store %arg11[%c0_27, %c0_28], %43 {strides = array<i32>} : memref<32x128xbf16, #tpu.memory_space<vmem>>, vector<32x128xbf16>,
      %cst_29 = arith.constant 0.000000e+00 : f32
      %45 = vector.broadcast %cst_29 : f32 to vector<32x128xf32>
      %c0_30 = arith.constant 0 : index
      %c0_31 = arith.constant 0 : index
      %46 = vector.load %arg12[%c0_30, %c0_31] : memref<32x128xf32, #tpu.memory_space<vmem>>, vector<32x128xf32>
      tpu.vector_store %arg12[%c0_30, %c0_31], %45 {strides = array<i32>} : memref<32x128xf32, #tpu.memory_space<vmem>>, vector<32x128xf32>,
    } else {
    }
    %c0 = arith.constant 0 : index
    %c0_1 = arith.constant 0 : index
    %3 = vector.load %arg11[%c0, %c0_1] : memref<32x128xbf16, #tpu.memory_space<vmem>>, vector<32x128xbf16>
    %c0_2 = arith.constant 0 : index
    %c0_3 = arith.constant 0 : index
    %4 = vector.load %arg5[%c0_2, %c0_3] : memref<128x512xbf16, #tpu.memory_space<vmem>>, vector<128x512xbf16>
    %cst = arith.constant dense<0.000000e+00> : vector<32x512xf32>
    %5 = tpu.matmul %3, %4, %cst {dimension_numbers = #tpu.dot_dimension_numbers<[1], [0], [0], [1], [0, 0, 1, 1], [], []>} : vector<32x128xbf16>, vector<128x512xbf16>, vector<32x512xf32> -> vector<32x512xf32>
    %c0_4 = arith.constant 0 : index
    %c0_5 = arith.constant 0 : index
    %6 = vector.load %arg6[%c0_4, %c0_5] : memref<1x512xf32, #tpu.memory_space<vmem>>, vector<1x512xf32>
    %7 = vector.broadcast %6 : vector<1x512xf32> to vector<32x512xf32>
    %8 = arith.addf %5, %7 : vector<32x512xf32>
    %cst_6 = arith.constant 0.000000e+00 : f32
    %9 = vector.broadcast %cst_6 : f32 to vector<32x512xf32>
    %10 = arith.maximumf %8, %9 : vector<32x512xf32>
    %c0_7 = arith.constant 0 : index
    %c0_8 = arith.constant 0 : index
    %11 = vector.load %arg12[%c0_7, %c0_8] : memref<32x128xf32, #tpu.memory_space<vmem>>, vector<32x128xf32>
    %12 = arith.truncf %10 : vector<32x512xf32> to vector<32x512xbf16>
    %c0_9 = arith.constant 0 : index
    %c0_10 = arith.constant 0 : index
    %13 = vector.load %arg7[%c0_9, %c0_10] : memref<512x128xbf16, #tpu.memory_space<vmem>>, vector<512x128xbf16>
    %cst_11 = arith.constant dense<0.000000e+00> : vector<32x128xf32>
    %14 = tpu.matmul %12, %13, %cst_11 {dimension_numbers = #tpu.dot_dimension_numbers<[1], [0], [0], [1], [0, 0, 1, 1], [], []>} : vector<32x512xbf16>, vector<512x128xbf16>, vector<32x128xf32> -> vector<32x128xf32>
    %15 = arith.addf %11, %14 : vector<32x128xf32>
    %c0_12 = arith.constant 0 : index
    %c0_13 = arith.constant 0 : index
    %16 = vector.load %arg12[%c0_12, %c0_13] : memref<32x128xf32, #tpu.memory_space<vmem>>, vector<32x128xf32>
    tpu.vector_store %arg12[%c0_12, %c0_13], %15 {strides = array<i32>} : memref<32x128xf32, #tpu.memory_space<vmem>>, vector<32x128xf32>,
    %c0_i32_14 = arith.constant 0 : i32
    %17 = arith.cmpi eq, %arg1, %c0_i32_14 : i32
    %18 = arith.extui %17 : i1 to i32
    %c0_i32_15 = arith.constant 0 : i32
    %19 = arith.cmpi ne, %18, %c0_i32_15 : i32
    scf.if %19 {
      %c0_16 = arith.constant 0 : index
      %c0_17 = arith.constant 0 : index
      %20 = vector.load %arg12[%c0_16, %c0_17] : memref<32x128xf32, #tpu.memory_space<vmem>>, vector<32x128xf32>
      %c0_18 = arith.constant 0 : index
      %c0_19 = arith.constant 0 : index
      %21 = vector.load %arg8[%c0_18, %c0_19] : memref<1x128xf32, #tpu.memory_space<vmem>>, vector<1x128xf32>
      %22 = vector.broadcast %21 : vector<1x128xf32> to vector<32x128xf32>
      %23 = arith.addf %20, %22 : vector<32x128xf32>
      %c0_20 = arith.constant 0 : index
      %c0_21 = arith.constant 0 : index
      %24 = vector.load %arg9[%c0_20, %c0_21] : memref<32x128xf32, #tpu.memory_space<vmem>>, vector<32x128xf32>
      %25 = arith.addf %23, %24 : vector<32x128xf32>
      %c0_22 = arith.constant 0 : index
      %c0_23 = arith.constant 0 : index
      %26 = vector.load %arg10[%c0_22, %c0_23] : memref<32x128xf32, #tpu.memory_space<vmem>>, vector<32x128xf32>
      tpu.vector_store %arg10[%c0_22, %c0_23], %25 {strides = array<i32>} : memref<32x128xf32, #tpu.memory_space<vmem>>, vector<32x128xf32>,
    } else {
    }
    return
  }
  func.func @transform_0(%arg0: i32, %arg1: i32) -> (i32, i32) {
    %c0_i32 = arith.constant 0 : i32
    %c0_i32_0 = arith.constant 0 : i32
    return %arg0, %c0_i32 : i32, i32
  }
  func.func @transform_1(%arg0: i32, %arg1: i32) -> (i32, i32) {
    %c0_i32 = arith.constant 0 : i32
    %c0_i32_0 = arith.constant 0 : i32
    %c0_i32_1 = arith.constant 0 : i32
    return %c0_i32, %c0_i32_0 : i32, i32
  }
  func.func @transform_2(%arg0: i32, %arg1: i32) -> (i32, i32) {
    %c0_i32 = arith.constant 0 : i32
    %c0_i32_0 = arith.constant 0 : i32
    %c0_i32_1 = arith.constant 0 : i32
    return %c0_i32, %c0_i32_0 : i32, i32
  }
  func.func @transform_3(%arg0: i32, %arg1: i32) -> (i32, i32) {
    %c0_i32 = arith.constant 0 : i32
    %c0_i32_0 = arith.constant 0 : i32
    return %c0_i32, %arg1 : i32, i32
  }
  func.func @transform_4(%arg0: i32, %arg1: i32) -> (i32, i32) {
    %c0_i32 = arith.constant 0 : i32
    %c0_i32_0 = arith.constant 0 : i32
    return %c0_i32, %arg1 : i32, i32
  }
  func.func @transform_5(%arg0: i32, %arg1: i32) -> (i32, i32) {
    %c0_i32 = arith.constant 0 : i32
    %c0_i32_0 = arith.constant 0 : i32
    return %arg1, %c0_i32 : i32, i32
  }
  func.func @transform_6(%arg0: i32, %arg1: i32) -> (i32, i32) {
    %c0_i32 = arith.constant 0 : i32
    %c0_i32_0 = arith.constant 0 : i32
    %c0_i32_1 = arith.constant 0 : i32
    return %c0_i32, %c0_i32_0 : i32, i32
  }
  func.func @transform_7(%arg0: i32, %arg1: i32) -> (i32, i32) {
    %c0_i32 = arith.constant 0 : i32
    %c0_i32_0 = arith.constant 0 : i32
    return %arg0, %c0_i32 : i32, i32
  }
  func.func @transform_8(%arg0: i32, %arg1: i32) -> (i32, i32) {
    %c0_i32 = arith.constant 0 : i32
    %c0_i32_0 = arith.constant 0 : i32
    return %arg0, %c0_i32 : i32, i32
  }
}

</mosaic_0001>

<bundles_post_ra>
// kernel: _lambda_.18
= control target key start
LH: loop header
LB: loop body
LE: loop exit
PB: predicated region body
PF: predicated region fallthrough
CT: control target
= control target key end

     0   :  { %s315_s1 = inlined_call_operand.vmem [shape: bf16[128,128], index: 1, kind: input, shape index: {}]   ;;  %s316_s0 = inlined_call_operand.vmem [shape: bf16[32,128], index: 0, kind: input, shape index: {}]   ;;  %s317_s2 = inlined_call_operand.vmem [shape: f32[1,128], index: 2, kind: input, shape index: {}]   ;;  %s318_s3 = inlined_call_operand.vmem [shape: f32[32,128], index: 3, kind: input, shape index: {}]   ;;  %s319_s4 = inlined_call_operand.vmem [shape: f32[32,128], index: 4, kind: output, shape index: {}]  }
   0x1   :  { %v223_v0 = vld [vmem:[%s315_s1 + $0x38] sm:$0xff]   ;;  %v224_v1 = vld [vmem:[%s315_s1 + $0x30] sm:$0xff]   ;;  %v225_v2 = vld [vmem:[%s315_s1 + $0x28] sm:$0xff]  }
   0x2   :  { %203 = vmatprep.subr.bf16.mxu0 %v223_v0  ;;  %v226_v3 = vld [vmem:[%s315_s1 + $0x20] sm:$0xff]   ;;  %v24_v5 = vld [vmem:[%s316_s0 + $0x8] sm:$0xff]   ;;  %v227_v6 = vld [vmem:[%s315_s1 + $0x18] sm:$0xff]  }
   0x3   :  { %204 = vmatpush3.bf16.msra.mxu0 %v223_v0  ;;  %v22_v4 = vld [vmem:[%s316_s0] sm:$0xff]   ;;  %28 = vst [vmem:[#allocation2 + $0x8] sm:$0xff] %v24_v5   ;;  %v228_v7 = vld [vmem:[%s315_s1 + $0x10] sm:$0xff]   ;;  %v229_v9 = vld [vmem:[%s315_s1 + $0x8] sm:$0xff]  }
   0x4   :  { %205 = vmatprep.subr.bf16.mxu0 %v224_v1  ;;  %26 = vst [vmem:[#allocation2] sm:$0xff] %v22_v4   ;;  %v230_v10 = vld [vmem:[%s315_s1] sm:$0xff]   ;;  %v168_v14 = vld [vmem:[%s318_s3 + $0x10] sm:$0xff]  ;;  %v169_v21 = vld [vmem:[%s318_s3 + $0x18] sm:$0xff] }
   0x5   :  { %v182_v12 = vld [vmem:[%s317_s2] ss:$0 sm:$0xff]  ;;  %v167_v25 = vld [vmem:[%s318_s3 + $0x8] sm:$0xff] }
   0x6   :  { %v166_v17 = vld [vmem:[%s318_s3] sm:$0xff] }
   0x7   :  { %206 = vmatpush3.bf16.msra.mxu0 %v224_v1 }
   0x8   :  { %207 = vmatprep.subr.bf16.mxu0 %v225_v2 }
   0xa   :  { %v232_v11 = vld [vmem:[#allocation2 + $0x8] sm:$0xff]  }
   0xb   :  { %208 = vmatpush3.bf16.msra.mxu0 %v225_v2  ;;  %v231_v8 = vld [vmem:[#allocation2] sm:$0xff]  }
   0xc   :  { %209 = vmatprep.subr.bf16.mxu0 %v226_v3  ;;  %219 = vmatprep.mubr.bf16.mxu0 %v231_v8 }
   0xf   :  { %210 = vmatpush3.bf16.msra.mxu0 %v226_v3 }
  0x10   :  { %211 = vmatprep.subr.bf16.mxu0 %v227_v6 }
  0x13   :  { %212 = vmatpush3.bf16.msra.mxu0 %v227_v6 }
  0x14   :  { %213 = vmatprep.subr.bf16.mxu0 %v228_v7 }
  0x17   :  { %214 = vmatpush3.bf16.msra.mxu0 %v228_v7 }
  0x18   :  { %215 = vmatprep.subr.bf16.mxu0 %v229_v9 }
  0x1b   :  { %216 = vmatpush3.bf16.msra.mxu0 %v229_v9 }
  0x1c   :  { %217 = vmatprep.subr.bf16.mxu0 %v230_v10 }
  0x1f   :  { %218 = vmatpush3.bf16.msra.mxu0 %v230_v10 }
  0x22   :  { %220 = vmatmul.mubr.bf16.vlgmr.msra.gmra.mxu0 %v232_v11 }
  0xe2   :  { %v221_v13 = vpop.f32.mrf.mxu0 }
  0xe3   :  { %v160_v15 = vadd.f32 %v221_v13, %v182_v12 }
  0xe4   :  { %v151_v16 = vpop.f32.mrf.mxu0 }
  0xe5   :  { %v172_v18 = vadd.f32 %v168_v14, %v160_v15  ;;  %v152_v19 = vadd.f32 %v182_v12, %v151_v16 }
  0xe6   :  { %v222_v20 = vpop.f32.mrf.mxu0 }
  0xe7   :  { %176 = vst [vmem:[%s319_s4 + $0x10] sm:$0xff] %v172_v18  ;;  %v170_v22 = vadd.f32 %v166_v17, %v152_v19  ;;  %v163_v23 = vadd.f32 %v222_v20, %v182_v12 }
  0xe8   :  { %v154_v24 = vpop.f32.mrf.mxu0 }
  0xe9   :  { %174 = vst [vmem:[%s319_s4] sm:$0xff] %v170_v22  ;;  %v173_v26 = vadd.f32 %v169_v21, %v163_v23  ;;  %v155_v27 = vadd.f32 %v182_v12, %v154_v24 }
  0xeb   :  { %177 = vst [vmem:[%s319_s4 + $0x18] sm:$0xff] %v173_v26  ;;  %v171_v28 = vadd.f32 %v167_v25, %v155_v27 }
  0xed   :  { %175 = vst [vmem:[%s319_s4 + $0x8] sm:$0xff] %v171_v28 }

// kernel: _lambda_.16
= control target key start
LH: loop header
LB: loop body
LE: loop exit
PB: predicated region body
PF: predicated region fallthrough
CT: control target
= control target key end

     0   :  { %10 = vsyncpa [#allocation4], 0  ;;  %s639_s18 = smov [#allocation3]   ;;  %s741_s0 = inlined_call_operand.vmem [shape: f32[32,128], index: 0, kind: input, shape index: {}]   ;;  %s742_s1 = inlined_call_operand.vmem [shape: f32[1,128], index: 1, kind: input, shape index: {}]   ;;  %s743_s2 = inlined_call_operand.vmem [shape: f32[1,128], index: 2, kind: input, shape index: {}]   ;;  %s744_s3 = inlined_call_operand.hbm [shape: bf16[128,384], index: 3, kind: input, shape index: {}]   ;;  %s745_s4 = inlined_call_operand.vmem [shape: f32[1,384], index: 4, kind: input, shape index: {}]   ;;  %s746_s5 = inlined_call_operand.vmem [shape: bf16[32,384], index: 5, kind: output, shape index: {}]  }
   0x1   :  { %s22_s19 = sshll.u32 %s639_s18, 4  ;;  %s23_s19 = int_to_ptr.vmem [resolvable:$true] %s22_s19 }
   0x2   :  { %s625_s20 = scalar_lea.vmem %s23_s19, 3072  ;;  %p630_p1 = scmp.lt.s32.totalorder %s23_s19, %s23_s19 }
   0x3   :  { %p626_p0 = scmp.ne.s32.totalorder %s23_s19, %s625_s20  ;;  %p631_p2 = scmp.lt.s32.totalorder %s625_s20, %s625_s20 }
   0x5   :  { %p632_p3 = por %p631_p2, %p630_p1 }
   0x7   :  { %p633_p4 = pnand %p632_p3, %p626_p0 }
   0x9   :  { %636 = shalt.err (!%p633_p4)
}
   0xa   :  { %s640_s21 = smov 192   ;;  %s641_s22 = smov 12  }
   0xb   :  { %28 = dma.hbm_to_vmem [thread:$0]  %s744_s3, 3072, %s23_s19, [#allocation4], %s640_s21, %s640_s21, %s641_s22  }
   0xc   :  { %637 = dma.done.wait [#allocation4], 3072  }
   0xd   :  { %638 = vsyncadd [#allocation4], 4294964224  ;;  %v39_v0 = vld [vmem:[%s741_s0] sm:$0xff]  ;;  %v41_v1 = vld [vmem:[%s741_s0 + $0x10] sm:$0xff]  ;;  %v642_v43 = vmov 0  }
   0xe   :  { %v40_v2 = vld [vmem:[%s741_s0 + $0x8] sm:$0xff]  ;;  %43 = vadd.xlane.f32.xlu0 %v39_v0  ;;  %47 = vadd.xlane.f32.xlu1 %v41_v1  ;;  %v42_v3 = vld [vmem:[%s741_s0 + $0x18] sm:$0xff]  ;;  %v578_v22 = vld [vmem:[#allocation3 + $0x94] ss:$12 sps:$4 sm:$0xff]  }
   0xf   :  { %v575_v20 = vld [vmem:[#allocation3 + $0xac] ss:$12 sps:$4 sm:$0xff]   ;;  %v577_v21 = vld [vmem:[#allocation3 + $0xa8] ss:$12 sps:$4 sm:$0xff]   ;;  %v580_v23 = vld [vmem:[#allocation3 + $0xb0] ss:$12 sps:$4 sm:$0xff]   ;;  %355 = vmatprep.mubr.bf16.mxu0 %v642_v43 }
  0x10   :  { %323 = vmatprep.subr.bf16.mxu0 %v575_v20  ;;  %v581_v24 = vld [vmem:[#allocation3 + $0x90] ss:$12 sps:$4 sm:$0xff]   ;;  %551 = vmatprep.subr.bf16.mxu1 %v580_v23  ;;  %v584_v26 = vld [vmem:[#allocation3 + $0x98] ss:$12 sps:$4 sm:$0xff]   ;;  %v588_v29 = vld [vmem:[#allocation3 + $0x80] ss:$12 sps:$4 sm:$0xff]  }
  0x11   :  { %324 = vmatpush1.bf16.msra.mxu0 %v577_v21  ;;  %552 = vmatpush3.bf16.msra.mxu1 %v580_v23  ;;  %v582_v25 = vld [vmem:[#allocation3 + $0x7c] ss:$12 sps:$4 sm:$0xff]   ;;  %v585_v27 = vld [vmem:[#allocation3 + $0x78] ss:$12 sps:$4 sm:$0xff]   ;;  %v589_v30 = vld [vmem:[#allocation3 + $0x60] ss:$12 sps:$4 sm:$0xff]  }
  0x12   :  { %45 = vadd.xlane.f32.xlu0 %v40_v2  ;;  %49 = vadd.xlane.f32.xlu1 %v42_v3  ;;  %v586_v28 = vld [vmem:[#allocation3 + $0x64] ss:$12 sps:$4 sm:$0xff]   ;;  %v590_v31 = vld [vmem:[#allocation3 + $0x4c] ss:$12 sps:$4 sm:$0xff]   ;;  %v592_v32 = vld [vmem:[#allocation3 + $0x68] ss:$12 sps:$4 sm:$0xff]  }
  0x13   :  { %325 = vmatprep.subr.bf16.mxu0 %v578_v22  ;;  %553 = vmatprep.subr.bf16.mxu1 %v584_v26  ;;  %v593_v33 = vld [vmem:[#allocation3 + $0x48] ss:$12 sps:$4 sm:$0xff]   ;;  %v596_v35 = vld [vmem:[#allocation3 + $0x50] ss:$12 sps:$4 sm:$0xff]   ;;  %v600_v38 = vld [vmem:[#allocation3 + $0x38] ss:$12 sps:$4 sm:$0xff]  }
  0x14   :  { %v594_v34 = vld [vmem:[#allocation3 + $0x34] ss:$12 sps:$4 sm:$0xff]   ;;  %v597_v36 = vld [vmem:[#allocation3 + $0x30] ss:$12 sps:$4 sm:$0xff]   ;;  %v601_v39 = vld [vmem:[#allocation3 + $0x18] ss:$12 sps:$4 sm:$0xff]  }
  0x15   :  { %326 = vmatpush1.bf16.msra.mxu0 %v581_v24  ;;  %554 = vmatpush3.bf16.msra.mxu1 %v584_v26  ;;  %v598_v37 = vld [vmem:[#allocation3 + $0x1c] ss:$12 sps:$4 sm:$0xff]   ;;  %v602_v40 = vld [vmem:[#allocation3 + $0x4] ss:$12 sps:$4 sm:$0xff]   ;;  %v604_v41 = vld [vmem:[#allocation3 + $0x20] ss:$12 sps:$4 sm:$0xff]  }
  0x16   :  { %327 = vmatprep.subr.bf16.mxu0 %v582_v25  ;;  %555 = vmatprep.subr.bf16.mxu1 %v588_v29  ;;  %v605_v42 = vld [vmem:[#allocation3] ss:$12 sps:$4 sm:$0xff]   ;;  %v607_v44 = vld [vmem:[#allocation3 + $0x8] ss:$12 sps:$4 sm:$0xff]   ;;  %v478_v59 = vld [vmem:[%s742_s1] ss:$0 sm:$0xff] }
  0x19   :  { %328 = vmatpush1.bf16.msra.mxu0 %v585_v27  ;;  %556 = vmatpush3.bf16.msra.mxu1 %v588_v29 }
  0x1a   :  { %329 = vmatprep.subr.bf16.mxu0 %v586_v28  ;;  %557 = vmatprep.subr.bf16.mxu1 %v592_v32 }
  0x1d   :  { %330 = vmatpush1.bf16.msra.mxu0 %v589_v30  ;;  %558 = vmatpush3.bf16.msra.mxu1 %v592_v32 }
  0x1e   :  { %331 = vmatprep.subr.bf16.mxu0 %v590_v31  ;;  %559 = vmatprep.subr.bf16.mxu1 %v596_v35 }
  0x21   :  { %332 = vmatpush1.bf16.msra.mxu0 %v593_v33  ;;  %560 = vmatpush3.bf16.msra.mxu1 %v596_v35 }
  0x22   :  { %333 = vmatprep.subr.bf16.mxu0 %v594_v34  ;;  %561 = vmatprep.subr.bf16.mxu1 %v600_v38 }
  0x25   :  { %334 = vmatpush1.bf16.msra.mxu0 %v597_v36  ;;  %562 = vmatpush3.bf16.msra.mxu1 %v600_v38 }
  0x26   :  { %335 = vmatprep.subr.bf16.mxu0 %v598_v37  ;;  %563 = vmatprep.subr.bf16.mxu1 %v604_v41 }
  0x29   :  { %336 = vmatpush1.bf16.msra.mxu0 %v601_v39  ;;  %564 = vmatpush3.bf16.msra.mxu1 %v604_v41 }
  0x2a   :  { %337 = vmatprep.subr.bf16.mxu0 %v602_v40  ;;  %565 = vmatprep.subr.bf16.mxu1 %v607_v44 }
  0x2d   :  { %338 = vmatpush1.bf16.msra.mxu0 %v605_v42  ;;  %566 = vmatpush3.bf16.msra.mxu1 %v607_v44 }
  0x97   :  { %v44_v4 = vpop.xlane.xlu0 %43  ;;  %v48_v5 = vpop.xlane.xlu1 %47 }
  0x98   :  { %v52_v6 = vmul.f32 0.0078125, %v44_v4  ;;  %v54_v7 = vmul.f32 0.0078125, %v48_v5 }
  0x9a   :  { %v688_v8 = vsub.f32 %v39_v0, %v52_v6  ;;  %v690_v9 = vsub.f32 %v41_v1, %v54_v7  ;;  %v479_v0 = vld [vmem:[%s743_s2] ss:$0 sm:$0xff] }
  0x9b   :  { %v46_v10 = vpop.xlane.xlu0 %45  ;;  %v50_v11 = vpop.xlane.xlu1 %49 }
  0x9c   :  { %v53_v12 = vmul.f32 0.0078125, %v46_v10  ;;  %v60_v13 = vmul.f32 %v688_v8, %v688_v8  ;;  %v55_v14 = vmul.f32 0.0078125, %v50_v11  ;;  %v62_v17 = vmul.f32 %v690_v9, %v690_v9 }
  0x9e   :  { %v694_v15 = vsub.f32 %v40_v2, %v53_v12  ;;  %64 = vadd.xlane.f32.xlu0 %v60_v13  ;;  %v696_v16 = vsub.f32 %v42_v3, %v55_v14 }
  0xa0   :  { %v61_v18 = vmul.f32 %v694_v15, %v694_v15  ;;  %v63_v19 = vmul.f32 %v696_v16, %v696_v16 }
  0xa2   :  { %68 = vadd.xlane.f32.xlu0 %v62_v17  ;;  %66 = vadd.xlane.f32.xlu1 %v61_v18 }
  0xa6   :  { %70 = vadd.xlane.f32.xlu1 %v63_v19 }
 0x127   :  { %v65_v45 = vpop.xlane.xlu0 %64 }
 0x128   :  { %v72_v46 = vmul.f32 0.0078125, %v65_v45 }
 0x12a   :  { %v76_v47 = vadd.f32 1e-06, %v72_v46 }
 0x12b   :  { %v67_v48 = vpop.xlane.xlu1 %66  ;;  %v69_v49 = vpop.xlane.xlu0 %68 }
 0x12c   :  { %609 = vrsqrt.f32 %v76_v47  ;;  %v73_v50 = vmul.f32 0.0078125, %v67_v48  ;;  %v74_v51 = vmul.f32 0.0078125, %v69_v49 }
 0x12e   :  { %v77_v52 = vadd.f32 1e-06, %v73_v50  ;;  %v78_v53 = vadd.f32 1e-06, %v74_v51 }
 0x12f   :  { %v71_v54 = vpop.xlane.xlu1 %70 }
 0x130   :  { %611 = vrsqrt.f32 %v77_v52  ;;  %v75_v55 = vmul.f32 0.0078125, %v71_v54 }
 0x131   :  { %613 = vrsqrt.f32 %v78_v53 }
 0x132   :  { %v79_v56 = vadd.f32 1e-06, %v75_v55 }
 0x134   :  { %615 = vrsqrt.f32 %v79_v56 }
 0x139   :  { %v610_v57 = vpop.eup %609 }
 0x13a   :  { %v84_v58 = vmul.f32 %v610_v57, %v688_v8 }
 0x13c   :  { %v95_v62 = vmul.f32 %v478_v59, %v84_v58 }
 0x13d   :  { %v612_v60 = vpop.eup %611 }
 0x13e   :  { %v614_v61 = vpop.eup %613  ;;  %v85_v63 = vmul.f32 %v612_v60, %v694_v15  ;;  %v106_v4 = vadd.f32 %v479_v0, %v95_v62 }
 0x13f   :  { %v86_v1 = vmul.f32 %v614_v61, %v690_v9  ;;  %v168_v9 = vlaneseq }
 0x140   :  { %v96_v2 = vmul.f32 %v478_v59, %v85_v63 }
 0x141   :  { %v616_v3 = vpop.eup %615  ;;  %v97_v6 = vmul.f32 %v478_v59, %v86_v1  ;;  %v169_v17 = vshrl.u32 %v168_v9, 7 }
 0x142   :  { %v107_v5 = vadd.f32 %v479_v0, %v96_v2  ;;  %v87_v7 = vmul.f32 %v616_v3, %v696_v16  ;;  %v166_v16 = vld [vmem:[%s745_s4] sm:$0x7] }
 0x143   :  { %v108_v11 = vadd.f32 %v479_v0, %v97_v6  ;;  %v170_v18 = vsub.s32 0, %v169_v17  ;;  %v174_v19 = vsub.s32 1, %v169_v17  ;;  %v178_v20 = vsub.s32 2, %v169_v17 }
 0x144   :  { %v533_v8 = vpack.c.bf16 %v107_v5, %v106_v4  ;;  %v98_v10 = vmul.f32 %v478_v59, %v87_v7 }
 0x145   :  { %v171_v21 = vrot.slane %v166_v16, %v170_v18  ;;  %v175_v22 = vrot.slane %v166_v16, %v174_v19  ;;  %v179_v24 = vrot.slane %v166_v16, %v178_v20 }
 0x146   :  { %534 = vst [vmem:[#allocation2] sm:$0xff] %v533_v8   ;;  %v109_v12 = vadd.f32 %v479_v0, %v98_v10 }
 0x148   :  { %v538_v13 = vpack.c.bf16 %v109_v12, %v108_v11 }
 0x14a   :  { %540 = vst [vmem:[#allocation2 + $0x8] sm:$0xff] %v538_v13  }
 0x14d   :  { %v606_v14 = vld [vmem:[#allocation2] sm:$0xff]  }
 0x14e   :  { %356 = vmatmul.mubr.bf16.vlgmr.msra.gmra.mxu0 %v606_v14  ;;  %567 = vmatprep.mubr.bf16.mxu1 %v606_v14 }
 0x14f   :  { %365 = vmatprep.mubr.bf16.mxu0 %v642_v43 }
 0x151   :  { %v608_v15 = vld [vmem:[#allocation2 + $0x8] sm:$0xff]  }
 0x152   :  { %568 = vmatmul.mubr.bf16.vlgmr.msra.gmra.mxu1 %v608_v15 }
 0x156   :  { %366 = vmatmul.mubr.bf16.gmra.mxu0 %v608_v15 }
 0x20e   :  { %v357_v23 = vpop.f32.mrf.mxu0 }
 0x20f   :  { %v358_v26 = vadd.f32 %v357_v23, %v171_v21 }
 0x210   :  { %v359_v25 = vpop.f32.mrf.mxu0 }
 0x211   :  { %v360_v27 = vadd.f32 %v359_v25, %v175_v22 }
 0x212   :  { %v361_v28 = vpop.f32.mrf.mxu0  ;;  %v569_v29 = vpop.f32.mrf.mxu1 }
 0x213   :  { %v522_v30 = vpack.c.bf16 %v360_v27, %v358_v26  ;;  %v419_v31 = vadd.f32 %v569_v29, %v179_v24  ;;  %v362_v34 = vadd.f32 %v361_v28, %v171_v21 }
 0x214   :  { %v363_v32 = vpop.f32.mrf.mxu0  ;;  %v410_v33 = vpop.f32.mrf.mxu1 }
 0x215   :  { %465 = vst [vmem:[%s746_s5] sm:$0xff] %v522_v30  ;;  %v527_v35 = vpack.c.bf16 %v419_v31, %v419_v31  ;;  %v364_v36 = vadd.f32 %v363_v32, %v175_v22  ;;  %v411_v37 = vadd.f32 %v410_v33, %v179_v24 }
 0x216   :  { %v367_v38 = vpop.f32.mrf.mxu0  ;;  %v570_v39 = vpop.f32.mrf.mxu1 }
 0x217   :  { %470 = vst [vmem:[%s746_s5 + $0x20] sm:$0xf] %v527_v35  ;;  %v524_v40 = vpack.c.bf16 %v364_v36, %v362_v34  ;;  %v523_v41 = vpack.c.bf16 %v411_v37, %v411_v37  ;;  %v422_v42 = vadd.f32 %v570_v39, %v179_v24  ;;  %v368_v45 = vadd.f32 %v367_v38, %v171_v21 }
 0x218   :  { %v369_v43 = vpop.f32.mrf.mxu0  ;;  %v413_v44 = vpop.f32.mrf.mxu1 }
 0x219   :  { %467 = vst [vmem:[%s746_s5 + $0xc] sm:$0xff] %v524_v40  ;;  %466 = vst [vmem:[%s746_s5 + $0x8] sm:$0xf] %v523_v41  ;;  %v529_v46 = vpack.c.bf16 %v422_v42, %v422_v42  ;;  %v370_v47 = vadd.f32 %v369_v43, %v175_v22  ;;  %v414_v48 = vadd.f32 %v413_v44, %v179_v24 }
 0x21a   :  { %v371_v49 = vpop.f32.mrf.mxu0 }
 0x21b   :  { %472 = vst [vmem:[%s746_s5 + $0x2c] sm:$0xf] %v529_v46  ;;  %v526_v50 = vpack.c.bf16 %v370_v47, %v368_v45  ;;  %v525_v51 = vpack.c.bf16 %v414_v48, %v414_v48  ;;  %v372_v53 = vadd.f32 %v371_v49, %v171_v21 }
 0x21c   :  { %v373_v52 = vpop.f32.mrf.mxu0 }
 0x21d   :  { %469 = vst [vmem:[%s746_s5 + $0x18] sm:$0xff] %v526_v50  ;;  %468 = vst [vmem:[%s746_s5 + $0x14] sm:$0xf] %v525_v51  ;;  %v374_v54 = vadd.f32 %v373_v52, %v175_v22 }
 0x21f   :  { %v528_v55 = vpack.c.bf16 %v374_v54, %v372_v53 }
 0x221   :  { %471 = vst [vmem:[%s746_s5 + $0x24] sm:$0xff] %v528_v55 }
 0x222   :  { %477 = vsyncpa [#allocation4], 1 }

// kernel: _lambda_.19
= control target key start
LH: loop header
LB: loop body
LE: loop exit
PB: predicated region body
PF: predicated region fallthrough
CT: control target
= control target key end

     0   :  { %s466_s0 = inlined_call_operand.vmem [shape: f32[32,128], index: 0, kind: input, shape index: {}]   ;;  %s467_s3 = inlined_call_operand.vmem [shape: bf16[128,128], index: 3, kind: input, shape index: {}]   ;;  %s468_s1 = inlined_call_operand.vmem [shape: f32[1,128], index: 1, kind: input, shape index: {}]   ;;  %s469_s2 = inlined_call_operand.vmem [shape: f32[1,128], index: 2, kind: input, shape index: {}]   ;;  %s470_s4 = inlined_call_operand.vmem [shape: f32[1,128], index: 4, kind: input, shape index: {}]   ;;  %s471_s5 = inlined_call_operand.vmem [shape: bf16[32,128], index: 5, kind: output, shape index: {}]  }
   0x1   :  { %v25_v0 = vld [vmem:[%s466_s0] sm:$0xff]  ;;  %v27_v1 = vld [vmem:[%s466_s0 + $0x10] sm:$0xff]  ;;  %v26_v2 = vld [vmem:[%s466_s0 + $0x8] sm:$0xff] }
   0x2   :  { %29 = vadd.xlane.f32.xlu0 %v25_v0  ;;  %33 = vadd.xlane.f32.xlu1 %v27_v1  ;;  %v28_v3 = vld [vmem:[%s466_s0 + $0x18] sm:$0xff]  ;;  %v358_v21 = vld [vmem:[%s467_s3 + $0x30] sm:$0xff]   ;;  %v359_v22 = vld [vmem:[%s467_s3 + $0x28] sm:$0xff]  }
   0x3   :  { %v357_v20 = vld [vmem:[%s467_s3 + $0x38] sm:$0xff]   ;;  %v360_v23 = vld [vmem:[%s467_s3 + $0x20] sm:$0xff]   ;;  %v362_v25 = vld [vmem:[%s467_s3 + $0x10] sm:$0xff]  }
   0x4   :  { %337 = vmatprep.subr.bf16.mxu0 %v357_v20  ;;  %v361_v24 = vld [vmem:[%s467_s3 + $0x18] sm:$0xff]   ;;  %v363_v26 = vld [vmem:[%s467_s3 + $0x8] sm:$0xff]   ;;  %v364_v27 = vld [vmem:[%s467_s3] sm:$0xff]  }
   0x5   :  { %338 = vmatpush3.bf16.msra.mxu0 %v357_v20  ;;  %v276_v42 = vld [vmem:[%s468_s1] ss:$0 sm:$0xff] }
   0x6   :  { %31 = vadd.xlane.f32.xlu0 %v26_v2  ;;  %35 = vadd.xlane.f32.xlu1 %v28_v3  ;;  %v277_v47 = vld [vmem:[%s469_s2] ss:$0 sm:$0xff] }
   0x7   :  { %339 = vmatprep.subr.bf16.mxu0 %v358_v21  ;;  %v282_v63 = vld [vmem:[%s470_s4] ss:$0 sm:$0xff] }
   0x9   :  { %340 = vmatpush3.bf16.msra.mxu0 %v358_v21 }
   0xa   :  { %341 = vmatprep.subr.bf16.mxu0 %v359_v22 }
   0xd   :  { %342 = vmatpush3.bf16.msra.mxu0 %v359_v22 }
   0xe   :  { %343 = vmatprep.subr.bf16.mxu0 %v360_v23 }
  0x11   :  { %344 = vmatpush3.bf16.msra.mxu0 %v360_v23 }
  0x12   :  { %345 = vmatprep.subr.bf16.mxu0 %v361_v24 }
  0x15   :  { %346 = vmatpush3.bf16.msra.mxu0 %v361_v24 }
  0x16   :  { %347 = vmatprep.subr.bf16.mxu0 %v362_v25 }
  0x19   :  { %348 = vmatpush3.bf16.msra.mxu0 %v362_v25 }
  0x1a   :  { %349 = vmatprep.subr.bf16.mxu0 %v363_v26 }
  0x1d   :  { %350 = vmatpush3.bf16.msra.mxu0 %v363_v26 }
  0x1e   :  { %351 = vmatprep.subr.bf16.mxu0 %v364_v27 }
  0x21   :  { %352 = vmatpush3.bf16.msra.mxu0 %v364_v27 }
  0x8b   :  { %v30_v4 = vpop.xlane.xlu0 %29  ;;  %v34_v5 = vpop.xlane.xlu1 %33 }
  0x8c   :  { %v38_v6 = vmul.f32 0.0078125, %v30_v4  ;;  %v40_v7 = vmul.f32 0.0078125, %v34_v5 }
  0x8e   :  { %v42_v8 = vsub.f32 %v25_v0, %v38_v6  ;;  %v417_v9 = vsub.f32 %v27_v1, %v40_v7 }
  0x8f   :  { %v32_v10 = vpop.xlane.xlu0 %31  ;;  %v36_v11 = vpop.xlane.xlu1 %35 }
  0x90   :  { %v39_v12 = vmul.f32 0.0078125, %v32_v10  ;;  %v46_v13 = vmul.f32 %v42_v8, %v42_v8  ;;  %v41_v14 = vmul.f32 0.0078125, %v36_v11  ;;  %v48_v17 = vmul.f32 %v417_v9, %v417_v9 }
  0x92   :  { %v43_v15 = vsub.f32 %v26_v2, %v39_v12  ;;  %50 = vadd.xlane.f32.xlu0 %v46_v13  ;;  %v419_v16 = vsub.f32 %v28_v3, %v41_v14 }
  0x94   :  { %v47_v18 = vmul.f32 %v43_v15, %v43_v15  ;;  %v49_v19 = vmul.f32 %v419_v16, %v419_v16 }
  0x96   :  { %54 = vadd.xlane.f32.xlu0 %v48_v17  ;;  %52 = vadd.xlane.f32.xlu1 %v47_v18 }
  0x9a   :  { %56 = vadd.xlane.f32.xlu1 %v49_v19 }
 0x11b   :  { %v51_v28 = vpop.xlane.xlu0 %50 }
 0x11c   :  { %v58_v29 = vmul.f32 0.0078125, %v51_v28 }
 0x11e   :  { %v62_v30 = vadd.f32 1e-06, %v58_v29 }
 0x11f   :  { %v53_v31 = vpop.xlane.xlu1 %52  ;;  %v55_v32 = vpop.xlane.xlu0 %54 }
 0x120   :  { %367 = vrsqrt.f32 %v62_v30  ;;  %v59_v33 = vmul.f32 0.0078125, %v53_v31  ;;  %v60_v34 = vmul.f32 0.0078125, %v55_v32 }
 0x122   :  { %v63_v35 = vadd.f32 1e-06, %v59_v33  ;;  %v64_v36 = vadd.f32 1e-06, %v60_v34 }
 0x123   :  { %v57_v37 = vpop.xlane.xlu1 %56 }
 0x124   :  { %369 = vrsqrt.f32 %v63_v35  ;;  %v61_v38 = vmul.f32 0.0078125, %v57_v37 }
 0x125   :  { %371 = vrsqrt.f32 %v64_v36 }
 0x126   :  { %v65_v39 = vadd.f32 1e-06, %v61_v38 }
 0x128   :  { %373 = vrsqrt.f32 %v65_v39 }
 0x12d   :  { %v368_v40 = vpop.eup %367 }
 0x12e   :  { %v70_v41 = vmul.f32 %v368_v40, %v42_v8 }
 0x130   :  { %v81_v45 = vmul.f32 %v276_v42, %v70_v41 }
 0x131   :  { %v370_v43 = vpop.eup %369 }
 0x132   :  { %v372_v44 = vpop.eup %371  ;;  %v71_v46 = vmul.f32 %v370_v43, %v43_v15  ;;  %v92_v51 = vadd.f32 %v277_v47, %v81_v45 }
 0x133   :  { %v72_v48 = vmul.f32 %v372_v44, %v417_v9 }
 0x134   :  { %v82_v49 = vmul.f32 %v276_v42, %v71_v46 }
 0x135   :  { %v374_v50 = vpop.eup %373  ;;  %v83_v53 = vmul.f32 %v276_v42, %v72_v48 }
 0x136   :  { %v93_v52 = vadd.f32 %v277_v47, %v82_v49  ;;  %v73_v54 = vmul.f32 %v374_v50, %v419_v16 }
 0x137   :  { %v94_v57 = vadd.f32 %v277_v47, %v83_v53 }
 0x138   :  { %v308_v55 = vpack.c.bf16 %v93_v52, %v92_v51  ;;  %v84_v56 = vmul.f32 %v276_v42, %v73_v54 }
 0x13a   :  { %309 = vst [vmem:[#allocation2] sm:$0xff] %v308_v55   ;;  %v95_v58 = vadd.f32 %v277_v47, %v84_v56 }
 0x13c   :  { %v313_v59 = vpack.c.bf16 %v95_v58, %v94_v57 }
 0x13e   :  { %325 = vst [vmem:[#allocation2 + $0x8] sm:$0xff] %v313_v59  }
 0x141   :  { %v365_v60 = vld [vmem:[#allocation2] sm:$0xff]  }
 0x142   :  { %353 = vmatprep.mubr.bf16.mxu0 %v365_v60 }
 0x145   :  { %v366_v61 = vld [vmem:[#allocation2 + $0x8] sm:$0xff]  }
 0x146   :  { %354 = vmatmul.mubr.bf16.vlgmr.msra.gmra.mxu0 %v366_v61 }
 0x206   :  { %v355_v62 = vpop.f32.mrf.mxu0 }
 0x207   :  { %v246_v2 = vadd.f32 %v355_v62, %v282_v63 }
 0x208   :  { %v237_v0 = vpop.f32.mrf.mxu0 }
 0x209   :  { %v238_v5 = vadd.f32 %v282_v63, %v237_v0 }
 0x20a   :  { %v356_v1 = vpop.f32.mrf.mxu0 }
 0x20b   :  { %v249_v3 = vadd.f32 %v356_v1, %v282_v63 }
 0x20c   :  { %v240_v4 = vpop.f32.mrf.mxu0 }
 0x20d   :  { %v323_v6 = vpack.c.bf16 %v249_v3, %v246_v2  ;;  %v241_v7 = vadd.f32 %v282_v63, %v240_v4 }
 0x20f   :  { %326 = vst [vmem:[%s471_s5 + $0x8] sm:$0xff] %v323_v6   ;;  %v318_v8 = vpack.c.bf16 %v241_v7, %v238_v5 }
 0x211   :  { %319 = vst [vmem:[%s471_s5] sm:$0xff] %v318_v8  }

// kernel: _lambda_.17
= control target key start
LH: loop header
LB: loop body
LE: loop exit
PB: predicated region body
PF: predicated region fallthrough
CT: control target
= control target key end

     0   :  { %s1817_s15 = smov 0   ;;  %s1819_s16 = smov 0   ;;  %s2222_s0 = inlined_call_operand.vmem [shape: bf16[2,16,384], index: 0, kind: input, shape index: {}, may-alias: {0,1,2}]   ;;  %s2223_s1 = inlined_call_operand.vmem [shape: bf16[2,16,384], index: 1, kind: input, shape index: {}, may-alias: {0,1,2}]   ;;  %s2224_s2 = inlined_call_operand.vmem [shape: bf16[2,16,384], index: 2, kind: input, shape index: {}, may-alias: {0,1,2}]   ;;  %s2225_s3 = inlined_call_operand.vmem [shape: bf16[1,16,16], index: 3, kind: input, shape index: {}]   ;;  %s2226_s4 = inlined_call_operand.vmem [shape: bf16[2,16,128], index: 4, kind: output, shape index: {}]  }
   0x1   :  { %s1821_s17 = smov 0   ;;  %s1823_s18 = smov 0  }
   0x2   :  { %s1825_s19 = smov 0  }
   0x3 LB: > { %s33_s20 = sadd.s32 1, %s1779_s18  ;;  %p49_p1 = scmp.ne.s32.totalorder %s1771_s16, %s1767_s15  ;;  %s1783_s19 = sphi %s1825_s19, %s14_s19   ;;  %s1779_s18 = sphi %s1823_s18, %s2231_s18   ;;  %s1775_s17 = sphi %s1821_s17, %s2230_s17   ;;  %s1771_s16 = sphi %s1819_s16, %s2229_s16   ;;  %s1767_s15 = sphi %s1817_s15, %s2228_s15  }
   0x4   : > { %p35_p0 = scmp.ge.s32.totalorder %s33_s20, 2  ;;  %p50_p2 = scmp.eq.s32.totalorder %s1783_s19, 0 }
   0x5   : > { %s42_s23 = sadd.s32 1, %s1771_s16  ;;  %p1515_p5 = scmp.ge.s32.totalorder %s1783_s19, 2 }
   0x6   : > { %s2233_s20 = smov (%p35_p0, %s33_s20), 0  ;;  %p1848_p3 = por %p50_p2, %p49_p1 }
   0x7   : > { %s37_s22 = ssub.s32 %s1779_s18, %s2233_s20  ;;  %199 = sbr.rel (%p1515_p5) target bundleno = 30 (0x1e), region = 20 }
   0x8   : > { %p40_p4 = scmp.eq.s32.totalorder %s37_s22, 0 }
   0xa   : > { %s1856_s24 = scalar_select %p40_p4, %s1771_s16, %s42_s23  }
   0xc   : > { %202 = sbr.rel (!%p1848_p3) target bundleno = 18 (0x12), region = 24  ;;  %s204_s25 = sand.u32 (%p1848_p3), 1, %s1771_s16  }
   0xd   : > { %s1626_s26 = smul.u32 (%p1848_p3), 24, %s1779_s18  ;;  %s1516_s27 = sshll.u32 (%p1848_p3), %s204_s25, 3 }
   0xe   : > { %s206_s5 = scalar_lea.vmem (%p1848_p3), [#allocation6], %s1516_s27 }
   0xf   : > { %s212_s30 = scalar_lea.vmem (%p1848_p3), %s2222_s0, %s1626_s26 }
  0x10   : > { %v229_v0 = vld [vmem:[%s212_s30] sm:$0xf] (%p1848_p3)  ;;  %v231_v1 = vld [vmem:[%s212_s30 + $0xc] sm:$0xf] (%p1848_p3) }
  0x11   : > { %230 = vst [vmem:[%s206_s5] sm:$0xf] %v229_v0  ;;  %232 = vst [vmem:[%s206_s5 + $0x4] sm:$0xf] %v231_v1 }
  0x12 PF: > { %260 = sbr.rel (!%p1848_p3) target bundleno = 24 (0x18), region = 65  ;;  %s262_s6 = sand.u32 (%p1848_p3), 1, %s1771_s16  }
  0x13   : > { %s1519_s7 = smul.u32 (%p1848_p3), 24, %s1779_s18  ;;  %s1518_s8 = sshll.u32 (%p1848_p3), %s262_s6, 3 }
  0x14   : > { %s264_s12 = scalar_lea.vmem (%p1848_p3), [#allocation7], %s1518_s8 }
  0x15   : > { %s1402_s11 = scalar_lea.vmem (%p1848_p3), %s2223_s1, %s1519_s7 }
  0x16   : > { %v1520_v2 = vld [vmem:[%s1402_s11 + $0x4] sm:$0xf] (%p1848_p3)  ;;  %v1521_v3 = vld [vmem:[%s1402_s11 + $0x10] sm:$0xf] (%p1848_p3) }
  0x17   : > { %289 = vst [vmem:[%s264_s12] sm:$0xf] %v1520_v2  ;;  %291 = vst [vmem:[%s264_s12 + $0x4] sm:$0xf] %v1521_v3 }
  0x18 PF: > { %319 = sbr.rel (!%p1848_p3) target bundleno = 30 (0x1e), region = 106  ;;  %s321_s13 = sand.u32 (%p1848_p3), 1, %s1771_s16  }
  0x19   : > { %s1523_s14 = smul.u32 (%p1848_p3), 24, %s1779_s18  ;;  %s1522_s22 = sshll.u32 (%p1848_p3), %s321_s13, 3 }
  0x1a   : > { %s323_s27 = scalar_lea.vmem (%p1848_p3), [#allocation8], %s1522_s22 }
  0x1b   : > { %s1410_s26 = scalar_lea.vmem (%p1848_p3), %s2224_s2, %s1523_s14 }
  0x1c   : > { %v1524_v4 = vld [vmem:[%s1410_s26 + $0x8] sm:$0xf] (%p1848_p3)  ;;  %v1525_v5 = vld [vmem:[%s1410_s26 + $0x14] sm:$0xf] (%p1848_p3) }
  0x1d   : > { %348 = vst [vmem:[%s323_s27] sm:$0xf] %v1524_v4  ;;  %350 = vst [vmem:[%s323_s27 + $0x4] sm:$0xf] %v1525_v5 }
  0x1e PF: > { %p1526_p6 = scmp.ge.s32.totalorder %s1783_s19, 1  ;;  %p377_p7 = scmp.lt.s32.totalorder %s1783_s19, 3 }
  0x20   : > { %p378_p8 = pnand %p1526_p6, %p377_p7 }
  0x21   : > { %s384_s21 = sand.u32 (!%p378_p8), 1, %s1767_s15   ;;  %s1789_s6 = smov (!%p378_p8), 96  }
  0x22   : > { %381 = sbr.rel (%p378_p8) target bundleno = 1454 (0x5ae), region = 147  ;;  %s1884_s28 = sshll.u32 (!%p378_p8), %s384_s21, 3 }
  0x23   : > { %s386_s15 = scalar_lea.vmem (!%p378_p8), [#allocation6], %s1884_s28  ;;  %s393_s29 = scalar_lea.vmem (!%p378_p8), [#allocation7], %s1884_s28 }
  0x24   : > { %s1790_s7 = smov (!%p378_p8), 32   ;;  %s400_s8 = scalar_lea.vmem (!%p378_p8), [#allocation8], %s1884_s28 }
  0x25   : > { %s1791_s9 = smov (!%p378_p8), 64   ;;  %p456_p9 = scmp.lt.s32.totalorder (!%p378_p8), %s1775_s17, 1 }
  0x27   : > { %vm521_vm0 = vcmask 261120   ;;  %v1785_v6 = vmov 0.0   ;;  %vm472_vm1 = vcmask 257024   ;;  %vm1786_vm2 = vmmov 0   ;;  %v1908_v7 = vld [vmem:[%s386_s15] sm:$0xf] }
  0x28   : > { %1578 = vmatprep.subr.bf16.mxu0 %v1785_v6  ;;  %522 = vst.msk [vmem:[#allocation5] sm:$0xff] %vm521_vm0, %v1785_v6  ;;  %523 = vst.msk [vmem:[#allocation5 + $0x8] sm:$0xff] %vm521_vm0, %v1785_v6  ;;  %1580 = vmatprep.mubr.msk.bf16.mxu0 %vm1786_vm2, %v1785_v6  ;;  %v1910_v8 = vld [vmem:[%s386_s15 + $0x4] sm:$0xf]  ;;  %v1917_v9 = vld [vmem:[%s393_s29] sm:$0xff]   ;;  %vm504_vm3 = vcmask 7168  }
  0x29   : > { %524 = vst.msk [vmem:[#allocation5 + $0x10] sm:$0xff] %vm521_vm0, %v1785_v6  ;;  %525 = vst.msk [vmem:[#allocation5 + $0x18] sm:$0xff] %vm521_vm0, %v1785_v6  ;;  %1584 = vmatprep.subr.bf16.mxu1 %v1785_v6  ;;  %1586 = vmatprep.mubr.msk.bf16.mxu1 %vm1786_vm2, %v1785_v6  ;;  %v555_v10 = vsel %vm521_vm0, %v1917_v9, 0  ;;  %v1787_v12 = vmov -inf   ;;  %v1554_v13 = vld [vmem:[%s2225_s3] sm:$0xff]   ;;  %vm600_vm4 = vcmask 130048  }
  0x2a   : > { %526 = vst.msk [vmem:[#allocation5 + $0x20] sm:$0xff] %vm521_vm0, %v1785_v6  ;;  %527 = vst.msk [vmem:[#allocation5 + $0x28] sm:$0xff] %vm521_vm0, %v1785_v6  ;;  %1579 = vmatpush3.bf16.xpose.msra.mxu0 %v555_v10  ;;  %v1952_v14 = vunpack.c.l.bf16 %v1554_v13  ;;  %v1955_v17 = vunpack.c.h.bf16 %v1554_v13  ;;  %v1788_v24 = vmov 0   ;;  %v1990_v34 = vld [vmem:[%s400_s8] sm:$0xff]   ;;  %s2235_s17 = smov (!%p456_p9, %s1775_s17), 1  ;;  %vm1340_vm5 = vcmask 523264  }
  0x2b   : > { %528 = vst.msk [vmem:[#allocation5 + $0x30] sm:$0xff] %vm521_vm0, %v1785_v6  ;;  %529 = vst.msk [vmem:[#allocation5 + $0x38] sm:$0xff] %vm521_vm0, %v1785_v6  ;;  %1596 = vmatprep.subr.bf16.mxu0 %v1785_v6  ;;  %1674 = vset.pattern.permute.xlu1 %v1788_v24  ;;  %s1550_s10 = sshll.u32 %s2235_s17, 3  ;;  %vm1343_vm6 = vcmask 785408  }
  0x2c   : > { %473 = vst.msk [vmem:[#allocation2] sm:$0xf] %vm472_vm1, %v1908_v7  ;;  %474 = vst.msk [vmem:[#allocation2 + $0x4] sm:$0xf] %vm472_vm1, %v1910_v8  ;;  %1675 = vset.pattern.permute.xlu0 %v1788_v24  ;;  %1585 = vmatpush3.bf16.msra.mxu1 %v1990_v34  ;;  %s463_s13 = scalar_lea.vmem %s2226_s4, %s1550_s10 }
  0x2d   : > { %505 = vst.msk [vmem:[#allocation3] sm:$0xff] %vm504_vm3, %v1787_v12  ;;  %506 = vst.msk [vmem:[#allocation3 + $0x8] sm:$0xff] %vm504_vm3, %v1787_v12  ;;  %1590 = vmatprep.subr.bf16.mxu1 %v1785_v6 }
  0x2e   : > { %507 = vst.msk [vmem:[#allocation3 + $0x10] sm:$0xff] %vm504_vm3, %v1787_v12  ;;  %508 = vst.msk [vmem:[#allocation3 + $0x18] sm:$0xff] %vm504_vm3, %v1787_v12 }
  0x2f   : > { %509 = vst.msk [vmem:[#allocation3 + $0x20] sm:$0xff] %vm504_vm3, %v1787_v12  ;;  %510 = vst.msk [vmem:[#allocation3 + $0x28] sm:$0xff] %vm504_vm3, %v1787_v12 }
  0x30   : > { %511 = vst.msk [vmem:[#allocation3 + $0x30] sm:$0xff] %vm504_vm3, %v1787_v12  ;;  %512 = vst.msk [vmem:[#allocation3 + $0x38] sm:$0xff] %vm504_vm3, %v1787_v12 }
  0x31   : > { %513 = vst.msk [vmem:[#allocation4] sm:$0xff] %vm504_vm3, %v1785_v6  ;;  %514 = vst.msk [vmem:[#allocation4 + $0x8] sm:$0xff] %vm504_vm3, %v1785_v6 }
  0x32   : > { %515 = vst.msk [vmem:[#allocation4 + $0x10] sm:$0xff] %vm504_vm3, %v1785_v6  ;;  %516 = vst.msk [vmem:[#allocation4 + $0x18] sm:$0xff] %vm504_vm3, %v1785_v6 }
  0x33   : > { %v1692_v11 = vld [vmem:[#allocation2] sm:$0xff]   ;;  %517 = vst.msk [vmem:[#allocation4 + $0x20] sm:$0xff] %vm504_vm3, %v1785_v6  ;;  %518 = vst.msk [vmem:[#allocation4 + $0x28] sm:$0xff] %vm504_vm3, %v1785_v6 }
  0x34   : > { %1581 = vmatmul.mubr.msk.bf16.vlgmr.msra.gmra.mxu0 %vm521_vm0, %v1692_v11  ;;  %519 = vst.msk [vmem:[#allocation4 + $0x30] sm:$0xff] %vm504_vm3, %v1785_v6  ;;  %520 = vst.msk [vmem:[#allocation4 + $0x38] sm:$0xff] %vm504_vm3, %v1785_v6  ;;  %v1964_v25 = vld [vmem:[#allocation3] sm:$0xff]  ;;  %v1969_v28 = vld [vmem:[#allocation3 + $0x8] sm:$0xff] }
  0x35   : > { %1598 = vmatprep.mubr.msk.bf16.mxu0 %vm1786_vm2, %v1785_v6 }
  0xf4   : > { %v591_v15 = vpop.f32.mrf.mxu0 }
  0xf5   : > { %v592_v16 = vadd.f32 %v1952_v14, %v591_v15 }
  0xf6   : > { %v1582_v18 = vpop.f32.mrf.mxu0 }
  0xf7   : > { %v601_v19 = vsel %vm600_vm4, %v592_v16, -inf }
  0xf8   : > { %602 = vmax.xlane.f32.xlu0 %v601_v19  ;;  %v594_v20 = vpop.f32.mrf.mxu0 }
  0xf9   : > { %v595_v21 = vadd.f32 %v1955_v17, %v594_v20 }
  0xfa   : > { %v1583_v22 = vpop.f32.mrf.mxu0 }
  0xfb   : > { %v604_v23 = vsel %vm600_vm4, %v595_v21, -inf }
  0xfc   : > { %605 = vmax.xlane.f32.xlu0 %v604_v23 }
 0x112   : > { %477 = vrot.lane.b32.xlu0 %v1908_v7, %s1789_s6 }
 0x116   : > { %497 = vrot.lane.b32.xlu0 %v1910_v8, %s1790_s7 }
 0x181   : > { %v603_v26 = vpop.xlane.xlu0 %602 }
 0x182   : > { %v1967_v27 = vmax.f32 %v1964_v25, %v603_v26  ;;  %v2064_v26 = vld [vmem:[#allocation3 + $0x10] sm:$0xff] }
 0x184   : > { %v609_v29 = vsub.f32 %v1964_v25, %v1967_v27  ;;  %715 = vst.msk [vmem:[#allocation3] sm:$0xff] %vm504_vm3, %v1967_v27  ;;  %617 = vperm.xlu1 %1674, %v1967_v27  }
 0x185   : > { %v606_v30 = vpop.xlane.xlu0 %605 }
 0x186   : > { %v1977_v31 = vmax.f32 %v1969_v28, %v606_v30 }
 0x188   : > { %v610_v32 = vsub.f32 %v1969_v28, %v1977_v31  ;;  %716 = vst.msk [vmem:[#allocation3 + $0x8] sm:$0xff] %vm504_vm3, %v1977_v31  ;;  %622 = vperm.xlu1 %1674, %v1977_v31  }
 0x189   : > { %v478_v33 = vpop.permute.xlu0 %477 }
 0x18a   : > { %484 = vst.msk [vmem:[#allocation2 + $0x8] sm:$0xf] %vm472_vm1, %v478_v33  ;;  %v2069_v33 = vld [vmem:[#allocation3 + $0x18] sm:$0xff] }
 0x18c   : > { %479 = vrot.lane.b32.xlu1 %v1910_v8, %s1789_s6 }
 0x18d   : > { %v498_v35 = vpop.permute.xlu0 %497 }
 0x18e   : > { %503 = vst.msk [vmem:[#allocation2 + $0x1c] sm:$0xf] %vm472_vm1, %v498_v35 }
 0x190   : > { %725 = vrot.lane.b32.xlu1 %v1917_v9, %s1789_s6 }
 0x194   : > { %486 = vrot.lane.b32.xlu1 %v1908_v7, %s1791_s9 }
 0x198   : > { %488 = vrot.lane.b32.xlu1 %v1910_v8, %s1791_s9 }
 0x19c   : > { %899 = vrot.lane.b32.xlu1 %v1917_v9, %s1791_s9 }
 0x1a0   : > { %495 = vrot.lane.b32.xlu1 %v1908_v7, %s1790_s7 }
 0x1a4   : > { %1073 = vrot.lane.b32.xlu1 %v1917_v9, %s1790_s7 }
 0x1ff   : > { %v618_v36 = vpop.permute.xlu1 %617 }
 0x200   : > { %v625_v37 = vsub.f32 %v592_v16, %v618_v36 }
 0x202   : > { %v627_v38 = vmul.f32 1.442695, %v625_v37  ;;  %v2079_v37 = vld [vmem:[#allocation3 + $0x20] sm:$0xff] }
 0x203   : > { %v623_v39 = vpop.permute.xlu1 %622 }
 0x204   : > { %v626_v40 = vsub.f32 %v595_v21, %v623_v39  ;;  %1697 = vpow2.f32 %v627_v38 }
 0x206   : > { %v629_v41 = vmul.f32 1.442695, %v626_v40 }
 0x207   : > { %v480_v42 = vpop.permute.xlu1 %479 }
 0x208   : > { %1699 = vpow2.f32 %v629_v41  ;;  %485 = vst.msk [vmem:[#allocation2 + $0xc] sm:$0xf] %vm472_vm1, %v480_v42  ;;  %v2089_v41 = vld [vmem:[#allocation3 + $0x28] sm:$0xff] }
 0x20b   : > { %v726_v43 = vpop.permute.xlu1 %725 }
 0x20c   : > { %v731_v50 = vsel %vm521_vm0, %v726_v43, 0 }
 0x20f   : > { %v487_v44 = vpop.permute.xlu1 %486  ;;  %v1694_v53 = vld [vmem:[#allocation2 + $0x8] sm:$0xff]  }
 0x210   : > { %493 = vst.msk [vmem:[#allocation2 + $0x10] sm:$0xf] %vm472_vm1, %v487_v44 }
 0x211   : > { %v2007_v46 = vpop.eup %1697 }
 0x213   : > { %v489_v45 = vpop.permute.xlu1 %488 }
 0x214   : > { %494 = vst.msk [vmem:[#allocation2 + $0x14] sm:$0xf] %vm472_vm1, %v489_v45  ;;  %v2099_v45 = vld [vmem:[#allocation3 + $0x30] sm:$0xff] }
 0x215   : > { %v2010_v47 = vpop.eup %1699 }
 0x216   : > { %v660_v48 = vpack.c.bf16 %v2010_v47, %v2007_v46 }
 0x217   : > { %v900_v49 = vpop.permute.xlu1 %899 }
 0x218   : > { %1587 = vmatmul.mubr.msk.bf16.vlgmr.msra.gmra.mxu1 %vm600_vm4, %v660_v48  ;;  %v905_v52 = vsel %vm521_vm0, %v900_v49, 0 }
 0x219   : > { %1591 = vmatpush3.bf16.xpose.msra.mxu1 %v731_v50  ;;  %1592 = vmatprep.mubr.msk.bf16.mxu1 %vm1786_vm2, %v1785_v6 }
 0x21a   : > { %1602 = vmatprep.subr.bf16.mxu1 %v1785_v6 }
 0x21b   : > { %v496_v51 = vpop.permute.xlu1 %495  ;;  %v1695_v56 = vld [vmem:[#allocation2 + $0x10] sm:$0xff]  }
 0x21c   : > { %502 = vst.msk [vmem:[#allocation2 + $0x18] sm:$0xf] %vm472_vm1, %v496_v51  ;;  %v2109_v51 = vld [vmem:[#allocation3 + $0x38] sm:$0xff] }
 0x21f   : > { %v1074_v54 = vpop.permute.xlu1 %1073 }
 0x220   : > { %1593 = vmatmul.mubr.msk.bf16.vlgmr.msra.gmra.mxu1 %vm521_vm0, %v1694_v53  ;;  %v1079_v55 = vsel %vm521_vm0, %v1074_v54, 0 }
 0x221   : > { %1603 = vmatpush3.bf16.xpose.msra.mxu1 %v905_v52  ;;  %1604 = vmatprep.mubr.msk.bf16.mxu1 %vm1786_vm2, %v1785_v6 }
 0x222   : > { %1614 = vmatprep.subr.bf16.mxu1 %v1785_v6 }
 0x223   : > { %v1696_v57 = vld [vmem:[#allocation2 + $0x18] sm:$0xff]  }
 0x228   : > { %1605 = vmatmul.mubr.msk.bf16.vlgmr.msra.gmra.mxu1 %vm521_vm0, %v1695_v56  ;;  %v635_v56 = vsel %vm600_vm4, %v2007_v46, 0.0 }
 0x229   : > { %1615 = vmatpush3.bf16.xpose.msra.mxu1 %v1079_v55  ;;  %1616 = vmatprep.mubr.msk.bf16.mxu1 %vm1786_vm2, %v1785_v6 }
 0x230   : > { %1617 = vmatmul.mubr.msk.bf16.vlgmr.msra.gmra.mxu1 %vm521_vm0, %v1696_v57  ;;  %v638_v57 = vsel %vm600_vm4, %v2010_v47, 0.0 }
 0x2d8   : > { %v2030_v58 = vpop.f32.mrf.mxu1 }
 0x2da   : > { %v1588_v59 = vpop.f32.mrf.mxu1 }
 0x2dc   : > { %v2032_v60 = vpop.f32.mrf.mxu1 }
 0x2de   : > { %v1589_v61 = vpop.f32.mrf.mxu1 }
 0x2e0   : > { %v767_v62 = vpop.f32.mrf.mxu1 }
 0x2e1   : > { %v2035_v63 = vadd.f32 %v1952_v14, %v767_v62 }
 0x2e2   : > { %v1594_v0 = vpop.f32.mrf.mxu1 }
 0x2e3   : > { %v777_v1 = vsel %vm600_vm4, %v2035_v63, -inf }
 0x2e4   : > { %778 = vmax.xlane.f32.xlu0 %v777_v1  ;;  %v770_v2 = vpop.f32.mrf.mxu1 }
 0x2e5   : > { %v2040_v3 = vadd.f32 %v1955_v17, %v770_v2 }
 0x2e6   : > { %v1595_v4 = vpop.f32.mrf.mxu1 }
 0x2e7   : > { %v780_v5 = vsel %vm600_vm4, %v2040_v3, -inf }
 0x2e8   : > { %781 = vmax.xlane.f32.xlu1 %v780_v5  ;;  %v941_v7 = vpop.f32.mrf.mxu1 }
 0x2e9   : > { %v2045_v8 = vadd.f32 %v1952_v14, %v941_v7 }
 0x2ea   : > { %v1606_v9 = vpop.f32.mrf.mxu1 }
 0x2eb   : > { %v951_v10 = vsel %vm600_vm4, %v2045_v8, -inf }
 0x2ec   : > { %952 = vmax.xlane.f32.xlu0 %v951_v10  ;;  %v944_v11 = vpop.f32.mrf.mxu1 }
 0x2ed   : > { %v2050_v12 = vadd.f32 %v1955_v17, %v944_v11 }
 0x2ee   : > { %v1607_v13 = vpop.f32.mrf.mxu1 }
 0x2ef   : > { %v954_v15 = vsel %vm600_vm4, %v2050_v12, -inf }
 0x2f0   : > { %955 = vmax.xlane.f32.xlu0 %v954_v15  ;;  %v1115_v16 = vpop.f32.mrf.mxu1 }
 0x2f1   : > { %v2055_v18 = vadd.f32 %v1952_v14, %v1115_v16 }
 0x2f2   : > { %v1618_v19 = vpop.f32.mrf.mxu1 }
 0x2f3   : > { %v1125_v20 = vsel %vm600_vm4, %v2055_v18, -inf }
 0x2f4   : > { %1126 = vmax.xlane.f32.xlu1 %v1125_v20  ;;  %v1118_v21 = vpop.f32.mrf.mxu1 }
 0x2f5   : > { %v2060_v22 = vadd.f32 %v1955_v17, %v1118_v21 }
 0x2f6   : > { %v1619_v23 = vpop.f32.mrf.mxu1 }
 0x2f7   : > { %v1128_v24 = vsel %vm600_vm4, %v2060_v22, -inf }
 0x2f8   : > { %1129 = vmax.xlane.f32.xlu0 %v1128_v24 }
 0x36d   : > { %v779_v30 = vpop.xlane.xlu0 %778 }
 0x36e   : > { %v2067_v14 = vmax.f32 %v2064_v26, %v779_v30 }
 0x370   : > { %v785_v35 = vsub.f32 %v2064_v26, %v2067_v14  ;;  %889 = vst.msk [vmem:[#allocation3 + $0x10] sm:$0xff] %vm504_vm3, %v2067_v14  ;;  %793 = vperm.xlu1 %1674, %v2067_v14  }
 0x371   : > { %v782_v17 = vpop.xlane.xlu1 %781 }
 0x372   : > { %v2077_v36 = vmax.f32 %v2069_v33, %v782_v17 }
 0x374   : > { %v786_v38 = vsub.f32 %v2069_v33, %v2077_v36  ;;  %890 = vst.msk [vmem:[#allocation3 + $0x18] sm:$0xff] %vm504_vm3, %v2077_v36  ;;  %798 = vperm.xlu0 %1675, %v2077_v36  }
 0x375   : > { %v953_v39 = vpop.xlane.xlu0 %952 }
 0x376   : > { %v2087_v40 = vmax.f32 %v2079_v37, %v953_v39  ;;  %v613_v39 = vmul.f32 1.442695, %v610_v32  ;;  %v631_v32 = vld [vmem:[#allocation4] sm:$0xff] }
 0x378   : > { %v959_v42 = vsub.f32 %v2079_v37, %v2087_v40  ;;  %1063 = vst.msk [vmem:[#allocation3 + $0x20] sm:$0xff] %vm504_vm3, %v2087_v40  ;;  %967 = vperm.xlu1 %1674, %v2087_v40  }
 0x379   : > { %v956_v43 = vpop.xlane.xlu0 %955 }
 0x37a   : > { %v2097_v44 = vmax.f32 %v2089_v41, %v956_v43  ;;  %v961_v24 = vmul.f32 1.442695, %v959_v42 }
 0x37c   : > { %v960_v48 = vsub.f32 %v2089_v41, %v2097_v44  ;;  %1064 = vst.msk [vmem:[#allocation3 + $0x28] sm:$0xff] %vm504_vm3, %v2097_v44  ;;  %972 = vperm.xlu1 %1674, %v2097_v44  }
 0x37d   : > { %v1127_v49 = vpop.xlane.xlu1 %1126 }
 0x37e   : > { %v2107_v50 = vmax.f32 %v2099_v45, %v1127_v49  ;;  %v963_v17 = vmul.f32 1.442695, %v960_v48 }
 0x380   : > { %v1133_v52 = vsub.f32 %v2099_v45, %v2107_v50  ;;  %1237 = vst.msk [vmem:[#allocation3 + $0x30] sm:$0xff] %vm504_vm3, %v2107_v50  ;;  %1141 = vperm.xlu1 %1674, %v2107_v50  }
 0x381   : > { %v1130_v53 = vpop.xlane.xlu0 %1129 }
 0x382   : > { %v2117_v54 = vmax.f32 %v2109_v51, %v1130_v53  ;;  %v1135_v41 = vmul.f32 1.442695, %v1133_v52 }
 0x384   : > { %v1134_v55 = vsub.f32 %v2109_v51, %v2117_v54  ;;  %1238 = vst.msk [vmem:[#allocation3 + $0x38] sm:$0xff] %vm504_vm3, %v2117_v54  ;;  %1146 = vperm.xlu1 %1674, %v2117_v54   ;;  %v632_v54 = vld [vmem:[#allocation4 + $0x8] sm:$0xff] }
 0x386   : > { %v1137_v28 = vmul.f32 1.442695, %v1134_v55 }
 0x388   : > { %838 = vrot.lane.b32.xlu1 %v1990_v34, %s1789_s6 }
 0x38c   : > { %1012 = vrot.lane.b32.xlu1 %v1990_v34, %s1791_s9 }
 0x390   : > { %1186 = vrot.lane.b32.xlu1 %v1990_v34, %s1790_s7 }
 0x393   : > { %636 = vadd.xlane.f32.xlu0 %v635_v56 }
 0x3b4   : > { %639 = vadd.xlane.f32.xlu1 %v638_v57 }
 0x3eb   : > { %v794_v59 = vpop.permute.xlu1 %793 }
 0x3ec   : > { %v801_v61 = vsub.f32 %v2035_v63, %v794_v59 }
 0x3ee   : > { %v803_v62 = vmul.f32 1.442695, %v801_v61 }
 0x3ef   : > { %v799_v0 = vpop.permute.xlu0 %798 }
 0x3f0   : > { %1701 = vpow2.f32 %v803_v62  ;;  %v802_v1 = vsub.f32 %v2040_v3, %v799_v0  ;;  %v808_v62 = vld [vmem:[#allocation4 + $0x10] sm:$0xff] }
 0x3f2   : > { %v805_v2 = vmul.f32 1.442695, %v802_v1 }
 0x3f3   : > { %v968_v4 = vpop.permute.xlu1 %967 }
 0x3f4   : > { %1703 = vpow2.f32 %v805_v2  ;;  %v975_v34 = vsub.f32 %v2045_v8, %v968_v4  ;;  %v809_v2 = vld [vmem:[#allocation4 + $0x18] sm:$0xff] }
 0x3f6   : > { %v977_v5 = vmul.f32 1.442695, %v975_v34 }
 0x3f7   : > { %v973_v46 = vpop.permute.xlu1 %972 }
 0x3f8   : > { %1705 = vpow2.f32 %v977_v5  ;;  %v976_v7 = vsub.f32 %v2050_v12, %v973_v46  ;;  %v611_v12 = vmul.f32 1.442695, %v609_v29  ;;  %v982_v46 = vld [vmem:[#allocation4 + $0x20] sm:$0xff] }
 0x3fa   : > { %v979_v47 = vmul.f32 1.442695, %v976_v7 }
 0x3fb   : > { %v1142_v9 = vpop.permute.xlu1 %1141 }
 0x3fc   : > { %1707 = vpow2.f32 %v979_v47  ;;  %v1149_v63 = vsub.f32 %v2055_v18, %v1142_v9  ;;  %v646_v47 = vld [vmem:[#allocation5] sm:$0xff] }
 0x3fd   : > { %v1702_v10 = vpop.eup %1701 }
 0x3fe   : > { %v1151_v11 = vmul.f32 1.442695, %v1149_v63  ;;  %v812_v13 = vsel %vm600_vm4, %v1702_v10, 0.0 }
 0x3ff   : > { %813 = vadd.xlane.f32.xlu0 %v812_v13  ;;  %v1147_v3 = vpop.permute.xlu1 %1146 }
 0x400   : > { %1709 = vpow2.f32 %v1151_v11  ;;  %v1150_v15 = vsub.f32 %v2060_v22, %v1147_v3  ;;  %v787_v22 = vmul.f32 1.442695, %v785_v35  ;;  %v983_v11 = vld [vmem:[#allocation4 + $0x28] sm:$0xff] }
 0x401   : > { %v1704_v8 = vpop.eup %1703 }
 0x402   : > { %v1153_v16 = vmul.f32 1.442695, %v1150_v15  ;;  %v815_v19 = vsel %vm600_vm4, %v1704_v8, 0.0  ;;  %v837_v21 = vpack.c.bf16 %v1704_v8, %v1702_v10 }
 0x403   : > { %v839_v20 = vpop.permute.xlu1 %838  ;;  %816 = vadd.xlane.f32.xlu1 %v815_v19 }
 0x404   : > { %1711 = vpow2.f32 %v1153_v16  ;;  %1597 = vmatpush3.bf16.msra.mxu0 %v839_v20 }
 0x405   : > { %v1706_v18 = vpop.eup %1705  ;;  %1608 = vmatprep.subr.bf16.mxu0 %v1785_v6  ;;  %1713 = vpow2.f32 %v611_v12  ;;  %v1156_v12 = vld [vmem:[#allocation4 + $0x30] sm:$0xff] }
 0x406   : > { %v986_v23 = vsel %vm600_vm4, %v1706_v18, 0.0  ;;  %1715 = vpow2.f32 %v787_v22  ;;  %v1157_v22 = vld [vmem:[#allocation4 + $0x38] sm:$0xff] }
 0x407   : > { %1599 = vmatmul.mubr.msk.bf16.vlgmr.msra.gmra.mxu0 %vm600_vm4, %v837_v21  ;;  %987 = vadd.xlane.f32.xlu1 %v986_v23  ;;  %v1013_v25 = vpop.permute.xlu1 %1012  ;;  %1717 = vpow2.f32 %v961_v24 }
 0x408   : > { %1609 = vmatpush3.bf16.msra.mxu0 %v1013_v25  ;;  %1610 = vmatprep.mubr.msk.bf16.mxu0 %vm1786_vm2, %v1785_v6  ;;  %1719 = vpow2.f32 %v963_v17 }
 0x409   : > { %v1708_v27 = vpop.eup %1707  ;;  %1620 = vmatprep.subr.bf16.mxu0 %v1785_v6  ;;  %1721 = vpow2.f32 %v613_v39 }
 0x40a   : > { %v989_v29 = vsel %vm600_vm4, %v1708_v27, 0.0  ;;  %v1011_v30 = vpack.c.bf16 %v1708_v27, %v1706_v18  ;;  %1723 = vpow2.f32 %v1135_v41 }
 0x40b   : > { %990 = vadd.xlane.f32.xlu1 %v989_v29  ;;  %v1187_v14 = vpop.permute.xlu1 %1186 }
 0x40d   : > { %v1710_v26 = vpop.eup %1709 }
 0x40e   : > { %v1160_v35 = vsel %vm600_vm4, %v1710_v26, 0.0 }
 0x40f   : > { %1611 = vmatmul.mubr.msk.bf16.vlgmr.msra.gmra.mxu0 %vm600_vm4, %v1011_v30  ;;  %1161 = vadd.xlane.f32.xlu1 %v1160_v35 }
 0x410   : > { %1621 = vmatpush3.bf16.msra.mxu0 %v1187_v14  ;;  %1622 = vmatprep.mubr.msk.bf16.mxu0 %vm1786_vm2, %v1785_v6  ;;  %v789_v6 = vmul.f32 1.442695, %v786_v38 }
 0x411   : > { %v1712_v37 = vpop.eup %1711 }
 0x412   : > { %v1163_v40 = vsel %vm600_vm4, %v1712_v37, 0.0  ;;  %v1714_v42 = vpop.eup %1713  ;;  %v1185_v43 = vpack.c.bf16 %v1712_v37, %v1710_v26  ;;  %1725 = vpow2.f32 %v789_v6  ;;  %v647_v26 = vld [vmem:[#allocation5 + $0x8] sm:$0xff] }
 0x413   : > { %1164 = vadd.xlane.f32.xlu1 %v1163_v40  ;;  %v1716_v31 = vpop.eup %1715  ;;  %1727 = vpow2.f32 %v1137_v28  ;;  %v633_v44 = vmul.f32 %v1714_v42, %v631_v32  ;;  %v823_v32 = vld [vmem:[#allocation5 + $0x10] sm:$0xff] }
 0x414   : > { %v1718_v45 = vpop.eup %1717  ;;  %v810_v0 = vmul.f32 %v1716_v31, %v808_v62 }
 0x415   : > { %650 = vperm.xlu0 %1675, %v1714_v42   ;;  %v1720_v33 = vpop.eup %1719  ;;  %v984_v9 = vmul.f32 %v1718_v45, %v982_v46  ;;  %v1172_v46 = vld [vmem:[#allocation5 + $0x38] sm:$0xff] }
 0x416   : > { %v1722_v36 = vpop.eup %1721  ;;  %v985_v16 = vmul.f32 %v1720_v33, %v983_v11 }
 0x417   : > { %1623 = vmatmul.mubr.msk.bf16.vlgmr.msra.gmra.mxu0 %vm600_vm4, %v1185_v43  ;;  %v1724_v38 = vpop.eup %1723  ;;  %v634_v55 = vmul.f32 %v1722_v36, %v632_v54 }
 0x418   : > { %v1158_v21 = vmul.f32 %v1724_v38, %v1156_v12 }
 0x419   : > { %827 = vperm.xlu0 %1675, %v1716_v31  }
 0x41c   : > { %v637_v48 = vpop.xlane.xlu0 %636 }
 0x41d   : > { %v641_v49 = vadd.f32 %v637_v48, %v633_v44  ;;  %1001 = vperm.xlu0 %1675, %v1718_v45  }
 0x41f   : > { %644 = vst.msk [vmem:[#allocation4] sm:$0xff] %vm504_vm3, %v641_v49  ;;  %v1726_v51 = vpop.eup %1725 }
 0x420   : > { %v1728_v52 = vpop.eup %1727  ;;  %v811_v34 = vmul.f32 %v1726_v51, %v809_v2 }
 0x421   : > { %1006 = vperm.xlu0 %1675, %v1720_v33   ;;  %v1159_v29 = vmul.f32 %v1728_v52, %v1157_v22 }
 0x424   : > { %655 = vperm.xlu1 %1674, %v1722_v36  }
 0x425   : > { %1175 = vperm.xlu0 %1675, %v1724_v38  }
 0x426   : > { %v1244_v50 = vld [vmem:[#allocation4] sm:$0xff] }
 0x427   : > { %1729 = vrcp.f32 %v1244_v50  ;;  %v997_v50 = vld [vmem:[#allocation5 + $0x20] sm:$0xff] }
 0x428   : > { %832 = vperm.xlu1 %1674, %v1726_v51  }
 0x429   : > { %1180 = vperm.xlu0 %1675, %v1728_v52  }
 0x434   : > { %v1730_v53 = vpop.eup %1729 }
 0x435   : > { %1250 = vperm.xlu0 %1675, %v1730_v53  }
 0x43d   : > { %v640_v56 = vpop.xlane.xlu1 %639 }
 0x43e   : > { %v642_v57 = vadd.f32 %v640_v56, %v634_v55  ;;  %v998_v56 = vld [vmem:[#allocation5 + $0x28] sm:$0xff] }
 0x440   : > { %645 = vst.msk [vmem:[#allocation4 + $0x8] sm:$0xff] %vm504_vm3, %v642_v57 }
 0x447   : > { %v1245_v59 = vld [vmem:[#allocation4 + $0x8] sm:$0xff] }
 0x448   : > { %1731 = vrcp.f32 %v1245_v59 }
 0x455   : > { %v1732_v61 = vpop.eup %1731 }
 0x456   : > { %1255 = vperm.xlu1 %1674, %v1732_v61  }
 0x488   : > { %v814_v1 = vpop.xlane.xlu0 %813 }
 0x489   : > { %v818_v4 = vadd.f32 %v814_v1, %v810_v0  ;;  %v1171_v1 = vld [vmem:[#allocation5 + $0x30] sm:$0xff] }
 0x48b   : > { %820 = vst.msk [vmem:[#allocation4 + $0x10] sm:$0xff] %vm504_vm3, %v818_v4 }
 0x48c   : > { %v817_v5 = vpop.xlane.xlu1 %816 }
 0x48d   : > { %v819_v7 = vadd.f32 %v817_v5, %v811_v34 }
 0x48f   : > { %821 = vst.msk [vmem:[#allocation4 + $0x18] sm:$0xff] %vm504_vm3, %v819_v7 }
 0x490   : > { %v988_v63 = vpop.xlane.xlu1 %987  ;;  %v651_v10 = vpop.permute.xlu0 %650 }
 0x491   : > { %v992_v13 = vadd.f32 %v988_v63, %v984_v9  ;;  %v658_v3 = vmul.f32 %v651_v10, %v646_v47 }
 0x492   : > { %v1262_v15 = vld [vmem:[#allocation4 + $0x10] sm:$0xff] }
 0x493   : > { %994 = vst.msk [vmem:[#allocation4 + $0x20] sm:$0xff] %vm504_vm3, %v992_v13  ;;  %v711_v8 = vadd.f32 %v2030_v58, %v658_v3  ;;  %1733 = vrcp.f32 %v1262_v15 }
 0x494   : > { %v991_v19 = vpop.xlane.xlu1 %990  ;;  %v828_v31 = vpop.permute.xlu0 %827 }
 0x495   : > { %713 = vst.msk [vmem:[#allocation5] sm:$0xff] %vm521_vm0, %v711_v8  ;;  %v993_v20 = vadd.f32 %v991_v19, %v985_v16  ;;  %v835_v45 = vmul.f32 %v828_v31, %v823_v32 }
 0x496   : > { %v1263_v18 = vld [vmem:[#allocation4 + $0x18] sm:$0xff] }
 0x497   : > { %995 = vst.msk [vmem:[#allocation4 + $0x28] sm:$0xff] %vm504_vm3, %v993_v20  ;;  %1735 = vrcp.f32 %v1263_v18 }
 0x498   : > { %v1162_v23 = vpop.xlane.xlu1 %1161  ;;  %v1002_v44 = vpop.permute.xlu0 %1001 }
 0x499   : > { %v1166_v25 = vadd.f32 %v1162_v23, %v1158_v21  ;;  %v1009_v55 = vmul.f32 %v1002_v44, %v997_v50 }
 0x49a   : > { %v1280_v27 = vld [vmem:[#allocation4 + $0x20] sm:$0xff] }
 0x49b   : > { %1168 = vst.msk [vmem:[#allocation4 + $0x30] sm:$0xff] %vm504_vm3, %v1166_v25  ;;  %1737 = vrcp.f32 %v1280_v27 }
 0x49c   : > { %v1165_v58 = vpop.xlane.xlu1 %1164  ;;  %v1007_v51 = vpop.permute.xlu0 %1006 }
 0x49d   : > { %v1167_v24 = vadd.f32 %v1165_v58, %v1159_v29  ;;  %v1010_v0 = vmul.f32 %v1007_v51, %v998_v56 }
 0x49e   : > { %v1281_v30 = vld [vmem:[#allocation4 + $0x28] sm:$0xff] }
 0x49f   : > { %1169 = vst.msk [vmem:[#allocation4 + $0x38] sm:$0xff] %vm504_vm3, %v1167_v24  ;;  %1739 = vrcp.f32 %v1281_v30 }
 0x4a0   : > { %v1734_v14 = vpop.eup %1733  ;;  %v656_v35 = vpop.permute.xlu1 %655 }
 0x4a1   : > { %v659_v17 = vmul.f32 %v656_v35, %v647_v26  ;;  %1268 = vperm.xlu0 %1675, %v1734_v14   ;;  %v1176_v61 = vpop.permute.xlu0 %1175 }
 0x4a2   : > { %v1298_v37 = vld [vmem:[#allocation4 + $0x30] sm:$0xff]  ;;  %v1183_v5 = vmul.f32 %v1176_v61, %v1171_v1 }
 0x4a3   : > { %v712_v39 = vadd.f32 %v2032_v60, %v659_v17  ;;  %1741 = vrcp.f32 %v1298_v37  ;;  %v824_v60 = vld [vmem:[#allocation5 + $0x18] sm:$0xff] }
 0x4a4   : > { %v1736_v40 = vpop.eup %1735  ;;  %v833_v48 = vpop.permute.xlu1 %832 }
 0x4a5   : > { %714 = vst.msk [vmem:[#allocation5 + $0x8] sm:$0xff] %vm521_vm0, %v712_v39  ;;  %1273 = vperm.xlu1 %1674, %v1736_v40   ;;  %v836_v38 = vmul.f32 %v833_v48, %v824_v60  ;;  %v1181_v7 = vpop.permute.xlu0 %1180 }
 0x4a6   : > { %v1299_v41 = vld [vmem:[#allocation4 + $0x38] sm:$0xff]  ;;  %v1184_v10 = vmul.f32 %v1181_v7, %v1172_v46 }
 0x4a7   : > { %1743 = vrcp.f32 %v1299_v41 }
 0x4a8   : > { %v1738_v42 = vpop.eup %1737 }
 0x4a9   : > { %1286 = vperm.xlu0 %1675, %v1738_v42  }
 0x4ac   : > { %v1740_v43 = vpop.eup %1739  ;;  %v1243_v31 = vld [vmem:[#allocation5 + $0x8] sm:$0xff] }
 0x4ad   : > { %1291 = vperm.xlu1 %1674, %v1740_v43  }
 0x4b0   : > { %v1742_v6 = vpop.eup %1741  ;;  %v1251_v15 = vpop.permute.xlu0 %1250 }
 0x4b1   : > { %1304 = vperm.xlu0 %1675, %v1742_v6  }
 0x4b4   : > { %v1744_v28 = vpop.eup %1743 }
 0x4b5   : > { %1309 = vperm.xlu1 %1674, %v1744_v28   ;;  %v1242_v28 = vld [vmem:[#allocation5] sm:$0xff] }
 0x4c7   : > { %v878_v49 = vpop.f32.mrf.mxu0 }
 0x4c8   : > { %v885_v33 = vadd.f32 %v878_v49, %v835_v45  ;;  %v1258_v45 = vmul.f32 %v1251_v15, %v1242_v28 }
 0x4c9   : > { %v1600_v36 = vpop.f32.mrf.mxu0 }
 0x4ca   : > { %887 = vst.msk [vmem:[#allocation5 + $0x10] sm:$0xff] %vm521_vm0, %v885_v33 }
 0x4cb   : > { %v881_v52 = vpop.f32.mrf.mxu0 }
 0x4cc   : > { %v886_v53 = vadd.f32 %v881_v52, %v836_v38 }
 0x4cd   : > { %v1601_v54 = vpop.f32.mrf.mxu0 }
 0x4ce   : > { %888 = vst.msk [vmem:[#allocation5 + $0x18] sm:$0xff] %vm521_vm0, %v886_v53 }
 0x4cf   : > { %v1052_v57 = vpop.f32.mrf.mxu0 }
 0x4d0   : > { %v1059_v59 = vadd.f32 %v1052_v57, %v1009_v55 }
 0x4d1   : > { %v1612_v62 = vpop.f32.mrf.mxu0  ;;  %v1256_v8 = vpop.permute.xlu1 %1255  ;;  %v1260_v19 = vld [vmem:[#allocation5 + $0x10] sm:$0xff] }
 0x4d2   : > { %1061 = vst.msk [vmem:[#allocation5 + $0x20] sm:$0xff] %vm521_vm0, %v1059_v59  ;;  %v1259_v60 = vmul.f32 %v1256_v8, %v1243_v31 }
 0x4d3   : > { %v1055_v2 = vpop.f32.mrf.mxu0 }
 0x4d4   : > { %v1060_v4 = vadd.f32 %v1055_v2, %v1010_v0 }
 0x4d5   : > { %v1613_v34 = vpop.f32.mrf.mxu0  ;;  %v1261_v20 = vld [vmem:[#allocation5 + $0x18] sm:$0xff] }
 0x4d6   : > { %1062 = vst.msk [vmem:[#allocation5 + $0x28] sm:$0xff] %vm521_vm0, %v1060_v4 }
 0x4d7   : > { %v1226_v47 = vpop.f32.mrf.mxu0 }
 0x4d8   : > { %v1233_v9 = vadd.f32 %v1226_v47, %v1183_v5 }
 0x4d9   : > { %v1624_v63 = vpop.f32.mrf.mxu0  ;;  %v1278_v25 = vld [vmem:[#allocation5 + $0x20] sm:$0xff] }
 0x4da   : > { %1235 = vst.msk [vmem:[#allocation5 + $0x30] sm:$0xff] %vm521_vm0, %v1233_v9 }
 0x4db   : > { %v1229_v11 = vpop.f32.mrf.mxu0 }
 0x4dc   : > { %v1234_v13 = vadd.f32 %v1229_v11, %v1184_v10 }
 0x4dd   : > { %v1625_v3 = vpop.f32.mrf.mxu0  ;;  %v1279_v29 = vld [vmem:[#allocation5 + $0x28] sm:$0xff] }
 0x4de   : > { %1236 = vst.msk [vmem:[#allocation5 + $0x38] sm:$0xff] %vm521_vm0, %v1234_v13 }
 0x4e1   : > { %v1296_v14 = vld [vmem:[#allocation5 + $0x30] sm:$0xff] }
 0x4e5   : > { %v1297_v17 = vld [vmem:[#allocation5 + $0x38] sm:$0xff] }
 0x51c   : > { %v1269_v16 = vpop.permute.xlu0 %1268 }
 0x51d   : > { %v1276_v18 = vmul.f32 %v1269_v16, %v1260_v19 }
 0x520   : > { %v1274_v12 = vpop.permute.xlu1 %1273 }
 0x521   : > { %v1277_v21 = vmul.f32 %v1274_v12, %v1261_v20 }
 0x523   : > { %v1676_v23 = vpack.i.bf16 %v1277_v21, %v1276_v18 }
 0x524   : > { %v1287_v22 = vpop.permute.xlu0 %1286 }
 0x525   : > { %1677 = vrot.lane.b32.xlu0 %v1676_v23, %s1790_s7  ;;  %v1294_v58 = vmul.f32 %v1287_v22, %v1278_v25 }
 0x528   : > { %v1292_v27 = vpop.permute.xlu1 %1291 }
 0x529   : > { %v1295_v24 = vmul.f32 %v1292_v27, %v1279_v29 }
 0x52b   : > { %v1681_v26 = vpack.i.bf16 %v1295_v24, %v1294_v58 }
 0x52c   : > { %v1305_v30 = vpop.permute.xlu0 %1304 }
 0x52d   : > { %1682 = vrot.lane.b32.xlu1 %v1681_v26, %s1791_s9  ;;  %v1312_v37 = vmul.f32 %v1305_v30, %v1296_v14 }
 0x530   : > { %v1310_v35 = vpop.permute.xlu1 %1309 }
 0x531   : > { %v1313_v39 = vmul.f32 %v1310_v35, %v1297_v17 }
 0x533   : > { %v1686_v40 = vpack.i.bf16 %v1313_v39, %v1312_v37 }
 0x535   : > { %1687 = vrot.lane.b32.xlu0 %v1686_v40, %s1789_s6 }
 0x597   : > { %v1678_v41 = vpop.permute.xlu0 %1677 }
 0x598   : > { %v1680_v43 = vunpack.i.h.bf16 %v1678_v41  ;;  %v1679_v6 = vunpack.i.l.bf16 %v1678_v41 }
 0x59a   : > { %v1339_v49 = vsel %vm521_vm0, %v1259_v60, %v1680_v43  ;;  %v1338_v33 = vsel %vm521_vm0, %v1258_v45, %v1679_v6 }
 0x59f   : > { %v1683_v42 = vpop.permute.xlu1 %1682 }
 0x5a0   : > { %v1685_v32 = vunpack.i.h.bf16 %v1683_v42  ;;  %v1684_v44 = vunpack.i.l.bf16 %v1683_v42 }
 0x5a2   : > { %v1342_v50 = vsel %vm1340_vm5, %v1339_v49, %v1685_v32  ;;  %v1341_v51 = vsel %vm1340_vm5, %v1338_v33, %v1684_v44 }
 0x5a7   : > { %v1688_v48 = vpop.permute.xlu0 %1687 }
 0x5a8   : > { %v1690_v36 = vunpack.i.h.bf16 %v1688_v48  ;;  %v1689_v38 = vunpack.i.l.bf16 %v1688_v48 }
 0x5aa   : > { %v1345_v52 = vsel %vm1343_vm6, %v1342_v50, %v1690_v36  ;;  %v1344_v53 = vsel %vm1343_vm6, %v1341_v51, %v1689_v38 }
 0x5ab   : > { %v1560_v54 = vpack.c.bf16 %v1345_v52, %v1344_v53 }
 0x5ad   : > { %1561 = vst [vmem:[%s463_s13] sm:$0xff] %v1560_v54  }
 0x5ae PF: > { %s14_s19 = sadd.s32 1, %s1783_s19   ;;  %s2228_s15 = smov %s1771_s16 }
 0x5af   : > { %p11_p10 = scmp.ge.s32.totalorder %s14_s19, 4   ;;  %s2229_s16 = smov %s1856_s24 }
 0x5b0   : > { %s2230_s17 = smov %s1779_s18  ;;  %s2231_s18 = smov %s2233_s20 }
 0x5b1   :  { %13 = sbr.rel (!%p11_p10) target bundleno = 3 (0x3), region = 236 }

// kernel: _lambda_.20
= control target key start
LH: loop header
LB: loop body
LE: loop exit
PB: predicated region body
PF: predicated region fallthrough
CT: control target
= control target key end

     0   :  { %v460_v1 = vmov 0   ;;  %v93_v33 = vlaneseq  ;;  %s584_s1 = inlined_call_operand.vmem [shape: bf16[128,256], index: 1, kind: input, shape index: {}]   ;;  %s585_s0 = inlined_call_operand.vmem [shape: f32[64,128], index: 0, kind: input, shape index: {}]   ;;  %s586_s2 = inlined_call_operand.vmem [shape: f32[1,256], index: 2, kind: input, shape index: {}]   ;;  %s587_s3 = inlined_call_operand.vmem [shape: bf16[64,256], index: 3, kind: output, shape index: {}]  }
   0x1   :  { %v432_v0 = vld [vmem:[%s584_s1 + $0x74] ss:$8 sps:$4 sm:$0xff]   ;;  %239 = vmatprep.mubr.bf16.mxu0 %v460_v1  ;;  %259 = vmatprep.mubr.bf16.mxu1 %v460_v1  ;;  %v434_v2 = vld [vmem:[%s584_s1 + $0x70] ss:$8 sps:$4 sm:$0xff]   ;;  %v435_v3 = vld [vmem:[%s584_s1 + $0x64] ss:$8 sps:$4 sm:$0xff]  }
   0x2   :  { %207 = vmatprep.subr.bf16.mxu0 %v432_v0  ;;  %415 = vmatprep.subr.bf16.mxu1 %v432_v0  ;;  %v437_v4 = vld [vmem:[%s584_s1 + $0x60] ss:$8 sps:$4 sm:$0xff]   ;;  %v438_v5 = vld [vmem:[%s584_s1 + $0x54] ss:$8 sps:$4 sm:$0xff]   ;;  %v440_v6 = vld [vmem:[%s584_s1 + $0x50] ss:$8 sps:$4 sm:$0xff]  }
   0x3   :  { %208 = vmatpush1.bf16.msra.mxu0 %v434_v2  ;;  %423 = vmatpush1.bf16.msra.mxu1 %v434_v2  ;;  %v441_v7 = vld [vmem:[%s584_s1 + $0x44] ss:$8 sps:$4 sm:$0xff]   ;;  %v443_v8 = vld [vmem:[%s584_s1 + $0x40] ss:$8 sps:$4 sm:$0xff]   ;;  %v444_v9 = vld [vmem:[%s584_s1 + $0x34] ss:$8 sps:$4 sm:$0xff]  }
   0x4   :  { %209 = vmatprep.subr.bf16.mxu0 %v435_v3  ;;  %416 = vmatprep.subr.bf16.mxu1 %v435_v3  ;;  %v19_v10 = vld [vmem:[%s585_s0] sm:$0xff]  ;;  %v20_v11 = vld [vmem:[%s585_s0 + $0x8] sm:$0xff]  ;;  %v21_v16 = vld [vmem:[%s585_s0 + $0x10] sm:$0xff]  ;;  %v94_v34 = vshrl.u32 %v93_v33, 7 }
   0x5   :  { %v23_v12 = vld [vmem:[%s585_s0 + $0x20] sm:$0xff]  ;;  %v24_v13 = vld [vmem:[%s585_s0 + $0x28] sm:$0xff]  ;;  %v395_v14 = vpack.c.bf16 %v20_v11, %v19_v10  ;;  %v22_v17 = vld [vmem:[%s585_s0 + $0x18] sm:$0xff] }
   0x6   :  { %v405_v15 = vpack.c.bf16 %v24_v13, %v23_v12  ;;  %v25_v18 = vld [vmem:[%s585_s0 + $0x30] sm:$0xff]  ;;  %v400_v19 = vpack.c.bf16 %v22_v17, %v21_v16  ;;  %v26_v20 = vld [vmem:[%s585_s0 + $0x38] sm:$0xff]  ;;  %v447_v23 = vld [vmem:[%s584_s1 + $0x24] ss:$8 sps:$4 sm:$0xff]   ;;  %v95_v35 = vsub.s32 0, %v94_v34  ;;  %v99_v36 = vsub.s32 1, %v94_v34 }
   0x7   :  { %210 = vmatpush1.bf16.msra.mxu0 %v437_v4  ;;  %424 = vmatpush1.bf16.msra.mxu1 %v437_v4  ;;  %396 = vst [vmem:[#allocation2] sm:$0xff] %v395_v14   ;;  %v410_v21 = vpack.c.bf16 %v26_v20, %v25_v18  ;;  %v446_v22 = vld [vmem:[%s584_s1 + $0x30] ss:$8 sps:$4 sm:$0xff]   ;;  %v449_v24 = vld [vmem:[%s584_s1 + $0x20] ss:$8 sps:$4 sm:$0xff]  }
   0x8   :  { %211 = vmatprep.subr.bf16.mxu0 %v438_v5  ;;  %417 = vmatprep.subr.bf16.mxu1 %v438_v5  ;;  %413 = vst [vmem:[#allocation2 + $0x10] sm:$0xff] %v405_v15   ;;  %412 = vst [vmem:[#allocation2 + $0x8] sm:$0xff] %v400_v19   ;;  %v450_v25 = vld [vmem:[%s584_s1 + $0x14] ss:$8 sps:$4 sm:$0xff]   ;;  %v452_v26 = vld [vmem:[%s584_s1 + $0x10] ss:$8 sps:$4 sm:$0xff]  }
   0x9   :  { %414 = vst [vmem:[#allocation2 + $0x18] sm:$0xff] %v410_v21   ;;  %v453_v27 = vld [vmem:[%s584_s1 + $0x4] ss:$8 sps:$4 sm:$0xff]   ;;  %v455_v28 = vld [vmem:[%s584_s1] ss:$8 sps:$4 sm:$0xff]  }
   0xa   :  { %v91_v37 = vld [vmem:[%s586_s2] sm:$0x3] }
   0xb   :  { %212 = vmatpush1.bf16.msra.mxu0 %v440_v6  ;;  %425 = vmatpush1.bf16.msra.mxu1 %v440_v6  ;;  %v96_v38 = vrot.slane %v91_v37, %v95_v35  ;;  %v100_v39 = vrot.slane %v91_v37, %v99_v36 }
   0xc   :  { %213 = vmatprep.subr.bf16.mxu0 %v441_v7  ;;  %418 = vmatprep.subr.bf16.mxu1 %v441_v7 }
   0xe   :  { %v456_v29 = vld [vmem:[#allocation2] sm:$0xff]  }
   0xf   :  { %214 = vmatpush1.bf16.msra.mxu0 %v443_v8  ;;  %426 = vmatpush1.bf16.msra.mxu1 %v443_v8  ;;  %v457_v30 = vld [vmem:[#allocation2 + $0x10] sm:$0xff]   ;;  %v458_v31 = vld [vmem:[#allocation2 + $0x8] sm:$0xff]  }
  0x10   :  { %215 = vmatprep.subr.bf16.mxu0 %v444_v9  ;;  %419 = vmatprep.subr.bf16.mxu1 %v444_v9  ;;  %v459_v32 = vld [vmem:[#allocation2 + $0x18] sm:$0xff]  }
  0x13   :  { %216 = vmatpush1.bf16.msra.mxu0 %v446_v22  ;;  %427 = vmatpush1.bf16.msra.mxu1 %v446_v22 }
  0x14   :  { %217 = vmatprep.subr.bf16.mxu0 %v447_v23  ;;  %420 = vmatprep.subr.bf16.mxu1 %v447_v23 }
  0x17   :  { %218 = vmatpush1.bf16.msra.mxu0 %v449_v24  ;;  %428 = vmatpush1.bf16.msra.mxu1 %v449_v24 }
  0x18   :  { %219 = vmatprep.subr.bf16.mxu0 %v450_v25  ;;  %421 = vmatprep.subr.bf16.mxu1 %v450_v25 }
  0x1b   :  { %220 = vmatpush1.bf16.msra.mxu0 %v452_v26  ;;  %429 = vmatpush1.bf16.msra.mxu1 %v452_v26 }
  0x1c   :  { %221 = vmatprep.subr.bf16.mxu0 %v453_v27  ;;  %422 = vmatprep.subr.bf16.mxu1 %v453_v27 }
  0x1f   :  { %222 = vmatpush1.bf16.msra.mxu0 %v455_v28  ;;  %430 = vmatpush1.bf16.msra.mxu1 %v455_v28 }
  0x22   :  { %240 = vmatmul.mubr.bf16.vlgmr.msra.gmra.mxu0 %v456_v29  ;;  %260 = vmatmul.mubr.bf16.vlgmr.msra.gmra.mxu1 %v457_v30 }
  0x23   :  { %249 = vmatprep.mubr.bf16.mxu0 %v460_v1  ;;  %269 = vmatprep.mubr.bf16.mxu1 %v460_v1 }
  0x2a   :  { %250 = vmatmul.mubr.bf16.gmra.mxu0 %v458_v31  ;;  %270 = vmatmul.mubr.bf16.gmra.mxu1 %v459_v32 }
  0xe2   :  { %v241_v40 = vpop.f32.mrf.mxu0  ;;  %v261_v41 = vpop.f32.mrf.mxu1 }
  0xe3   :  { %v242_v44 = vadd.f32 %v241_v40, %v96_v38  ;;  %v262_v45 = vadd.f32 %v261_v41, %v96_v38 }
  0xe4   :  { %v243_v42 = vpop.f32.mrf.mxu0  ;;  %v263_v43 = vpop.f32.mrf.mxu1 }
  0xe5   :  { %v244_v46 = vadd.f32 %v243_v42, %v100_v39  ;;  %v264_v47 = vadd.f32 %v263_v43, %v100_v39 }
  0xe6   :  { %v245_v48 = vpop.f32.mrf.mxu0  ;;  %v265_v49 = vpop.f32.mrf.mxu1 }
  0xe7   :  { %v384_v50 = vpack.c.bf16 %v244_v46, %v242_v44  ;;  %v388_v51 = vpack.c.bf16 %v264_v47, %v262_v45  ;;  %v246_v54 = vadd.f32 %v245_v48, %v96_v38  ;;  %v266_v55 = vadd.f32 %v265_v49, %v96_v38 }
  0xe8   :  { %v247_v52 = vpop.f32.mrf.mxu0  ;;  %v267_v53 = vpop.f32.mrf.mxu1 }
  0xe9   :  { %328 = vst [vmem:[%s587_s3] sm:$0xff] %v384_v50  ;;  %332 = vst [vmem:[%s587_s3 + $0x20] sm:$0xff] %v388_v51  ;;  %v248_v56 = vadd.f32 %v247_v52, %v100_v39  ;;  %v268_v57 = vadd.f32 %v267_v53, %v100_v39 }
  0xea   :  { %v251_v58 = vpop.f32.mrf.mxu0  ;;  %v271_v59 = vpop.f32.mrf.mxu1 }
  0xeb   :  { %v385_v60 = vpack.c.bf16 %v248_v56, %v246_v54  ;;  %v389_v61 = vpack.c.bf16 %v268_v57, %v266_v55  ;;  %v252_v0 = vadd.f32 %v251_v58, %v96_v38  ;;  %v272_v1 = vadd.f32 %v271_v59, %v96_v38 }
  0xec   :  { %v253_v62 = vpop.f32.mrf.mxu0  ;;  %v273_v63 = vpop.f32.mrf.mxu1 }
  0xed   :  { %329 = vst [vmem:[%s587_s3 + $0x8] sm:$0xff] %v385_v60  ;;  %333 = vst [vmem:[%s587_s3 + $0x28] sm:$0xff] %v389_v61  ;;  %v254_v2 = vadd.f32 %v253_v62, %v100_v39  ;;  %v274_v3 = vadd.f32 %v273_v63, %v100_v39 }
  0xee   :  { %v255_v4 = vpop.f32.mrf.mxu0  ;;  %v275_v5 = vpop.f32.mrf.mxu1 }
  0xef   :  { %v386_v6 = vpack.c.bf16 %v254_v2, %v252_v0  ;;  %v390_v7 = vpack.c.bf16 %v274_v3, %v272_v1  ;;  %v256_v10 = vadd.f32 %v255_v4, %v96_v38  ;;  %v276_v11 = vadd.f32 %v275_v5, %v96_v38 }
  0xf0   :  { %v257_v8 = vpop.f32.mrf.mxu0  ;;  %v277_v9 = vpop.f32.mrf.mxu1 }
  0xf1   :  { %330 = vst [vmem:[%s587_s3 + $0x10] sm:$0xff] %v386_v6  ;;  %334 = vst [vmem:[%s587_s3 + $0x30] sm:$0xff] %v390_v7  ;;  %v258_v12 = vadd.f32 %v257_v8, %v100_v39  ;;  %v278_v13 = vadd.f32 %v277_v9, %v100_v39 }
  0xf3   :  { %v387_v14 = vpack.c.bf16 %v258_v12, %v256_v10  ;;  %v391_v15 = vpack.c.bf16 %v278_v13, %v276_v11 }
  0xf5   :  { %331 = vst [vmem:[%s587_s3 + $0x18] sm:$0xff] %v387_v14  ;;  %335 = vst [vmem:[%s587_s3 + $0x38] sm:$0xff] %v391_v15 }

// kernel: _lambda_.23
= control target key start
LH: loop header
LB: loop body
LE: loop exit
PB: predicated region body
PF: predicated region fallthrough
CT: control target
= control target key end

     0   :  { %v1124_v52 = vmov 0   ;;  %s1430_s0 = inlined_call_operand.vmem [shape: f32[32,128], index: 0, kind: input, shape index: {}, may-alias: {0,7}]   ;;  %s1431_s3 = inlined_call_operand.vmem [shape: bf16[128,512], index: 3, kind: input, shape index: {}]   ;;  %s1432_s5 = inlined_call_operand.vmem [shape: bf16[512,128], index: 5, kind: input, shape index: {}]   ;;  %s1433_s1 = inlined_call_operand.vmem [shape: f32[1,128], index: 1, kind: input, shape index: {}]   ;;  %s1434_s2 = inlined_call_operand.vmem [shape: f32[1,128], index: 2, kind: input, shape index: {}]   ;;  %s1435_s4 = inlined_call_operand.vmem [shape: f32[1,512], index: 4, kind: input, shape index: {}]   ;;  %s1436_s6 = inlined_call_operand.vmem [shape: f32[1,128], index: 6, kind: input, shape index: {}]   ;;  %s1437_s7 = inlined_call_operand.vmem [shape: f32[32,128], index: 7, kind: input, shape index: {}, may-alias: {0,7}]   ;;  %s1438_s8 = inlined_call_operand.vmem [shape: f32[32,128], index: 8, kind: output, shape index: {}]  }
   0x1   :  { %v34_v0 = vld [vmem:[%s1430_s0] sm:$0xff]  ;;  %v36_v1 = vld [vmem:[%s1430_s0 + $0x10] sm:$0xff]  ;;  %v35_v2 = vld [vmem:[%s1430_s0 + $0x8] sm:$0xff]  ;;  %391 = vmatprep.mubr.bf16.mxu0 %v1124_v52  ;;  %444 = vmatprep.mubr.bf16.mxu1 %v1124_v52 }
   0x2   :  { %38 = vadd.xlane.f32.xlu0 %v34_v0  ;;  %42 = vadd.xlane.f32.xlu1 %v36_v1  ;;  %v37_v3 = vld [vmem:[%s1430_s0 + $0x18] sm:$0xff]  ;;  %v1034_v20 = vld [vmem:[%s1431_s3 + $0xe4] ss:$16 sps:$4 sm:$0xff]   ;;  %v1038_v22 = vld [vmem:[%s1431_s3 + $0xe0] ss:$16 sps:$4 sm:$0xff]  }
   0x3   :  { %v1036_v21 = vld [vmem:[%s1431_s3 + $0xec] ss:$16 sps:$4 sm:$0xff]   ;;  %359 = vmatprep.subr.bf16.mxu0 %v1034_v20  ;;  %v1039_v23 = vld [vmem:[%s1431_s3 + $0xe8] ss:$16 sps:$4 sm:$0xff]   ;;  %v1040_v24 = vld [vmem:[%s1431_s3 + $0xc4] ss:$16 sps:$4 sm:$0xff]  }
   0x4   :  { %412 = vmatprep.subr.bf16.mxu1 %v1036_v21  ;;  %360 = vmatpush1.bf16.msra.mxu0 %v1038_v22  ;;  %v1042_v25 = vld [vmem:[%s1431_s3 + $0xcc] ss:$16 sps:$4 sm:$0xff]   ;;  %v1044_v26 = vld [vmem:[%s1431_s3 + $0xc0] ss:$16 sps:$4 sm:$0xff]   ;;  %v1045_v27 = vld [vmem:[%s1431_s3 + $0xc8] ss:$16 sps:$4 sm:$0xff]  }
   0x5   :  { %413 = vmatpush1.bf16.msra.mxu1 %v1039_v23  ;;  %361 = vmatprep.subr.bf16.mxu0 %v1040_v24  ;;  %v1046_v28 = vld [vmem:[%s1431_s3 + $0xa4] ss:$16 sps:$4 sm:$0xff]   ;;  %v1048_v29 = vld [vmem:[%s1431_s3 + $0xac] ss:$16 sps:$4 sm:$0xff]   ;;  %v1050_v30 = vld [vmem:[%s1431_s3 + $0xa0] ss:$16 sps:$4 sm:$0xff]  }
   0x6   :  { %40 = vadd.xlane.f32.xlu0 %v35_v2  ;;  %44 = vadd.xlane.f32.xlu1 %v37_v3  ;;  %v1051_v31 = vld [vmem:[%s1431_s3 + $0xa8] ss:$16 sps:$4 sm:$0xff]   ;;  %v1052_v32 = vld [vmem:[%s1431_s3 + $0x84] ss:$16 sps:$4 sm:$0xff]   ;;  %v1054_v33 = vld [vmem:[%s1431_s3 + $0x8c] ss:$16 sps:$4 sm:$0xff]  }
   0x7   :  { %414 = vmatprep.subr.bf16.mxu1 %v1042_v25  ;;  %v1056_v34 = vld [vmem:[%s1431_s3 + $0x80] ss:$16 sps:$4 sm:$0xff]   ;;  %v1057_v35 = vld [vmem:[%s1431_s3 + $0x88] ss:$16 sps:$4 sm:$0xff]   ;;  %v1058_v36 = vld [vmem:[%s1431_s3 + $0x64] ss:$16 sps:$4 sm:$0xff]  }
   0x8   :  { %362 = vmatpush1.bf16.msra.mxu0 %v1044_v26  ;;  %v1060_v37 = vld [vmem:[%s1431_s3 + $0x6c] ss:$16 sps:$4 sm:$0xff]   ;;  %v1062_v38 = vld [vmem:[%s1431_s3 + $0x60] ss:$16 sps:$4 sm:$0xff]   ;;  %v1063_v39 = vld [vmem:[%s1431_s3 + $0x68] ss:$16 sps:$4 sm:$0xff]  }
   0x9   :  { %415 = vmatpush1.bf16.msra.mxu1 %v1045_v27  ;;  %363 = vmatprep.subr.bf16.mxu0 %v1046_v28  ;;  %v1064_v40 = vld [vmem:[%s1431_s3 + $0x44] ss:$16 sps:$4 sm:$0xff]   ;;  %v1066_v41 = vld [vmem:[%s1431_s3 + $0x4c] ss:$16 sps:$4 sm:$0xff]   ;;  %v1068_v42 = vld [vmem:[%s1431_s3 + $0x40] ss:$16 sps:$4 sm:$0xff]  }
   0xa   :  { %416 = vmatprep.subr.bf16.mxu1 %v1048_v29  ;;  %v1069_v43 = vld [vmem:[%s1431_s3 + $0x48] ss:$16 sps:$4 sm:$0xff]   ;;  %v1070_v44 = vld [vmem:[%s1431_s3 + $0x24] ss:$16 sps:$4 sm:$0xff]   ;;  %v1072_v45 = vld [vmem:[%s1431_s3 + $0x2c] ss:$16 sps:$4 sm:$0xff]  }
   0xb   :  { %v1074_v46 = vld [vmem:[%s1431_s3 + $0x20] ss:$16 sps:$4 sm:$0xff]   ;;  %v1075_v47 = vld [vmem:[%s1431_s3 + $0x28] ss:$16 sps:$4 sm:$0xff]   ;;  %v1076_v48 = vld [vmem:[%s1431_s3 + $0x4] ss:$16 sps:$4 sm:$0xff]  }
   0xc   :  { %364 = vmatpush1.bf16.msra.mxu0 %v1050_v30  ;;  %v1078_v49 = vld [vmem:[%s1431_s3 + $0xc] ss:$16 sps:$4 sm:$0xff]   ;;  %v1080_v50 = vld [vmem:[%s1431_s3] ss:$16 sps:$4 sm:$0xff]   ;;  %v1081_v51 = vld [vmem:[%s1431_s3 + $0x8] ss:$16 sps:$4 sm:$0xff]  }
   0xd   :  { %417 = vmatpush1.bf16.msra.mxu1 %v1051_v31  ;;  %365 = vmatprep.subr.bf16.mxu0 %v1052_v32  ;;  %v1084_v53 = vld [vmem:[%s1432_s5 + $0x78] sm:$0xff]   ;;  %v1089_v27 = vld [vmem:[%s1432_s5 + $0xf0] sm:$0xff]   ;;  %v1092_v30 = vld [vmem:[%s1432_s5 + $0x68] sm:$0xff]  }
   0xe   :  { %418 = vmatprep.subr.bf16.mxu1 %v1054_v33  ;;  %v1085_v54 = vld [vmem:[%s1432_s5 + $0xf8] sm:$0xff]   ;;  %v1090_v28 = vld [vmem:[%s1432_s5 + $0x30] sm:$0xff]   ;;  %v1093_v31 = vld [vmem:[%s1432_s5 + $0xe8] sm:$0xff]  }
   0xf   :  { %v1091_v29 = vld [vmem:[%s1432_s5 + $0xb0] sm:$0xff]   ;;  %v1094_v33 = vld [vmem:[%s1432_s5 + $0x28] sm:$0xff]  }
  0x10   :  { %366 = vmatpush1.bf16.msra.mxu0 %v1056_v34  ;;  %v1095_v34 = vld [vmem:[%s1432_s5 + $0xa8] sm:$0xff]  }
  0x11   :  { %419 = vmatpush1.bf16.msra.mxu1 %v1057_v35  ;;  %367 = vmatprep.subr.bf16.mxu0 %v1058_v36  ;;  %v1096_v35 = vld [vmem:[%s1432_s5 + $0x60] sm:$0xff]  }
  0x12   :  { %420 = vmatprep.subr.bf16.mxu1 %v1060_v37  ;;  %v1097_v36 = vld [vmem:[%s1432_s5 + $0xe0] sm:$0xff]  }
  0x13   :  { %v1098_v37 = vld [vmem:[%s1432_s5 + $0x20] sm:$0xff]  }
  0x14   :  { %368 = vmatpush1.bf16.msra.mxu0 %v1062_v38  ;;  %v1099_v38 = vld [vmem:[%s1432_s5 + $0xa0] sm:$0xff]  }
  0x15   :  { %421 = vmatpush1.bf16.msra.mxu1 %v1063_v39  ;;  %369 = vmatprep.subr.bf16.mxu0 %v1064_v40  ;;  %v1100_v39 = vld [vmem:[%s1432_s5 + $0x58] sm:$0xff]  }
  0x16   :  { %422 = vmatprep.subr.bf16.mxu1 %v1066_v41  ;;  %v1101_v40 = vld [vmem:[%s1432_s5 + $0xd8] sm:$0xff]  }
  0x17   :  { %v1102_v41 = vld [vmem:[%s1432_s5 + $0x18] sm:$0xff]  }
  0x18   :  { %370 = vmatpush1.bf16.msra.mxu0 %v1068_v42  ;;  %v1103_v42 = vld [vmem:[%s1432_s5 + $0x98] sm:$0xff]  }
  0x19   :  { %423 = vmatpush1.bf16.msra.mxu1 %v1069_v43  ;;  %371 = vmatprep.subr.bf16.mxu0 %v1070_v44  ;;  %v1104_v43 = vld [vmem:[%s1432_s5 + $0x50] sm:$0xff]  }
  0x1a   :  { %424 = vmatprep.subr.bf16.mxu1 %v1072_v45  ;;  %v1105_v44 = vld [vmem:[%s1432_s5 + $0xd0] sm:$0xff]  }
  0x1b   :  { %v1106_v45 = vld [vmem:[%s1432_s5 + $0x10] sm:$0xff]  }
  0x1c   :  { %372 = vmatpush1.bf16.msra.mxu0 %v1074_v46  ;;  %v1107_v46 = vld [vmem:[%s1432_s5 + $0x90] sm:$0xff]  }
  0x1d   :  { %425 = vmatpush1.bf16.msra.mxu1 %v1075_v47  ;;  %373 = vmatprep.subr.bf16.mxu0 %v1076_v48  ;;  %v1108_v47 = vld [vmem:[%s1432_s5 + $0x48] sm:$0xff]  }
  0x1e   :  { %426 = vmatprep.subr.bf16.mxu1 %v1078_v49  ;;  %v1109_v48 = vld [vmem:[%s1432_s5 + $0xc8] sm:$0xff]  }
  0x1f   :  { %v1110_v49 = vld [vmem:[%s1432_s5 + $0x8] sm:$0xff]  }
  0x20   :  { %374 = vmatpush1.bf16.msra.mxu0 %v1080_v50  ;;  %v1111_v50 = vld [vmem:[%s1432_s5 + $0x88] sm:$0xff]  }
  0x21   :  { %427 = vmatpush1.bf16.msra.mxu1 %v1081_v51  ;;  %977 = vmatprep.subr.bf16.mxu0 %v1084_v53  ;;  %v1112_v51 = vld [vmem:[%s1432_s5 + $0x40] sm:$0xff]  }
  0x22   :  { %1005 = vmatprep.subr.bf16.mxu1 %v1085_v54  ;;  %v1114_v53 = vld [vmem:[%s1432_s5] sm:$0xff]  }
  0x23   :  { %v1115_v54 = vld [vmem:[%s1432_s5 + $0x80] sm:$0xff]  }
  0x8b   :  { %v39_v4 = vpop.xlane.xlu0 %38  ;;  %v43_v5 = vpop.xlane.xlu1 %42 }
  0x8c   :  { %v47_v6 = vmul.f32 0.0078125, %v39_v4  ;;  %v49_v7 = vmul.f32 0.0078125, %v43_v5  ;;  %v889_v5 = vld [vmem:[%s1433_s1] ss:$0 sm:$0xff] }
  0x8e   :  { %v1182_v8 = vsub.f32 %v34_v0, %v47_v6  ;;  %v1184_v9 = vsub.f32 %v36_v1, %v49_v7 }
  0x8f   :  { %v41_v10 = vpop.xlane.xlu0 %40  ;;  %v45_v11 = vpop.xlane.xlu1 %44 }
  0x90   :  { %v48_v12 = vmul.f32 0.0078125, %v41_v10  ;;  %v55_v13 = vmul.f32 %v1182_v8, %v1182_v8  ;;  %v50_v14 = vmul.f32 0.0078125, %v45_v11  ;;  %v57_v17 = vmul.f32 %v1184_v9, %v1184_v9 }
  0x92   :  { %v1188_v15 = vsub.f32 %v35_v2, %v48_v12  ;;  %59 = vadd.xlane.f32.xlu0 %v55_v13  ;;  %v1190_v16 = vsub.f32 %v37_v3, %v50_v14  ;;  %v890_v12 = vld [vmem:[%s1434_s2] ss:$0 sm:$0xff] }
  0x94   :  { %v56_v18 = vmul.f32 %v1188_v15, %v1188_v15  ;;  %v58_v19 = vmul.f32 %v1190_v16, %v1190_v16 }
  0x96   :  { %63 = vadd.xlane.f32.xlu0 %v57_v17  ;;  %61 = vadd.xlane.f32.xlu1 %v56_v18 }
  0x9a   :  { %65 = vadd.xlane.f32.xlu1 %v58_v19 }
 0x11b   :  { %v60_v55 = vpop.xlane.xlu0 %59 }
 0x11c   :  { %v67_v56 = vmul.f32 0.0078125, %v60_v55  ;;  %v167_v55 = vlaneseq }
 0x11e   :  { %v71_v57 = vadd.f32 1e-06, %v67_v56  ;;  %v168_v56 = vshrl.u32 %v167_v55, 7 }
 0x11f   :  { %v62_v58 = vpop.xlane.xlu1 %61  ;;  %v64_v59 = vpop.xlane.xlu0 %63 }
 0x120   :  { %1116 = vrsqrt.f32 %v71_v57  ;;  %v68_v60 = vmul.f32 0.0078125, %v62_v58  ;;  %v69_v61 = vmul.f32 0.0078125, %v64_v59  ;;  %v173_v57 = vsub.s32 1, %v168_v56 }
 0x121   :  { %v181_v58 = vsub.s32 3, %v168_v56  ;;  %v169_v59 = vsub.s32 0, %v168_v56 }
 0x122   :  { %v72_v62 = vadd.f32 1e-06, %v68_v60  ;;  %v73_v63 = vadd.f32 1e-06, %v69_v61  ;;  %v177_v60 = vsub.s32 2, %v168_v56 }
 0x123   :  { %v66_v0 = vpop.xlane.xlu1 %65  ;;  %v165_v61 = vld [vmem:[%s1435_s4] sm:$0xf] }
 0x124   :  { %1118 = vrsqrt.f32 %v72_v62  ;;  %v70_v1 = vmul.f32 0.0078125, %v66_v0  ;;  %v174_v0 = vrot.slane %v165_v61, %v173_v57 }
 0x125   :  { %1120 = vrsqrt.f32 %v73_v63 }
 0x126   :  { %v74_v2 = vadd.f32 1e-06, %v70_v1  ;;  %v182_v1 = vrot.slane %v165_v61, %v181_v58 }
 0x128   :  { %1122 = vrsqrt.f32 %v74_v2  ;;  %v170_v2 = vrot.slane %v165_v61, %v169_v59 }
 0x12d   :  { %v1117_v3 = vpop.eup %1116 }
 0x12e   :  { %v79_v4 = vmul.f32 %v1117_v3, %v1182_v8  ;;  %v178_v3 = vrot.slane %v165_v61, %v177_v60 }
 0x130   :  { %v90_v10 = vmul.f32 %v889_v5, %v79_v4 }
 0x131   :  { %v1119_v6 = vpop.eup %1118 }
 0x132   :  { %v1121_v7 = vpop.eup %1120  ;;  %v80_v11 = vmul.f32 %v1119_v6, %v1188_v15  ;;  %v101_v18 = vadd.f32 %v890_v12, %v90_v10  ;;  %v1086_v15 = vld [vmem:[%s1432_s5 + $0x38] sm:$0xff]  }
 0x133   :  { %v81_v13 = vmul.f32 %v1121_v7, %v1184_v9  ;;  %v1087_v9 = vld [vmem:[%s1432_s5 + $0xb8] sm:$0xff]  }
 0x134   :  { %v91_v14 = vmul.f32 %v889_v5, %v80_v11 }
 0x135   :  { %v1123_v17 = vpop.eup %1122  ;;  %v92_v8 = vmul.f32 %v889_v5, %v81_v13 }
 0x136   :  { %v102_v19 = vadd.f32 %v890_v12, %v91_v14  ;;  %v82_v20 = vmul.f32 %v1123_v17, %v1190_v16  ;;  %v1088_v16 = vld [vmem:[%s1432_s5 + $0x70] sm:$0xff]  }
 0x137   :  { %v103_v23 = vadd.f32 %v890_v12, %v92_v8 }
 0x138   :  { %v969_v21 = vpack.c.bf16 %v102_v19, %v101_v18  ;;  %v93_v22 = vmul.f32 %v889_v5, %v82_v20 }
 0x13a   :  { %970 = vst [vmem:[#allocation2] sm:$0xff] %v969_v21   ;;  %v104_v24 = vadd.f32 %v890_v12, %v93_v22 }
 0x13c   :  { %v974_v25 = vpack.c.bf16 %v104_v24, %v103_v23 }
 0x13e   :  { %976 = vst [vmem:[#allocation2 + $0x8] sm:$0xff] %v974_v25  }
 0x141   :  { %v1082_v26 = vld [vmem:[#allocation2] sm:$0xff]  }
 0x142   :  { %392 = vmatmul.mubr.bf16.vlgmr.msra.gmra.mxu0 %v1082_v26  ;;  %445 = vmatmul.mubr.bf16.vlgmr.msra.gmra.mxu1 %v1082_v26 }
 0x143   :  { %401 = vmatprep.mubr.bf16.mxu0 %v1124_v52  ;;  %454 = vmatprep.mubr.bf16.mxu1 %v1124_v52  ;;  %v1113_v52 = vld [vmem:[%s1432_s5 + $0xc0] sm:$0xff]  }
 0x144   :  { %978 = vmatpush3.bf16.msra.mxu0 %v1086_v15  ;;  %1006 = vmatpush3.bf16.msra.mxu1 %v1087_v9 }
 0x145   :  { %979 = vmatprep.subr.bf16.mxu0 %v1088_v16  ;;  %1007 = vmatprep.subr.bf16.mxu1 %v1089_v27  ;;  %v1083_v32 = vld [vmem:[#allocation2 + $0x8] sm:$0xff]  }
 0x148   :  { %980 = vmatpush3.bf16.msra.mxu0 %v1090_v28  ;;  %1008 = vmatpush3.bf16.msra.mxu1 %v1091_v29 }
 0x149   :  { %981 = vmatprep.subr.bf16.mxu0 %v1092_v30  ;;  %1009 = vmatprep.subr.bf16.mxu1 %v1093_v31 }
 0x14a   :  { %402 = vmatmul.mubr.bf16.gmra.mxu0 %v1083_v32  ;;  %455 = vmatmul.mubr.bf16.gmra.mxu1 %v1083_v32 }
 0x14c   :  { %982 = vmatpush3.bf16.msra.mxu0 %v1094_v33  ;;  %1010 = vmatpush3.bf16.msra.mxu1 %v1095_v34 }
 0x14d   :  { %983 = vmatprep.subr.bf16.mxu0 %v1096_v35  ;;  %1011 = vmatprep.subr.bf16.mxu1 %v1097_v36 }
 0x150   :  { %984 = vmatpush3.bf16.msra.mxu0 %v1098_v37  ;;  %1012 = vmatpush3.bf16.msra.mxu1 %v1099_v38 }
 0x151   :  { %985 = vmatprep.subr.bf16.mxu0 %v1100_v39  ;;  %1013 = vmatprep.subr.bf16.mxu1 %v1101_v40 }
 0x154   :  { %986 = vmatpush3.bf16.msra.mxu0 %v1102_v41  ;;  %1014 = vmatpush3.bf16.msra.mxu1 %v1103_v42 }
 0x155   :  { %987 = vmatprep.subr.bf16.mxu0 %v1104_v43  ;;  %1015 = vmatprep.subr.bf16.mxu1 %v1105_v44 }
 0x158   :  { %988 = vmatpush3.bf16.msra.mxu0 %v1106_v45  ;;  %1016 = vmatpush3.bf16.msra.mxu1 %v1107_v46 }
 0x159   :  { %989 = vmatprep.subr.bf16.mxu0 %v1108_v47  ;;  %1017 = vmatprep.subr.bf16.mxu1 %v1109_v48 }
 0x15c   :  { %990 = vmatpush3.bf16.msra.mxu0 %v1110_v49  ;;  %1018 = vmatpush3.bf16.msra.mxu1 %v1111_v50 }
 0x15d   :  { %991 = vmatprep.subr.bf16.mxu0 %v1112_v51  ;;  %1019 = vmatprep.subr.bf16.mxu1 %v1113_v52 }
 0x160   :  { %992 = vmatpush3.bf16.msra.mxu0 %v1114_v53  ;;  %1020 = vmatpush3.bf16.msra.mxu1 %v1115_v54 }
 0x202   :  { %v393_v62 = vpop.f32.mrf.mxu0  ;;  %v446_v63 = vpop.f32.mrf.mxu1 }
 0x203   :  { %v394_v14 = vadd.f32 %v393_v62, %v170_v2  ;;  %v447_v17 = vadd.f32 %v446_v63, %v178_v3 }
 0x204   :  { %v395_v4 = vpop.f32.mrf.mxu0  ;;  %v448_v5 = vpop.f32.mrf.mxu1 }
 0x205   :  { %v396_v10 = vadd.f32 %v395_v4, %v174_v0  ;;  %v449_v11 = vadd.f32 %v448_v5, %v182_v1  ;;  %v465_v16 = vmax.f32 %v394_v14, 0.0  ;;  %v467_v27 = vmax.f32 %v447_v17, 0.0  ;;  %v873_v4 = vld [vmem:[%s1437_s7] sm:$0xff] }
 0x206   :  { %v397_v6 = vpop.f32.mrf.mxu0  ;;  %v450_v7 = vpop.f32.mrf.mxu1 }
 0x207   :  { %v398_v12 = vadd.f32 %v397_v6, %v170_v2  ;;  %v451_v13 = vadd.f32 %v450_v7, %v178_v3  ;;  %v466_v25 = vmax.f32 %v396_v10, 0.0  ;;  %v468_v15 = vmax.f32 %v449_v11, 0.0 }
 0x208   :  { %v399_v18 = vpop.f32.mrf.mxu0  ;;  %v452_v19 = vpop.f32.mrf.mxu1 }
 0x209   :  { %v400_v8 = vadd.f32 %v399_v18, %v174_v0  ;;  %v453_v20 = vadd.f32 %v452_v19, %v182_v1  ;;  %v469_v21 = vmax.f32 %v398_v12, 0.0  ;;  %v471_v22 = vmax.f32 %v451_v13, 0.0  ;;  %v874_v18 = vld [vmem:[%s1437_s7 + $0x8] sm:$0xff] }
 0x20a   :  { %v403_v23 = vpop.f32.mrf.mxu0  ;;  %v456_v24 = vpop.f32.mrf.mxu1 }
 0x20b   :  { %v470_v9 = vmax.f32 %v400_v8, 0.0  ;;  %v472_v26 = vmax.f32 %v453_v20, 0.0  ;;  %v485_v32 = vpack.c.bf16 %v469_v21, %v465_v16  ;;  %v487_v33 = vpack.c.bf16 %v471_v22, %v467_v27 }
 0x20c   :  { %v405_v28 = vpop.f32.mrf.mxu0  ;;  %v458_v29 = vpop.f32.mrf.mxu1  ;;  %v404_v40 = vadd.f32 %v403_v23, %v170_v2  ;;  %v457_v41 = vadd.f32 %v456_v24, %v178_v3 }
 0x20d   :  { %v486_v30 = vpack.c.bf16 %v470_v9, %v466_v25  ;;  %v488_v31 = vpack.c.bf16 %v472_v26, %v468_v15  ;;  %v406_v34 = vadd.f32 %v405_v28, %v174_v0  ;;  %v459_v37 = vadd.f32 %v458_v29, %v182_v1  ;;  %v875_v9 = vld [vmem:[%s1437_s7 + $0x10] sm:$0xff] }
 0x20e   :  { %v407_v35 = vpop.f32.mrf.mxu0  ;;  %v460_v36 = vpop.f32.mrf.mxu1  ;;  %v473_v52 = vmax.f32 %v404_v40, 0.0  ;;  %v475_v53 = vmax.f32 %v457_v41, 0.0 }
 0x20f   :  { %v408_v38 = vadd.f32 %v407_v35, %v170_v2  ;;  %v461_v39 = vadd.f32 %v460_v36, %v178_v3  ;;  %781 = vmatprep.mubr.bf16.mxu0 %v486_v30  ;;  %830 = vmatprep.mubr.bf16.mxu1 %v488_v31  ;;  %v474_v48 = vmax.f32 %v406_v34, 0.0  ;;  %v476_v49 = vmax.f32 %v459_v37, 0.0 }
 0x210   :  { %v409_v42 = vpop.f32.mrf.mxu0  ;;  %v462_v43 = vpop.f32.mrf.mxu1  ;;  %782 = vmatmul.mubr.bf16.vlgmr.msra.gmra.mxu0 %v485_v32  ;;  %831 = vmatmul.mubr.bf16.vlgmr.msra.gmra.mxu1 %v487_v33  ;;  %v876_v32 = vld [vmem:[%s1437_s7 + $0x18] sm:$0xff] }
 0x211   :  { %v410_v44 = vadd.f32 %v409_v42, %v174_v0  ;;  %v463_v45 = vadd.f32 %v462_v43, %v182_v1  ;;  %v477_v46 = vmax.f32 %v408_v38, 0.0  ;;  %v479_v47 = vmax.f32 %v461_v39, 0.0  ;;  %v961_v0 = vld [vmem:[%s1436_s6] ss:$0 sm:$0xff] }
 0x213   :  { %v478_v50 = vmax.f32 %v410_v44, 0.0  ;;  %v480_v51 = vmax.f32 %v463_v45, 0.0  ;;  %v489_v56 = vpack.c.bf16 %v477_v46, %v473_v52  ;;  %v491_v57 = vpack.c.bf16 %v479_v47, %v475_v53 }
 0x215   :  { %v490_v54 = vpack.c.bf16 %v478_v50, %v474_v48  ;;  %v492_v55 = vpack.c.bf16 %v480_v51, %v476_v49 }
 0x217   :  { %789 = vmatprep.mubr.bf16.mxu0 %v490_v54  ;;  %838 = vmatprep.mubr.bf16.mxu1 %v492_v55 }
 0x218   :  { %790 = vmatmul.mubr.bf16.gmra.mxu0 %v489_v56  ;;  %839 = vmatmul.mubr.bf16.gmra.mxu1 %v491_v57 }
 0x2d0   :  { %v993_v58 = vpop.f32.mrf.mxu0  ;;  %v1021_v59 = vpop.f32.mrf.mxu1 }
 0x2d2   :  { %v994_v60 = vpop.f32.mrf.mxu0  ;;  %v1022_v61 = vpop.f32.mrf.mxu1 }
 0x2d3   :  { %v995_v62 = vadd.f32 %v994_v60, %v993_v58  ;;  %v1023_v63 = vadd.f32 %v1022_v61, %v1021_v59 }
 0x2d4   :  { %v996_v1 = vpop.f32.mrf.mxu0  ;;  %v1024_v2 = vpop.f32.mrf.mxu1 }
 0x2d5   :  { %v833_v3 = vadd.f32 %v1023_v63, %v995_v62 }
 0x2d6   :  { %v997_v5 = vpop.f32.mrf.mxu0  ;;  %v1025_v6 = vpop.f32.mrf.mxu1 }
 0x2d7   :  { %v869_v7 = vadd.f32 %v961_v0, %v833_v3  ;;  %v998_v10 = vadd.f32 %v997_v5, %v996_v1  ;;  %v1026_v11 = vadd.f32 %v1025_v6, %v1024_v2 }
 0x2d8   :  { %v999_v12 = vpop.f32.mrf.mxu0  ;;  %v1027_v13 = vpop.f32.mrf.mxu1 }
 0x2d9   :  { %v877_v14 = vadd.f32 %v873_v4, %v869_v7  ;;  %v836_v17 = vadd.f32 %v1026_v11, %v998_v10 }
 0x2da   :  { %v1000_v19 = vpop.f32.mrf.mxu0  ;;  %v1028_v8 = vpop.f32.mrf.mxu1 }
 0x2db   :  { %881 = vst [vmem:[%s1438_s8] sm:$0xff] %v877_v14  ;;  %v870_v20 = vadd.f32 %v961_v0, %v836_v17  ;;  %v1001_v21 = vadd.f32 %v1000_v19, %v999_v12  ;;  %v1029_v22 = vadd.f32 %v1028_v8, %v1027_v13 }
 0x2dc   :  { %v1002_v23 = vpop.f32.mrf.mxu0  ;;  %v1030_v24 = vpop.f32.mrf.mxu1 }
 0x2dd   :  { %v878_v25 = vadd.f32 %v874_v18, %v870_v20  ;;  %v841_v15 = vadd.f32 %v1029_v22, %v1001_v21 }
 0x2de   :  { %v1003_v26 = vpop.f32.mrf.mxu0  ;;  %v1031_v16 = vpop.f32.mrf.mxu1 }
 0x2df   :  { %882 = vst [vmem:[%s1438_s8 + $0x8] sm:$0xff] %v878_v25  ;;  %v871_v27 = vadd.f32 %v961_v0, %v841_v15  ;;  %v1004_v28 = vadd.f32 %v1003_v26, %v1002_v23  ;;  %v1032_v29 = vadd.f32 %v1031_v16, %v1030_v24 }
 0x2e1   :  { %v879_v30 = vadd.f32 %v875_v9, %v871_v27  ;;  %v844_v31 = vadd.f32 %v1032_v29, %v1004_v28 }
 0x2e3   :  { %883 = vst [vmem:[%s1438_s8 + $0x10] sm:$0xff] %v879_v30  ;;  %v872_v33 = vadd.f32 %v961_v0, %v844_v31 }
 0x2e5   :  { %v880_v34 = vadd.f32 %v876_v32, %v872_v33 }
 0x2e7   :  { %884 = vst [vmem:[%s1438_s8 + $0x18] sm:$0xff] %v880_v34 }

// kernel: _lambda_.21
= control target key start
LH: loop header
LB: loop body
LE: loop exit
PB: predicated region body
PF: predicated region fallthrough
CT: control target
= control target key end

     0   :  { %s1845_s15 = smov 0   ;;  %s1847_s16 = smov 0   ;;  %s2255_s0 = inlined_call_operand.vmem [shape: bf16[2,16,128], index: 0, kind: input, shape index: {}]   ;;  %s2256_s1 = inlined_call_operand.vmem [shape: bf16[2,32,256], index: 1, kind: input, shape index: {}, may-alias: {1,2}]   ;;  %s2257_s2 = inlined_call_operand.vmem [shape: bf16[2,32,256], index: 2, kind: input, shape index: {}, may-alias: {1,2}]   ;;  %s2258_s3 = inlined_call_operand.vmem [shape: bf16[2,1,32], index: 3, kind: input, shape index: {}]   ;;  %s2259_s4 = inlined_call_operand.vmem [shape: bf16[2,16,128], index: 4, kind: output, shape index: {}]  }
   0x1   :  { %s1849_s17 = smov 0   ;;  %s1851_s18 = smov 0  }
   0x2   :  { %s1853_s19 = smov 0  }
   0x3 LB: > { %s33_s20 = sadd.s32 1, %s1807_s18  ;;  %p77_p1 = scmp.ne.s32.totalorder %s1799_s16, %s1795_s15  ;;  %s1811_s19 = sphi %s1853_s19, %s14_s19   ;;  %s1807_s18 = sphi %s1851_s18, %s2264_s18   ;;  %s1803_s17 = sphi %s1849_s17, %s2263_s17   ;;  %s1799_s16 = sphi %s1847_s16, %s2262_s16   ;;  %s1795_s15 = sphi %s1845_s15, %s2261_s15  }
   0x4   : > { %p35_p0 = scmp.ge.s32.totalorder %s33_s20, 2  ;;  %p78_p2 = scmp.eq.s32.totalorder %s1811_s19, 0 }
   0x5   : > { %s70_s23 = sadd.s32 1, %s1799_s16  ;;  %p1516_p5 = scmp.ge.s32.totalorder %s1811_s19, 2 }
   0x6   : > { %s2266_s20 = smov (%p35_p0, %s33_s20), 0  ;;  %p1876_p3 = por %p78_p2, %p77_p1 }
   0x7   : > { %s65_s22 = ssub.s32 %s1807_s18, %s2266_s20  ;;  %187 = sbr.rel (%p1516_p5) target bundleno = 24 (0x18), region = 16 }
   0x8   : > { %p68_p4 = scmp.eq.s32.totalorder %s65_s22, 0 }
   0xa   : > { %s1884_s24 = scalar_select %p68_p4, %s1799_s16, %s70_s23  }
   0xc   : > { %203 = sbr.rel (!%p1876_p3) target bundleno = 18 (0x12), region = 24  ;;  %s205_s25 = sand.u32 (%p1876_p3), 1, %s1799_s16  }
   0xd   : > { %s1554_s26 = sshll.u32 (%p1876_p3), %s1807_s18, 5  ;;  %s1517_s27 = sshll.u32 (%p1876_p3), %s205_s25, 4 }
   0xe   : > { %s213_s30 = scalar_lea.vmem (%p1876_p3), %s2256_s1, %s1554_s26  ;;  %s207_s5 = scalar_lea.vmem (%p1876_p3), [#allocation6], %s1517_s27 }
   0xf   : > { %v230_v0 = vld [vmem:[%s213_s30] sm:$0xf] (%p1876_p3)  ;;  %v232_v1 = vld [vmem:[%s213_s30 + $0x8] sm:$0xf] (%p1876_p3)  ;;  %v234_v2 = vld [vmem:[%s213_s30 + $0x10] sm:$0xf] (%p1876_p3) }
  0x10   : > { %231 = vst [vmem:[%s207_s5] sm:$0xf] (%p1876_p3), %v230_v0  ;;  %233 = vst [vmem:[%s207_s5 + $0x4] sm:$0xf] (%p1876_p3), %v232_v1  ;;  %v236_v3 = vld [vmem:[%s213_s30 + $0x18] sm:$0xf] (%p1876_p3) }
  0x11   : > { %235 = vst [vmem:[%s207_s5 + $0x8] sm:$0xf] %v234_v2  ;;  %237 = vst [vmem:[%s207_s5 + $0xc] sm:$0xf] %v236_v3 }
  0x12 PF: > { %269 = sbr.rel (!%p1876_p3) target bundleno = 24 (0x18), region = 65  ;;  %s271_s6 = sand.u32 (%p1876_p3), 1, %s1799_s16  }
  0x13   : > { %s1555_s7 = sshll.u32 (%p1876_p3), %s1807_s18, 5  ;;  %s1520_s8 = sshll.u32 (%p1876_p3), %s271_s6, 4 }
  0x14   : > { %s1415_s11 = scalar_lea.vmem (%p1876_p3), %s2257_s2, %s1555_s7  ;;  %s273_s12 = scalar_lea.vmem (%p1876_p3), [#allocation7], %s1520_s8 }
  0x15   : > { %v1523_v4 = vld [vmem:[%s1415_s11 + $0x4] sm:$0xf] (%p1876_p3)  ;;  %v1524_v5 = vld [vmem:[%s1415_s11 + $0xc] sm:$0xf] (%p1876_p3)  ;;  %v1525_v6 = vld [vmem:[%s1415_s11 + $0x14] sm:$0xf] (%p1876_p3) }
  0x16   : > { %298 = vst [vmem:[%s273_s12] sm:$0xf] (%p1876_p3), %v1523_v4  ;;  %300 = vst [vmem:[%s273_s12 + $0x4] sm:$0xf] (%p1876_p3), %v1524_v5  ;;  %v1526_v7 = vld [vmem:[%s1415_s11 + $0x1c] sm:$0xf] (%p1876_p3) }
  0x17   : > { %302 = vst [vmem:[%s273_s12 + $0x8] sm:$0xf] %v1525_v6  ;;  %304 = vst [vmem:[%s273_s12 + $0xc] sm:$0xf] %v1526_v7 }
  0x18 PF: > { %p1527_p6 = scmp.ge.s32.totalorder %s1811_s19, 1  ;;  %p344_p7 = scmp.lt.s32.totalorder %s1811_s19, 3 }
  0x1a   : > { %p345_p8 = pnand %p1527_p6, %p344_p7 }
  0x1b   : > { %s351_s13 = sand.u32 (!%p345_p8), 1, %s1795_s15   ;;  %p407_p9 = scmp.lt.s32.totalorder (!%p345_p8), %s1803_s17, 1 }
  0x1c   : > { %348 = sbr.rel (%p345_p8) target bundleno = 2457 (0x999), region = 110  ;;  %s1906_s14 = sshll.u32 (!%p345_p8), %s351_s13, 4 }
  0x1d   : > { %s353_s15 = scalar_lea.vmem (!%p345_p8), [#allocation6], %s1906_s14  ;;  %s1817_s29 = smov (!%p345_p8), 96  }
  0x1e   : > { %s360_s30 = scalar_lea.vmem (!%p345_p8), [#allocation7], %s1906_s14  ;;  %s1818_s5 = smov (!%p345_p8), 64  }
  0x1f   : > { %s1819_s6 = smov (!%p345_p8), 32  }
  0x21   : > { %vm490_vm0 = vcmask 261120   ;;  %v1813_v8 = vmov 0.0   ;;  %vm1814_vm1 = vmmov 0   ;;  %v1930_v9 = vld [vmem:[%s353_s15 + $0x8] sm:$0xff]   ;;  %s2268_s17 = smov (!%p407_p9, %s1803_s17), 1  ;;  %vm441_vm2 = vcmask 257024  }
  0x22   : > { %1589 = vmatprep.subr.bf16.mxu0 %v1813_v8  ;;  %491 = vst.msk [vmem:[#allocation5] sm:$0xff] %vm490_vm0, %v1813_v8  ;;  %492 = vst.msk [vmem:[#allocation5 + $0x8] sm:$0xff] %vm490_vm0, %v1813_v8  ;;  %1593 = vmatprep.mubr.msk.bf16.mxu0 %vm1814_vm1, %v1813_v8  ;;  %v538_v10 = vsel %vm490_vm0, %v1930_v9, 0  ;;  %s1556_s21 = sshll.u32 %s2268_s17, 3  ;;  %v1946_v11 = vld [vmem:[%s353_s15] sm:$0xff]   ;;  %vm473_vm3 = vcmask 7168   ;;  %v511_v17 = vlaneseq  ;;  %s423_s28 = scalar_lea.vmem %s2258_s3, %s2268_s17 }
  0x23   : > { %493 = vst.msk [vmem:[#allocation5 + $0x10] sm:$0xff] %vm490_vm0, %v1813_v8  ;;  %494 = vst.msk [vmem:[#allocation5 + $0x18] sm:$0xff] %vm490_vm0, %v1813_v8  ;;  %1597 = vmatprep.subr.bf16.mxu1 %v1813_v8  ;;  %1601 = vmatprep.mubr.msk.bf16.mxu1 %vm1814_vm1, %v1813_v8  ;;  %s414_s25 = scalar_lea.vmem %s2255_s0, %s1556_s21  ;;  %v535_v14 = vsel %vm490_vm0, %v1946_v11, 0  ;;  %v1815_v16 = vmov -inf   ;;  %v507_v19 = vld [vmem:[%s423_s28] sm:$0x1]  ;;  %s432_s9 = scalar_lea.vmem %s2259_s4, %s1556_s21 }
  0x24   : > { %495 = vst.msk [vmem:[#allocation5 + $0x20] sm:$0xff] %vm490_vm0, %v1813_v8  ;;  %496 = vst.msk [vmem:[#allocation5 + $0x28] sm:$0xff] %vm490_vm0, %v1813_v8  ;;  %1590 = vmatpush3.bf16.xpose.msra.mxu0 %v538_v10  ;;  %v1948_v12 = vld [vmem:[%s414_s25] sm:$0xf]  ;;  %v1950_v13 = vld [vmem:[%s414_s25 + $0x4] sm:$0xf]  ;;  %v508_v20 = vunpack.c.l.bf16 %v507_v19 }
  0x25   : > { %497 = vst.msk [vmem:[#allocation5 + $0x30] sm:$0xff] %vm490_vm0, %v1813_v8  ;;  %498 = vst.msk [vmem:[#allocation5 + $0x38] sm:$0xff] %vm490_vm0, %v1813_v8  ;;  %1591 = vmatprep.subr.bf16.mxu0 %v1813_v8  ;;  %v512_v18 = vshrl.u32 %v511_v17, 7  ;;  %v1816_v31 = vmov 0   ;;  %v2019_v40 = vld [vmem:[%s360_s30 + $0x8] sm:$0xff]   ;;  %v2022_v41 = vld [vmem:[%s360_s30] sm:$0xff]  }
  0x26   : > { %442 = vst.msk [vmem:[#allocation2] sm:$0xf] %vm441_vm2, %v1948_v12  ;;  %443 = vst.msk [vmem:[#allocation2 + $0x4] sm:$0xf] %vm441_vm2, %v1950_v13  ;;  %1700 = vset.pattern.permute.xlu1 %v1816_v31  ;;  %1701 = vset.pattern.permute.xlu0 %v1816_v31  ;;  %vm1352_vm4 = vcmask 523264   ;;  %vm1355_vm5 = vcmask 785408  }
  0x27   : > { %474 = vst.msk [vmem:[#allocation3] sm:$0xff] %vm473_vm3, %v1815_v16  ;;  %475 = vst.msk [vmem:[#allocation3 + $0x8] sm:$0xff] %vm473_vm3, %v1815_v16  ;;  %v513_v21 = vsub.s32 0, %v512_v18  ;;  %1598 = vmatpush3.bf16.msra.mxu1 %v2019_v40 }
  0x28   : > { %476 = vst.msk [vmem:[#allocation3 + $0x10] sm:$0xff] %vm473_vm3, %v1815_v16  ;;  %477 = vst.msk [vmem:[#allocation3 + $0x18] sm:$0xff] %vm473_vm3, %v1815_v16  ;;  %1599 = vmatprep.subr.bf16.mxu1 %v1813_v8 }
  0x29   : > { %478 = vst.msk [vmem:[#allocation3 + $0x20] sm:$0xff] %vm473_vm3, %v1815_v16  ;;  %479 = vst.msk [vmem:[#allocation3 + $0x28] sm:$0xff] %vm473_vm3, %v1815_v16  ;;  %v1990_v22 = vrot.slane %v508_v20, %v513_v21 }
  0x2a   : > { %480 = vst.msk [vmem:[#allocation3 + $0x30] sm:$0xff] %vm473_vm3, %v1815_v16  ;;  %481 = vst.msk [vmem:[#allocation3 + $0x38] sm:$0xff] %vm473_vm3, %v1815_v16 }
  0x2b   : > { %482 = vst.msk [vmem:[#allocation4] sm:$0xff] %vm473_vm3, %v1813_v8  ;;  %483 = vst.msk [vmem:[#allocation4 + $0x8] sm:$0xff] %vm473_vm3, %v1813_v8  ;;  %1600 = vmatpush3.bf16.msra.mxu1 %v2022_v41 }
  0x2c   : > { %1592 = vmatpush3.bf16.xpose.msra.mxu0 %v535_v14  ;;  %484 = vst.msk [vmem:[#allocation4 + $0x10] sm:$0xff] %vm473_vm3, %v1813_v8  ;;  %485 = vst.msk [vmem:[#allocation4 + $0x18] sm:$0xff] %vm473_vm3, %v1813_v8  ;;  %1605 = vmatprep.subr.bf16.mxu1 %v1813_v8 }
  0x2d   : > { %1613 = vmatprep.subr.bf16.mxu0 %v1813_v8  ;;  %v1719_v15 = vld [vmem:[#allocation2] sm:$0xff]   ;;  %486 = vst.msk [vmem:[#allocation4 + $0x20] sm:$0xff] %vm473_vm3, %v1813_v8  ;;  %487 = vst.msk [vmem:[#allocation4 + $0x28] sm:$0xff] %vm473_vm3, %v1813_v8 }
  0x2e   : > { %488 = vst.msk [vmem:[#allocation4 + $0x30] sm:$0xff] %vm473_vm3, %v1813_v8  ;;  %489 = vst.msk [vmem:[#allocation4 + $0x38] sm:$0xff] %vm473_vm3, %v1813_v8  ;;  %v1998_v32 = vld [vmem:[#allocation3] sm:$0xff]  ;;  %v2003_v35 = vld [vmem:[#allocation3 + $0x8] sm:$0xff] }
  0x2f   : > { %v2059_v6 = vld [vmem:[#allocation3 + $0x10] sm:$0xff]  ;;  %v2064_v14 = vld [vmem:[#allocation3 + $0x18] sm:$0xff] }
  0x33   : > { %1594 = vmatmul.mubr.msk.bf16.vlgmr.msra.gmra.mxu0 %vm490_vm0, %v1719_v15 }
  0x34   : > { %1617 = vmatprep.mubr.msk.bf16.mxu0 %vm1814_vm1, %v1813_v8 }
  0xf3   : > { %v574_v23 = vpop.f32.mrf.mxu0 }
  0xf4   : > { %v575_v24 = vadd.f32 %v574_v23, %v1990_v22 }
  0xf5   : > { %v1595_v25 = vpop.f32.mrf.mxu0 }
  0xf6   : > { %v583_v26 = vsel %vm490_vm0, %v575_v24, -inf }
  0xf7   : > { %584 = vmax.xlane.f32.xlu0 %v583_v26  ;;  %v577_v27 = vpop.f32.mrf.mxu0 }
  0xf8   : > { %v578_v28 = vadd.f32 %v577_v27, %v1990_v22 }
  0xf9   : > { %v1596_v29 = vpop.f32.mrf.mxu0 }
  0xfa   : > { %v586_v30 = vsel %vm490_vm0, %v578_v28, -inf }
  0xfb   : > { %587 = vmax.xlane.f32.xlu0 %v586_v30 }
 0x111   : > { %715 = vrot.lane.b32.xlu0 %v1930_v9, %s1817_s29 }
 0x180   : > { %v585_v33 = vpop.xlane.xlu0 %584 }
 0x181   : > { %v2001_v34 = vmax.f32 %v1998_v32, %v585_v33 }
 0x183   : > { %v591_v36 = vsub.f32 %v1998_v32, %v2001_v34  ;;  %703 = vst.msk [vmem:[#allocation3] sm:$0xff] %vm473_vm3, %v2001_v34  ;;  %599 = vperm.xlu1 %1700, %v2001_v34  }
 0x184   : > { %v588_v37 = vpop.xlane.xlu0 %587 }
 0x185   : > { %v2011_v38 = vmax.f32 %v2003_v35, %v588_v37 }
 0x187   : > { %v592_v39 = vsub.f32 %v2003_v35, %v2011_v38  ;;  %704 = vst.msk [vmem:[#allocation3 + $0x8] sm:$0xff] %vm473_vm3, %v2011_v38  ;;  %604 = vperm.xlu1 %1700, %v2011_v38  }
 0x188   : > { %v716_v50 = vpop.permute.xlu0 %715 }
 0x189   : > { %v724_v53 = vsel %vm490_vm0, %v716_v50, 0  ;;  %v595_v32 = vmul.f32 1.442695, %v592_v39 }
 0x18b   : > { %446 = vrot.lane.b32.xlu1 %v1948_v12, %s1817_s29 }
 0x18f   : > { %448 = vrot.lane.b32.xlu1 %v1950_v13, %s1817_s29 }
 0x193   : > { %713 = vrot.lane.b32.xlu1 %v1946_v11, %s1817_s29 }
 0x1fe   : > { %v600_v42 = vpop.permute.xlu1 %599 }
 0x1ff   : > { %v607_v43 = vsub.f32 %v575_v24, %v600_v42 }
 0x201   : > { %v609_v44 = vmul.f32 1.442695, %v607_v43 }
 0x202   : > { %v605_v45 = vpop.permute.xlu1 %604 }
 0x203   : > { %v608_v46 = vsub.f32 %v578_v28, %v605_v45  ;;  %1725 = vpow2.f32 %v609_v44 }
 0x205   : > { %v611_v47 = vmul.f32 1.442695, %v608_v46 }
 0x206   : > { %v447_v48 = vpop.permute.xlu1 %446 }
 0x207   : > { %1727 = vpow2.f32 %v611_v47  ;;  %453 = vst.msk [vmem:[#allocation2 + $0x8] sm:$0xf] %vm441_vm2, %v447_v48 }
 0x20a   : > { %v449_v49 = vpop.permute.xlu1 %448 }
 0x20b   : > { %454 = vst.msk [vmem:[#allocation2 + $0xc] sm:$0xf] %vm441_vm2, %v449_v49 }
 0x20e   : > { %v714_v55 = vpop.permute.xlu1 %713 }
 0x20f   : > { %v721_v56 = vsel %vm490_vm0, %v714_v55, 0 }
 0x210   : > { %v2035_v51 = vpop.eup %1725 }
 0x212   : > { %v1722_v57 = vld [vmem:[#allocation2 + $0x8] sm:$0xff]  }
 0x214   : > { %v2037_v52 = vpop.eup %1727 }
 0x215   : > { %v642_v54 = vpack.c.bf16 %v2037_v52, %v2035_v51 }
 0x217   : > { %1602 = vmatmul.mubr.msk.bf16.vlgmr.msra.gmra.mxu1 %vm490_vm0, %v642_v54 }
 0x218   : > { %1606 = vmatpush3.bf16.xpose.msra.mxu1 %v724_v53  ;;  %1609 = vmatprep.mubr.msk.bf16.mxu1 %vm1814_vm1, %v1813_v8 }
 0x219   : > { %1607 = vmatprep.subr.bf16.mxu1 %v1813_v8 }
 0x220   : > { %1608 = vmatpush3.bf16.xpose.msra.mxu1 %v721_v56 }
 0x221   : > { %1629 = vmatprep.subr.bf16.mxu1 %v1813_v8 }
 0x227   : > { %1610 = vmatmul.mubr.msk.bf16.vlgmr.msra.gmra.mxu1 %vm490_vm0, %v1722_v57 }
 0x228   : > { %1633 = vmatprep.mubr.msk.bf16.mxu1 %vm1814_vm1, %v1813_v8 }
 0x2d7   : > { %v2051_v58 = vpop.f32.mrf.mxu1 }
 0x2d9   : > { %v1603_v59 = vpop.f32.mrf.mxu1 }
 0x2db   : > { %v2053_v60 = vpop.f32.mrf.mxu1 }
 0x2dd   : > { %v1604_v61 = vpop.f32.mrf.mxu1 }
 0x2e7   : > { %v760_v62 = vpop.f32.mrf.mxu1 }
 0x2e8   : > { %v761_v63 = vadd.f32 %v760_v62, %v1990_v22  ;;  %v2119_v62 = vld [vmem:[#allocation3 + $0x20] sm:$0xff] }
 0x2e9   : > { %v1611_v0 = vpop.f32.mrf.mxu1 }
 0x2ea   : > { %v770_v1 = vsel %vm490_vm0, %v761_v63, -inf }
 0x2eb   : > { %771 = vmax.xlane.f32.xlu1 %v770_v1  ;;  %v763_v2 = vpop.f32.mrf.mxu1  ;;  %v2124_v1 = vld [vmem:[#allocation3 + $0x28] sm:$0xff] }
 0x2ec   : > { %v764_v3 = vadd.f32 %v763_v2, %v1990_v22 }
 0x2ed   : > { %v1612_v4 = vpop.f32.mrf.mxu1 }
 0x2ee   : > { %v773_v5 = vsel %vm490_vm0, %v764_v3, -inf }
 0x2ef   : > { %774 = vmax.xlane.f32.xlu0 %v773_v5 }
 0x374   : > { %v772_v7 = vpop.xlane.xlu1 %771 }
 0x375   : > { %v2062_v10 = vmax.f32 %v2059_v6, %v772_v7 }
 0x377   : > { %v778_v15 = vsub.f32 %v2059_v6, %v2062_v10  ;;  %885 = vst.msk [vmem:[#allocation3 + $0x10] sm:$0xff] %vm473_vm3, %v2062_v10  ;;  %786 = vperm.xlu1 %1700, %v2062_v10  }
 0x378   : > { %v775_v16 = vpop.xlane.xlu0 %774 }
 0x379   : > { %v2072_v17 = vmax.f32 %v2064_v14, %v775_v16 }
 0x37b   : > { %v779_v18 = vsub.f32 %v2064_v14, %v2072_v17  ;;  %886 = vst.msk [vmem:[#allocation3 + $0x18] sm:$0xff] %vm473_vm3, %v2072_v17  ;;  %791 = vperm.xlu0 %1701, %v2072_v17   ;;  %833 = vrot.lane.b32.xlu1 %v2019_v40, %s1817_s29  ;;  %v613_v14 = vld [vmem:[#allocation4] sm:$0xff] }
 0x37d   : > { %v782_v34 = vmul.f32 1.442695, %v779_v18 }
 0x37f   : > { %831 = vrot.lane.b32.xlu1 %v2022_v41, %s1817_s29 }
 0x383   : > { %897 = vrot.lane.b32.xlu1 %v1930_v9, %s1818_s5 }
 0x387   : > { %455 = vrot.lane.b32.xlu1 %v1948_v12, %s1818_s5 }
 0x38b   : > { %457 = vrot.lane.b32.xlu1 %v1950_v13, %s1818_s5 }
 0x38f   : > { %895 = vrot.lane.b32.xlu1 %v1946_v11, %s1818_s5 }
 0x3f2   : > { %v787_v19 = vpop.permute.xlu1 %786 }
 0x3f3   : > { %v794_v20 = vsub.f32 %v761_v63, %v787_v19 }
 0x3f5   : > { %v796_v21 = vmul.f32 1.442695, %v794_v20 }
 0x3f6   : > { %v792_v23 = vpop.permute.xlu0 %791  ;;  %v834_v24 = vpop.permute.xlu1 %833 }
 0x3f7   : > { %v795_v25 = vsub.f32 %v764_v3, %v792_v23  ;;  %1614 = vmatpush3.bf16.msra.mxu0 %v834_v24  ;;  %1729 = vpow2.f32 %v796_v21 }
 0x3f8   : > { %1615 = vmatprep.subr.bf16.mxu0 %v1813_v8 }
 0x3f9   : > { %v798_v26 = vmul.f32 1.442695, %v795_v25 }
 0x3fa   : > { %v832_v27 = vpop.permute.xlu1 %831 }
 0x3fb   : > { %1731 = vpow2.f32 %v798_v26  ;;  %1616 = vmatpush3.bf16.msra.mxu0 %v832_v27 }
 0x3fc   : > { %1621 = vmatprep.subr.bf16.mxu0 %v1813_v8 }
 0x3fe   : > { %v898_v28 = vpop.permute.xlu1 %897 }
 0x3ff   : > { %v906_v42 = vsel %vm490_vm0, %v898_v28, 0 }
 0x402   : > { %v456_v29 = vpop.permute.xlu1 %455 }
 0x403   : > { %462 = vst.msk [vmem:[#allocation2 + $0x10] sm:$0xf] %vm441_vm2, %v456_v29 }
 0x404   : > { %v2094_v31 = vpop.eup %1729 }
 0x406   : > { %v458_v30 = vpop.permute.xlu1 %457 }
 0x407   : > { %463 = vst.msk [vmem:[#allocation2 + $0x14] sm:$0xf] %vm441_vm2, %v458_v30 }
 0x408   : > { %v2097_v33 = vpop.eup %1731 }
 0x409   : > { %v830_v37 = vpack.c.bf16 %v2097_v33, %v2094_v31 }
 0x40a   : > { %v896_v43 = vpop.permute.xlu1 %895 }
 0x40b   : > { %1618 = vmatmul.mubr.msk.bf16.vlgmr.msra.gmra.mxu0 %vm490_vm0, %v830_v37  ;;  %v903_v44 = vsel %vm490_vm0, %v896_v43, 0 }
 0x40c   : > { %1622 = vmatpush3.bf16.xpose.msra.mxu0 %v906_v42  ;;  %1625 = vmatprep.mubr.msk.bf16.mxu0 %vm1814_vm1, %v1813_v8 }
 0x40d   : > { %1623 = vmatprep.subr.bf16.mxu0 %v1813_v8 }
 0x40e   : > { %v1723_v45 = vld [vmem:[#allocation2 + $0x10] sm:$0xff]  }
 0x414   : > { %1624 = vmatpush3.bf16.xpose.msra.mxu0 %v903_v44 }
 0x415   : > { %1645 = vmatprep.subr.bf16.mxu0 %v1813_v8 }
 0x41b   : > { %1626 = vmatmul.mubr.msk.bf16.vlgmr.msra.gmra.mxu0 %vm490_vm0, %v1723_v45 }
 0x41c   : > { %1649 = vmatprep.mubr.msk.bf16.mxu0 %vm1814_vm1, %v1813_v8 }
 0x4cb   : > { %v2111_v46 = vpop.f32.mrf.mxu0 }
 0x4cd   : > { %v1619_v47 = vpop.f32.mrf.mxu0 }
 0x4cf   : > { %v2113_v48 = vpop.f32.mrf.mxu0 }
 0x4d1   : > { %v1620_v49 = vpop.f32.mrf.mxu0 }
 0x4db   : > { %v942_v50 = vpop.f32.mrf.mxu0 }
 0x4dc   : > { %v943_v53 = vadd.f32 %v942_v50, %v1990_v22 }
 0x4dd   : > { %v1627_v54 = vpop.f32.mrf.mxu0 }
 0x4de   : > { %v952_v55 = vsel %vm490_vm0, %v943_v53, -inf }
 0x4df   : > { %953 = vmax.xlane.f32.xlu1 %v952_v55  ;;  %v945_v56 = vpop.f32.mrf.mxu0 }
 0x4e0   : > { %v946_v57 = vadd.f32 %v945_v56, %v1990_v22 }
 0x4e1   : > { %v1628_v59 = vpop.f32.mrf.mxu0 }
 0x4e2   : > { %v955_v61 = vsel %vm490_vm0, %v946_v57, -inf  ;;  %v1132_v59 = vld [vmem:[#allocation3 + $0x30] sm:$0xff] }
 0x4e3   : > { %956 = vmax.xlane.f32.xlu0 %v955_v61 }
 0x568   : > { %v954_v63 = vpop.xlane.xlu1 %953 }
 0x569   : > { %v2122_v0 = vmax.f32 %v2119_v62, %v954_v63 }
 0x56b   : > { %v960_v2 = vsub.f32 %v2119_v62, %v2122_v0  ;;  %1067 = vst.msk [vmem:[#allocation3 + $0x20] sm:$0xff] %vm473_vm3, %v2122_v0  ;;  %968 = vperm.xlu1 %1700, %v2122_v0   ;;  %v802_v0 = vld [vmem:[#allocation4 + $0x18] sm:$0xff] }
 0x56c   : > { %v957_v3 = vpop.xlane.xlu0 %956 }
 0x56d   : > { %v2132_v4 = vmax.f32 %v2124_v1, %v957_v3  ;;  %v1133_v3 = vld [vmem:[#allocation3 + $0x38] sm:$0xff] }
 0x56f   : > { %v961_v5 = vsub.f32 %v2124_v1, %v2132_v4  ;;  %1068 = vst.msk [vmem:[#allocation3 + $0x28] sm:$0xff] %vm473_vm3, %v2132_v4  ;;  %973 = vperm.xlu0 %1701, %v2132_v4   ;;  %1015 = vrot.lane.b32.xlu1 %v2019_v40, %s1818_s5 }
 0x573   : > { %1013 = vrot.lane.b32.xlu1 %v2022_v41, %s1818_s5  ;;  %1079 = vrot.lane.b32.xlu0 %v1930_v9, %s1819_s6 }
 0x577   : > { %464 = vrot.lane.b32.xlu1 %v1948_v12, %s1819_s6  ;;  %466 = vrot.lane.b32.xlu0 %v1950_v13, %s1819_s6 }
 0x57b   : > { %1077 = vrot.lane.b32.xlu1 %v1946_v11, %s1819_s6 }
 0x5e6   : > { %v969_v7 = vpop.permute.xlu1 %968 }
 0x5e7   : > { %v976_v16 = vsub.f32 %v943_v53, %v969_v7 }
 0x5e9   : > { %v978_v19 = vmul.f32 1.442695, %v976_v16 }
 0x5ea   : > { %v974_v20 = vpop.permute.xlu0 %973  ;;  %v1016_v21 = vpop.permute.xlu1 %1015 }
 0x5eb   : > { %v977_v23 = vsub.f32 %v946_v57, %v974_v20  ;;  %1630 = vmatpush3.bf16.msra.mxu1 %v1016_v21  ;;  %1733 = vpow2.f32 %v978_v19  ;;  %v808_v21 = vsel %vm490_vm0, %v2097_v33, 0.0 }
 0x5ec   : > { %1631 = vmatprep.subr.bf16.mxu1 %v1813_v8 }
 0x5ed   : > { %v980_v24 = vmul.f32 1.442695, %v977_v23 }
 0x5ee   : > { %v1014_v9 = vpop.permute.xlu1 %1013  ;;  %v1080_v25 = vpop.permute.xlu0 %1079 }
 0x5ef   : > { %1735 = vpow2.f32 %v980_v24  ;;  %1632 = vmatpush3.bf16.msra.mxu1 %v1014_v9  ;;  %v1088_v27 = vsel %vm490_vm0, %v1080_v25, 0  ;;  %v805_v24 = vsel %vm490_vm0, %v2094_v31, 0.0 }
 0x5f0   : > { %1637 = vmatprep.subr.bf16.mxu1 %v1813_v8 }
 0x5f2   : > { %v465_v12 = vpop.permute.xlu1 %464  ;;  %v467_v13 = vpop.permute.xlu0 %466 }
 0x5f3   : > { %471 = vst.msk [vmem:[#allocation2 + $0x18] sm:$0xf] %vm441_vm2, %v465_v12  ;;  %472 = vst.msk [vmem:[#allocation2 + $0x1c] sm:$0xf] %vm441_vm2, %v467_v13 }
 0x5f6   : > { %v1078_v29 = vpop.permute.xlu1 %1077 }
 0x5f7   : > { %v1085_v30 = vsel %vm490_vm0, %v1078_v29, 0  ;;  %v620_v29 = vsel %vm490_vm0, %v2037_v52, 0.0  ;;  %v964_v52 = vmul.f32 1.442695, %v961_v5 }
 0x5f8   : > { %v1734_v11 = vpop.eup %1733 }
 0x5f9   : > { %v987_v23 = vsel %vm490_vm0, %v1734_v11, 0.0 }
 0x5fa   : > { %v1724_v37 = vld [vmem:[#allocation2 + $0x18] sm:$0xff]  }
 0x5fc   : > { %v1736_v26 = vpop.eup %1735 }
 0x5fd   : > { %v1012_v28 = vpack.c.bf16 %v1736_v26, %v1734_v11 }
 0x5ff   : > { %1634 = vmatmul.mubr.msk.bf16.vlgmr.msra.gmra.mxu1 %vm490_vm0, %v1012_v28  ;;  %v593_v28 = vmul.f32 1.442695, %v591_v36  ;;  %v962_v36 = vmul.f32 1.442695, %v960_v2 }
 0x600   : > { %1638 = vmatpush3.bf16.xpose.msra.mxu1 %v1088_v27  ;;  %1641 = vmatprep.mubr.msk.bf16.mxu1 %vm1814_vm1, %v1813_v8 }
 0x601   : > { %1639 = vmatprep.subr.bf16.mxu1 %v1813_v8 }
 0x608   : > { %1640 = vmatpush3.bf16.xpose.msra.mxu1 %v1085_v30 }
 0x60f   : > { %1642 = vmatmul.mubr.msk.bf16.vlgmr.msra.gmra.mxu1 %vm490_vm0, %v1724_v37 }
 0x6bf   : > { %v2162_v42 = vpop.f32.mrf.mxu1 }
 0x6c1   : > { %v1635_v43 = vpop.f32.mrf.mxu1 }
 0x6c3   : > { %v2164_v44 = vpop.f32.mrf.mxu1 }
 0x6c5   : > { %v1636_v45 = vpop.f32.mrf.mxu1 }
 0x6c6   : > { %v983_v45 = vld [vmem:[#allocation4 + $0x20] sm:$0xff] }
 0x6cf   : > { %v1124_v47 = vpop.f32.mrf.mxu1 }
 0x6d0   : > { %v1125_v49 = vadd.f32 %v1124_v47, %v1990_v22 }
 0x6d1   : > { %v1643_v50 = vpop.f32.mrf.mxu1 }
 0x6d2   : > { %v1134_v53 = vsel %vm490_vm0, %v1125_v49, -inf }
 0x6d3   : > { %1135 = vmax.xlane.f32.xlu0 %v1134_v53  ;;  %v1127_v54 = vpop.f32.mrf.mxu1 }
 0x6d4   : > { %v1128_v55 = vadd.f32 %v1127_v54, %v1990_v22  ;;  %v617_v22 = vsel %vm490_vm0, %v2035_v51, 0.0 }
 0x6d5   : > { %v1644_v56 = vpop.f32.mrf.mxu1 }
 0x6d6   : > { %v1137_v57 = vsel %vm490_vm0, %v1128_v55, -inf }
 0x6d7   : > { %1138 = vmax.xlane.f32.xlu1 %v1137_v57 }
 0x75c   : > { %v1136_v61 = vpop.xlane.xlu0 %1135 }
 0x75d   : > { %v1140_v63 = vmax.f32 %v1132_v59, %v1136_v61 }
 0x75f   : > { %v1142_v7 = vsub.f32 %v1132_v59, %v1140_v63  ;;  %1249 = vst.msk [vmem:[#allocation3 + $0x30] sm:$0xff] %vm473_vm3, %v1140_v63  ;;  %1150 = vperm.xlu0 %1701, %v1140_v63   ;;  %v984_v59 = vld [vmem:[#allocation4 + $0x28] sm:$0xff] }
 0x760   : > { %v1139_v16 = vpop.xlane.xlu1 %1138 }
 0x761   : > { %v1141_v19 = vmax.f32 %v1133_v3, %v1139_v16  ;;  %v1144_v6 = vmul.f32 1.442695, %v1142_v7 }
 0x763   : > { %v1143_v20 = vsub.f32 %v1133_v3, %v1141_v19  ;;  %1250 = vst.msk [vmem:[#allocation3 + $0x38] sm:$0xff] %vm473_vm3, %v1141_v19  ;;  %1197 = vrot.lane.b32.xlu0 %v2019_v40, %s1819_s6  ;;  %1155 = vperm.xlu1 %1700, %v1141_v19   ;;  %v990_v40 = vsel %vm490_vm0, %v1736_v26, 0.0 }
 0x765   : > { %v1146_v35 = vmul.f32 1.442695, %v1143_v20 }
 0x767   : > { %1195 = vrot.lane.b32.xlu1 %v2022_v41, %s1819_s6 }
 0x782   : > { %618 = vadd.xlane.f32.xlu0 %v617_v22 }
 0x786   : > { %809 = vadd.xlane.f32.xlu0 %v808_v21 }
 0x78a   : > { %988 = vadd.xlane.f32.xlu0 %v987_v23 }
 0x78b   : > { %806 = vadd.xlane.f32.xlu1 %v805_v24  ;;  %v1165_v24 = vld [vmem:[#allocation4 + $0x30] sm:$0xff] }
 0x78f   : > { %991 = vadd.xlane.f32.xlu1 %v990_v40 }
 0x7da   : > { %v1151_v9 = vpop.permute.xlu0 %1150 }
 0x7db   : > { %v1158_v41 = vsub.f32 %v1125_v49, %v1151_v9  ;;  %v801_v49 = vld [vmem:[#allocation4 + $0x10] sm:$0xff] }
 0x7dd   : > { %v1160_v25 = vmul.f32 1.442695, %v1158_v41  ;;  %v614_v41 = vld [vmem:[#allocation4 + $0x8] sm:$0xff] }
 0x7de   : > { %v1156_v12 = vpop.permute.xlu1 %1155  ;;  %v1198_v51 = vpop.permute.xlu0 %1197 }
 0x7df   : > { %1737 = vpow2.f32 %v1160_v25  ;;  %v1159_v13 = vsub.f32 %v1128_v55, %v1156_v12  ;;  %1646 = vmatpush3.bf16.msra.mxu0 %v1198_v51  ;;  %v1166_v25 = vld [vmem:[#allocation4 + $0x38] sm:$0xff] }
 0x7e0   : > { %1647 = vmatprep.subr.bf16.mxu0 %v1813_v8  ;;  %v780_v8 = vmul.f32 1.442695, %v778_v15 }
 0x7e1   : > { %v1162_v33 = vmul.f32 1.442695, %v1159_v13 }
 0x7e2   : > { %v1196_v11 = vpop.permute.xlu1 %1195 }
 0x7e3   : > { %1739 = vpow2.f32 %v1162_v33  ;;  %1648 = vmatpush3.bf16.msra.mxu0 %v1196_v11 }
 0x7e4   : > { %1741 = vpow2.f32 %v593_v28 }
 0x7e5   : > { %1743 = vpow2.f32 %v780_v8 }
 0x7e6   : > { %1745 = vpow2.f32 %v595_v32 }
 0x7e7   : > { %1747 = vpow2.f32 %v782_v34 }
 0x7e8   : > { %1749 = vpow2.f32 %v962_v36 }
 0x7e9   : > { %1751 = vpow2.f32 %v964_v52 }
 0x7ea   : > { %1753 = vpow2.f32 %v1144_v6 }
 0x7eb   : > { %1755 = vpow2.f32 %v1146_v35  ;;  %v998_v35 = vld [vmem:[#allocation5 + $0x20] sm:$0xff] }
 0x7ec   : > { %v1738_v27 = vpop.eup %1737 }
 0x7ed   : > { %v1169_v31 = vsel %vm490_vm0, %v1738_v27, 0.0 }
 0x7ee   : > { %1170 = vadd.xlane.f32.xlu0 %v1169_v31 }
 0x7f0   : > { %v1740_v26 = vpop.eup %1739 }
 0x7f1   : > { %v1172_v30 = vsel %vm490_vm0, %v1740_v26, 0.0  ;;  %v1194_v37 = vpack.c.bf16 %v1740_v26, %v1738_v27  ;;  %v1742_v38 = vpop.eup %1741  ;;  %v628_v26 = vld [vmem:[#allocation5] sm:$0xff] }
 0x7f2   : > { %621 = vadd.xlane.f32.xlu0 %v620_v29  ;;  %1173 = vadd.xlane.f32.xlu1 %v1172_v30  ;;  %v1744_v39 = vpop.eup %1743  ;;  %v615_v17 = vmul.f32 %v1742_v38, %v613_v14  ;;  %v629_v30 = vld [vmem:[#allocation5 + $0x8] sm:$0xff] }
 0x7f3   : > { %1650 = vmatmul.mubr.msk.bf16.vlgmr.msra.gmra.mxu0 %vm490_vm0, %v1194_v37  ;;  %v1746_v10 = vpop.eup %1745  ;;  %v803_v55 = vmul.f32 %v1744_v39, %v801_v49  ;;  %v816_v37 = vld [vmem:[#allocation5 + $0x10] sm:$0xff] }
 0x7f4   : > { %v1748_v15 = vpop.eup %1747  ;;  %v616_v51 = vmul.f32 %v1746_v10, %v614_v41 }
 0x7f5   : > { %v1750_v18 = vpop.eup %1749  ;;  %v804_v4 = vmul.f32 %v1748_v15, %v802_v0  ;;  %v999_v0 = vld [vmem:[#allocation5 + $0x28] sm:$0xff] }
 0x7f6   : > { %v1752_v2 = vpop.eup %1751  ;;  %v985_v53 = vmul.f32 %v1750_v18, %v983_v45 }
 0x7f7   : > { %v1754_v5 = vpop.eup %1753  ;;  %v986_v3 = vmul.f32 %v1752_v2, %v984_v59 }
 0x7f8   : > { %v1756_v50 = vpop.eup %1755  ;;  %v1167_v40 = vmul.f32 %v1754_v5, %v1165_v24 }
 0x7f9   : > { %v1168_v13 = vmul.f32 %v1756_v50, %v1166_v25 }
 0x803   : > { %632 = vperm.xlu1 %1700, %v1742_v38   ;;  %v817_v38 = vld [vmem:[#allocation5 + $0x18] sm:$0xff] }
 0x807   : > { %820 = vperm.xlu1 %1700, %v1744_v39  }
 0x808   : > { %637 = vperm.xlu0 %1701, %v1746_v10  }
 0x80b   : > { %v619_v62 = vpop.xlane.xlu0 %618  ;;  %825 = vperm.xlu1 %1700, %v1748_v15  }
 0x80c   : > { %v623_v1 = vadd.f32 %v619_v62, %v615_v17  ;;  %1002 = vperm.xlu0 %1701, %v1750_v18  }
 0x80e   : > { %626 = vst.msk [vmem:[#allocation4] sm:$0xff] %vm473_vm3, %v623_v1 }
 0x80f   : > { %v810_v43 = vpop.xlane.xlu0 %809  ;;  %1007 = vperm.xlu1 %1700, %v1752_v2  }
 0x810   : > { %v812_v47 = vadd.f32 %v810_v43, %v804_v4  ;;  %1184 = vperm.xlu0 %1701, %v1754_v5  }
 0x812   : > { %814 = vst.msk [vmem:[#allocation4 + $0x18] sm:$0xff] %vm473_vm3, %v812_v47 }
 0x813   : > { %v989_v54 = vpop.xlane.xlu0 %988  ;;  %1189 = vperm.xlu1 %1700, %v1756_v50   ;;  %v1180_v50 = vld [vmem:[#allocation5 + $0x30] sm:$0xff] }
 0x814   : > { %v993_v56 = vadd.f32 %v989_v54, %v985_v53  ;;  %v807_v57 = vpop.xlane.xlu1 %806 }
 0x815   : > { %v811_v61 = vadd.f32 %v807_v57, %v803_v55  ;;  %v1256_v63 = vld [vmem:[#allocation4] sm:$0xff]  ;;  %v1181_v55 = vld [vmem:[#allocation5 + $0x38] sm:$0xff] }
 0x816   : > { %995 = vst.msk [vmem:[#allocation4 + $0x20] sm:$0xff] %vm473_vm3, %v993_v56  ;;  %1757 = vrcp.f32 %v1256_v63 }
 0x817   : > { %813 = vst.msk [vmem:[#allocation4 + $0x10] sm:$0xff] %vm473_vm3, %v811_v61 }
 0x818   : > { %v992_v7 = vpop.xlane.xlu1 %991 }
 0x819   : > { %v994_v16 = vadd.f32 %v992_v7, %v986_v3  ;;  %v1275_v18 = vld [vmem:[#allocation4 + $0x18] sm:$0xff] }
 0x81b   : > { %996 = vst.msk [vmem:[#allocation4 + $0x28] sm:$0xff] %vm473_vm3, %v994_v16 }
 0x81d   : > { %v1292_v20 = vld [vmem:[#allocation4 + $0x20] sm:$0xff] }
 0x81e   : > { %v1274_v19 = vld [vmem:[#allocation4 + $0x10] sm:$0xff] }
 0x81f   : > { %1759 = vrcp.f32 %v1274_v19 }
 0x820   : > { %1761 = vrcp.f32 %v1292_v20 }
 0x823   : > { %v1758_v22 = vpop.eup %1757 }
 0x824   : > { %1262 = vperm.xlu0 %1701, %v1758_v22  }
 0x82c   : > { %v1760_v21 = vpop.eup %1759 }
 0x82d   : > { %1280 = vperm.xlu0 %1701, %v1760_v21   ;;  %v1762_v23 = vpop.eup %1761 }
 0x831   : > { %1298 = vperm.xlu0 %1701, %v1762_v23  }
 0x877   : > { %v1171_v9 = vpop.xlane.xlu0 %1170 }
 0x878   : > { %v1175_v12 = vadd.f32 %v1171_v9, %v1167_v40 }
 0x87a   : > { %1177 = vst.msk [vmem:[#allocation4 + $0x30] sm:$0xff] %vm473_vm3, %v1175_v12 }
 0x87b   : > { %v622_v33 = vpop.xlane.xlu0 %621  ;;  %v1174_v11 = vpop.xlane.xlu1 %1173 }
 0x87c   : > { %v624_v27 = vadd.f32 %v622_v33, %v616_v51  ;;  %v1176_v31 = vadd.f32 %v1174_v11, %v1168_v13 }
 0x87e   : > { %627 = vst.msk [vmem:[#allocation4 + $0x8] sm:$0xff] %vm473_vm3, %v624_v27  ;;  %1178 = vst.msk [vmem:[#allocation4 + $0x38] sm:$0xff] %vm473_vm3, %v1176_v31 }
 0x87f   : > { %v633_v28 = vpop.permute.xlu1 %632 }
 0x880   : > { %v640_v29 = vmul.f32 %v633_v28, %v628_v26 }
 0x881   : > { %v1310_v8 = vld [vmem:[#allocation4 + $0x30] sm:$0xff] }
 0x882   : > { %v699_v32 = vadd.f32 %v2051_v58, %v640_v29  ;;  %1763 = vrcp.f32 %v1310_v8 }
 0x883   : > { %v638_v34 = vpop.permute.xlu0 %637  ;;  %v821_v36 = vpop.permute.xlu1 %820 }
 0x884   : > { %701 = vst.msk [vmem:[#allocation5] sm:$0xff] %vm490_vm0, %v699_v32  ;;  %v641_v52 = vmul.f32 %v638_v34, %v629_v30  ;;  %v828_v6 = vmul.f32 %v821_v36, %v816_v37 }
 0x885   : > { %v1257_v39 = vld [vmem:[#allocation4 + $0x8] sm:$0xff]  ;;  %v1311_v45 = vld [vmem:[#allocation4 + $0x38] sm:$0xff] }
 0x886   : > { %v700_v10 = vadd.f32 %v2053_v60, %v641_v52  ;;  %v881_v14 = vadd.f32 %v2111_v46, %v828_v6  ;;  %1765 = vrcp.f32 %v1257_v39  ;;  %v1293_v60 = vld [vmem:[#allocation4 + $0x28] sm:$0xff] }
 0x887   : > { %v1003_v15 = vpop.permute.xlu0 %1002  ;;  %v826_v17 = vpop.permute.xlu1 %825  ;;  %1767 = vrcp.f32 %v1275_v18 }
 0x888   : > { %702 = vst.msk [vmem:[#allocation5 + $0x8] sm:$0xff] %vm490_vm0, %v700_v10  ;;  %883 = vst.msk [vmem:[#allocation5 + $0x10] sm:$0xff] %vm490_vm0, %v881_v14  ;;  %v1010_v58 = vmul.f32 %v1003_v15, %v998_v35  ;;  %v829_v62 = vmul.f32 %v826_v17, %v817_v38  ;;  %1769 = vrcp.f32 %v1293_v60 }
 0x889   : > { %1771 = vrcp.f32 %v1311_v45 }
 0x88a   : > { %v1063_v1 = vadd.f32 %v2162_v42, %v1010_v58  ;;  %v882_v2 = vadd.f32 %v2113_v48, %v829_v62 }
 0x88b   : > { %v1008_v4 = vpop.permute.xlu1 %1007  ;;  %v1185_v53 = vpop.permute.xlu0 %1184  ;;  %v1254_v52 = vld [vmem:[#allocation5] sm:$0xff] }
 0x88c   : > { %1065 = vst.msk [vmem:[#allocation5 + $0x20] sm:$0xff] %vm490_vm0, %v1063_v1  ;;  %884 = vst.msk [vmem:[#allocation5 + $0x18] sm:$0xff] %vm490_vm0, %v882_v2  ;;  %v1011_v46 = vmul.f32 %v1008_v4, %v999_v0  ;;  %v1192_v54 = vmul.f32 %v1185_v53, %v1180_v50 }
 0x88e   : > { %v1064_v5 = vadd.f32 %v2164_v44, %v1011_v46 }
 0x88f   : > { %v1764_v43 = vpop.eup %1763  ;;  %v1190_v44 = vpop.permute.xlu1 %1189  ;;  %v1272_v22 = vld [vmem:[#allocation5 + $0x10] sm:$0xff]  ;;  %v1255_v6 = vld [vmem:[#allocation5 + $0x8] sm:$0xff] }
 0x890   : > { %1066 = vst.msk [vmem:[#allocation5 + $0x28] sm:$0xff] %vm490_vm0, %v1064_v5  ;;  %1316 = vperm.xlu0 %1701, %v1764_v43   ;;  %v1193_v61 = vmul.f32 %v1190_v44, %v1181_v55 }
 0x893   : > { %v1766_v42 = vpop.eup %1765  ;;  %v1273_v21 = vld [vmem:[#allocation5 + $0x18] sm:$0xff]  ;;  %v1290_v25 = vld [vmem:[#allocation5 + $0x20] sm:$0xff] }
 0x894   : > { %1267 = vperm.xlu1 %1700, %v1766_v42   ;;  %v1768_v48 = vpop.eup %1767 }
 0x895   : > { %v1770_v47 = vpop.eup %1769 }
 0x896   : > { %v1772_v49 = vpop.eup %1771 }
 0x897   : > { %v1291_v12 = vld [vmem:[#allocation5 + $0x28] sm:$0xff] }
 0x898   : > { %1285 = vperm.xlu1 %1700, %v1768_v48  }
 0x89c   : > { %1303 = vperm.xlu1 %1700, %v1770_v47  }
 0x89f   : > { %v1263_v16 = vpop.permute.xlu0 %1262 }
 0x8a0   : > { %1321 = vperm.xlu1 %1700, %v1772_v49   ;;  %v1270_v39 = vmul.f32 %v1263_v16, %v1254_v52 }
 0x8a8   : > { %v1281_v19 = vpop.permute.xlu0 %1280 }
 0x8a9   : > { %v1288_v24 = vmul.f32 %v1281_v19, %v1272_v22 }
 0x8ac   : > { %v1299_v9 = vpop.permute.xlu0 %1298 }
 0x8ad   : > { %v1306_v13 = vmul.f32 %v1299_v9, %v1290_v25 }
 0x8b3   : > { %v1238_v56 = vpop.f32.mrf.mxu0 }
 0x8b4   : > { %v1245_v57 = vadd.f32 %v1238_v56, %v1192_v54 }
 0x8b5   : > { %v1651_v59 = vpop.f32.mrf.mxu0 }
 0x8b6   : > { %1247 = vst.msk [vmem:[#allocation5 + $0x30] sm:$0xff] %vm490_vm0, %v1245_v57 }
 0x8b7   : > { %v1241_v63 = vpop.f32.mrf.mxu0 }
 0x8b8   : > { %v1246_v3 = vadd.f32 %v1241_v63, %v1193_v61 }
 0x8b9   : > { %v1652_v7 = vpop.f32.mrf.mxu0 }
 0x8ba   : > { %1248 = vst.msk [vmem:[#allocation5 + $0x38] sm:$0xff] %vm490_vm0, %v1246_v3 }
 0x8bd   : > { %v1308_v31 = vld [vmem:[#allocation5 + $0x30] sm:$0xff] }
 0x8c1   : > { %v1309_v28 = vld [vmem:[#allocation5 + $0x38] sm:$0xff] }
 0x90b   : > { %v1317_v11 = vpop.permute.xlu0 %1316 }
 0x90c   : > { %v1324_v29 = vmul.f32 %v1317_v11, %v1308_v31 }
 0x90f   : > { %v1268_v20 = vpop.permute.xlu1 %1267 }
 0x910   : > { %v1271_v10 = vmul.f32 %v1268_v20, %v1255_v6 }
 0x913   : > { %v1286_v23 = vpop.permute.xlu1 %1285 }
 0x914   : > { %v1289_v40 = vmul.f32 %v1286_v23, %v1273_v21 }
 0x916   : > { %v1702_v41 = vpack.i.bf16 %v1289_v40, %v1288_v24 }
 0x917   : > { %v1304_v51 = vpop.permute.xlu1 %1303 }
 0x918   : > { %v1307_v33 = vmul.f32 %v1304_v51, %v1291_v12  ;;  %1703 = vrot.lane.b32.xlu0 %v1702_v41, %s1819_s6 }
 0x91a   : > { %v1707_v27 = vpack.i.bf16 %v1307_v33, %v1306_v13 }
 0x91b   : > { %v1322_v26 = vpop.permute.xlu1 %1321 }
 0x91c   : > { %v1325_v30 = vmul.f32 %v1322_v26, %v1309_v28  ;;  %1708 = vrot.lane.b32.xlu1 %v1707_v27, %s1818_s5 }
 0x91e   : > { %v1712_v37 = vpack.i.bf16 %v1325_v30, %v1324_v29 }
 0x920   : > { %1713 = vrot.lane.b32.xlu0 %v1712_v37, %s1817_s29 }
 0x98a   : > { %v1704_v8 = vpop.permute.xlu0 %1703 }
 0x98b   : > { %v1706_v34 = vunpack.i.h.bf16 %v1704_v8  ;;  %v1705_v36 = vunpack.i.l.bf16 %v1704_v8 }
 0x98d   : > { %v1351_v15 = vsel %vm490_vm0, %v1271_v10, %v1706_v34  ;;  %v1350_v17 = vsel %vm490_vm0, %v1270_v39, %v1705_v36 }
 0x98e   : > { %v1709_v32 = vpop.permute.xlu1 %1708 }
 0x98f   : > { %v1711_v35 = vunpack.i.h.bf16 %v1709_v32  ;;  %v1710_v38 = vunpack.i.l.bf16 %v1709_v32 }
 0x991   : > { %v1354_v62 = vsel %vm1352_vm4, %v1351_v15, %v1711_v35  ;;  %v1353_v0 = vsel %vm1352_vm4, %v1350_v17, %v1710_v38 }
 0x992   : > { %v1714_v14 = vpop.permute.xlu0 %1713 }
 0x993   : > { %v1716_v18 = vunpack.i.h.bf16 %v1714_v14  ;;  %v1715_v58 = vunpack.i.l.bf16 %v1714_v14 }
 0x995   : > { %v1357_v1 = vsel %vm1355_vm5, %v1354_v62, %v1716_v18  ;;  %v1356_v2 = vsel %vm1355_vm5, %v1353_v0, %v1715_v58 }
 0x996   : > { %v1563_v4 = vpack.c.bf16 %v1357_v1, %v1356_v2 }
 0x998   : > { %1564 = vst [vmem:[%s432_s9] sm:$0xff] %v1563_v4  }
 0x999 PF: > { %s14_s19 = sadd.s32 1, %s1811_s19   ;;  %s2261_s15 = smov %s1799_s16 }
 0x99a   : > { %p11_p10 = scmp.ge.s32.totalorder %s14_s19, 4   ;;  %s2262_s16 = smov %s1884_s24 }
 0x99b   : > { %s2263_s17 = smov %s1807_s18  ;;  %s2264_s18 = smov %s2266_s20 }
 0x99c   :  { %13 = sbr.rel (!%p11_p10) target bundleno = 3 (0x3), region = 190 }

// kernel: _lambda_.24
= control target key start
LH: loop header
LB: loop body
LE: loop exit
PB: predicated region body
PF: predicated region fallthrough
CT: control target
= control target key end

     0   :  { %v599_v43 = vmov 0   ;;  %s767_s0 = inlined_call_operand.vmem [shape: f32[32,128], index: 0, kind: input, shape index: {}]   ;;  %s768_s3 = inlined_call_operand.vmem [shape: bf16[128,384], index: 3, kind: input, shape index: {}]   ;;  %s769_s1 = inlined_call_operand.vmem [shape: f32[1,128], index: 1, kind: input, shape index: {}]   ;;  %s770_s2 = inlined_call_operand.vmem [shape: f32[1,128], index: 2, kind: input, shape index: {}]   ;;  %s771_s4 = inlined_call_operand.vmem [shape: f32[1,384], index: 4, kind: input, shape index: {}]   ;;  %s772_s5 = inlined_call_operand.vmem [shape: bf16[32,384], index: 5, kind: output, shape index: {}]  }
   0x1   :  { %v25_v0 = vld [vmem:[%s767_s0] sm:$0xff]  ;;  %v27_v1 = vld [vmem:[%s767_s0 + $0x10] sm:$0xff]  ;;  %v26_v2 = vld [vmem:[%s767_s0 + $0x8] sm:$0xff]  ;;  %341 = vmatprep.mubr.bf16.mxu0 %v599_v43 }
   0x2   :  { %29 = vadd.xlane.f32.xlu0 %v25_v0  ;;  %33 = vadd.xlane.f32.xlu1 %v27_v1  ;;  %v28_v3 = vld [vmem:[%s767_s0 + $0x18] sm:$0xff]  ;;  %v559_v21 = vld [vmem:[%s768_s3 + $0xa8] ss:$12 sps:$4 sm:$0xff]   ;;  %v568_v28 = vld [vmem:[%s768_s3 + $0x64] ss:$12 sps:$4 sm:$0xff]  }
   0x3   :  { %v557_v20 = vld [vmem:[%s768_s3 + $0xac] ss:$12 sps:$4 sm:$0xff]   ;;  %v560_v22 = vld [vmem:[%s768_s3 + $0x94] ss:$12 sps:$4 sm:$0xff]   ;;  %v562_v23 = vld [vmem:[%s768_s3 + $0xb0] ss:$12 sps:$4 sm:$0xff]  }
   0x4   :  { %309 = vmatprep.subr.bf16.mxu0 %v557_v20  ;;  %v563_v24 = vld [vmem:[%s768_s3 + $0x90] ss:$12 sps:$4 sm:$0xff]   ;;  %536 = vmatprep.subr.bf16.mxu1 %v562_v23  ;;  %v566_v26 = vld [vmem:[%s768_s3 + $0x98] ss:$12 sps:$4 sm:$0xff]   ;;  %v570_v29 = vld [vmem:[%s768_s3 + $0x80] ss:$12 sps:$4 sm:$0xff]  }
   0x5   :  { %310 = vmatpush1.bf16.msra.mxu0 %v559_v21  ;;  %537 = vmatpush3.bf16.msra.mxu1 %v562_v23  ;;  %v564_v25 = vld [vmem:[%s768_s3 + $0x7c] ss:$12 sps:$4 sm:$0xff]   ;;  %v567_v27 = vld [vmem:[%s768_s3 + $0x78] ss:$12 sps:$4 sm:$0xff]   ;;  %v571_v30 = vld [vmem:[%s768_s3 + $0x60] ss:$12 sps:$4 sm:$0xff]  }
   0x6   :  { %31 = vadd.xlane.f32.xlu0 %v26_v2  ;;  %35 = vadd.xlane.f32.xlu1 %v28_v3  ;;  %v572_v31 = vld [vmem:[%s768_s3 + $0x4c] ss:$12 sps:$4 sm:$0xff]   ;;  %v574_v32 = vld [vmem:[%s768_s3 + $0x68] ss:$12 sps:$4 sm:$0xff]   ;;  %v578_v35 = vld [vmem:[%s768_s3 + $0x50] ss:$12 sps:$4 sm:$0xff]  }
   0x7   :  { %311 = vmatprep.subr.bf16.mxu0 %v560_v22  ;;  %538 = vmatprep.subr.bf16.mxu1 %v566_v26  ;;  %v575_v33 = vld [vmem:[%s768_s3 + $0x48] ss:$12 sps:$4 sm:$0xff]   ;;  %v579_v36 = vld [vmem:[%s768_s3 + $0x30] ss:$12 sps:$4 sm:$0xff]   ;;  %v582_v38 = vld [vmem:[%s768_s3 + $0x38] ss:$12 sps:$4 sm:$0xff]  }
   0x8   :  { %v576_v34 = vld [vmem:[%s768_s3 + $0x34] ss:$12 sps:$4 sm:$0xff]   ;;  %v580_v37 = vld [vmem:[%s768_s3 + $0x1c] ss:$12 sps:$4 sm:$0xff]   ;;  %v583_v39 = vld [vmem:[%s768_s3 + $0x18] ss:$12 sps:$4 sm:$0xff]  }
   0x9   :  { %312 = vmatpush1.bf16.msra.mxu0 %v563_v24  ;;  %539 = vmatpush3.bf16.msra.mxu1 %v566_v26  ;;  %v584_v40 = vld [vmem:[%s768_s3 + $0x4] ss:$12 sps:$4 sm:$0xff]   ;;  %v586_v41 = vld [vmem:[%s768_s3 + $0x20] ss:$12 sps:$4 sm:$0xff]   ;;  %v589_v44 = vld [vmem:[%s768_s3 + $0x8] ss:$12 sps:$4 sm:$0xff]  }
   0xa   :  { %313 = vmatprep.subr.bf16.mxu0 %v564_v25  ;;  %540 = vmatprep.subr.bf16.mxu1 %v570_v29  ;;  %v587_v42 = vld [vmem:[%s768_s3] ss:$12 sps:$4 sm:$0xff]  }
   0xb   :  { %v463_v59 = vld [vmem:[%s769_s1] ss:$0 sm:$0xff] }
   0xd   :  { %314 = vmatpush1.bf16.msra.mxu0 %v567_v27  ;;  %541 = vmatpush3.bf16.msra.mxu1 %v570_v29 }
   0xe   :  { %315 = vmatprep.subr.bf16.mxu0 %v568_v28  ;;  %542 = vmatprep.subr.bf16.mxu1 %v574_v32 }
  0x11   :  { %316 = vmatpush1.bf16.msra.mxu0 %v571_v30  ;;  %543 = vmatpush3.bf16.msra.mxu1 %v574_v32 }
  0x12   :  { %317 = vmatprep.subr.bf16.mxu0 %v572_v31  ;;  %544 = vmatprep.subr.bf16.mxu1 %v578_v35 }
  0x15   :  { %318 = vmatpush1.bf16.msra.mxu0 %v575_v33  ;;  %545 = vmatpush3.bf16.msra.mxu1 %v578_v35 }
  0x16   :  { %319 = vmatprep.subr.bf16.mxu0 %v576_v34  ;;  %546 = vmatprep.subr.bf16.mxu1 %v582_v38 }
  0x19   :  { %320 = vmatpush1.bf16.msra.mxu0 %v579_v36  ;;  %547 = vmatpush3.bf16.msra.mxu1 %v582_v38 }
  0x1a   :  { %321 = vmatprep.subr.bf16.mxu0 %v580_v37  ;;  %548 = vmatprep.subr.bf16.mxu1 %v586_v41 }
  0x1d   :  { %322 = vmatpush1.bf16.msra.mxu0 %v583_v39  ;;  %549 = vmatpush3.bf16.msra.mxu1 %v586_v41 }
  0x1e   :  { %323 = vmatprep.subr.bf16.mxu0 %v584_v40  ;;  %550 = vmatprep.subr.bf16.mxu1 %v589_v44 }
  0x21   :  { %324 = vmatpush1.bf16.msra.mxu0 %v587_v42  ;;  %551 = vmatpush3.bf16.msra.mxu1 %v589_v44 }
  0x8b   :  { %v30_v4 = vpop.xlane.xlu0 %29  ;;  %v34_v5 = vpop.xlane.xlu1 %33 }
  0x8c   :  { %v38_v6 = vmul.f32 0.0078125, %v30_v4  ;;  %v40_v7 = vmul.f32 0.0078125, %v34_v5 }
  0x8e   :  { %v642_v8 = vsub.f32 %v25_v0, %v38_v6  ;;  %v644_v9 = vsub.f32 %v27_v1, %v40_v7  ;;  %v464_v0 = vld [vmem:[%s770_s2] ss:$0 sm:$0xff] }
  0x8f   :  { %v32_v10 = vpop.xlane.xlu0 %31  ;;  %v36_v11 = vpop.xlane.xlu1 %35 }
  0x90   :  { %v39_v12 = vmul.f32 0.0078125, %v32_v10  ;;  %v46_v13 = vmul.f32 %v642_v8, %v642_v8  ;;  %v41_v14 = vmul.f32 0.0078125, %v36_v11  ;;  %v48_v17 = vmul.f32 %v644_v9, %v644_v9 }
  0x92   :  { %v648_v15 = vsub.f32 %v26_v2, %v39_v12  ;;  %50 = vadd.xlane.f32.xlu0 %v46_v13  ;;  %v650_v16 = vsub.f32 %v28_v3, %v41_v14 }
  0x94   :  { %v47_v18 = vmul.f32 %v648_v15, %v648_v15  ;;  %v49_v19 = vmul.f32 %v650_v16, %v650_v16 }
  0x96   :  { %54 = vadd.xlane.f32.xlu0 %v48_v17  ;;  %52 = vadd.xlane.f32.xlu1 %v47_v18 }
  0x9a   :  { %56 = vadd.xlane.f32.xlu1 %v49_v19 }
 0x11b   :  { %v51_v45 = vpop.xlane.xlu0 %50 }
 0x11c   :  { %v58_v46 = vmul.f32 0.0078125, %v51_v45 }
 0x11e   :  { %v62_v47 = vadd.f32 1e-06, %v58_v46 }
 0x11f   :  { %v53_v48 = vpop.xlane.xlu1 %52  ;;  %v55_v49 = vpop.xlane.xlu0 %54 }
 0x120   :  { %591 = vrsqrt.f32 %v62_v47  ;;  %v59_v50 = vmul.f32 0.0078125, %v53_v48  ;;  %v60_v51 = vmul.f32 0.0078125, %v55_v49 }
 0x122   :  { %v63_v52 = vadd.f32 1e-06, %v59_v50  ;;  %v64_v53 = vadd.f32 1e-06, %v60_v51 }
 0x123   :  { %v57_v54 = vpop.xlane.xlu1 %56 }
 0x124   :  { %593 = vrsqrt.f32 %v63_v52  ;;  %v61_v55 = vmul.f32 0.0078125, %v57_v54 }
 0x125   :  { %595 = vrsqrt.f32 %v64_v53 }
 0x126   :  { %v65_v56 = vadd.f32 1e-06, %v61_v55 }
 0x128   :  { %597 = vrsqrt.f32 %v65_v56 }
 0x12d   :  { %v592_v57 = vpop.eup %591 }
 0x12e   :  { %v70_v58 = vmul.f32 %v592_v57, %v642_v8 }
 0x130   :  { %v81_v62 = vmul.f32 %v463_v59, %v70_v58 }
 0x131   :  { %v594_v60 = vpop.eup %593 }
 0x132   :  { %v596_v61 = vpop.eup %595  ;;  %v71_v63 = vmul.f32 %v594_v60, %v648_v15  ;;  %v92_v4 = vadd.f32 %v464_v0, %v81_v62 }
 0x133   :  { %v72_v1 = vmul.f32 %v596_v61, %v644_v9  ;;  %v154_v9 = vlaneseq }
 0x134   :  { %v82_v2 = vmul.f32 %v463_v59, %v71_v63 }
 0x135   :  { %v598_v3 = vpop.eup %597  ;;  %v83_v6 = vmul.f32 %v463_v59, %v72_v1  ;;  %v155_v17 = vshrl.u32 %v154_v9, 7 }
 0x136   :  { %v93_v5 = vadd.f32 %v464_v0, %v82_v2  ;;  %v73_v7 = vmul.f32 %v598_v3, %v650_v16  ;;  %v152_v16 = vld [vmem:[%s771_s4] sm:$0x7] }
 0x137   :  { %v94_v11 = vadd.f32 %v464_v0, %v83_v6  ;;  %v156_v18 = vsub.s32 0, %v155_v17  ;;  %v160_v19 = vsub.s32 1, %v155_v17  ;;  %v164_v20 = vsub.s32 2, %v155_v17 }
 0x138   :  { %v518_v8 = vpack.c.bf16 %v93_v5, %v92_v4  ;;  %v84_v10 = vmul.f32 %v463_v59, %v73_v7 }
 0x139   :  { %v157_v21 = vrot.slane %v152_v16, %v156_v18  ;;  %v161_v22 = vrot.slane %v152_v16, %v160_v19  ;;  %v165_v24 = vrot.slane %v152_v16, %v164_v20 }
 0x13a   :  { %519 = vst [vmem:[#allocation2] sm:$0xff] %v518_v8   ;;  %v95_v12 = vadd.f32 %v464_v0, %v84_v10 }
 0x13c   :  { %v523_v13 = vpack.c.bf16 %v95_v12, %v94_v11 }
 0x13e   :  { %525 = vst [vmem:[#allocation2 + $0x8] sm:$0xff] %v523_v13  }
 0x141   :  { %v588_v14 = vld [vmem:[#allocation2] sm:$0xff]  }
 0x142   :  { %342 = vmatmul.mubr.bf16.vlgmr.msra.gmra.mxu0 %v588_v14  ;;  %552 = vmatprep.mubr.bf16.mxu1 %v588_v14 }
 0x143   :  { %351 = vmatprep.mubr.bf16.mxu0 %v599_v43 }
 0x145   :  { %v590_v15 = vld [vmem:[#allocation2 + $0x8] sm:$0xff]  }
 0x146   :  { %553 = vmatmul.mubr.bf16.vlgmr.msra.gmra.mxu1 %v590_v15 }
 0x14a   :  { %352 = vmatmul.mubr.bf16.gmra.mxu0 %v590_v15 }
 0x202   :  { %v343_v23 = vpop.f32.mrf.mxu0 }
 0x203   :  { %v344_v26 = vadd.f32 %v343_v23, %v157_v21 }
 0x204   :  { %v345_v25 = vpop.f32.mrf.mxu0 }
 0x205   :  { %v346_v27 = vadd.f32 %v345_v25, %v161_v22 }
 0x206   :  { %v347_v28 = vpop.f32.mrf.mxu0  ;;  %v554_v29 = vpop.f32.mrf.mxu1 }
 0x207   :  { %v507_v30 = vpack.c.bf16 %v346_v27, %v344_v26  ;;  %v405_v31 = vadd.f32 %v554_v29, %v165_v24  ;;  %v348_v34 = vadd.f32 %v347_v28, %v157_v21 }
 0x208   :  { %v349_v32 = vpop.f32.mrf.mxu0  ;;  %v396_v33 = vpop.f32.mrf.mxu1 }
 0x209   :  { %451 = vst [vmem:[%s772_s5] sm:$0xff] %v507_v30  ;;  %v512_v35 = vpack.c.bf16 %v405_v31, %v405_v31  ;;  %v350_v36 = vadd.f32 %v349_v32, %v161_v22  ;;  %v397_v37 = vadd.f32 %v396_v33, %v165_v24 }
 0x20a   :  { %v353_v38 = vpop.f32.mrf.mxu0  ;;  %v555_v39 = vpop.f32.mrf.mxu1 }
 0x20b   :  { %456 = vst [vmem:[%s772_s5 + $0x20] sm:$0xf] %v512_v35  ;;  %v509_v40 = vpack.c.bf16 %v350_v36, %v348_v34  ;;  %v508_v41 = vpack.c.bf16 %v397_v37, %v397_v37  ;;  %v408_v42 = vadd.f32 %v555_v39, %v165_v24  ;;  %v354_v45 = vadd.f32 %v353_v38, %v157_v21 }
 0x20c   :  { %v355_v43 = vpop.f32.mrf.mxu0  ;;  %v399_v44 = vpop.f32.mrf.mxu1 }
 0x20d   :  { %453 = vst [vmem:[%s772_s5 + $0xc] sm:$0xff] %v509_v40  ;;  %452 = vst [vmem:[%s772_s5 + $0x8] sm:$0xf] %v508_v41  ;;  %v514_v46 = vpack.c.bf16 %v408_v42, %v408_v42  ;;  %v356_v47 = vadd.f32 %v355_v43, %v161_v22  ;;  %v400_v48 = vadd.f32 %v399_v44, %v165_v24 }
 0x20e   :  { %v357_v49 = vpop.f32.mrf.mxu0 }
 0x20f   :  { %458 = vst [vmem:[%s772_s5 + $0x2c] sm:$0xf] %v514_v46  ;;  %v511_v50 = vpack.c.bf16 %v356_v47, %v354_v45  ;;  %v510_v51 = vpack.c.bf16 %v400_v48, %v400_v48  ;;  %v358_v53 = vadd.f32 %v357_v49, %v157_v21 }
 0x210   :  { %v359_v52 = vpop.f32.mrf.mxu0 }
 0x211   :  { %455 = vst [vmem:[%s772_s5 + $0x18] sm:$0xff] %v511_v50  ;;  %454 = vst [vmem:[%s772_s5 + $0x14] sm:$0xf] %v510_v51  ;;  %v360_v54 = vadd.f32 %v359_v52, %v161_v22 }
 0x213   :  { %v513_v55 = vpack.c.bf16 %v360_v54, %v358_v53 }
 0x215   :  { %457 = vst [vmem:[%s772_s5 + $0x24] sm:$0xff] %v513_v55 }

// kernel: _lambda_.31
= control target key start
LH: loop header
LB: loop body
LE: loop exit
PB: predicated region body
PF: predicated region fallthrough
CT: control target
= control target key end

     0   :  { %s1462_s0 = inlined_call_operand.vmem [shape: f32[32,128], index: 0, kind: input, shape index: {}, may-alias: {0,7}]   ;;  %s1463_s1 = inlined_call_operand.vmem [shape: f32[1,128], index: 1, kind: input, shape index: {}]   ;;  %s1464_s2 = inlined_call_operand.vmem [shape: f32[1,128], index: 2, kind: input, shape index: {}]   ;;  %s1465_s3 = inlined_call_operand.vmem [shape: bf16[128,512], index: 3, kind: input, shape index: {}]   ;;  %s1466_s4 = inlined_call_operand.vmem [shape: f32[1,512], index: 4, kind: input, shape index: {}]   ;;  %s1467_s5 = inlined_call_operand.vmem [shape: bf16[512,128], index: 5, kind: input, shape index: {}]   ;;  %s1468_s6 = inlined_call_operand.vmem [shape: f32[1,128], index: 6, kind: input, shape index: {}]   ;;  %s1469_s7 = inlined_call_operand.vmem [shape: f32[32,128], index: 7, kind: input, shape index: {}, may-alias: {0,7}]   ;;  %s1470_s8 = inlined_call_operand.hbm [shape: f32[32,128], index: 8, kind: output, shape index: {}]  }
   0x1   :  { %v35_v0 = vld [vmem:[%s1462_s0] sm:$0xff]  ;;  %v37_v1 = vld [vmem:[%s1462_s0 + $0x10] sm:$0xff]  ;;  %v36_v2 = vld [vmem:[%s1462_s0 + $0x8] sm:$0xff] }
   0x2   :  { %39 = vadd.xlane.f32.xlu0 %v35_v0  ;;  %43 = vadd.xlane.f32.xlu1 %v37_v1  ;;  %v38_v3 = vld [vmem:[%s1462_s0 + $0x18] sm:$0xff] }
   0x6   :  { %41 = vadd.xlane.f32.xlu0 %v36_v2  ;;  %45 = vadd.xlane.f32.xlu1 %v38_v3 }
   0x7   :  { %13 = vsyncpa [#allocation5], 0  ;;  %v1050_v20 = vld [vmem:[%s1465_s3 + $0xe4] ss:$16 sps:$4 sm:$0xff]   ;;  %v1052_v21 = vld [vmem:[%s1465_s3 + $0xec] ss:$16 sps:$4 sm:$0xff]  }
   0x8   :  { %v1054_v22 = vld [vmem:[%s1465_s3 + $0xe0] ss:$16 sps:$4 sm:$0xff]   ;;  %v1055_v23 = vld [vmem:[%s1465_s3 + $0xe8] ss:$16 sps:$4 sm:$0xff]   ;;  %360 = vmatprep.subr.bf16.mxu0 %v1050_v20  ;;  %413 = vmatprep.subr.bf16.mxu1 %v1052_v21  ;;  %v1056_v24 = vld [vmem:[%s1465_s3 + $0xc4] ss:$16 sps:$4 sm:$0xff]  }
   0x9   :  { %361 = vmatpush1.bf16.msra.mxu0 %v1054_v22  ;;  %414 = vmatpush1.bf16.msra.mxu1 %v1055_v23  ;;  %v1058_v25 = vld [vmem:[%s1465_s3 + $0xcc] ss:$16 sps:$4 sm:$0xff]   ;;  %v1060_v26 = vld [vmem:[%s1465_s3 + $0xc0] ss:$16 sps:$4 sm:$0xff]   ;;  %v1061_v27 = vld [vmem:[%s1465_s3 + $0xc8] ss:$16 sps:$4 sm:$0xff]  }
   0xa   :  { %362 = vmatprep.subr.bf16.mxu0 %v1056_v24  ;;  %415 = vmatprep.subr.bf16.mxu1 %v1058_v25  ;;  %v1062_v28 = vld [vmem:[%s1465_s3 + $0xa4] ss:$16 sps:$4 sm:$0xff]   ;;  %v1064_v29 = vld [vmem:[%s1465_s3 + $0xac] ss:$16 sps:$4 sm:$0xff]   ;;  %v1066_v30 = vld [vmem:[%s1465_s3 + $0xa0] ss:$16 sps:$4 sm:$0xff]  }
   0xb   :  { %v1067_v31 = vld [vmem:[%s1465_s3 + $0xa8] ss:$16 sps:$4 sm:$0xff]   ;;  %v1068_v32 = vld [vmem:[%s1465_s3 + $0x84] ss:$16 sps:$4 sm:$0xff]   ;;  %v1070_v33 = vld [vmem:[%s1465_s3 + $0x8c] ss:$16 sps:$4 sm:$0xff]  }
   0xc   :  { %v1072_v34 = vld [vmem:[%s1465_s3 + $0x80] ss:$16 sps:$4 sm:$0xff]   ;;  %v1073_v35 = vld [vmem:[%s1465_s3 + $0x88] ss:$16 sps:$4 sm:$0xff]   ;;  %v1074_v36 = vld [vmem:[%s1465_s3 + $0x64] ss:$16 sps:$4 sm:$0xff]  }
   0xd   :  { %363 = vmatpush1.bf16.msra.mxu0 %v1060_v26  ;;  %416 = vmatpush1.bf16.msra.mxu1 %v1061_v27  ;;  %v1076_v37 = vld [vmem:[%s1465_s3 + $0x6c] ss:$16 sps:$4 sm:$0xff]   ;;  %v1078_v38 = vld [vmem:[%s1465_s3 + $0x60] ss:$16 sps:$4 sm:$0xff]   ;;  %v1079_v39 = vld [vmem:[%s1465_s3 + $0x68] ss:$16 sps:$4 sm:$0xff]  }
   0xe   :  { %364 = vmatprep.subr.bf16.mxu0 %v1062_v28  ;;  %417 = vmatprep.subr.bf16.mxu1 %v1064_v29  ;;  %v1080_v40 = vld [vmem:[%s1465_s3 + $0x44] ss:$16 sps:$4 sm:$0xff]   ;;  %v1082_v41 = vld [vmem:[%s1465_s3 + $0x4c] ss:$16 sps:$4 sm:$0xff]   ;;  %v1084_v42 = vld [vmem:[%s1465_s3 + $0x40] ss:$16 sps:$4 sm:$0xff]  }
   0xf   :  { %v1085_v43 = vld [vmem:[%s1465_s3 + $0x48] ss:$16 sps:$4 sm:$0xff]   ;;  %v1086_v44 = vld [vmem:[%s1465_s3 + $0x24] ss:$16 sps:$4 sm:$0xff]   ;;  %v1088_v45 = vld [vmem:[%s1465_s3 + $0x2c] ss:$16 sps:$4 sm:$0xff]  }
  0x10   :  { %v1090_v46 = vld [vmem:[%s1465_s3 + $0x20] ss:$16 sps:$4 sm:$0xff]   ;;  %v1091_v47 = vld [vmem:[%s1465_s3 + $0x28] ss:$16 sps:$4 sm:$0xff]   ;;  %v1092_v48 = vld [vmem:[%s1465_s3 + $0x4] ss:$16 sps:$4 sm:$0xff]  }
  0x11   :  { %365 = vmatpush1.bf16.msra.mxu0 %v1066_v30  ;;  %418 = vmatpush1.bf16.msra.mxu1 %v1067_v31  ;;  %v1094_v49 = vld [vmem:[%s1465_s3 + $0xc] ss:$16 sps:$4 sm:$0xff]   ;;  %v1096_v50 = vld [vmem:[%s1465_s3] ss:$16 sps:$4 sm:$0xff]   ;;  %v1097_v51 = vld [vmem:[%s1465_s3 + $0x8] ss:$16 sps:$4 sm:$0xff]  }
  0x12   :  { %366 = vmatprep.subr.bf16.mxu0 %v1068_v32  ;;  %419 = vmatprep.subr.bf16.mxu1 %v1070_v33  ;;  %v1162_v52 = vmov 0   ;;  %v1100_v53 = vld [vmem:[%s1467_s5 + $0x78] sm:$0xff]   ;;  %v1105_v27 = vld [vmem:[%s1467_s5 + $0xf0] sm:$0xff]   ;;  %v1108_v30 = vld [vmem:[%s1467_s5 + $0x68] sm:$0xff]   ;;  %s1163_s29 = smov [#allocation4]  }
  0x13   :  { %392 = vmatprep.mubr.bf16.mxu0 %v1162_v52  ;;  %445 = vmatprep.mubr.bf16.mxu1 %v1162_v52  ;;  %v1101_v54 = vld [vmem:[%s1467_s5 + $0xf8] sm:$0xff]   ;;  %v1106_v28 = vld [vmem:[%s1467_s5 + $0x30] sm:$0xff]   ;;  %v1109_v31 = vld [vmem:[%s1467_s5 + $0xe8] sm:$0xff]   ;;  %s891_s30 = sshll.u32 %s1163_s29, 4  ;;  %s892_s30 = int_to_ptr.vmem [resolvable:$true] %s891_s30 }
  0x14   :  { %v1107_v29 = vld [vmem:[%s1467_s5 + $0xb0] sm:$0xff]   ;;  %v1110_v33 = vld [vmem:[%s1467_s5 + $0x28] sm:$0xff]   ;;  %s1140_s9 = scalar_lea.vmem %s892_s30, 512  ;;  %p1145_p1 = scmp.lt.s32.totalorder %s892_s30, %s892_s30 }
  0x15   :  { %367 = vmatpush1.bf16.msra.mxu0 %v1072_v34  ;;  %420 = vmatpush1.bf16.msra.mxu1 %v1073_v35  ;;  %v1111_v34 = vld [vmem:[%s1467_s5 + $0xa8] sm:$0xff]   ;;  %v1112_v35 = vld [vmem:[%s1467_s5 + $0x60] sm:$0xff]   ;;  %p1141_p0 = scmp.ne.s32.totalorder %s892_s30, %s1140_s9  ;;  %p1146_p2 = scmp.lt.s32.totalorder %s1140_s9, %s1140_s9 }
  0x16   :  { %368 = vmatprep.subr.bf16.mxu0 %v1074_v36  ;;  %421 = vmatprep.subr.bf16.mxu1 %v1076_v37  ;;  %v1113_v36 = vld [vmem:[%s1467_s5 + $0xe0] sm:$0xff]  }
  0x17   :  { %v1114_v37 = vld [vmem:[%s1467_s5 + $0x20] sm:$0xff]   ;;  %p1147_p3 = por %p1146_p2, %p1145_p1 }
  0x19   :  { %369 = vmatpush1.bf16.msra.mxu0 %v1078_v38  ;;  %422 = vmatpush1.bf16.msra.mxu1 %v1079_v39  ;;  %v1115_v38 = vld [vmem:[%s1467_s5 + $0xa0] sm:$0xff]   ;;  %v1116_v39 = vld [vmem:[%s1467_s5 + $0x58] sm:$0xff]   ;;  %p1148_p4 = pnand %p1147_p3, %p1141_p0 }
  0x1a   :  { %370 = vmatprep.subr.bf16.mxu0 %v1080_v40  ;;  %423 = vmatprep.subr.bf16.mxu1 %v1082_v41  ;;  %v1117_v40 = vld [vmem:[%s1467_s5 + $0xd8] sm:$0xff]  }
  0x1b   :  { %v1118_v41 = vld [vmem:[%s1467_s5 + $0x18] sm:$0xff]  }
  0x1d   :  { %371 = vmatpush1.bf16.msra.mxu0 %v1084_v42  ;;  %424 = vmatpush1.bf16.msra.mxu1 %v1085_v43  ;;  %v1119_v42 = vld [vmem:[%s1467_s5 + $0x98] sm:$0xff]   ;;  %v1120_v43 = vld [vmem:[%s1467_s5 + $0x50] sm:$0xff]  }
  0x1e   :  { %372 = vmatprep.subr.bf16.mxu0 %v1086_v44  ;;  %425 = vmatprep.subr.bf16.mxu1 %v1088_v45  ;;  %v1121_v44 = vld [vmem:[%s1467_s5 + $0xd0] sm:$0xff]  }
  0x1f   :  { %v1122_v45 = vld [vmem:[%s1467_s5 + $0x10] sm:$0xff]  }
  0x21   :  { %373 = vmatpush1.bf16.msra.mxu0 %v1090_v46  ;;  %426 = vmatpush1.bf16.msra.mxu1 %v1091_v47  ;;  %v1123_v46 = vld [vmem:[%s1467_s5 + $0x90] sm:$0xff]   ;;  %v1124_v47 = vld [vmem:[%s1467_s5 + $0x48] sm:$0xff]  }
  0x22   :  { %374 = vmatprep.subr.bf16.mxu0 %v1092_v48  ;;  %427 = vmatprep.subr.bf16.mxu1 %v1094_v49  ;;  %v1125_v48 = vld [vmem:[%s1467_s5 + $0xc8] sm:$0xff]  }
  0x23   :  { %v1126_v49 = vld [vmem:[%s1467_s5 + $0x8] sm:$0xff]  }
  0x25   :  { %375 = vmatpush1.bf16.msra.mxu0 %v1096_v50  ;;  %428 = vmatpush1.bf16.msra.mxu1 %v1097_v51  ;;  %v1127_v50 = vld [vmem:[%s1467_s5 + $0x88] sm:$0xff]   ;;  %v1128_v51 = vld [vmem:[%s1467_s5 + $0x40] sm:$0xff]  }
  0x26   :  { %990 = vmatprep.subr.bf16.mxu0 %v1100_v53  ;;  %1018 = vmatprep.subr.bf16.mxu1 %v1101_v54  ;;  %v1130_v53 = vld [vmem:[%s1467_s5] sm:$0xff]  }
  0x27   :  { %v1131_v54 = vld [vmem:[%s1467_s5 + $0x80] sm:$0xff]  }
  0x8b   :  { %v40_v4 = vpop.xlane.xlu0 %39  ;;  %v44_v5 = vpop.xlane.xlu1 %43 }
  0x8c   :  { %v48_v6 = vmul.f32 0.0078125, %v40_v4  ;;  %v50_v7 = vmul.f32 0.0078125, %v44_v5  ;;  %v902_v5 = vld [vmem:[%s1463_s1] ss:$0 sm:$0xff] }
  0x8e   :  { %v1223_v8 = vsub.f32 %v35_v0, %v48_v6  ;;  %v1225_v9 = vsub.f32 %v37_v1, %v50_v7 }
  0x8f   :  { %v42_v10 = vpop.xlane.xlu0 %41  ;;  %v46_v11 = vpop.xlane.xlu1 %45 }
  0x90   :  { %v49_v12 = vmul.f32 0.0078125, %v42_v10  ;;  %v56_v13 = vmul.f32 %v1223_v8, %v1223_v8  ;;  %v51_v14 = vmul.f32 0.0078125, %v46_v11  ;;  %v58_v17 = vmul.f32 %v1225_v9, %v1225_v9 }
  0x92   :  { %v1229_v15 = vsub.f32 %v36_v2, %v49_v12  ;;  %60 = vadd.xlane.f32.xlu0 %v56_v13  ;;  %v1231_v16 = vsub.f32 %v38_v3, %v51_v14  ;;  %v903_v12 = vld [vmem:[%s1464_s2] ss:$0 sm:$0xff] }
  0x94   :  { %v57_v18 = vmul.f32 %v1229_v15, %v1229_v15  ;;  %v59_v19 = vmul.f32 %v1231_v16, %v1231_v16 }
  0x96   :  { %64 = vadd.xlane.f32.xlu0 %v58_v17  ;;  %62 = vadd.xlane.f32.xlu1 %v57_v18 }
  0x9a   :  { %66 = vadd.xlane.f32.xlu1 %v59_v19 }
 0x11b   :  { %v61_v55 = vpop.xlane.xlu0 %60 }
 0x11c   :  { %v68_v56 = vmul.f32 0.0078125, %v61_v55  ;;  %v168_v55 = vlaneseq }
 0x11e   :  { %v72_v57 = vadd.f32 1e-06, %v68_v56  ;;  %v169_v56 = vshrl.u32 %v168_v55, 7 }
 0x11f   :  { %v63_v58 = vpop.xlane.xlu1 %62  ;;  %v65_v59 = vpop.xlane.xlu0 %64 }
 0x120   :  { %1132 = vrsqrt.f32 %v72_v57  ;;  %v69_v60 = vmul.f32 0.0078125, %v63_v58  ;;  %v70_v61 = vmul.f32 0.0078125, %v65_v59  ;;  %v174_v57 = vsub.s32 1, %v169_v56 }
 0x121   :  { %v182_v58 = vsub.s32 3, %v169_v56  ;;  %v170_v59 = vsub.s32 0, %v169_v56 }
 0x122   :  { %v73_v62 = vadd.f32 1e-06, %v69_v60  ;;  %v74_v63 = vadd.f32 1e-06, %v70_v61  ;;  %v178_v60 = vsub.s32 2, %v169_v56 }
 0x123   :  { %v67_v0 = vpop.xlane.xlu1 %66  ;;  %v166_v61 = vld [vmem:[%s1466_s4] sm:$0xf] }
 0x124   :  { %1134 = vrsqrt.f32 %v73_v62  ;;  %v71_v1 = vmul.f32 0.0078125, %v67_v0  ;;  %v175_v0 = vrot.slane %v166_v61, %v174_v57 }
 0x125   :  { %1136 = vrsqrt.f32 %v74_v63 }
 0x126   :  { %v75_v2 = vadd.f32 1e-06, %v71_v1  ;;  %v183_v1 = vrot.slane %v166_v61, %v182_v58 }
 0x128   :  { %1138 = vrsqrt.f32 %v75_v2  ;;  %v171_v2 = vrot.slane %v166_v61, %v170_v59 }
 0x12d   :  { %v1133_v3 = vpop.eup %1132 }
 0x12e   :  { %v80_v4 = vmul.f32 %v1133_v3, %v1223_v8  ;;  %v179_v3 = vrot.slane %v166_v61, %v178_v60 }
 0x130   :  { %v91_v10 = vmul.f32 %v902_v5, %v80_v4 }
 0x131   :  { %v1135_v6 = vpop.eup %1134 }
 0x132   :  { %v1137_v7 = vpop.eup %1136  ;;  %v81_v11 = vmul.f32 %v1135_v6, %v1229_v15  ;;  %v102_v18 = vadd.f32 %v903_v12, %v91_v10  ;;  %v1102_v15 = vld [vmem:[%s1467_s5 + $0x38] sm:$0xff]  }
 0x133   :  { %v82_v13 = vmul.f32 %v1137_v7, %v1225_v9  ;;  %v1103_v9 = vld [vmem:[%s1467_s5 + $0xb8] sm:$0xff]  }
 0x134   :  { %v92_v14 = vmul.f32 %v902_v5, %v81_v11 }
 0x135   :  { %v1139_v17 = vpop.eup %1138  ;;  %v93_v8 = vmul.f32 %v902_v5, %v82_v13 }
 0x136   :  { %v103_v19 = vadd.f32 %v903_v12, %v92_v14  ;;  %v83_v20 = vmul.f32 %v1139_v17, %v1231_v16  ;;  %v1104_v16 = vld [vmem:[%s1467_s5 + $0x70] sm:$0xff]  }
 0x137   :  { %v104_v23 = vadd.f32 %v903_v12, %v93_v8 }
 0x138   :  { %v982_v21 = vpack.c.bf16 %v103_v19, %v102_v18  ;;  %v94_v22 = vmul.f32 %v902_v5, %v83_v20 }
 0x13a   :  { %983 = vst [vmem:[#allocation2] sm:$0xff] %v982_v21   ;;  %v105_v24 = vadd.f32 %v903_v12, %v94_v22 }
 0x13c   :  { %v987_v25 = vpack.c.bf16 %v105_v24, %v104_v23 }
 0x13e   :  { %989 = vst [vmem:[#allocation2 + $0x8] sm:$0xff] %v987_v25  }
 0x141   :  { %v1098_v26 = vld [vmem:[#allocation2] sm:$0xff]  }
 0x142   :  { %393 = vmatmul.mubr.bf16.vlgmr.msra.gmra.mxu0 %v1098_v26  ;;  %446 = vmatmul.mubr.bf16.vlgmr.msra.gmra.mxu1 %v1098_v26 }
 0x143   :  { %402 = vmatprep.mubr.bf16.mxu0 %v1162_v52  ;;  %455 = vmatprep.mubr.bf16.mxu1 %v1162_v52  ;;  %v1129_v52 = vld [vmem:[%s1467_s5 + $0xc0] sm:$0xff]  }
 0x144   :  { %991 = vmatpush3.bf16.msra.mxu0 %v1102_v15  ;;  %1019 = vmatpush3.bf16.msra.mxu1 %v1103_v9 }
 0x145   :  { %992 = vmatprep.subr.bf16.mxu0 %v1104_v16  ;;  %1020 = vmatprep.subr.bf16.mxu1 %v1105_v27  ;;  %v1099_v32 = vld [vmem:[#allocation2 + $0x8] sm:$0xff]  }
 0x148   :  { %993 = vmatpush3.bf16.msra.mxu0 %v1106_v28  ;;  %1021 = vmatpush3.bf16.msra.mxu1 %v1107_v29 }
 0x149   :  { %994 = vmatprep.subr.bf16.mxu0 %v1108_v30  ;;  %1022 = vmatprep.subr.bf16.mxu1 %v1109_v31 }
 0x14a   :  { %403 = vmatmul.mubr.bf16.gmra.mxu0 %v1099_v32  ;;  %456 = vmatmul.mubr.bf16.gmra.mxu1 %v1099_v32 }
 0x14c   :  { %995 = vmatpush3.bf16.msra.mxu0 %v1110_v33  ;;  %1023 = vmatpush3.bf16.msra.mxu1 %v1111_v34 }
 0x14d   :  { %996 = vmatprep.subr.bf16.mxu0 %v1112_v35  ;;  %1024 = vmatprep.subr.bf16.mxu1 %v1113_v36 }
 0x150   :  { %997 = vmatpush3.bf16.msra.mxu0 %v1114_v37  ;;  %1025 = vmatpush3.bf16.msra.mxu1 %v1115_v38 }
 0x151   :  { %998 = vmatprep.subr.bf16.mxu0 %v1116_v39  ;;  %1026 = vmatprep.subr.bf16.mxu1 %v1117_v40 }
 0x154   :  { %999 = vmatpush3.bf16.msra.mxu0 %v1118_v41  ;;  %1027 = vmatpush3.bf16.msra.mxu1 %v1119_v42 }
 0x155   :  { %1000 = vmatprep.subr.bf16.mxu0 %v1120_v43  ;;  %1028 = vmatprep.subr.bf16.mxu1 %v1121_v44 }
 0x158   :  { %1001 = vmatpush3.bf16.msra.mxu0 %v1122_v45  ;;  %1029 = vmatpush3.bf16.msra.mxu1 %v1123_v46 }
 0x159   :  { %1002 = vmatprep.subr.bf16.mxu0 %v1124_v47  ;;  %1030 = vmatprep.subr.bf16.mxu1 %v1125_v48 }
 0x15c   :  { %1003 = vmatpush3.bf16.msra.mxu0 %v1126_v49  ;;  %1031 = vmatpush3.bf16.msra.mxu1 %v1127_v50 }
 0x15d   :  { %1004 = vmatprep.subr.bf16.mxu0 %v1128_v51  ;;  %1032 = vmatprep.subr.bf16.mxu1 %v1129_v52 }
 0x160   :  { %1005 = vmatpush3.bf16.msra.mxu0 %v1130_v53  ;;  %1033 = vmatpush3.bf16.msra.mxu1 %v1131_v54 }
 0x202   :  { %v394_v62 = vpop.f32.mrf.mxu0  ;;  %v447_v63 = vpop.f32.mrf.mxu1 }
 0x203   :  { %v395_v14 = vadd.f32 %v394_v62, %v171_v2  ;;  %v448_v17 = vadd.f32 %v447_v63, %v179_v3 }
 0x204   :  { %v396_v4 = vpop.f32.mrf.mxu0  ;;  %v449_v5 = vpop.f32.mrf.mxu1 }
 0x205   :  { %v397_v10 = vadd.f32 %v396_v4, %v175_v0  ;;  %v450_v11 = vadd.f32 %v449_v5, %v183_v1  ;;  %v466_v16 = vmax.f32 %v395_v14, 0.0  ;;  %v468_v27 = vmax.f32 %v448_v17, 0.0  ;;  %v874_v4 = vld [vmem:[%s1469_s7] sm:$0xff] }
 0x206   :  { %v398_v6 = vpop.f32.mrf.mxu0  ;;  %v451_v7 = vpop.f32.mrf.mxu1 }
 0x207   :  { %v399_v12 = vadd.f32 %v398_v6, %v171_v2  ;;  %v452_v13 = vadd.f32 %v451_v7, %v179_v3  ;;  %v467_v25 = vmax.f32 %v397_v10, 0.0  ;;  %v469_v15 = vmax.f32 %v450_v11, 0.0 }
 0x208   :  { %v400_v18 = vpop.f32.mrf.mxu0  ;;  %v453_v19 = vpop.f32.mrf.mxu1 }
 0x209   :  { %v401_v8 = vadd.f32 %v400_v18, %v175_v0  ;;  %v454_v20 = vadd.f32 %v453_v19, %v183_v1  ;;  %v470_v21 = vmax.f32 %v399_v12, 0.0  ;;  %v472_v22 = vmax.f32 %v452_v13, 0.0  ;;  %v875_v18 = vld [vmem:[%s1469_s7 + $0x8] sm:$0xff] }
 0x20a   :  { %v404_v23 = vpop.f32.mrf.mxu0  ;;  %v457_v24 = vpop.f32.mrf.mxu1 }
 0x20b   :  { %v471_v9 = vmax.f32 %v401_v8, 0.0  ;;  %v473_v26 = vmax.f32 %v454_v20, 0.0  ;;  %v486_v32 = vpack.c.bf16 %v470_v21, %v466_v16  ;;  %v488_v33 = vpack.c.bf16 %v472_v22, %v468_v27 }
 0x20c   :  { %v406_v28 = vpop.f32.mrf.mxu0  ;;  %v459_v29 = vpop.f32.mrf.mxu1  ;;  %v405_v40 = vadd.f32 %v404_v23, %v171_v2  ;;  %v458_v41 = vadd.f32 %v457_v24, %v179_v3 }
 0x20d   :  { %v487_v30 = vpack.c.bf16 %v471_v9, %v467_v25  ;;  %v489_v31 = vpack.c.bf16 %v473_v26, %v469_v15  ;;  %v407_v34 = vadd.f32 %v406_v28, %v175_v0  ;;  %v460_v37 = vadd.f32 %v459_v29, %v183_v1  ;;  %v876_v9 = vld [vmem:[%s1469_s7 + $0x10] sm:$0xff] }
 0x20e   :  { %v408_v35 = vpop.f32.mrf.mxu0  ;;  %v461_v36 = vpop.f32.mrf.mxu1  ;;  %v474_v52 = vmax.f32 %v405_v40, 0.0  ;;  %v476_v53 = vmax.f32 %v458_v41, 0.0 }
 0x20f   :  { %v409_v38 = vadd.f32 %v408_v35, %v171_v2  ;;  %v462_v39 = vadd.f32 %v461_v36, %v179_v3  ;;  %782 = vmatprep.mubr.bf16.mxu0 %v487_v30  ;;  %831 = vmatprep.mubr.bf16.mxu1 %v489_v31  ;;  %v475_v48 = vmax.f32 %v407_v34, 0.0  ;;  %v477_v49 = vmax.f32 %v460_v37, 0.0 }
 0x210   :  { %v410_v42 = vpop.f32.mrf.mxu0  ;;  %v463_v43 = vpop.f32.mrf.mxu1  ;;  %783 = vmatmul.mubr.bf16.vlgmr.msra.gmra.mxu0 %v486_v32  ;;  %832 = vmatmul.mubr.bf16.vlgmr.msra.gmra.mxu1 %v488_v33  ;;  %v877_v32 = vld [vmem:[%s1469_s7 + $0x18] sm:$0xff] }
 0x211   :  { %v411_v44 = vadd.f32 %v410_v42, %v175_v0  ;;  %v464_v45 = vadd.f32 %v463_v43, %v183_v1  ;;  %v478_v46 = vmax.f32 %v409_v38, 0.0  ;;  %v480_v47 = vmax.f32 %v462_v39, 0.0  ;;  %v974_v0 = vld [vmem:[%s1468_s6] ss:$0 sm:$0xff] }
 0x213   :  { %v479_v50 = vmax.f32 %v411_v44, 0.0  ;;  %v481_v51 = vmax.f32 %v464_v45, 0.0  ;;  %v490_v56 = vpack.c.bf16 %v478_v46, %v474_v52  ;;  %v492_v57 = vpack.c.bf16 %v480_v47, %v476_v53 }
 0x215   :  { %v491_v54 = vpack.c.bf16 %v479_v50, %v475_v48  ;;  %v493_v55 = vpack.c.bf16 %v481_v51, %v477_v49 }
 0x217   :  { %790 = vmatprep.mubr.bf16.mxu0 %v491_v54  ;;  %839 = vmatprep.mubr.bf16.mxu1 %v493_v55 }
 0x218   :  { %791 = vmatmul.mubr.bf16.gmra.mxu0 %v490_v56  ;;  %840 = vmatmul.mubr.bf16.gmra.mxu1 %v492_v57 }
 0x2d0   :  { %v1006_v58 = vpop.f32.mrf.mxu0  ;;  %v1034_v59 = vpop.f32.mrf.mxu1 }
 0x2d2   :  { %v1007_v60 = vpop.f32.mrf.mxu0  ;;  %v1035_v61 = vpop.f32.mrf.mxu1 }
 0x2d3   :  { %v1008_v62 = vadd.f32 %v1007_v60, %v1006_v58  ;;  %v1036_v63 = vadd.f32 %v1035_v61, %v1034_v59 }
 0x2d4   :  { %v1009_v1 = vpop.f32.mrf.mxu0  ;;  %v1037_v2 = vpop.f32.mrf.mxu1 }
 0x2d5   :  { %v834_v3 = vadd.f32 %v1036_v63, %v1008_v62 }
 0x2d6   :  { %v1010_v5 = vpop.f32.mrf.mxu0  ;;  %v1038_v6 = vpop.f32.mrf.mxu1 }
 0x2d7   :  { %v870_v7 = vadd.f32 %v974_v0, %v834_v3  ;;  %v1011_v10 = vadd.f32 %v1010_v5, %v1009_v1  ;;  %v1039_v11 = vadd.f32 %v1038_v6, %v1037_v2 }
 0x2d8   :  { %v1012_v12 = vpop.f32.mrf.mxu0  ;;  %v1040_v13 = vpop.f32.mrf.mxu1 }
 0x2d9   :  { %v878_v14 = vadd.f32 %v874_v4, %v870_v7  ;;  %v837_v17 = vadd.f32 %v1039_v11, %v1011_v10 }
 0x2da   :  { %v1013_v19 = vpop.f32.mrf.mxu0  ;;  %v1041_v8 = vpop.f32.mrf.mxu1 }
 0x2db   :  { %882 = vst [vmem:[#allocation4] sm:$0xff] %v878_v14  ;;  %v871_v20 = vadd.f32 %v974_v0, %v837_v17  ;;  %v1014_v21 = vadd.f32 %v1013_v19, %v1012_v12  ;;  %v1042_v22 = vadd.f32 %v1041_v8, %v1040_v13 }
 0x2dc   :  { %v1015_v23 = vpop.f32.mrf.mxu0  ;;  %v1043_v24 = vpop.f32.mrf.mxu1 }
 0x2dd   :  { %v879_v25 = vadd.f32 %v875_v18, %v871_v20  ;;  %v842_v15 = vadd.f32 %v1042_v22, %v1014_v21 }
 0x2de   :  { %v1016_v26 = vpop.f32.mrf.mxu0  ;;  %v1044_v16 = vpop.f32.mrf.mxu1 }
 0x2df   :  { %883 = vst [vmem:[#allocation4 + $0x8] sm:$0xff] %v879_v25  ;;  %v872_v27 = vadd.f32 %v974_v0, %v842_v15  ;;  %v1017_v28 = vadd.f32 %v1016_v26, %v1015_v23  ;;  %v1045_v29 = vadd.f32 %v1044_v16, %v1043_v24 }
 0x2e1   :  { %v880_v30 = vadd.f32 %v876_v9, %v872_v27  ;;  %v845_v31 = vadd.f32 %v1045_v29, %v1017_v28 }
 0x2e3   :  { %884 = vst [vmem:[#allocation4 + $0x10] sm:$0xff] %v880_v30  ;;  %v873_v33 = vadd.f32 %v974_v0, %v845_v31 }
 0x2e5   :  { %v881_v34 = vadd.f32 %v877_v32, %v873_v33 }
 0x2e7   :  { %885 = vst [vmem:[#allocation4 + $0x18] sm:$0xff] %v881_v34 }
 0x2e8   :  { %1151 = shalt.err (!%p1148_p4)
}
 0x2e9   :  { %s1164_s10 = smov 128   ;;  %s1165_s11 = smov 8  }
 0x2ea   :  { %897 = dma.vmem_to_hbm [thread:$0]  %s892_s30, 512, %s1470_s8, [#allocation5], %s1164_s10, %s1164_s10, %s1165_s11  }
 0x2eb   :  { %1160 = dma.done.wait [#allocation5], 512  }
 0x2ec   :  { %1161 = vsyncadd [#allocation5], 4294966784 }
 0x2ed   :  { %901 = vsyncpa [#allocation5], 1 }

</bundles_post_ra>
